<compile_context>
chip_gen: v5e
topology: v5e:2x2
jax: 0.10.0
libtpu: 0.0.40
codegen_flags: <defaults>
</compile_context>

<pallas_src>
import jax
import jax.numpy as jnp
from jax.experimental import pallas as pl
from jax.experimental.pallas import tpu as pltpu

B, H_IN, W_IN = 2, 48, 5          # NCHW input (B, 1, 48, 5)

# ---- lane-packed dilated-frame geometry -------------------------------------
STRIPE = 64        # lanes owned by one sample (power of two, >= 44 needed)
R0 = 18            # frame row of conv1's padded-input origin
C0 = 18            # per-stripe col of conv1's padded-input origin
FRAME_H = 88       # frame rows (covers every dilated read, padded to sublanes)

# geometry recap (per sample, "compact" coordinates):
#   conv1: pad 2 -> (52, 9), kernel (10,3)  -> (43, 7)
#   pool1: 2x2 max                          -> (21, 3)
#   conv2: pad 3 -> (27, 9), kernel (10,4)  -> (18, 6)
#   pool2: 2x2 max                          -> ( 9, 3)
#   conv3: pad 3 -> (15, 9), kernel (12,6)  -> ( 4, 4)
#   pool3: 2x2 avg                          -> ( 2, 2)


def _conv_frame(src_ref, w_ref, b_ref, kh, kw, dil):
    """Dilated single-channel cross-correlation over a frame ref (VPU only).

    out[p, q] = bias + sum_{di,dj} w[di,dj] * src[p + dil*di, q + dil*dj]
    """
    oh = src_ref.shape[0] - dil * (kh - 1)
    ow = src_ref.shape[1] - dil * (kw - 1)
    # hoist all SMEM scalar weight loads out of the multiply/add chain
    w = [[w_ref[i, j] for j in range(kw)] for i in range(kh)]
    acc = jnp.full((oh, ow), b_ref[0], dtype=jnp.float32)
    for di in range(kh):
        for dj in range(kw):
            acc = acc + w[di][dj] * src_ref[pl.ds(dil * di, oh),
                                            pl.ds(dil * dj, ow)]
    return acc


def _pool_frame(src_ref, dil, op):
    """2x2/stride-2 pooling kept at dilated frame positions (no compaction).

    out[p, q] = op over src[p + {0,dil}, q + {0,dil}]; only positions on the
    (2*dil)-spaced grid are meaningful downstream, the rest is discarded by
    the box mask / never read.
    """
    oh = src_ref.shape[0] - dil
    ow = src_ref.shape[1] - dil
    a = src_ref[pl.ds(0, oh), pl.ds(0, ow)]
    b = src_ref[pl.ds(dil, oh), pl.ds(0, ow)]
    c = src_ref[pl.ds(0, oh), pl.ds(dil, ow)]
    d = src_ref[pl.ds(dil, oh), pl.ds(dil, ow)]
    return op(op(a, b), op(c, d))


def _box_mask(shape, r_lo, r_hi, c_lo, c_hi):
    """1 inside rows [r_lo, r_hi] and per-stripe cols [c_lo, c_hi], else 0."""
    r = jax.lax.broadcasted_iota(jnp.int32, shape, 0)
    c = jax.lax.broadcasted_iota(jnp.int32, shape, 1) & (STRIPE - 1)
    return (r >= r_lo) & (r <= r_hi) & (c >= c_lo) & (c <= c_hi)


def cnn_kernel(x_ref, w1_ref, b1_ref, w2_ref, b2_ref, w3_ref, b3_ref, out_ref,
               y1, p1, y2, p2, y3):
    # layer 1: Conv2d(1,1,(10,3),p=2) -> MaxPool2d(2,2)   (frame dilation 1)
    y1[...] = _conv_frame(x_ref, w1_ref, b1_ref, 10, 3, 1)
    u1 = _pool_frame(y1, 1, jnp.maximum)
    p1[...] = jnp.where(_box_mask(u1.shape, R0, R0 + 40, C0, C0 + 4), u1, 0.0)

    # layer 2: Conv2d(1,1,(10,4),p=3) -> MaxPool2d(2,2)   (frame dilation 2)
    y2[...] = _conv_frame(p1, w2_ref, b2_ref, 10, 4, 2)
    u2 = _pool_frame(y2, 2, jnp.maximum)
    p2[...] = jnp.where(_box_mask(u2.shape, R0 - 6, R0 + 26, C0 - 6, C0 + 2),
                        u2, 0.0)

    # layer 3: Conv2d(1,1,(12,6),p=3) -> AvgPool2d(2,2)   (frame dilation 4)
    y3[...] = _conv_frame(p2, w3_ref, b3_ref, 12, 6, 4)
    u3 = _pool_frame(y3, 4, jnp.add)
    # valid outputs sit at frame rows {0, 8}, stripe cols {0, 8}; write the
    # whole lane-dense slab once and let the wrapper gather.
    out_ref[...] = u3 * 0.25


@jax.jit
def cnn_forward(x_nchw, w1, b1, w2, b2, w3, b3):
    """x_nchw: (B, 1, 48, 5) float32 -> (B, 4), matching CNN_Model.forward."""
    x = jnp.squeeze(x_nchw, axis=1).astype(jnp.float32)      # (B, 48, 5)
    bsz, h, w = x.shape
    wf = bsz * STRIPE

    # conv1 zero-padding + per-sample lane-stripe packing, fused into XLA.
    xpad = jnp.pad(x, ((0, 0),
                       (R0 + 2, FRAME_H - (R0 + 2) - h),
                       (C0 + 2, STRIPE - (C0 + 2) - w)))     # (B, 88, 64)
    frame = jnp.transpose(xpad, (1, 0, 2)).reshape(FRAME_H, wf)

    smem = pl.BlockSpec(memory_space=pltpu.MemorySpace.SMEM)
    vmem = pl.BlockSpec(memory_space=pltpu.MemorySpace.VMEM)

    slab = pl.pallas_call(
        cnn_kernel,
        out_shape=jax.ShapeDtypeStruct((10, wf - 35), jnp.float32),
        in_specs=[vmem, smem, smem, smem, smem, smem, smem],
        out_specs=vmem,
        scratch_shapes=[
            pltpu.VMEM((79, wf - 2), jnp.float32),    # conv1 out frame
            pltpu.VMEM((78, wf - 3), jnp.float32),    # masked pool1 frame
            pltpu.VMEM((60, wf - 9), jnp.float32),    # conv2 out frame
            pltpu.VMEM((58, wf - 11), jnp.float32),   # masked pool2 frame
            pltpu.VMEM((14, wf - 31), jnp.float32),   # conv3 out frame
        ],
    )(frame, w1, b1, w2, b2, w3, b3)

    # gather the 2x2 avg-pool result per sample in torch's reshape order:
    # (0,0) (0,1) (1,0) (1,1)  ->  frame (0,0) (0,8) (8,0) (8,8) per stripe.
    rows = jnp.array([0, 0, 8, 8], dtype=jnp.int32)[None, :]
    cols = (STRIPE * jnp.arange(bsz, dtype=jnp.int32)[:, None]
            + jnp.array([0, 8, 0, 8], dtype=jnp.int32)[None, :])
    return slab[rows, cols]                                   # (B, 4)


def reference(x_nchw, w1, b1, w2, b2, w3, b3):
    """Pure-JAX reference of the PyTorch forward (for verification)."""
    def conv(y, w, b, pad):
        return jax.lax.conv_general_dilated(
            y, w[None, None, :, :], window_strides=(1, 1),
            padding=((pad, pad), (pad, pad)),
            dimension_numbers=("NCHW", "OIHW", "NCHW"),
            precision=jax.lax.Precision.HIGHEST) + b.reshape(1, 1, 1, 1)

    def maxpool(y):
        return jax.lax.reduce_window(y, -jnp.inf, jax.lax.max,
                                     (1, 1, 2, 2), (1, 1, 2, 2), "VALID")

    def avgpool(y):
        s = jax.lax.reduce_window(y, 0.0, jax.lax.add,
                                  (1, 1, 2, 2), (1, 1, 2, 2), "VALID")
        return s * 0.25

    y = x_nchw.astype(jnp.float32)
    y = maxpool(conv(y, w1, b1, 2))
    y = maxpool(conv(y, w2, b2, 3))
    y = avgpool(conv(y, w3, b3, 3))
    y = jnp.squeeze(y, axis=1)
    y = y.reshape(y.shape[0], 4, 1)
    return jnp.squeeze(y, axis=2)


def init_params(key):
    """Deterministic params with PyTorch Conv2d-style uniform init bounds."""
    ks = jax.random.split(key, 6)

    def u(k, shape, fan_in):
        bound = 1.0 / jnp.sqrt(jnp.float32(fan_in))
        return jax.random.uniform(k, shape, jnp.float32, -bound, bound)

    w1 = u(ks[0], (10, 3), 1 * 10 * 3)
    b1 = u(ks[1], (1,), 1 * 10 * 3)
    w2 = u(ks[2], (10, 4), 1 * 10 * 4)
    b2 = u(ks[3], (1,), 1 * 10 * 4)
    w3 = u(ks[4], (12, 6), 1 * 12 * 6)
    b3 = u(ks[5], (1,), 1 * 12 * 6)
    return w1, b1, w2, b2, w3, b3


if __name__ == "__main__":
    key = jax.random.PRNGKey(0)
    k_x, k_p = jax.random.split(key)
    x = jax.random.normal(k_x, (B, 1, H_IN, W_IN), dtype=jnp.float32)  # NCHW
    params = init_params(k_p)

    out = jax.block_until_ready(cnn_forward(x, *params))
    assert out.shape == (B, 4), out.shape

    ref = jax.block_until_ready(reference(x, *params))
    assert jnp.allclose(out, ref, atol=1e-4, rtol=1e-4), (out, ref)

    print("KERNEL_OK")
</pallas_src>

<mosaic_0001>
module attributes {stable_mosaic.version = 11 : i64} {
  func.func @cnn_kernel(%arg0: memref<88x128xf32, #tpu.memory_space<vmem>>, %arg1: memref<10x3xf32, #tpu.memory_space<smem>>, %arg2: memref<1xf32, #tpu.memory_space<smem>>, %arg3: memref<10x4xf32, #tpu.memory_space<smem>>, %arg4: memref<1xf32, #tpu.memory_space<smem>>, %arg5: memref<12x6xf32, #tpu.memory_space<smem>>, %arg6: memref<1xf32, #tpu.memory_space<smem>>, %arg7: memref<10x93xf32, #tpu.memory_space<vmem>>, %arg8: memref<79x126xf32, #tpu.memory_space<vmem>>, %arg9: memref<78x125xf32, #tpu.memory_space<vmem>>, %arg10: memref<60x119xf32, #tpu.memory_space<vmem>>, %arg11: memref<58x117xf32, #tpu.memory_space<vmem>>, %arg12: memref<14x97xf32, #tpu.memory_space<vmem>>) attributes {dimension_semantics = [], scalar_prefetch = 0 : i64, scratch_operands = 5 : i64, tpu.core_type = #tpu.core_type<tc>} {
    %c0 = arith.constant 0 : index
    %c0_0 = arith.constant 0 : index
    %0 = memref.load %arg1[%c0, %c0_0] : memref<10x3xf32, #tpu.memory_space<smem>>
    %c0_1 = arith.constant 0 : index
    %c1 = arith.constant 1 : index
    %1 = memref.load %arg1[%c0_1, %c1] : memref<10x3xf32, #tpu.memory_space<smem>>
    %c0_2 = arith.constant 0 : index
    %c2 = arith.constant 2 : index
    %2 = memref.load %arg1[%c0_2, %c2] : memref<10x3xf32, #tpu.memory_space<smem>>
    %c1_3 = arith.constant 1 : index
    %c0_4 = arith.constant 0 : index
    %3 = memref.load %arg1[%c1_3, %c0_4] : memref<10x3xf32, #tpu.memory_space<smem>>
    %c1_5 = arith.constant 1 : index
    %c1_6 = arith.constant 1 : index
    %4 = memref.load %arg1[%c1_5, %c1_6] : memref<10x3xf32, #tpu.memory_space<smem>>
    %c1_7 = arith.constant 1 : index
    %c2_8 = arith.constant 2 : index
    %5 = memref.load %arg1[%c1_7, %c2_8] : memref<10x3xf32, #tpu.memory_space<smem>>
    %c2_9 = arith.constant 2 : index
    %c0_10 = arith.constant 0 : index
    %6 = memref.load %arg1[%c2_9, %c0_10] : memref<10x3xf32, #tpu.memory_space<smem>>
    %c2_11 = arith.constant 2 : index
    %c1_12 = arith.constant 1 : index
    %7 = memref.load %arg1[%c2_11, %c1_12] : memref<10x3xf32, #tpu.memory_space<smem>>
    %c2_13 = arith.constant 2 : index
    %c2_14 = arith.constant 2 : index
    %8 = memref.load %arg1[%c2_13, %c2_14] : memref<10x3xf32, #tpu.memory_space<smem>>
    %c3 = arith.constant 3 : index
    %c0_15 = arith.constant 0 : index
    %9 = memref.load %arg1[%c3, %c0_15] : memref<10x3xf32, #tpu.memory_space<smem>>
    %c3_16 = arith.constant 3 : index
    %c1_17 = arith.constant 1 : index
    %10 = memref.load %arg1[%c3_16, %c1_17] : memref<10x3xf32, #tpu.memory_space<smem>>
    %c3_18 = arith.constant 3 : index
    %c2_19 = arith.constant 2 : index
    %11 = memref.load %arg1[%c3_18, %c2_19] : memref<10x3xf32, #tpu.memory_space<smem>>
    %c4 = arith.constant 4 : index
    %c0_20 = arith.constant 0 : index
    %12 = memref.load %arg1[%c4, %c0_20] : memref<10x3xf32, #tpu.memory_space<smem>>
    %c4_21 = arith.constant 4 : index
    %c1_22 = arith.constant 1 : index
    %13 = memref.load %arg1[%c4_21, %c1_22] : memref<10x3xf32, #tpu.memory_space<smem>>
    %c4_23 = arith.constant 4 : index
    %c2_24 = arith.constant 2 : index
    %14 = memref.load %arg1[%c4_23, %c2_24] : memref<10x3xf32, #tpu.memory_space<smem>>
    %c5 = arith.constant 5 : index
    %c0_25 = arith.constant 0 : index
    %15 = memref.load %arg1[%c5, %c0_25] : memref<10x3xf32, #tpu.memory_space<smem>>
    %c5_26 = arith.constant 5 : index
    %c1_27 = arith.constant 1 : index
    %16 = memref.load %arg1[%c5_26, %c1_27] : memref<10x3xf32, #tpu.memory_space<smem>>
    %c5_28 = arith.constant 5 : index
    %c2_29 = arith.constant 2 : index
    %17 = memref.load %arg1[%c5_28, %c2_29] : memref<10x3xf32, #tpu.memory_space<smem>>
    %c6 = arith.constant 6 : index
    %c0_30 = arith.constant 0 : index
    %18 = memref.load %arg1[%c6, %c0_30] : memref<10x3xf32, #tpu.memory_space<smem>>
    %c6_31 = arith.constant 6 : index
    %c1_32 = arith.constant 1 : index
    %19 = memref.load %arg1[%c6_31, %c1_32] : memref<10x3xf32, #tpu.memory_space<smem>>
    %c6_33 = arith.constant 6 : index
    %c2_34 = arith.constant 2 : index
    %20 = memref.load %arg1[%c6_33, %c2_34] : memref<10x3xf32, #tpu.memory_space<smem>>
    %c7 = arith.constant 7 : index
    %c0_35 = arith.constant 0 : index
    %21 = memref.load %arg1[%c7, %c0_35] : memref<10x3xf32, #tpu.memory_space<smem>>
    %c7_36 = arith.constant 7 : index
    %c1_37 = arith.constant 1 : index
    %22 = memref.load %arg1[%c7_36, %c1_37] : memref<10x3xf32, #tpu.memory_space<smem>>
    %c7_38 = arith.constant 7 : index
    %c2_39 = arith.constant 2 : index
    %23 = memref.load %arg1[%c7_38, %c2_39] : memref<10x3xf32, #tpu.memory_space<smem>>
    %c8 = arith.constant 8 : index
    %c0_40 = arith.constant 0 : index
    %24 = memref.load %arg1[%c8, %c0_40] : memref<10x3xf32, #tpu.memory_space<smem>>
    %c8_41 = arith.constant 8 : index
    %c1_42 = arith.constant 1 : index
    %25 = memref.load %arg1[%c8_41, %c1_42] : memref<10x3xf32, #tpu.memory_space<smem>>
    %c8_43 = arith.constant 8 : index
    %c2_44 = arith.constant 2 : index
    %26 = memref.load %arg1[%c8_43, %c2_44] : memref<10x3xf32, #tpu.memory_space<smem>>
    %c9 = arith.constant 9 : index
    %c0_45 = arith.constant 0 : index
    %27 = memref.load %arg1[%c9, %c0_45] : memref<10x3xf32, #tpu.memory_space<smem>>
    %c9_46 = arith.constant 9 : index
    %c1_47 = arith.constant 1 : index
    %28 = memref.load %arg1[%c9_46, %c1_47] : memref<10x3xf32, #tpu.memory_space<smem>>
    %c9_48 = arith.constant 9 : index
    %c2_49 = arith.constant 2 : index
    %29 = memref.load %arg1[%c9_48, %c2_49] : memref<10x3xf32, #tpu.memory_space<smem>>
    %c0_50 = arith.constant 0 : index
    %30 = memref.load %arg2[%c0_50] : memref<1xf32, #tpu.memory_space<smem>>
    %31 = vector.broadcast %30 : f32 to vector<79x126xf32>
    %c0_51 = arith.constant 0 : index
    %c0_52 = arith.constant 0 : index
    %32 = vector.load %arg0[%c0_51, %c0_52] : memref<88x128xf32, #tpu.memory_space<vmem>>, vector<79x126xf32>
    %33 = vector.broadcast %0 : f32 to vector<79x126xf32>
    %34 = arith.mulf %33, %32 : vector<79x126xf32>
    %35 = arith.addf %31, %34 : vector<79x126xf32>
    %c0_53 = arith.constant 0 : index
    %c1_54 = arith.constant 1 : index
    %36 = vector.load %arg0[%c0_53, %c1_54] : memref<88x128xf32, #tpu.memory_space<vmem>>, vector<79x126xf32>
    %37 = vector.broadcast %1 : f32 to vector<79x126xf32>
    %38 = arith.mulf %37, %36 : vector<79x126xf32>
    %39 = arith.addf %35, %38 : vector<79x126xf32>
    %c0_55 = arith.constant 0 : index
    %c2_56 = arith.constant 2 : index
    %40 = vector.load %arg0[%c0_55, %c2_56] : memref<88x128xf32, #tpu.memory_space<vmem>>, vector<79x126xf32>
    %41 = vector.broadcast %2 : f32 to vector<79x126xf32>
    %42 = arith.mulf %41, %40 : vector<79x126xf32>
    %43 = arith.addf %39, %42 : vector<79x126xf32>
    %c1_57 = arith.constant 1 : index
    %c0_58 = arith.constant 0 : index
    %44 = vector.load %arg0[%c1_57, %c0_58] : memref<88x128xf32, #tpu.memory_space<vmem>>, vector<79x126xf32>
    %45 = vector.broadcast %3 : f32 to vector<79x126xf32>
    %46 = arith.mulf %45, %44 : vector<79x126xf32>
    %47 = arith.addf %43, %46 : vector<79x126xf32>
    %c1_59 = arith.constant 1 : index
    %c1_60 = arith.constant 1 : index
    %48 = vector.load %arg0[%c1_59, %c1_60] : memref<88x128xf32, #tpu.memory_space<vmem>>, vector<79x126xf32>
    %49 = vector.broadcast %4 : f32 to vector<79x126xf32>
    %50 = arith.mulf %49, %48 : vector<79x126xf32>
    %51 = arith.addf %47, %50 : vector<79x126xf32>
    %c1_61 = arith.constant 1 : index
    %c2_62 = arith.constant 2 : index
    %52 = vector.load %arg0[%c1_61, %c2_62] : memref<88x128xf32, #tpu.memory_space<vmem>>, vector<79x126xf32>
    %53 = vector.broadcast %5 : f32 to vector<79x126xf32>
    %54 = arith.mulf %53, %52 : vector<79x126xf32>
    %55 = arith.addf %51, %54 : vector<79x126xf32>
    %c2_63 = arith.constant 2 : index
    %c0_64 = arith.constant 0 : index
    %56 = vector.load %arg0[%c2_63, %c0_64] : memref<88x128xf32, #tpu.memory_space<vmem>>, vector<79x126xf32>
    %57 = vector.broadcast %6 : f32 to vector<79x126xf32>
    %58 = arith.mulf %57, %56 : vector<79x126xf32>
    %59 = arith.addf %55, %58 : vector<79x126xf32>
    %c2_65 = arith.constant 2 : index
    %c1_66 = arith.constant 1 : index
    %60 = vector.load %arg0[%c2_65, %c1_66] : memref<88x128xf32, #tpu.memory_space<vmem>>, vector<79x126xf32>
    %61 = vector.broadcast %7 : f32 to vector<79x126xf32>
    %62 = arith.mulf %61, %60 : vector<79x126xf32>
    %63 = arith.addf %59, %62 : vector<79x126xf32>
    %c2_67 = arith.constant 2 : index
    %c2_68 = arith.constant 2 : index
    %64 = vector.load %arg0[%c2_67, %c2_68] : memref<88x128xf32, #tpu.memory_space<vmem>>, vector<79x126xf32>
    %65 = vector.broadcast %8 : f32 to vector<79x126xf32>
    %66 = arith.mulf %65, %64 : vector<79x126xf32>
    %67 = arith.addf %63, %66 : vector<79x126xf32>
    %c3_69 = arith.constant 3 : index
    %c0_70 = arith.constant 0 : index
    %68 = vector.load %arg0[%c3_69, %c0_70] : memref<88x128xf32, #tpu.memory_space<vmem>>, vector<79x126xf32>
    %69 = vector.broadcast %9 : f32 to vector<79x126xf32>
    %70 = arith.mulf %69, %68 : vector<79x126xf32>
    %71 = arith.addf %67, %70 : vector<79x126xf32>
    %c3_71 = arith.constant 3 : index
    %c1_72 = arith.constant 1 : index
    %72 = vector.load %arg0[%c3_71, %c1_72] : memref<88x128xf32, #tpu.memory_space<vmem>>, vector<79x126xf32>
    %73 = vector.broadcast %10 : f32 to vector<79x126xf32>
    %74 = arith.mulf %73, %72 : vector<79x126xf32>
    %75 = arith.addf %71, %74 : vector<79x126xf32>
    %c3_73 = arith.constant 3 : index
    %c2_74 = arith.constant 2 : index
    %76 = vector.load %arg0[%c3_73, %c2_74] : memref<88x128xf32, #tpu.memory_space<vmem>>, vector<79x126xf32>
    %77 = vector.broadcast %11 : f32 to vector<79x126xf32>
    %78 = arith.mulf %77, %76 : vector<79x126xf32>
    %79 = arith.addf %75, %78 : vector<79x126xf32>
    %c4_75 = arith.constant 4 : index
    %c0_76 = arith.constant 0 : index
    %80 = vector.load %arg0[%c4_75, %c0_76] : memref<88x128xf32, #tpu.memory_space<vmem>>, vector<79x126xf32>
    %81 = vector.broadcast %12 : f32 to vector<79x126xf32>
    %82 = arith.mulf %81, %80 : vector<79x126xf32>
    %83 = arith.addf %79, %82 : vector<79x126xf32>
    %c4_77 = arith.constant 4 : index
    %c1_78 = arith.constant 1 : index
    %84 = vector.load %arg0[%c4_77, %c1_78] : memref<88x128xf32, #tpu.memory_space<vmem>>, vector<79x126xf32>
    %85 = vector.broadcast %13 : f32 to vector<79x126xf32>
    %86 = arith.mulf %85, %84 : vector<79x126xf32>
    %87 = arith.addf %83, %86 : vector<79x126xf32>
    %c4_79 = arith.constant 4 : index
    %c2_80 = arith.constant 2 : index
    %88 = vector.load %arg0[%c4_79, %c2_80] : memref<88x128xf32, #tpu.memory_space<vmem>>, vector<79x126xf32>
    %89 = vector.broadcast %14 : f32 to vector<79x126xf32>
    %90 = arith.mulf %89, %88 : vector<79x126xf32>
    %91 = arith.addf %87, %90 : vector<79x126xf32>
    %c5_81 = arith.constant 5 : index
    %c0_82 = arith.constant 0 : index
    %92 = vector.load %arg0[%c5_81, %c0_82] : memref<88x128xf32, #tpu.memory_space<vmem>>, vector<79x126xf32>
    %93 = vector.broadcast %15 : f32 to vector<79x126xf32>
    %94 = arith.mulf %93, %92 : vector<79x126xf32>
    %95 = arith.addf %91, %94 : vector<79x126xf32>
    %c5_83 = arith.constant 5 : index
    %c1_84 = arith.constant 1 : index
    %96 = vector.load %arg0[%c5_83, %c1_84] : memref<88x128xf32, #tpu.memory_space<vmem>>, vector<79x126xf32>
    %97 = vector.broadcast %16 : f32 to vector<79x126xf32>
    %98 = arith.mulf %97, %96 : vector<79x126xf32>
    %99 = arith.addf %95, %98 : vector<79x126xf32>
    %c5_85 = arith.constant 5 : index
    %c2_86 = arith.constant 2 : index
    %100 = vector.load %arg0[%c5_85, %c2_86] : memref<88x128xf32, #tpu.memory_space<vmem>>, vector<79x126xf32>
    %101 = vector.broadcast %17 : f32 to vector<79x126xf32>
    %102 = arith.mulf %101, %100 : vector<79x126xf32>
    %103 = arith.addf %99, %102 : vector<79x126xf32>
    %c6_87 = arith.constant 6 : index
    %c0_88 = arith.constant 0 : index
    %104 = vector.load %arg0[%c6_87, %c0_88] : memref<88x128xf32, #tpu.memory_space<vmem>>, vector<79x126xf32>
    %105 = vector.broadcast %18 : f32 to vector<79x126xf32>
    %106 = arith.mulf %105, %104 : vector<79x126xf32>
    %107 = arith.addf %103, %106 : vector<79x126xf32>
    %c6_89 = arith.constant 6 : index
    %c1_90 = arith.constant 1 : index
    %108 = vector.load %arg0[%c6_89, %c1_90] : memref<88x128xf32, #tpu.memory_space<vmem>>, vector<79x126xf32>
    %109 = vector.broadcast %19 : f32 to vector<79x126xf32>
    %110 = arith.mulf %109, %108 : vector<79x126xf32>
    %111 = arith.addf %107, %110 : vector<79x126xf32>
    %c6_91 = arith.constant 6 : index
    %c2_92 = arith.constant 2 : index
    %112 = vector.load %arg0[%c6_91, %c2_92] : memref<88x128xf32, #tpu.memory_space<vmem>>, vector<79x126xf32>
    %113 = vector.broadcast %20 : f32 to vector<79x126xf32>
    %114 = arith.mulf %113, %112 : vector<79x126xf32>
    %115 = arith.addf %111, %114 : vector<79x126xf32>
    %c7_93 = arith.constant 7 : index
    %c0_94 = arith.constant 0 : index
    %116 = vector.load %arg0[%c7_93, %c0_94] : memref<88x128xf32, #tpu.memory_space<vmem>>, vector<79x126xf32>
    %117 = vector.broadcast %21 : f32 to vector<79x126xf32>
    %118 = arith.mulf %117, %116 : vector<79x126xf32>
    %119 = arith.addf %115, %118 : vector<79x126xf32>
    %c7_95 = arith.constant 7 : index
    %c1_96 = arith.constant 1 : index
    %120 = vector.load %arg0[%c7_95, %c1_96] : memref<88x128xf32, #tpu.memory_space<vmem>>, vector<79x126xf32>
    %121 = vector.broadcast %22 : f32 to vector<79x126xf32>
    %122 = arith.mulf %121, %120 : vector<79x126xf32>
    %123 = arith.addf %119, %122 : vector<79x126xf32>
    %c7_97 = arith.constant 7 : index
    %c2_98 = arith.constant 2 : index
    %124 = vector.load %arg0[%c7_97, %c2_98] : memref<88x128xf32, #tpu.memory_space<vmem>>, vector<79x126xf32>
    %125 = vector.broadcast %23 : f32 to vector<79x126xf32>
    %126 = arith.mulf %125, %124 : vector<79x126xf32>
    %127 = arith.addf %123, %126 : vector<79x126xf32>
    %c8_99 = arith.constant 8 : index
    %c0_100 = arith.constant 0 : index
    %128 = vector.load %arg0[%c8_99, %c0_100] : memref<88x128xf32, #tpu.memory_space<vmem>>, vector<79x126xf32>
    %129 = vector.broadcast %24 : f32 to vector<79x126xf32>
    %130 = arith.mulf %129, %128 : vector<79x126xf32>
    %131 = arith.addf %127, %130 : vector<79x126xf32>
    %c8_101 = arith.constant 8 : index
    %c1_102 = arith.constant 1 : index
    %132 = vector.load %arg0[%c8_101, %c1_102] : memref<88x128xf32, #tpu.memory_space<vmem>>, vector<79x126xf32>
    %133 = vector.broadcast %25 : f32 to vector<79x126xf32>
    %134 = arith.mulf %133, %132 : vector<79x126xf32>
    %135 = arith.addf %131, %134 : vector<79x126xf32>
    %c8_103 = arith.constant 8 : index
    %c2_104 = arith.constant 2 : index
    %136 = vector.load %arg0[%c8_103, %c2_104] : memref<88x128xf32, #tpu.memory_space<vmem>>, vector<79x126xf32>
    %137 = vector.broadcast %26 : f32 to vector<79x126xf32>
    %138 = arith.mulf %137, %136 : vector<79x126xf32>
    %139 = arith.addf %135, %138 : vector<79x126xf32>
    %c9_105 = arith.constant 9 : index
    %c0_106 = arith.constant 0 : index
    %140 = vector.load %arg0[%c9_105, %c0_106] : memref<88x128xf32, #tpu.memory_space<vmem>>, vector<79x126xf32>
    %141 = vector.broadcast %27 : f32 to vector<79x126xf32>
    %142 = arith.mulf %141, %140 : vector<79x126xf32>
    %143 = arith.addf %139, %142 : vector<79x126xf32>
    %c9_107 = arith.constant 9 : index
    %c1_108 = arith.constant 1 : index
    %144 = vector.load %arg0[%c9_107, %c1_108] : memref<88x128xf32, #tpu.memory_space<vmem>>, vector<79x126xf32>
    %145 = vector.broadcast %28 : f32 to vector<79x126xf32>
    %146 = arith.mulf %145, %144 : vector<79x126xf32>
    %147 = arith.addf %143, %146 : vector<79x126xf32>
    %c9_109 = arith.constant 9 : index
    %c2_110 = arith.constant 2 : index
    %148 = vector.load %arg0[%c9_109, %c2_110] : memref<88x128xf32, #tpu.memory_space<vmem>>, vector<79x126xf32>
    %149 = vector.broadcast %29 : f32 to vector<79x126xf32>
    %150 = arith.mulf %149, %148 : vector<79x126xf32>
    %151 = arith.addf %147, %150 : vector<79x126xf32>
    %c0_111 = arith.constant 0 : index
    %c0_112 = arith.constant 0 : index
    %152 = vector.load %arg8[%c0_111, %c0_112] : memref<79x126xf32, #tpu.memory_space<vmem>>, vector<79x126xf32>
    tpu.vector_store %arg8[%c0_111, %c0_112], %151 {strides = array<i32>} : memref<79x126xf32, #tpu.memory_space<vmem>>, vector<79x126xf32>,
    %c0_113 = arith.constant 0 : index
    %c0_114 = arith.constant 0 : index
    %153 = vector.load %arg8[%c0_113, %c0_114] : memref<79x126xf32, #tpu.memory_space<vmem>>, vector<78x125xf32>
    %c1_115 = arith.constant 1 : index
    %c0_116 = arith.constant 0 : index
    %154 = vector.load %arg8[%c1_115, %c0_116] : memref<79x126xf32, #tpu.memory_space<vmem>>, vector<78x125xf32>
    %c0_117 = arith.constant 0 : index
    %c1_118 = arith.constant 1 : index
    %155 = vector.load %arg8[%c0_117, %c1_118] : memref<79x126xf32, #tpu.memory_space<vmem>>, vector<78x125xf32>
    %c1_119 = arith.constant 1 : index
    %c1_120 = arith.constant 1 : index
    %156 = vector.load %arg8[%c1_119, %c1_120] : memref<79x126xf32, #tpu.memory_space<vmem>>, vector<78x125xf32>
    %157 = arith.maximumf %153, %154 : vector<78x125xf32>
    %158 = arith.maximumf %155, %156 : vector<78x125xf32>
    %159 = arith.maximumf %157, %158 : vector<78x125xf32>
    %160 = tpu.iota {dimensions = array<i32: 0>} : vector<78x125xi32>
    %161 = tpu.iota {dimensions = array<i32: 1>} : vector<78x125xi32>
    %c63_i32 = arith.constant 63 : i32
    %162 = vector.broadcast %c63_i32 : i32 to vector<78x125xi32>
    %163 = arith.andi %161, %162 : vector<78x125xi32>
    %c18_i32 = arith.constant 18 : i32
    %164 = vector.broadcast %c18_i32 : i32 to vector<78x125xi32>
    %165 = arith.cmpi sge, %160, %164 : vector<78x125xi32>
    %c58_i32 = arith.constant 58 : i32
    %166 = vector.broadcast %c58_i32 : i32 to vector<78x125xi32>
    %167 = arith.cmpi sle, %160, %166 : vector<78x125xi32>
    %168 = arith.andi %165, %167 : vector<78x125xi1>
    %c18_i32_121 = arith.constant 18 : i32
    %169 = vector.broadcast %c18_i32_121 : i32 to vector<78x125xi32>
    %170 = arith.cmpi sge, %163, %169 : vector<78x125xi32>
    %171 = arith.andi %168, %170 : vector<78x125xi1>
    %c22_i32 = arith.constant 22 : i32
    %172 = vector.broadcast %c22_i32 : i32 to vector<78x125xi32>
    %173 = arith.cmpi sle, %163, %172 : vector<78x125xi32>
    %174 = arith.andi %171, %173 : vector<78x125xi1>
    %cst = arith.constant 0.000000e+00 : f32
    %175 = vector.broadcast %cst : f32 to vector<78x125xf32>
    %176 = arith.select %174, %159, %175 : vector<78x125xi1>, vector<78x125xf32>
    %c0_122 = arith.constant 0 : index
    %c0_123 = arith.constant 0 : index
    %177 = vector.load %arg9[%c0_122, %c0_123] : memref<78x125xf32, #tpu.memory_space<vmem>>, vector<78x125xf32>
    tpu.vector_store %arg9[%c0_122, %c0_123], %176 {strides = array<i32>} : memref<78x125xf32, #tpu.memory_space<vmem>>, vector<78x125xf32>,
    %c0_124 = arith.constant 0 : index
    %c0_125 = arith.constant 0 : index
    %178 = memref.load %arg3[%c0_124, %c0_125] : memref<10x4xf32, #tpu.memory_space<smem>>
    %c0_126 = arith.constant 0 : index
    %c1_127 = arith.constant 1 : index
    %179 = memref.load %arg3[%c0_126, %c1_127] : memref<10x4xf32, #tpu.memory_space<smem>>
    %c0_128 = arith.constant 0 : index
    %c2_129 = arith.constant 2 : index
    %180 = memref.load %arg3[%c0_128, %c2_129] : memref<10x4xf32, #tpu.memory_space<smem>>
    %c0_130 = arith.constant 0 : index
    %c3_131 = arith.constant 3 : index
    %181 = memref.load %arg3[%c0_130, %c3_131] : memref<10x4xf32, #tpu.memory_space<smem>>
    %c1_132 = arith.constant 1 : index
    %c0_133 = arith.constant 0 : index
    %182 = memref.load %arg3[%c1_132, %c0_133] : memref<10x4xf32, #tpu.memory_space<smem>>
    %c1_134 = arith.constant 1 : index
    %c1_135 = arith.constant 1 : index
    %183 = memref.load %arg3[%c1_134, %c1_135] : memref<10x4xf32, #tpu.memory_space<smem>>
    %c1_136 = arith.constant 1 : index
    %c2_137 = arith.constant 2 : index
    %184 = memref.load %arg3[%c1_136, %c2_137] : memref<10x4xf32, #tpu.memory_space<smem>>
    %c1_138 = arith.constant 1 : index
    %c3_139 = arith.constant 3 : index
    %185 = memref.load %arg3[%c1_138, %c3_139] : memref<10x4xf32, #tpu.memory_space<smem>>
    %c2_140 = arith.constant 2 : index
    %c0_141 = arith.constant 0 : index
    %186 = memref.load %arg3[%c2_140, %c0_141] : memref<10x4xf32, #tpu.memory_space<smem>>
    %c2_142 = arith.constant 2 : index
    %c1_143 = arith.constant 1 : index
    %187 = memref.load %arg3[%c2_142, %c1_143] : memref<10x4xf32, #tpu.memory_space<smem>>
    %c2_144 = arith.constant 2 : index
    %c2_145 = arith.constant 2 : index
    %188 = memref.load %arg3[%c2_144, %c2_145] : memref<10x4xf32, #tpu.memory_space<smem>>
    %c2_146 = arith.constant 2 : index
    %c3_147 = arith.constant 3 : index
    %189 = memref.load %arg3[%c2_146, %c3_147] : memref<10x4xf32, #tpu.memory_space<smem>>
    %c3_148 = arith.constant 3 : index
    %c0_149 = arith.constant 0 : index
    %190 = memref.load %arg3[%c3_148, %c0_149] : memref<10x4xf32, #tpu.memory_space<smem>>
    %c3_150 = arith.constant 3 : index
    %c1_151 = arith.constant 1 : index
    %191 = memref.load %arg3[%c3_150, %c1_151] : memref<10x4xf32, #tpu.memory_space<smem>>
    %c3_152 = arith.constant 3 : index
    %c2_153 = arith.constant 2 : index
    %192 = memref.load %arg3[%c3_152, %c2_153] : memref<10x4xf32, #tpu.memory_space<smem>>
    %c3_154 = arith.constant 3 : index
    %c3_155 = arith.constant 3 : index
    %193 = memref.load %arg3[%c3_154, %c3_155] : memref<10x4xf32, #tpu.memory_space<smem>>
    %c4_156 = arith.constant 4 : index
    %c0_157 = arith.constant 0 : index
    %194 = memref.load %arg3[%c4_156, %c0_157] : memref<10x4xf32, #tpu.memory_space<smem>>
    %c4_158 = arith.constant 4 : index
    %c1_159 = arith.constant 1 : index
    %195 = memref.load %arg3[%c4_158, %c1_159] : memref<10x4xf32, #tpu.memory_space<smem>>
    %c4_160 = arith.constant 4 : index
    %c2_161 = arith.constant 2 : index
    %196 = memref.load %arg3[%c4_160, %c2_161] : memref<10x4xf32, #tpu.memory_space<smem>>
    %c4_162 = arith.constant 4 : index
    %c3_163 = arith.constant 3 : index
    %197 = memref.load %arg3[%c4_162, %c3_163] : memref<10x4xf32, #tpu.memory_space<smem>>
    %c5_164 = arith.constant 5 : index
    %c0_165 = arith.constant 0 : index
    %198 = memref.load %arg3[%c5_164, %c0_165] : memref<10x4xf32, #tpu.memory_space<smem>>
    %c5_166 = arith.constant 5 : index
    %c1_167 = arith.constant 1 : index
    %199 = memref.load %arg3[%c5_166, %c1_167] : memref<10x4xf32, #tpu.memory_space<smem>>
    %c5_168 = arith.constant 5 : index
    %c2_169 = arith.constant 2 : index
    %200 = memref.load %arg3[%c5_168, %c2_169] : memref<10x4xf32, #tpu.memory_space<smem>>
    %c5_170 = arith.constant 5 : index
    %c3_171 = arith.constant 3 : index
    %201 = memref.load %arg3[%c5_170, %c3_171] : memref<10x4xf32, #tpu.memory_space<smem>>
    %c6_172 = arith.constant 6 : index
    %c0_173 = arith.constant 0 : index
    %202 = memref.load %arg3[%c6_172, %c0_173] : memref<10x4xf32, #tpu.memory_space<smem>>
    %c6_174 = arith.constant 6 : index
    %c1_175 = arith.constant 1 : index
    %203 = memref.load %arg3[%c6_174, %c1_175] : memref<10x4xf32, #tpu.memory_space<smem>>
    %c6_176 = arith.constant 6 : index
    %c2_177 = arith.constant 2 : index
    %204 = memref.load %arg3[%c6_176, %c2_177] : memref<10x4xf32, #tpu.memory_space<smem>>
    %c6_178 = arith.constant 6 : index
    %c3_179 = arith.constant 3 : index
    %205 = memref.load %arg3[%c6_178, %c3_179] : memref<10x4xf32, #tpu.memory_space<smem>>
    %c7_180 = arith.constant 7 : index
    %c0_181 = arith.constant 0 : index
    %206 = memref.load %arg3[%c7_180, %c0_181] : memref<10x4xf32, #tpu.memory_space<smem>>
    %c7_182 = arith.constant 7 : index
    %c1_183 = arith.constant 1 : index
    %207 = memref.load %arg3[%c7_182, %c1_183] : memref<10x4xf32, #tpu.memory_space<smem>>
    %c7_184 = arith.constant 7 : index
    %c2_185 = arith.constant 2 : index
    %208 = memref.load %arg3[%c7_184, %c2_185] : memref<10x4xf32, #tpu.memory_space<smem>>
    %c7_186 = arith.constant 7 : index
    %c3_187 = arith.constant 3 : index
    %209 = memref.load %arg3[%c7_186, %c3_187] : memref<10x4xf32, #tpu.memory_space<smem>>
    %c8_188 = arith.constant 8 : index
    %c0_189 = arith.constant 0 : index
    %210 = memref.load %arg3[%c8_188, %c0_189] : memref<10x4xf32, #tpu.memory_space<smem>>
    %c8_190 = arith.constant 8 : index
    %c1_191 = arith.constant 1 : index
    %211 = memref.load %arg3[%c8_190, %c1_191] : memref<10x4xf32, #tpu.memory_space<smem>>
    %c8_192 = arith.constant 8 : index
    %c2_193 = arith.constant 2 : index
    %212 = memref.load %arg3[%c8_192, %c2_193] : memref<10x4xf32, #tpu.memory_space<smem>>
    %c8_194 = arith.constant 8 : index
    %c3_195 = arith.constant 3 : index
    %213 = memref.load %arg3[%c8_194, %c3_195] : memref<10x4xf32, #tpu.memory_space<smem>>
    %c9_196 = arith.constant 9 : index
    %c0_197 = arith.constant 0 : index
    %214 = memref.load %arg3[%c9_196, %c0_197] : memref<10x4xf32, #tpu.memory_space<smem>>
    %c9_198 = arith.constant 9 : index
    %c1_199 = arith.constant 1 : index
    %215 = memref.load %arg3[%c9_198, %c1_199] : memref<10x4xf32, #tpu.memory_space<smem>>
    %c9_200 = arith.constant 9 : index
    %c2_201 = arith.constant 2 : index
    %216 = memref.load %arg3[%c9_200, %c2_201] : memref<10x4xf32, #tpu.memory_space<smem>>
    %c9_202 = arith.constant 9 : index
    %c3_203 = arith.constant 3 : index
    %217 = memref.load %arg3[%c9_202, %c3_203] : memref<10x4xf32, #tpu.memory_space<smem>>
    %c0_204 = arith.constant 0 : index
    %218 = memref.load %arg4[%c0_204] : memref<1xf32, #tpu.memory_space<smem>>
    %219 = vector.broadcast %218 : f32 to vector<60x119xf32>
    %c0_205 = arith.constant 0 : index
    %c0_206 = arith.constant 0 : index
    %220 = vector.load %arg9[%c0_205, %c0_206] : memref<78x125xf32, #tpu.memory_space<vmem>>, vector<60x119xf32>
    %221 = vector.broadcast %178 : f32 to vector<60x119xf32>
    %222 = arith.mulf %221, %220 : vector<60x119xf32>
    %223 = arith.addf %219, %222 : vector<60x119xf32>
    %c0_207 = arith.constant 0 : index
    %c2_208 = arith.constant 2 : index
    %224 = vector.load %arg9[%c0_207, %c2_208] : memref<78x125xf32, #tpu.memory_space<vmem>>, vector<60x119xf32>
    %225 = vector.broadcast %179 : f32 to vector<60x119xf32>
    %226 = arith.mulf %225, %224 : vector<60x119xf32>
    %227 = arith.addf %223, %226 : vector<60x119xf32>
    %c0_209 = arith.constant 0 : index
    %c4_210 = arith.constant 4 : index
    %228 = vector.load %arg9[%c0_209, %c4_210] : memref<78x125xf32, #tpu.memory_space<vmem>>, vector<60x119xf32>
    %229 = vector.broadcast %180 : f32 to vector<60x119xf32>
    %230 = arith.mulf %229, %228 : vector<60x119xf32>
    %231 = arith.addf %227, %230 : vector<60x119xf32>
    %c0_211 = arith.constant 0 : index
    %c6_212 = arith.constant 6 : index
    %232 = vector.load %arg9[%c0_211, %c6_212] : memref<78x125xf32, #tpu.memory_space<vmem>>, vector<60x119xf32>
    %233 = vector.broadcast %181 : f32 to vector<60x119xf32>
    %234 = arith.mulf %233, %232 : vector<60x119xf32>
    %235 = arith.addf %231, %234 : vector<60x119xf32>
    %c2_213 = arith.constant 2 : index
    %c0_214 = arith.constant 0 : index
    %236 = vector.load %arg9[%c2_213, %c0_214] : memref<78x125xf32, #tpu.memory_space<vmem>>, vector<60x119xf32>
    %237 = vector.broadcast %182 : f32 to vector<60x119xf32>
    %238 = arith.mulf %237, %236 : vector<60x119xf32>
    %239 = arith.addf %235, %238 : vector<60x119xf32>
    %c2_215 = arith.constant 2 : index
    %c2_216 = arith.constant 2 : index
    %240 = vector.load %arg9[%c2_215, %c2_216] : memref<78x125xf32, #tpu.memory_space<vmem>>, vector<60x119xf32>
    %241 = vector.broadcast %183 : f32 to vector<60x119xf32>
    %242 = arith.mulf %241, %240 : vector<60x119xf32>
    %243 = arith.addf %239, %242 : vector<60x119xf32>
    %c2_217 = arith.constant 2 : index
    %c4_218 = arith.constant 4 : index
    %244 = vector.load %arg9[%c2_217, %c4_218] : memref<78x125xf32, #tpu.memory_space<vmem>>, vector<60x119xf32>
    %245 = vector.broadcast %184 : f32 to vector<60x119xf32>
    %246 = arith.mulf %245, %244 : vector<60x119xf32>
    %247 = arith.addf %243, %246 : vector<60x119xf32>
    %c2_219 = arith.constant 2 : index
    %c6_220 = arith.constant 6 : index
    %248 = vector.load %arg9[%c2_219, %c6_220] : memref<78x125xf32, #tpu.memory_space<vmem>>, vector<60x119xf32>
    %249 = vector.broadcast %185 : f32 to vector<60x119xf32>
    %250 = arith.mulf %249, %248 : vector<60x119xf32>
    %251 = arith.addf %247, %250 : vector<60x119xf32>
    %c4_221 = arith.constant 4 : index
    %c0_222 = arith.constant 0 : index
    %252 = vector.load %arg9[%c4_221, %c0_222] : memref<78x125xf32, #tpu.memory_space<vmem>>, vector<60x119xf32>
    %253 = vector.broadcast %186 : f32 to vector<60x119xf32>
    %254 = arith.mulf %253, %252 : vector<60x119xf32>
    %255 = arith.addf %251, %254 : vector<60x119xf32>
    %c4_223 = arith.constant 4 : index
    %c2_224 = arith.constant 2 : index
    %256 = vector.load %arg9[%c4_223, %c2_224] : memref<78x125xf32, #tpu.memory_space<vmem>>, vector<60x119xf32>
    %257 = vector.broadcast %187 : f32 to vector<60x119xf32>
    %258 = arith.mulf %257, %256 : vector<60x119xf32>
    %259 = arith.addf %255, %258 : vector<60x119xf32>
    %c4_225 = arith.constant 4 : index
    %c4_226 = arith.constant 4 : index
    %260 = vector.load %arg9[%c4_225, %c4_226] : memref<78x125xf32, #tpu.memory_space<vmem>>, vector<60x119xf32>
    %261 = vector.broadcast %188 : f32 to vector<60x119xf32>
    %262 = arith.mulf %261, %260 : vector<60x119xf32>
    %263 = arith.addf %259, %262 : vector<60x119xf32>
    %c4_227 = arith.constant 4 : index
    %c6_228 = arith.constant 6 : index
    %264 = vector.load %arg9[%c4_227, %c6_228] : memref<78x125xf32, #tpu.memory_space<vmem>>, vector<60x119xf32>
    %265 = vector.broadcast %189 : f32 to vector<60x119xf32>
    %266 = arith.mulf %265, %264 : vector<60x119xf32>
    %267 = arith.addf %263, %266 : vector<60x119xf32>
    %c6_229 = arith.constant 6 : index
    %c0_230 = arith.constant 0 : index
    %268 = vector.load %arg9[%c6_229, %c0_230] : memref<78x125xf32, #tpu.memory_space<vmem>>, vector<60x119xf32>
    %269 = vector.broadcast %190 : f32 to vector<60x119xf32>
    %270 = arith.mulf %269, %268 : vector<60x119xf32>
    %271 = arith.addf %267, %270 : vector<60x119xf32>
    %c6_231 = arith.constant 6 : index
    %c2_232 = arith.constant 2 : index
    %272 = vector.load %arg9[%c6_231, %c2_232] : memref<78x125xf32, #tpu.memory_space<vmem>>, vector<60x119xf32>
    %273 = vector.broadcast %191 : f32 to vector<60x119xf32>
    %274 = arith.mulf %273, %272 : vector<60x119xf32>
    %275 = arith.addf %271, %274 : vector<60x119xf32>
    %c6_233 = arith.constant 6 : index
    %c4_234 = arith.constant 4 : index
    %276 = vector.load %arg9[%c6_233, %c4_234] : memref<78x125xf32, #tpu.memory_space<vmem>>, vector<60x119xf32>
    %277 = vector.broadcast %192 : f32 to vector<60x119xf32>
    %278 = arith.mulf %277, %276 : vector<60x119xf32>
    %279 = arith.addf %275, %278 : vector<60x119xf32>
    %c6_235 = arith.constant 6 : index
    %c6_236 = arith.constant 6 : index
    %280 = vector.load %arg9[%c6_235, %c6_236] : memref<78x125xf32, #tpu.memory_space<vmem>>, vector<60x119xf32>
    %281 = vector.broadcast %193 : f32 to vector<60x119xf32>
    %282 = arith.mulf %281, %280 : vector<60x119xf32>
    %283 = arith.addf %279, %282 : vector<60x119xf32>
    %c8_237 = arith.constant 8 : index
    %c0_238 = arith.constant 0 : index
    %284 = vector.load %arg9[%c8_237, %c0_238] : memref<78x125xf32, #tpu.memory_space<vmem>>, vector<60x119xf32>
    %285 = vector.broadcast %194 : f32 to vector<60x119xf32>
    %286 = arith.mulf %285, %284 : vector<60x119xf32>
    %287 = arith.addf %283, %286 : vector<60x119xf32>
    %c8_239 = arith.constant 8 : index
    %c2_240 = arith.constant 2 : index
    %288 = vector.load %arg9[%c8_239, %c2_240] : memref<78x125xf32, #tpu.memory_space<vmem>>, vector<60x119xf32>
    %289 = vector.broadcast %195 : f32 to vector<60x119xf32>
    %290 = arith.mulf %289, %288 : vector<60x119xf32>
    %291 = arith.addf %287, %290 : vector<60x119xf32>
    %c8_241 = arith.constant 8 : index
    %c4_242 = arith.constant 4 : index
    %292 = vector.load %arg9[%c8_241, %c4_242] : memref<78x125xf32, #tpu.memory_space<vmem>>, vector<60x119xf32>
    %293 = vector.broadcast %196 : f32 to vector<60x119xf32>
    %294 = arith.mulf %293, %292 : vector<60x119xf32>
    %295 = arith.addf %291, %294 : vector<60x119xf32>
    %c8_243 = arith.constant 8 : index
    %c6_244 = arith.constant 6 : index
    %296 = vector.load %arg9[%c8_243, %c6_244] : memref<78x125xf32, #tpu.memory_space<vmem>>, vector<60x119xf32>
    %297 = vector.broadcast %197 : f32 to vector<60x119xf32>
    %298 = arith.mulf %297, %296 : vector<60x119xf32>
    %299 = arith.addf %295, %298 : vector<60x119xf32>
    %c10 = arith.constant 10 : index
    %c0_245 = arith.constant 0 : index
    %300 = vector.load %arg9[%c10, %c0_245] : memref<78x125xf32, #tpu.memory_space<vmem>>, vector<60x119xf32>
    %301 = vector.broadcast %198 : f32 to vector<60x119xf32>
    %302 = arith.mulf %301, %300 : vector<60x119xf32>
    %303 = arith.addf %299, %302 : vector<60x119xf32>
    %c10_246 = arith.constant 10 : index
    %c2_247 = arith.constant 2 : index
    %304 = vector.load %arg9[%c10_246, %c2_247] : memref<78x125xf32, #tpu.memory_space<vmem>>, vector<60x119xf32>
    %305 = vector.broadcast %199 : f32 to vector<60x119xf32>
    %306 = arith.mulf %305, %304 : vector<60x119xf32>
    %307 = arith.addf %303, %306 : vector<60x119xf32>
    %c10_248 = arith.constant 10 : index
    %c4_249 = arith.constant 4 : index
    %308 = vector.load %arg9[%c10_248, %c4_249] : memref<78x125xf32, #tpu.memory_space<vmem>>, vector<60x119xf32>
    %309 = vector.broadcast %200 : f32 to vector<60x119xf32>
    %310 = arith.mulf %309, %308 : vector<60x119xf32>
    %311 = arith.addf %307, %310 : vector<60x119xf32>
    %c10_250 = arith.constant 10 : index
    %c6_251 = arith.constant 6 : index
    %312 = vector.load %arg9[%c10_250, %c6_251] : memref<78x125xf32, #tpu.memory_space<vmem>>, vector<60x119xf32>
    %313 = vector.broadcast %201 : f32 to vector<60x119xf32>
    %314 = arith.mulf %313, %312 : vector<60x119xf32>
    %315 = arith.addf %311, %314 : vector<60x119xf32>
    %c12 = arith.constant 12 : index
    %c0_252 = arith.constant 0 : index
    %316 = vector.load %arg9[%c12, %c0_252] : memref<78x125xf32, #tpu.memory_space<vmem>>, vector<60x119xf32>
    %317 = vector.broadcast %202 : f32 to vector<60x119xf32>
    %318 = arith.mulf %317, %316 : vector<60x119xf32>
    %319 = arith.addf %315, %318 : vector<60x119xf32>
    %c12_253 = arith.constant 12 : index
    %c2_254 = arith.constant 2 : index
    %320 = vector.load %arg9[%c12_253, %c2_254] : memref<78x125xf32, #tpu.memory_space<vmem>>, vector<60x119xf32>
    %321 = vector.broadcast %203 : f32 to vector<60x119xf32>
    %322 = arith.mulf %321, %320 : vector<60x119xf32>
    %323 = arith.addf %319, %322 : vector<60x119xf32>
    %c12_255 = arith.constant 12 : index
    %c4_256 = arith.constant 4 : index
    %324 = vector.load %arg9[%c12_255, %c4_256] : memref<78x125xf32, #tpu.memory_space<vmem>>, vector<60x119xf32>
    %325 = vector.broadcast %204 : f32 to vector<60x119xf32>
    %326 = arith.mulf %325, %324 : vector<60x119xf32>
    %327 = arith.addf %323, %326 : vector<60x119xf32>
    %c12_257 = arith.constant 12 : index
    %c6_258 = arith.constant 6 : index
    %328 = vector.load %arg9[%c12_257, %c6_258] : memref<78x125xf32, #tpu.memory_space<vmem>>, vector<60x119xf32>
    %329 = vector.broadcast %205 : f32 to vector<60x119xf32>
    %330 = arith.mulf %329, %328 : vector<60x119xf32>
    %331 = arith.addf %327, %330 : vector<60x119xf32>
    %c14 = arith.constant 14 : index
    %c0_259 = arith.constant 0 : index
    %332 = vector.load %arg9[%c14, %c0_259] : memref<78x125xf32, #tpu.memory_space<vmem>>, vector<60x119xf32>
    %333 = vector.broadcast %206 : f32 to vector<60x119xf32>
    %334 = arith.mulf %333, %332 : vector<60x119xf32>
    %335 = arith.addf %331, %334 : vector<60x119xf32>
    %c14_260 = arith.constant 14 : index
    %c2_261 = arith.constant 2 : index
    %336 = vector.load %arg9[%c14_260, %c2_261] : memref<78x125xf32, #tpu.memory_space<vmem>>, vector<60x119xf32>
    %337 = vector.broadcast %207 : f32 to vector<60x119xf32>
    %338 = arith.mulf %337, %336 : vector<60x119xf32>
    %339 = arith.addf %335, %338 : vector<60x119xf32>
    %c14_262 = arith.constant 14 : index
    %c4_263 = arith.constant 4 : index
    %340 = vector.load %arg9[%c14_262, %c4_263] : memref<78x125xf32, #tpu.memory_space<vmem>>, vector<60x119xf32>
    %341 = vector.broadcast %208 : f32 to vector<60x119xf32>
    %342 = arith.mulf %341, %340 : vector<60x119xf32>
    %343 = arith.addf %339, %342 : vector<60x119xf32>
    %c14_264 = arith.constant 14 : index
    %c6_265 = arith.constant 6 : index
    %344 = vector.load %arg9[%c14_264, %c6_265] : memref<78x125xf32, #tpu.memory_space<vmem>>, vector<60x119xf32>
    %345 = vector.broadcast %209 : f32 to vector<60x119xf32>
    %346 = arith.mulf %345, %344 : vector<60x119xf32>
    %347 = arith.addf %343, %346 : vector<60x119xf32>
    %c16 = arith.constant 16 : index
    %c0_266 = arith.constant 0 : index
    %348 = vector.load %arg9[%c16, %c0_266] : memref<78x125xf32, #tpu.memory_space<vmem>>, vector<60x119xf32>
    %349 = vector.broadcast %210 : f32 to vector<60x119xf32>
    %350 = arith.mulf %349, %348 : vector<60x119xf32>
    %351 = arith.addf %347, %350 : vector<60x119xf32>
    %c16_267 = arith.constant 16 : index
    %c2_268 = arith.constant 2 : index
    %352 = vector.load %arg9[%c16_267, %c2_268] : memref<78x125xf32, #tpu.memory_space<vmem>>, vector<60x119xf32>
    %353 = vector.broadcast %211 : f32 to vector<60x119xf32>
    %354 = arith.mulf %353, %352 : vector<60x119xf32>
    %355 = arith.addf %351, %354 : vector<60x119xf32>
    %c16_269 = arith.constant 16 : index
    %c4_270 = arith.constant 4 : index
    %356 = vector.load %arg9[%c16_269, %c4_270] : memref<78x125xf32, #tpu.memory_space<vmem>>, vector<60x119xf32>
    %357 = vector.broadcast %212 : f32 to vector<60x119xf32>
    %358 = arith.mulf %357, %356 : vector<60x119xf32>
    %359 = arith.addf %355, %358 : vector<60x119xf32>
    %c16_271 = arith.constant 16 : index
    %c6_272 = arith.constant 6 : index
    %360 = vector.load %arg9[%c16_271, %c6_272] : memref<78x125xf32, #tpu.memory_space<vmem>>, vector<60x119xf32>
    %361 = vector.broadcast %213 : f32 to vector<60x119xf32>
    %362 = arith.mulf %361, %360 : vector<60x119xf32>
    %363 = arith.addf %359, %362 : vector<60x119xf32>
    %c18 = arith.constant 18 : index
    %c0_273 = arith.constant 0 : index
    %364 = vector.load %arg9[%c18, %c0_273] : memref<78x125xf32, #tpu.memory_space<vmem>>, vector<60x119xf32>
    %365 = vector.broadcast %214 : f32 to vector<60x119xf32>
    %366 = arith.mulf %365, %364 : vector<60x119xf32>
    %367 = arith.addf %363, %366 : vector<60x119xf32>
    %c18_274 = arith.constant 18 : index
    %c2_275 = arith.constant 2 : index
    %368 = vector.load %arg9[%c18_274, %c2_275] : memref<78x125xf32, #tpu.memory_space<vmem>>, vector<60x119xf32>
    %369 = vector.broadcast %215 : f32 to vector<60x119xf32>
    %370 = arith.mulf %369, %368 : vector<60x119xf32>
    %371 = arith.addf %367, %370 : vector<60x119xf32>
    %c18_276 = arith.constant 18 : index
    %c4_277 = arith.constant 4 : index
    %372 = vector.load %arg9[%c18_276, %c4_277] : memref<78x125xf32, #tpu.memory_space<vmem>>, vector<60x119xf32>
    %373 = vector.broadcast %216 : f32 to vector<60x119xf32>
    %374 = arith.mulf %373, %372 : vector<60x119xf32>
    %375 = arith.addf %371, %374 : vector<60x119xf32>
    %c18_278 = arith.constant 18 : index
    %c6_279 = arith.constant 6 : index
    %376 = vector.load %arg9[%c18_278, %c6_279] : memref<78x125xf32, #tpu.memory_space<vmem>>, vector<60x119xf32>
    %377 = vector.broadcast %217 : f32 to vector<60x119xf32>
    %378 = arith.mulf %377, %376 : vector<60x119xf32>
    %379 = arith.addf %375, %378 : vector<60x119xf32>
    %c0_280 = arith.constant 0 : index
    %c0_281 = arith.constant 0 : index
    %380 = vector.load %arg10[%c0_280, %c0_281] : memref<60x119xf32, #tpu.memory_space<vmem>>, vector<60x119xf32>
    tpu.vector_store %arg10[%c0_280, %c0_281], %379 {strides = array<i32>} : memref<60x119xf32, #tpu.memory_space<vmem>>, vector<60x119xf32>,
    %c0_282 = arith.constant 0 : index
    %c0_283 = arith.constant 0 : index
    %381 = vector.load %arg10[%c0_282, %c0_283] : memref<60x119xf32, #tpu.memory_space<vmem>>, vector<58x117xf32>
    %c2_284 = arith.constant 2 : index
    %c0_285 = arith.constant 0 : index
    %382 = vector.load %arg10[%c2_284, %c0_285] : memref<60x119xf32, #tpu.memory_space<vmem>>, vector<58x117xf32>
    %c0_286 = arith.constant 0 : index
    %c2_287 = arith.constant 2 : index
    %383 = vector.load %arg10[%c0_286, %c2_287] : memref<60x119xf32, #tpu.memory_space<vmem>>, vector<58x117xf32>
    %c2_288 = arith.constant 2 : index
    %c2_289 = arith.constant 2 : index
    %384 = vector.load %arg10[%c2_288, %c2_289] : memref<60x119xf32, #tpu.memory_space<vmem>>, vector<58x117xf32>
    %385 = arith.maximumf %381, %382 : vector<58x117xf32>
    %386 = arith.maximumf %383, %384 : vector<58x117xf32>
    %387 = arith.maximumf %385, %386 : vector<58x117xf32>
    %388 = tpu.iota {dimensions = array<i32: 0>} : vector<58x117xi32>
    %389 = tpu.iota {dimensions = array<i32: 1>} : vector<58x117xi32>
    %c63_i32_290 = arith.constant 63 : i32
    %390 = vector.broadcast %c63_i32_290 : i32 to vector<58x117xi32>
    %391 = arith.andi %389, %390 : vector<58x117xi32>
    %c12_i32 = arith.constant 12 : i32
    %392 = vector.broadcast %c12_i32 : i32 to vector<58x117xi32>
    %393 = arith.cmpi sge, %388, %392 : vector<58x117xi32>
    %c44_i32 = arith.constant 44 : i32
    %394 = vector.broadcast %c44_i32 : i32 to vector<58x117xi32>
    %395 = arith.cmpi sle, %388, %394 : vector<58x117xi32>
    %396 = arith.andi %393, %395 : vector<58x117xi1>
    %c12_i32_291 = arith.constant 12 : i32
    %397 = vector.broadcast %c12_i32_291 : i32 to vector<58x117xi32>
    %398 = arith.cmpi sge, %391, %397 : vector<58x117xi32>
    %399 = arith.andi %396, %398 : vector<58x117xi1>
    %c20_i32 = arith.constant 20 : i32
    %400 = vector.broadcast %c20_i32 : i32 to vector<58x117xi32>
    %401 = arith.cmpi sle, %391, %400 : vector<58x117xi32>
    %402 = arith.andi %399, %401 : vector<58x117xi1>
    %cst_292 = arith.constant 0.000000e+00 : f32
    %403 = vector.broadcast %cst_292 : f32 to vector<58x117xf32>
    %404 = arith.select %402, %387, %403 : vector<58x117xi1>, vector<58x117xf32>
    %c0_293 = arith.constant 0 : index
    %c0_294 = arith.constant 0 : index
    %405 = vector.load %arg11[%c0_293, %c0_294] : memref<58x117xf32, #tpu.memory_space<vmem>>, vector<58x117xf32>
    tpu.vector_store %arg11[%c0_293, %c0_294], %404 {strides = array<i32>} : memref<58x117xf32, #tpu.memory_space<vmem>>, vector<58x117xf32>,
    %c0_295 = arith.constant 0 : index
    %c0_296 = arith.constant 0 : index
    %406 = memref.load %arg5[%c0_295, %c0_296] : memref<12x6xf32, #tpu.memory_space<smem>>
    %c0_297 = arith.constant 0 : index
    %c1_298 = arith.constant 1 : index
    %407 = memref.load %arg5[%c0_297, %c1_298] : memref<12x6xf32, #tpu.memory_space<smem>>
    %c0_299 = arith.constant 0 : index
    %c2_300 = arith.constant 2 : index
    %408 = memref.load %arg5[%c0_299, %c2_300] : memref<12x6xf32, #tpu.memory_space<smem>>
    %c0_301 = arith.constant 0 : index
    %c3_302 = arith.constant 3 : index
    %409 = memref.load %arg5[%c0_301, %c3_302] : memref<12x6xf32, #tpu.memory_space<smem>>
    %c0_303 = arith.constant 0 : index
    %c4_304 = arith.constant 4 : index
    %410 = memref.load %arg5[%c0_303, %c4_304] : memref<12x6xf32, #tpu.memory_space<smem>>
    %c0_305 = arith.constant 0 : index
    %c5_306 = arith.constant 5 : index
    %411 = memref.load %arg5[%c0_305, %c5_306] : memref<12x6xf32, #tpu.memory_space<smem>>
    %c1_307 = arith.constant 1 : index
    %c0_308 = arith.constant 0 : index
    %412 = memref.load %arg5[%c1_307, %c0_308] : memref<12x6xf32, #tpu.memory_space<smem>>
    %c1_309 = arith.constant 1 : index
    %c1_310 = arith.constant 1 : index
    %413 = memref.load %arg5[%c1_309, %c1_310] : memref<12x6xf32, #tpu.memory_space<smem>>
    %c1_311 = arith.constant 1 : index
    %c2_312 = arith.constant 2 : index
    %414 = memref.load %arg5[%c1_311, %c2_312] : memref<12x6xf32, #tpu.memory_space<smem>>
    %c1_313 = arith.constant 1 : index
    %c3_314 = arith.constant 3 : index
    %415 = memref.load %arg5[%c1_313, %c3_314] : memref<12x6xf32, #tpu.memory_space<smem>>
    %c1_315 = arith.constant 1 : index
    %c4_316 = arith.constant 4 : index
    %416 = memref.load %arg5[%c1_315, %c4_316] : memref<12x6xf32, #tpu.memory_space<smem>>
    %c1_317 = arith.constant 1 : index
    %c5_318 = arith.constant 5 : index
    %417 = memref.load %arg5[%c1_317, %c5_318] : memref<12x6xf32, #tpu.memory_space<smem>>
    %c2_319 = arith.constant 2 : index
    %c0_320 = arith.constant 0 : index
    %418 = memref.load %arg5[%c2_319, %c0_320] : memref<12x6xf32, #tpu.memory_space<smem>>
    %c2_321 = arith.constant 2 : index
    %c1_322 = arith.constant 1 : index
    %419 = memref.load %arg5[%c2_321, %c1_322] : memref<12x6xf32, #tpu.memory_space<smem>>
    %c2_323 = arith.constant 2 : index
    %c2_324 = arith.constant 2 : index
    %420 = memref.load %arg5[%c2_323, %c2_324] : memref<12x6xf32, #tpu.memory_space<smem>>
    %c2_325 = arith.constant 2 : index
    %c3_326 = arith.constant 3 : index
    %421 = memref.load %arg5[%c2_325, %c3_326] : memref<12x6xf32, #tpu.memory_space<smem>>
    %c2_327 = arith.constant 2 : index
    %c4_328 = arith.constant 4 : index
    %422 = memref.load %arg5[%c2_327, %c4_328] : memref<12x6xf32, #tpu.memory_space<smem>>
    %c2_329 = arith.constant 2 : index
    %c5_330 = arith.constant 5 : index
    %423 = memref.load %arg5[%c2_329, %c5_330] : memref<12x6xf32, #tpu.memory_space<smem>>
    %c3_331 = arith.constant 3 : index
    %c0_332 = arith.constant 0 : index
    %424 = memref.load %arg5[%c3_331, %c0_332] : memref<12x6xf32, #tpu.memory_space<smem>>
    %c3_333 = arith.constant 3 : index
    %c1_334 = arith.constant 1 : index
    %425 = memref.load %arg5[%c3_333, %c1_334] : memref<12x6xf32, #tpu.memory_space<smem>>
    %c3_335 = arith.constant 3 : index
    %c2_336 = arith.constant 2 : index
    %426 = memref.load %arg5[%c3_335, %c2_336] : memref<12x6xf32, #tpu.memory_space<smem>>
    %c3_337 = arith.constant 3 : index
    %c3_338 = arith.constant 3 : index
    %427 = memref.load %arg5[%c3_337, %c3_338] : memref<12x6xf32, #tpu.memory_space<smem>>
    %c3_339 = arith.constant 3 : index
    %c4_340 = arith.constant 4 : index
    %428 = memref.load %arg5[%c3_339, %c4_340] : memref<12x6xf32, #tpu.memory_space<smem>>
    %c3_341 = arith.constant 3 : index
    %c5_342 = arith.constant 5 : index
    %429 = memref.load %arg5[%c3_341, %c5_342] : memref<12x6xf32, #tpu.memory_space<smem>>
    %c4_343 = arith.constant 4 : index
    %c0_344 = arith.constant 0 : index
    %430 = memref.load %arg5[%c4_343, %c0_344] : memref<12x6xf32, #tpu.memory_space<smem>>
    %c4_345 = arith.constant 4 : index
    %c1_346 = arith.constant 1 : index
    %431 = memref.load %arg5[%c4_345, %c1_346] : memref<12x6xf32, #tpu.memory_space<smem>>
    %c4_347 = arith.constant 4 : index
    %c2_348 = arith.constant 2 : index
    %432 = memref.load %arg5[%c4_347, %c2_348] : memref<12x6xf32, #tpu.memory_space<smem>>
    %c4_349 = arith.constant 4 : index
    %c3_350 = arith.constant 3 : index
    %433 = memref.load %arg5[%c4_349, %c3_350] : memref<12x6xf32, #tpu.memory_space<smem>>
    %c4_351 = arith.constant 4 : index
    %c4_352 = arith.constant 4 : index
    %434 = memref.load %arg5[%c4_351, %c4_352] : memref<12x6xf32, #tpu.memory_space<smem>>
    %c4_353 = arith.constant 4 : index
    %c5_354 = arith.constant 5 : index
    %435 = memref.load %arg5[%c4_353, %c5_354] : memref<12x6xf32, #tpu.memory_space<smem>>
    %c5_355 = arith.constant 5 : index
    %c0_356 = arith.constant 0 : index
    %436 = memref.load %arg5[%c5_355, %c0_356] : memref<12x6xf32, #tpu.memory_space<smem>>
    %c5_357 = arith.constant 5 : index
    %c1_358 = arith.constant 1 : index
    %437 = memref.load %arg5[%c5_357, %c1_358] : memref<12x6xf32, #tpu.memory_space<smem>>
    %c5_359 = arith.constant 5 : index
    %c2_360 = arith.constant 2 : index
    %438 = memref.load %arg5[%c5_359, %c2_360] : memref<12x6xf32, #tpu.memory_space<smem>>
    %c5_361 = arith.constant 5 : index
    %c3_362 = arith.constant 3 : index
    %439 = memref.load %arg5[%c5_361, %c3_362] : memref<12x6xf32, #tpu.memory_space<smem>>
    %c5_363 = arith.constant 5 : index
    %c4_364 = arith.constant 4 : index
    %440 = memref.load %arg5[%c5_363, %c4_364] : memref<12x6xf32, #tpu.memory_space<smem>>
    %c5_365 = arith.constant 5 : index
    %c5_366 = arith.constant 5 : index
    %441 = memref.load %arg5[%c5_365, %c5_366] : memref<12x6xf32, #tpu.memory_space<smem>>
    %c6_367 = arith.constant 6 : index
    %c0_368 = arith.constant 0 : index
    %442 = memref.load %arg5[%c6_367, %c0_368] : memref<12x6xf32, #tpu.memory_space<smem>>
    %c6_369 = arith.constant 6 : index
    %c1_370 = arith.constant 1 : index
    %443 = memref.load %arg5[%c6_369, %c1_370] : memref<12x6xf32, #tpu.memory_space<smem>>
    %c6_371 = arith.constant 6 : index
    %c2_372 = arith.constant 2 : index
    %444 = memref.load %arg5[%c6_371, %c2_372] : memref<12x6xf32, #tpu.memory_space<smem>>
    %c6_373 = arith.constant 6 : index
    %c3_374 = arith.constant 3 : index
    %445 = memref.load %arg5[%c6_373, %c3_374] : memref<12x6xf32, #tpu.memory_space<smem>>
    %c6_375 = arith.constant 6 : index
    %c4_376 = arith.constant 4 : index
    %446 = memref.load %arg5[%c6_375, %c4_376] : memref<12x6xf32, #tpu.memory_space<smem>>
    %c6_377 = arith.constant 6 : index
    %c5_378 = arith.constant 5 : index
    %447 = memref.load %arg5[%c6_377, %c5_378] : memref<12x6xf32, #tpu.memory_space<smem>>
    %c7_379 = arith.constant 7 : index
    %c0_380 = arith.constant 0 : index
    %448 = memref.load %arg5[%c7_379, %c0_380] : memref<12x6xf32, #tpu.memory_space<smem>>
    %c7_381 = arith.constant 7 : index
    %c1_382 = arith.constant 1 : index
    %449 = memref.load %arg5[%c7_381, %c1_382] : memref<12x6xf32, #tpu.memory_space<smem>>
    %c7_383 = arith.constant 7 : index
    %c2_384 = arith.constant 2 : index
    %450 = memref.load %arg5[%c7_383, %c2_384] : memref<12x6xf32, #tpu.memory_space<smem>>
    %c7_385 = arith.constant 7 : index
    %c3_386 = arith.constant 3 : index
    %451 = memref.load %arg5[%c7_385, %c3_386] : memref<12x6xf32, #tpu.memory_space<smem>>
    %c7_387 = arith.constant 7 : index
    %c4_388 = arith.constant 4 : index
    %452 = memref.load %arg5[%c7_387, %c4_388] : memref<12x6xf32, #tpu.memory_space<smem>>
    %c7_389 = arith.constant 7 : index
    %c5_390 = arith.constant 5 : index
    %453 = memref.load %arg5[%c7_389, %c5_390] : memref<12x6xf32, #tpu.memory_space<smem>>
    %c8_391 = arith.constant 8 : index
    %c0_392 = arith.constant 0 : index
    %454 = memref.load %arg5[%c8_391, %c0_392] : memref<12x6xf32, #tpu.memory_space<smem>>
    %c8_393 = arith.constant 8 : index
    %c1_394 = arith.constant 1 : index
    %455 = memref.load %arg5[%c8_393, %c1_394] : memref<12x6xf32, #tpu.memory_space<smem>>
    %c8_395 = arith.constant 8 : index
    %c2_396 = arith.constant 2 : index
    %456 = memref.load %arg5[%c8_395, %c2_396] : memref<12x6xf32, #tpu.memory_space<smem>>
    %c8_397 = arith.constant 8 : index
    %c3_398 = arith.constant 3 : index
    %457 = memref.load %arg5[%c8_397, %c3_398] : memref<12x6xf32, #tpu.memory_space<smem>>
    %c8_399 = arith.constant 8 : index
    %c4_400 = arith.constant 4 : index
    %458 = memref.load %arg5[%c8_399, %c4_400] : memref<12x6xf32, #tpu.memory_space<smem>>
    %c8_401 = arith.constant 8 : index
    %c5_402 = arith.constant 5 : index
    %459 = memref.load %arg5[%c8_401, %c5_402] : memref<12x6xf32, #tpu.memory_space<smem>>
    %c9_403 = arith.constant 9 : index
    %c0_404 = arith.constant 0 : index
    %460 = memref.load %arg5[%c9_403, %c0_404] : memref<12x6xf32, #tpu.memory_space<smem>>
    %c9_405 = arith.constant 9 : index
    %c1_406 = arith.constant 1 : index
    %461 = memref.load %arg5[%c9_405, %c1_406] : memref<12x6xf32, #tpu.memory_space<smem>>
    %c9_407 = arith.constant 9 : index
    %c2_408 = arith.constant 2 : index
    %462 = memref.load %arg5[%c9_407, %c2_408] : memref<12x6xf32, #tpu.memory_space<smem>>
    %c9_409 = arith.constant 9 : index
    %c3_410 = arith.constant 3 : index
    %463 = memref.load %arg5[%c9_409, %c3_410] : memref<12x6xf32, #tpu.memory_space<smem>>
    %c9_411 = arith.constant 9 : index
    %c4_412 = arith.constant 4 : index
    %464 = memref.load %arg5[%c9_411, %c4_412] : memref<12x6xf32, #tpu.memory_space<smem>>
    %c9_413 = arith.constant 9 : index
    %c5_414 = arith.constant 5 : index
    %465 = memref.load %arg5[%c9_413, %c5_414] : memref<12x6xf32, #tpu.memory_space<smem>>
    %c10_415 = arith.constant 10 : index
    %c0_416 = arith.constant 0 : index
    %466 = memref.load %arg5[%c10_415, %c0_416] : memref<12x6xf32, #tpu.memory_space<smem>>
    %c10_417 = arith.constant 10 : index
    %c1_418 = arith.constant 1 : index
    %467 = memref.load %arg5[%c10_417, %c1_418] : memref<12x6xf32, #tpu.memory_space<smem>>
    %c10_419 = arith.constant 10 : index
    %c2_420 = arith.constant 2 : index
    %468 = memref.load %arg5[%c10_419, %c2_420] : memref<12x6xf32, #tpu.memory_space<smem>>
    %c10_421 = arith.constant 10 : index
    %c3_422 = arith.constant 3 : index
    %469 = memref.load %arg5[%c10_421, %c3_422] : memref<12x6xf32, #tpu.memory_space<smem>>
    %c10_423 = arith.constant 10 : index
    %c4_424 = arith.constant 4 : index
    %470 = memref.load %arg5[%c10_423, %c4_424] : memref<12x6xf32, #tpu.memory_space<smem>>
    %c10_425 = arith.constant 10 : index
    %c5_426 = arith.constant 5 : index
    %471 = memref.load %arg5[%c10_425, %c5_426] : memref<12x6xf32, #tpu.memory_space<smem>>
    %c11 = arith.constant 11 : index
    %c0_427 = arith.constant 0 : index
    %472 = memref.load %arg5[%c11, %c0_427] : memref<12x6xf32, #tpu.memory_space<smem>>
    %c11_428 = arith.constant 11 : index
    %c1_429 = arith.constant 1 : index
    %473 = memref.load %arg5[%c11_428, %c1_429] : memref<12x6xf32, #tpu.memory_space<smem>>
    %c11_430 = arith.constant 11 : index
    %c2_431 = arith.constant 2 : index
    %474 = memref.load %arg5[%c11_430, %c2_431] : memref<12x6xf32, #tpu.memory_space<smem>>
    %c11_432 = arith.constant 11 : index
    %c3_433 = arith.constant 3 : index
    %475 = memref.load %arg5[%c11_432, %c3_433] : memref<12x6xf32, #tpu.memory_space<smem>>
    %c11_434 = arith.constant 11 : index
    %c4_435 = arith.constant 4 : index
    %476 = memref.load %arg5[%c11_434, %c4_435] : memref<12x6xf32, #tpu.memory_space<smem>>
    %c11_436 = arith.constant 11 : index
    %c5_437 = arith.constant 5 : index
    %477 = memref.load %arg5[%c11_436, %c5_437] : memref<12x6xf32, #tpu.memory_space<smem>>
    %c0_438 = arith.constant 0 : index
    %478 = memref.load %arg6[%c0_438] : memref<1xf32, #tpu.memory_space<smem>>
    %479 = vector.broadcast %478 : f32 to vector<14x97xf32>
    %c0_439 = arith.constant 0 : index
    %c0_440 = arith.constant 0 : index
    %480 = vector.load %arg11[%c0_439, %c0_440] : memref<58x117xf32, #tpu.memory_space<vmem>>, vector<14x97xf32>
    %481 = vector.broadcast %406 : f32 to vector<14x97xf32>
    %482 = arith.mulf %481, %480 : vector<14x97xf32>
    %483 = arith.addf %479, %482 : vector<14x97xf32>
    %c0_441 = arith.constant 0 : index
    %c4_442 = arith.constant 4 : index
    %484 = vector.load %arg11[%c0_441, %c4_442] : memref<58x117xf32, #tpu.memory_space<vmem>>, vector<14x97xf32>
    %485 = vector.broadcast %407 : f32 to vector<14x97xf32>
    %486 = arith.mulf %485, %484 : vector<14x97xf32>
    %487 = arith.addf %483, %486 : vector<14x97xf32>
    %c0_443 = arith.constant 0 : index
    %c8_444 = arith.constant 8 : index
    %488 = vector.load %arg11[%c0_443, %c8_444] : memref<58x117xf32, #tpu.memory_space<vmem>>, vector<14x97xf32>
    %489 = vector.broadcast %408 : f32 to vector<14x97xf32>
    %490 = arith.mulf %489, %488 : vector<14x97xf32>
    %491 = arith.addf %487, %490 : vector<14x97xf32>
    %c0_445 = arith.constant 0 : index
    %c12_446 = arith.constant 12 : index
    %492 = vector.load %arg11[%c0_445, %c12_446] : memref<58x117xf32, #tpu.memory_space<vmem>>, vector<14x97xf32>
    %493 = vector.broadcast %409 : f32 to vector<14x97xf32>
    %494 = arith.mulf %493, %492 : vector<14x97xf32>
    %495 = arith.addf %491, %494 : vector<14x97xf32>
    %c0_447 = arith.constant 0 : index
    %c16_448 = arith.constant 16 : index
    %496 = vector.load %arg11[%c0_447, %c16_448] : memref<58x117xf32, #tpu.memory_space<vmem>>, vector<14x97xf32>
    %497 = vector.broadcast %410 : f32 to vector<14x97xf32>
    %498 = arith.mulf %497, %496 : vector<14x97xf32>
    %499 = arith.addf %495, %498 : vector<14x97xf32>
    %c0_449 = arith.constant 0 : index
    %c20 = arith.constant 20 : index
    %500 = vector.load %arg11[%c0_449, %c20] : memref<58x117xf32, #tpu.memory_space<vmem>>, vector<14x97xf32>
    %501 = vector.broadcast %411 : f32 to vector<14x97xf32>
    %502 = arith.mulf %501, %500 : vector<14x97xf32>
    %503 = arith.addf %499, %502 : vector<14x97xf32>
    %c4_450 = arith.constant 4 : index
    %c0_451 = arith.constant 0 : index
    %504 = vector.load %arg11[%c4_450, %c0_451] : memref<58x117xf32, #tpu.memory_space<vmem>>, vector<14x97xf32>
    %505 = vector.broadcast %412 : f32 to vector<14x97xf32>
    %506 = arith.mulf %505, %504 : vector<14x97xf32>
    %507 = arith.addf %503, %506 : vector<14x97xf32>
    %c4_452 = arith.constant 4 : index
    %c4_453 = arith.constant 4 : index
    %508 = vector.load %arg11[%c4_452, %c4_453] : memref<58x117xf32, #tpu.memory_space<vmem>>, vector<14x97xf32>
    %509 = vector.broadcast %413 : f32 to vector<14x97xf32>
    %510 = arith.mulf %509, %508 : vector<14x97xf32>
    %511 = arith.addf %507, %510 : vector<14x97xf32>
    %c4_454 = arith.constant 4 : index
    %c8_455 = arith.constant 8 : index
    %512 = vector.load %arg11[%c4_454, %c8_455] : memref<58x117xf32, #tpu.memory_space<vmem>>, vector<14x97xf32>
    %513 = vector.broadcast %414 : f32 to vector<14x97xf32>
    %514 = arith.mulf %513, %512 : vector<14x97xf32>
    %515 = arith.addf %511, %514 : vector<14x97xf32>
    %c4_456 = arith.constant 4 : index
    %c12_457 = arith.constant 12 : index
    %516 = vector.load %arg11[%c4_456, %c12_457] : memref<58x117xf32, #tpu.memory_space<vmem>>, vector<14x97xf32>
    %517 = vector.broadcast %415 : f32 to vector<14x97xf32>
    %518 = arith.mulf %517, %516 : vector<14x97xf32>
    %519 = arith.addf %515, %518 : vector<14x97xf32>
    %c4_458 = arith.constant 4 : index
    %c16_459 = arith.constant 16 : index
    %520 = vector.load %arg11[%c4_458, %c16_459] : memref<58x117xf32, #tpu.memory_space<vmem>>, vector<14x97xf32>
    %521 = vector.broadcast %416 : f32 to vector<14x97xf32>
    %522 = arith.mulf %521, %520 : vector<14x97xf32>
    %523 = arith.addf %519, %522 : vector<14x97xf32>
    %c4_460 = arith.constant 4 : index
    %c20_461 = arith.constant 20 : index
    %524 = vector.load %arg11[%c4_460, %c20_461] : memref<58x117xf32, #tpu.memory_space<vmem>>, vector<14x97xf32>
    %525 = vector.broadcast %417 : f32 to vector<14x97xf32>
    %526 = arith.mulf %525, %524 : vector<14x97xf32>
    %527 = arith.addf %523, %526 : vector<14x97xf32>
    %c8_462 = arith.constant 8 : index
    %c0_463 = arith.constant 0 : index
    %528 = vector.load %arg11[%c8_462, %c0_463] : memref<58x117xf32, #tpu.memory_space<vmem>>, vector<14x97xf32>
    %529 = vector.broadcast %418 : f32 to vector<14x97xf32>
    %530 = arith.mulf %529, %528 : vector<14x97xf32>
    %531 = arith.addf %527, %530 : vector<14x97xf32>
    %c8_464 = arith.constant 8 : index
    %c4_465 = arith.constant 4 : index
    %532 = vector.load %arg11[%c8_464, %c4_465] : memref<58x117xf32, #tpu.memory_space<vmem>>, vector<14x97xf32>
    %533 = vector.broadcast %419 : f32 to vector<14x97xf32>
    %534 = arith.mulf %533, %532 : vector<14x97xf32>
    %535 = arith.addf %531, %534 : vector<14x97xf32>
    %c8_466 = arith.constant 8 : index
    %c8_467 = arith.constant 8 : index
    %536 = vector.load %arg11[%c8_466, %c8_467] : memref<58x117xf32, #tpu.memory_space<vmem>>, vector<14x97xf32>
    %537 = vector.broadcast %420 : f32 to vector<14x97xf32>
    %538 = arith.mulf %537, %536 : vector<14x97xf32>
    %539 = arith.addf %535, %538 : vector<14x97xf32>
    %c8_468 = arith.constant 8 : index
    %c12_469 = arith.constant 12 : index
    %540 = vector.load %arg11[%c8_468, %c12_469] : memref<58x117xf32, #tpu.memory_space<vmem>>, vector<14x97xf32>
    %541 = vector.broadcast %421 : f32 to vector<14x97xf32>
    %542 = arith.mulf %541, %540 : vector<14x97xf32>
    %543 = arith.addf %539, %542 : vector<14x97xf32>
    %c8_470 = arith.constant 8 : index
    %c16_471 = arith.constant 16 : index
    %544 = vector.load %arg11[%c8_470, %c16_471] : memref<58x117xf32, #tpu.memory_space<vmem>>, vector<14x97xf32>
    %545 = vector.broadcast %422 : f32 to vector<14x97xf32>
    %546 = arith.mulf %545, %544 : vector<14x97xf32>
    %547 = arith.addf %543, %546 : vector<14x97xf32>
    %c8_472 = arith.constant 8 : index
    %c20_473 = arith.constant 20 : index
    %548 = vector.load %arg11[%c8_472, %c20_473] : memref<58x117xf32, #tpu.memory_space<vmem>>, vector<14x97xf32>
    %549 = vector.broadcast %423 : f32 to vector<14x97xf32>
    %550 = arith.mulf %549, %548 : vector<14x97xf32>
    %551 = arith.addf %547, %550 : vector<14x97xf32>
    %c12_474 = arith.constant 12 : index
    %c0_475 = arith.constant 0 : index
    %552 = vector.load %arg11[%c12_474, %c0_475] : memref<58x117xf32, #tpu.memory_space<vmem>>, vector<14x97xf32>
    %553 = vector.broadcast %424 : f32 to vector<14x97xf32>
    %554 = arith.mulf %553, %552 : vector<14x97xf32>
    %555 = arith.addf %551, %554 : vector<14x97xf32>
    %c12_476 = arith.constant 12 : index
    %c4_477 = arith.constant 4 : index
    %556 = vector.load %arg11[%c12_476, %c4_477] : memref<58x117xf32, #tpu.memory_space<vmem>>, vector<14x97xf32>
    %557 = vector.broadcast %425 : f32 to vector<14x97xf32>
    %558 = arith.mulf %557, %556 : vector<14x97xf32>
    %559 = arith.addf %555, %558 : vector<14x97xf32>
    %c12_478 = arith.constant 12 : index
    %c8_479 = arith.constant 8 : index
    %560 = vector.load %arg11[%c12_478, %c8_479] : memref<58x117xf32, #tpu.memory_space<vmem>>, vector<14x97xf32>
    %561 = vector.broadcast %426 : f32 to vector<14x97xf32>
    %562 = arith.mulf %561, %560 : vector<14x97xf32>
    %563 = arith.addf %559, %562 : vector<14x97xf32>
    %c12_480 = arith.constant 12 : index
    %c12_481 = arith.constant 12 : index
    %564 = vector.load %arg11[%c12_480, %c12_481] : memref<58x117xf32, #tpu.memory_space<vmem>>, vector<14x97xf32>
    %565 = vector.broadcast %427 : f32 to vector<14x97xf32>
    %566 = arith.mulf %565, %564 : vector<14x97xf32>
    %567 = arith.addf %563, %566 : vector<14x97xf32>
    %c12_482 = arith.constant 12 : index
    %c16_483 = arith.constant 16 : index
    %568 = vector.load %arg11[%c12_482, %c16_483] : memref<58x117xf32, #tpu.memory_space<vmem>>, vector<14x97xf32>
    %569 = vector.broadcast %428 : f32 to vector<14x97xf32>
    %570 = arith.mulf %569, %568 : vector<14x97xf32>
    %571 = arith.addf %567, %570 : vector<14x97xf32>
    %c12_484 = arith.constant 12 : index
    %c20_485 = arith.constant 20 : index
    %572 = vector.load %arg11[%c12_484, %c20_485] : memref<58x117xf32, #tpu.memory_space<vmem>>, vector<14x97xf32>
    %573 = vector.broadcast %429 : f32 to vector<14x97xf32>
    %574 = arith.mulf %573, %572 : vector<14x97xf32>
    %575 = arith.addf %571, %574 : vector<14x97xf32>
    %c16_486 = arith.constant 16 : index
    %c0_487 = arith.constant 0 : index
    %576 = vector.load %arg11[%c16_486, %c0_487] : memref<58x117xf32, #tpu.memory_space<vmem>>, vector<14x97xf32>
    %577 = vector.broadcast %430 : f32 to vector<14x97xf32>
    %578 = arith.mulf %577, %576 : vector<14x97xf32>
    %579 = arith.addf %575, %578 : vector<14x97xf32>
    %c16_488 = arith.constant 16 : index
    %c4_489 = arith.constant 4 : index
    %580 = vector.load %arg11[%c16_488, %c4_489] : memref<58x117xf32, #tpu.memory_space<vmem>>, vector<14x97xf32>
    %581 = vector.broadcast %431 : f32 to vector<14x97xf32>
    %582 = arith.mulf %581, %580 : vector<14x97xf32>
    %583 = arith.addf %579, %582 : vector<14x97xf32>
    %c16_490 = arith.constant 16 : index
    %c8_491 = arith.constant 8 : index
    %584 = vector.load %arg11[%c16_490, %c8_491] : memref<58x117xf32, #tpu.memory_space<vmem>>, vector<14x97xf32>
    %585 = vector.broadcast %432 : f32 to vector<14x97xf32>
    %586 = arith.mulf %585, %584 : vector<14x97xf32>
    %587 = arith.addf %583, %586 : vector<14x97xf32>
    %c16_492 = arith.constant 16 : index
    %c12_493 = arith.constant 12 : index
    %588 = vector.load %arg11[%c16_492, %c12_493] : memref<58x117xf32, #tpu.memory_space<vmem>>, vector<14x97xf32>
    %589 = vector.broadcast %433 : f32 to vector<14x97xf32>
    %590 = arith.mulf %589, %588 : vector<14x97xf32>
    %591 = arith.addf %587, %590 : vector<14x97xf32>
    %c16_494 = arith.constant 16 : index
    %c16_495 = arith.constant 16 : index
    %592 = vector.load %arg11[%c16_494, %c16_495] : memref<58x117xf32, #tpu.memory_space<vmem>>, vector<14x97xf32>
    %593 = vector.broadcast %434 : f32 to vector<14x97xf32>
    %594 = arith.mulf %593, %592 : vector<14x97xf32>
    %595 = arith.addf %591, %594 : vector<14x97xf32>
    %c16_496 = arith.constant 16 : index
    %c20_497 = arith.constant 20 : index
    %596 = vector.load %arg11[%c16_496, %c20_497] : memref<58x117xf32, #tpu.memory_space<vmem>>, vector<14x97xf32>
    %597 = vector.broadcast %435 : f32 to vector<14x97xf32>
    %598 = arith.mulf %597, %596 : vector<14x97xf32>
    %599 = arith.addf %595, %598 : vector<14x97xf32>
    %c20_498 = arith.constant 20 : index
    %c0_499 = arith.constant 0 : index
    %600 = vector.load %arg11[%c20_498, %c0_499] : memref<58x117xf32, #tpu.memory_space<vmem>>, vector<14x97xf32>
    %601 = vector.broadcast %436 : f32 to vector<14x97xf32>
    %602 = arith.mulf %601, %600 : vector<14x97xf32>
    %603 = arith.addf %599, %602 : vector<14x97xf32>
    %c20_500 = arith.constant 20 : index
    %c4_501 = arith.constant 4 : index
    %604 = vector.load %arg11[%c20_500, %c4_501] : memref<58x117xf32, #tpu.memory_space<vmem>>, vector<14x97xf32>
    %605 = vector.broadcast %437 : f32 to vector<14x97xf32>
    %606 = arith.mulf %605, %604 : vector<14x97xf32>
    %607 = arith.addf %603, %606 : vector<14x97xf32>
    %c20_502 = arith.constant 20 : index
    %c8_503 = arith.constant 8 : index
    %608 = vector.load %arg11[%c20_502, %c8_503] : memref<58x117xf32, #tpu.memory_space<vmem>>, vector<14x97xf32>
    %609 = vector.broadcast %438 : f32 to vector<14x97xf32>
    %610 = arith.mulf %609, %608 : vector<14x97xf32>
    %611 = arith.addf %607, %610 : vector<14x97xf32>
    %c20_504 = arith.constant 20 : index
    %c12_505 = arith.constant 12 : index
    %612 = vector.load %arg11[%c20_504, %c12_505] : memref<58x117xf32, #tpu.memory_space<vmem>>, vector<14x97xf32>
    %613 = vector.broadcast %439 : f32 to vector<14x97xf32>
    %614 = arith.mulf %613, %612 : vector<14x97xf32>
    %615 = arith.addf %611, %614 : vector<14x97xf32>
    %c20_506 = arith.constant 20 : index
    %c16_507 = arith.constant 16 : index
    %616 = vector.load %arg11[%c20_506, %c16_507] : memref<58x117xf32, #tpu.memory_space<vmem>>, vector<14x97xf32>
    %617 = vector.broadcast %440 : f32 to vector<14x97xf32>
    %618 = arith.mulf %617, %616 : vector<14x97xf32>
    %619 = arith.addf %615, %618 : vector<14x97xf32>
    %c20_508 = arith.constant 20 : index
    %c20_509 = arith.constant 20 : index
    %620 = vector.load %arg11[%c20_508, %c20_509] : memref<58x117xf32, #tpu.memory_space<vmem>>, vector<14x97xf32>
    %621 = vector.broadcast %441 : f32 to vector<14x97xf32>
    %622 = arith.mulf %621, %620 : vector<14x97xf32>
    %623 = arith.addf %619, %622 : vector<14x97xf32>
    %c24 = arith.constant 24 : index
    %c0_510 = arith.constant 0 : index
    %624 = vector.load %arg11[%c24, %c0_510] : memref<58x117xf32, #tpu.memory_space<vmem>>, vector<14x97xf32>
    %625 = vector.broadcast %442 : f32 to vector<14x97xf32>
    %626 = arith.mulf %625, %624 : vector<14x97xf32>
    %627 = arith.addf %623, %626 : vector<14x97xf32>
    %c24_511 = arith.constant 24 : index
    %c4_512 = arith.constant 4 : index
    %628 = vector.load %arg11[%c24_511, %c4_512] : memref<58x117xf32, #tpu.memory_space<vmem>>, vector<14x97xf32>
    %629 = vector.broadcast %443 : f32 to vector<14x97xf32>
    %630 = arith.mulf %629, %628 : vector<14x97xf32>
    %631 = arith.addf %627, %630 : vector<14x97xf32>
    %c24_513 = arith.constant 24 : index
    %c8_514 = arith.constant 8 : index
    %632 = vector.load %arg11[%c24_513, %c8_514] : memref<58x117xf32, #tpu.memory_space<vmem>>, vector<14x97xf32>
    %633 = vector.broadcast %444 : f32 to vector<14x97xf32>
    %634 = arith.mulf %633, %632 : vector<14x97xf32>
    %635 = arith.addf %631, %634 : vector<14x97xf32>
    %c24_515 = arith.constant 24 : index
    %c12_516 = arith.constant 12 : index
    %636 = vector.load %arg11[%c24_515, %c12_516] : memref<58x117xf32, #tpu.memory_space<vmem>>, vector<14x97xf32>
    %637 = vector.broadcast %445 : f32 to vector<14x97xf32>
    %638 = arith.mulf %637, %636 : vector<14x97xf32>
    %639 = arith.addf %635, %638 : vector<14x97xf32>
    %c24_517 = arith.constant 24 : index
    %c16_518 = arith.constant 16 : index
    %640 = vector.load %arg11[%c24_517, %c16_518] : memref<58x117xf32, #tpu.memory_space<vmem>>, vector<14x97xf32>
    %641 = vector.broadcast %446 : f32 to vector<14x97xf32>
    %642 = arith.mulf %641, %640 : vector<14x97xf32>
    %643 = arith.addf %639, %642 : vector<14x97xf32>
    %c24_519 = arith.constant 24 : index
    %c20_520 = arith.constant 20 : index
    %644 = vector.load %arg11[%c24_519, %c20_520] : memref<58x117xf32, #tpu.memory_space<vmem>>, vector<14x97xf32>
    %645 = vector.broadcast %447 : f32 to vector<14x97xf32>
    %646 = arith.mulf %645, %644 : vector<14x97xf32>
    %647 = arith.addf %643, %646 : vector<14x97xf32>
    %c28 = arith.constant 28 : index
    %c0_521 = arith.constant 0 : index
    %648 = vector.load %arg11[%c28, %c0_521] : memref<58x117xf32, #tpu.memory_space<vmem>>, vector<14x97xf32>
    %649 = vector.broadcast %448 : f32 to vector<14x97xf32>
    %650 = arith.mulf %649, %648 : vector<14x97xf32>
    %651 = arith.addf %647, %650 : vector<14x97xf32>
    %c28_522 = arith.constant 28 : index
    %c4_523 = arith.constant 4 : index
    %652 = vector.load %arg11[%c28_522, %c4_523] : memref<58x117xf32, #tpu.memory_space<vmem>>, vector<14x97xf32>
    %653 = vector.broadcast %449 : f32 to vector<14x97xf32>
    %654 = arith.mulf %653, %652 : vector<14x97xf32>
    %655 = arith.addf %651, %654 : vector<14x97xf32>
    %c28_524 = arith.constant 28 : index
    %c8_525 = arith.constant 8 : index
    %656 = vector.load %arg11[%c28_524, %c8_525] : memref<58x117xf32, #tpu.memory_space<vmem>>, vector<14x97xf32>
    %657 = vector.broadcast %450 : f32 to vector<14x97xf32>
    %658 = arith.mulf %657, %656 : vector<14x97xf32>
    %659 = arith.addf %655, %658 : vector<14x97xf32>
    %c28_526 = arith.constant 28 : index
    %c12_527 = arith.constant 12 : index
    %660 = vector.load %arg11[%c28_526, %c12_527] : memref<58x117xf32, #tpu.memory_space<vmem>>, vector<14x97xf32>
    %661 = vector.broadcast %451 : f32 to vector<14x97xf32>
    %662 = arith.mulf %661, %660 : vector<14x97xf32>
    %663 = arith.addf %659, %662 : vector<14x97xf32>
    %c28_528 = arith.constant 28 : index
    %c16_529 = arith.constant 16 : index
    %664 = vector.load %arg11[%c28_528, %c16_529] : memref<58x117xf32, #tpu.memory_space<vmem>>, vector<14x97xf32>
    %665 = vector.broadcast %452 : f32 to vector<14x97xf32>
    %666 = arith.mulf %665, %664 : vector<14x97xf32>
    %667 = arith.addf %663, %666 : vector<14x97xf32>
    %c28_530 = arith.constant 28 : index
    %c20_531 = arith.constant 20 : index
    %668 = vector.load %arg11[%c28_530, %c20_531] : memref<58x117xf32, #tpu.memory_space<vmem>>, vector<14x97xf32>
    %669 = vector.broadcast %453 : f32 to vector<14x97xf32>
    %670 = arith.mulf %669, %668 : vector<14x97xf32>
    %671 = arith.addf %667, %670 : vector<14x97xf32>
    %c32 = arith.constant 32 : index
    %c0_532 = arith.constant 0 : index
    %672 = vector.load %arg11[%c32, %c0_532] : memref<58x117xf32, #tpu.memory_space<vmem>>, vector<14x97xf32>
    %673 = vector.broadcast %454 : f32 to vector<14x97xf32>
    %674 = arith.mulf %673, %672 : vector<14x97xf32>
    %675 = arith.addf %671, %674 : vector<14x97xf32>
    %c32_533 = arith.constant 32 : index
    %c4_534 = arith.constant 4 : index
    %676 = vector.load %arg11[%c32_533, %c4_534] : memref<58x117xf32, #tpu.memory_space<vmem>>, vector<14x97xf32>
    %677 = vector.broadcast %455 : f32 to vector<14x97xf32>
    %678 = arith.mulf %677, %676 : vector<14x97xf32>
    %679 = arith.addf %675, %678 : vector<14x97xf32>
    %c32_535 = arith.constant 32 : index
    %c8_536 = arith.constant 8 : index
    %680 = vector.load %arg11[%c32_535, %c8_536] : memref<58x117xf32, #tpu.memory_space<vmem>>, vector<14x97xf32>
    %681 = vector.broadcast %456 : f32 to vector<14x97xf32>
    %682 = arith.mulf %681, %680 : vector<14x97xf32>
    %683 = arith.addf %679, %682 : vector<14x97xf32>
    %c32_537 = arith.constant 32 : index
    %c12_538 = arith.constant 12 : index
    %684 = vector.load %arg11[%c32_537, %c12_538] : memref<58x117xf32, #tpu.memory_space<vmem>>, vector<14x97xf32>
    %685 = vector.broadcast %457 : f32 to vector<14x97xf32>
    %686 = arith.mulf %685, %684 : vector<14x97xf32>
    %687 = arith.addf %683, %686 : vector<14x97xf32>
    %c32_539 = arith.constant 32 : index
    %c16_540 = arith.constant 16 : index
    %688 = vector.load %arg11[%c32_539, %c16_540] : memref<58x117xf32, #tpu.memory_space<vmem>>, vector<14x97xf32>
    %689 = vector.broadcast %458 : f32 to vector<14x97xf32>
    %690 = arith.mulf %689, %688 : vector<14x97xf32>
    %691 = arith.addf %687, %690 : vector<14x97xf32>
    %c32_541 = arith.constant 32 : index
    %c20_542 = arith.constant 20 : index
    %692 = vector.load %arg11[%c32_541, %c20_542] : memref<58x117xf32, #tpu.memory_space<vmem>>, vector<14x97xf32>
    %693 = vector.broadcast %459 : f32 to vector<14x97xf32>
    %694 = arith.mulf %693, %692 : vector<14x97xf32>
    %695 = arith.addf %691, %694 : vector<14x97xf32>
    %c36 = arith.constant 36 : index
    %c0_543 = arith.constant 0 : index
    %696 = vector.load %arg11[%c36, %c0_543] : memref<58x117xf32, #tpu.memory_space<vmem>>, vector<14x97xf32>
    %697 = vector.broadcast %460 : f32 to vector<14x97xf32>
    %698 = arith.mulf %697, %696 : vector<14x97xf32>
    %699 = arith.addf %695, %698 : vector<14x97xf32>
    %c36_544 = arith.constant 36 : index
    %c4_545 = arith.constant 4 : index
    %700 = vector.load %arg11[%c36_544, %c4_545] : memref<58x117xf32, #tpu.memory_space<vmem>>, vector<14x97xf32>
    %701 = vector.broadcast %461 : f32 to vector<14x97xf32>
    %702 = arith.mulf %701, %700 : vector<14x97xf32>
    %703 = arith.addf %699, %702 : vector<14x97xf32>
    %c36_546 = arith.constant 36 : index
    %c8_547 = arith.constant 8 : index
    %704 = vector.load %arg11[%c36_546, %c8_547] : memref<58x117xf32, #tpu.memory_space<vmem>>, vector<14x97xf32>
    %705 = vector.broadcast %462 : f32 to vector<14x97xf32>
    %706 = arith.mulf %705, %704 : vector<14x97xf32>
    %707 = arith.addf %703, %706 : vector<14x97xf32>
    %c36_548 = arith.constant 36 : index
    %c12_549 = arith.constant 12 : index
    %708 = vector.load %arg11[%c36_548, %c12_549] : memref<58x117xf32, #tpu.memory_space<vmem>>, vector<14x97xf32>
    %709 = vector.broadcast %463 : f32 to vector<14x97xf32>
    %710 = arith.mulf %709, %708 : vector<14x97xf32>
    %711 = arith.addf %707, %710 : vector<14x97xf32>
    %c36_550 = arith.constant 36 : index
    %c16_551 = arith.constant 16 : index
    %712 = vector.load %arg11[%c36_550, %c16_551] : memref<58x117xf32, #tpu.memory_space<vmem>>, vector<14x97xf32>
    %713 = vector.broadcast %464 : f32 to vector<14x97xf32>
    %714 = arith.mulf %713, %712 : vector<14x97xf32>
    %715 = arith.addf %711, %714 : vector<14x97xf32>
    %c36_552 = arith.constant 36 : index
    %c20_553 = arith.constant 20 : index
    %716 = vector.load %arg11[%c36_552, %c20_553] : memref<58x117xf32, #tpu.memory_space<vmem>>, vector<14x97xf32>
    %717 = vector.broadcast %465 : f32 to vector<14x97xf32>
    %718 = arith.mulf %717, %716 : vector<14x97xf32>
    %719 = arith.addf %715, %718 : vector<14x97xf32>
    %c40 = arith.constant 40 : index
    %c0_554 = arith.constant 0 : index
    %720 = vector.load %arg11[%c40, %c0_554] : memref<58x117xf32, #tpu.memory_space<vmem>>, vector<14x97xf32>
    %721 = vector.broadcast %466 : f32 to vector<14x97xf32>
    %722 = arith.mulf %721, %720 : vector<14x97xf32>
    %723 = arith.addf %719, %722 : vector<14x97xf32>
    %c40_555 = arith.constant 40 : index
    %c4_556 = arith.constant 4 : index
    %724 = vector.load %arg11[%c40_555, %c4_556] : memref<58x117xf32, #tpu.memory_space<vmem>>, vector<14x97xf32>
    %725 = vector.broadcast %467 : f32 to vector<14x97xf32>
    %726 = arith.mulf %725, %724 : vector<14x97xf32>
    %727 = arith.addf %723, %726 : vector<14x97xf32>
    %c40_557 = arith.constant 40 : index
    %c8_558 = arith.constant 8 : index
    %728 = vector.load %arg11[%c40_557, %c8_558] : memref<58x117xf32, #tpu.memory_space<vmem>>, vector<14x97xf32>
    %729 = vector.broadcast %468 : f32 to vector<14x97xf32>
    %730 = arith.mulf %729, %728 : vector<14x97xf32>
    %731 = arith.addf %727, %730 : vector<14x97xf32>
    %c40_559 = arith.constant 40 : index
    %c12_560 = arith.constant 12 : index
    %732 = vector.load %arg11[%c40_559, %c12_560] : memref<58x117xf32, #tpu.memory_space<vmem>>, vector<14x97xf32>
    %733 = vector.broadcast %469 : f32 to vector<14x97xf32>
    %734 = arith.mulf %733, %732 : vector<14x97xf32>
    %735 = arith.addf %731, %734 : vector<14x97xf32>
    %c40_561 = arith.constant 40 : index
    %c16_562 = arith.constant 16 : index
    %736 = vector.load %arg11[%c40_561, %c16_562] : memref<58x117xf32, #tpu.memory_space<vmem>>, vector<14x97xf32>
    %737 = vector.broadcast %470 : f32 to vector<14x97xf32>
    %738 = arith.mulf %737, %736 : vector<14x97xf32>
    %739 = arith.addf %735, %738 : vector<14x97xf32>
    %c40_563 = arith.constant 40 : index
    %c20_564 = arith.constant 20 : index
    %740 = vector.load %arg11[%c40_563, %c20_564] : memref<58x117xf32, #tpu.memory_space<vmem>>, vector<14x97xf32>
    %741 = vector.broadcast %471 : f32 to vector<14x97xf32>
    %742 = arith.mulf %741, %740 : vector<14x97xf32>
    %743 = arith.addf %739, %742 : vector<14x97xf32>
    %c44 = arith.constant 44 : index
    %c0_565 = arith.constant 0 : index
    %744 = vector.load %arg11[%c44, %c0_565] : memref<58x117xf32, #tpu.memory_space<vmem>>, vector<14x97xf32>
    %745 = vector.broadcast %472 : f32 to vector<14x97xf32>
    %746 = arith.mulf %745, %744 : vector<14x97xf32>
    %747 = arith.addf %743, %746 : vector<14x97xf32>
    %c44_566 = arith.constant 44 : index
    %c4_567 = arith.constant 4 : index
    %748 = vector.load %arg11[%c44_566, %c4_567] : memref<58x117xf32, #tpu.memory_space<vmem>>, vector<14x97xf32>
    %749 = vector.broadcast %473 : f32 to vector<14x97xf32>
    %750 = arith.mulf %749, %748 : vector<14x97xf32>
    %751 = arith.addf %747, %750 : vector<14x97xf32>
    %c44_568 = arith.constant 44 : index
    %c8_569 = arith.constant 8 : index
    %752 = vector.load %arg11[%c44_568, %c8_569] : memref<58x117xf32, #tpu.memory_space<vmem>>, vector<14x97xf32>
    %753 = vector.broadcast %474 : f32 to vector<14x97xf32>
    %754 = arith.mulf %753, %752 : vector<14x97xf32>
    %755 = arith.addf %751, %754 : vector<14x97xf32>
    %c44_570 = arith.constant 44 : index
    %c12_571 = arith.constant 12 : index
    %756 = vector.load %arg11[%c44_570, %c12_571] : memref<58x117xf32, #tpu.memory_space<vmem>>, vector<14x97xf32>
    %757 = vector.broadcast %475 : f32 to vector<14x97xf32>
    %758 = arith.mulf %757, %756 : vector<14x97xf32>
    %759 = arith.addf %755, %758 : vector<14x97xf32>
    %c44_572 = arith.constant 44 : index
    %c16_573 = arith.constant 16 : index
    %760 = vector.load %arg11[%c44_572, %c16_573] : memref<58x117xf32, #tpu.memory_space<vmem>>, vector<14x97xf32>
    %761 = vector.broadcast %476 : f32 to vector<14x97xf32>
    %762 = arith.mulf %761, %760 : vector<14x97xf32>
    %763 = arith.addf %759, %762 : vector<14x97xf32>
    %c44_574 = arith.constant 44 : index
    %c20_575 = arith.constant 20 : index
    %764 = vector.load %arg11[%c44_574, %c20_575] : memref<58x117xf32, #tpu.memory_space<vmem>>, vector<14x97xf32>
    %765 = vector.broadcast %477 : f32 to vector<14x97xf32>
    %766 = arith.mulf %765, %764 : vector<14x97xf32>
    %767 = arith.addf %763, %766 : vector<14x97xf32>
    %c0_576 = arith.constant 0 : index
    %c0_577 = arith.constant 0 : index
    %768 = vector.load %arg12[%c0_576, %c0_577] : memref<14x97xf32, #tpu.memory_space<vmem>>, vector<14x97xf32>
    tpu.vector_store %arg12[%c0_576, %c0_577], %767 {strides = array<i32>} : memref<14x97xf32, #tpu.memory_space<vmem>>, vector<14x97xf32>,
    %c0_578 = arith.constant 0 : index
    %c0_579 = arith.constant 0 : index
    %769 = vector.load %arg12[%c0_578, %c0_579] : memref<14x97xf32, #tpu.memory_space<vmem>>, vector<10x93xf32>
    %c4_580 = arith.constant 4 : index
    %c0_581 = arith.constant 0 : index
    %770 = vector.load %arg12[%c4_580, %c0_581] : memref<14x97xf32, #tpu.memory_space<vmem>>, vector<10x93xf32>
    %c0_582 = arith.constant 0 : index
    %c4_583 = arith.constant 4 : index
    %771 = vector.load %arg12[%c0_582, %c4_583] : memref<14x97xf32, #tpu.memory_space<vmem>>, vector<10x93xf32>
    %c4_584 = arith.constant 4 : index
    %c4_585 = arith.constant 4 : index
    %772 = vector.load %arg12[%c4_584, %c4_585] : memref<14x97xf32, #tpu.memory_space<vmem>>, vector<10x93xf32>
    %773 = arith.addf %769, %770 : vector<10x93xf32>
    %774 = arith.addf %771, %772 : vector<10x93xf32>
    %775 = arith.addf %773, %774 : vector<10x93xf32>
    %cst_586 = arith.constant 2.500000e-01 : f32
    %776 = vector.broadcast %cst_586 : f32 to vector<10x93xf32>
    %777 = arith.mulf %775, %776 : vector<10x93xf32>
    %c0_587 = arith.constant 0 : index
    %c0_588 = arith.constant 0 : index
    %778 = vector.load %arg7[%c0_587, %c0_588] : memref<10x93xf32, #tpu.memory_space<vmem>>, vector<10x93xf32>
    tpu.vector_store %arg7[%c0_587, %c0_588], %777 {strides = array<i32>} : memref<10x93xf32, #tpu.memory_space<vmem>>, vector<10x93xf32>,
    return
  }
}

</mosaic_0001>

<bundles_post_ra>
// kernel: cnn_forward.1
= control target key start
LH: loop header
LB: loop body
LE: loop exit
PB: predicated region body
PF: predicated region fallthrough
CT: control target
= control target key end

     0   :  { %15 = vsyncpa [#allocation11], 0  ;;  %s8099_s0 = inlined_call_operand.vmem [shape: f32[88,128], index: 0, kind: input, shape index: {}]   ;;  %s8100_s1 = inlined_call_operand.vmem [shape: f32[10,3], index: 1, kind: input, shape index: {}]   ;;  %s8101_s2 = inlined_call_operand.<no memory space> [shape: f32[1], index: 2, kind: input, shape index: {}]   ;;  %s8102_s3 = inlined_call_operand.vmem [shape: f32[10,4], index: 3, kind: input, shape index: {}]   ;;  %s8103_s4 = inlined_call_operand.<no memory space> [shape: f32[1], index: 4, kind: input, shape index: {}]   ;;  %s8104_s5 = inlined_call_operand.vmem [shape: f32[12,6], index: 5, kind: input, shape index: {}]   ;;  %s8105_s6 = inlined_call_operand.<no memory space> [shape: f32[1], index: 6, kind: input, shape index: {}]   ;;  %s8106_s7 = inlined_call_operand.vmem [shape: f32[10,93], index: 7, kind: output, shape index: {}]  }
   0x1   :  { %16 = vsyncpa [#allocation13], 0  ;;  %s36_s26 = sshll.u32 %s8102_s3, 4  ;;  %s23_s29 = sshll.u32 %s8100_s1, 4  ;;  %s37_s26 = int_to_ptr.vmem [resolvable:$true] %s36_s26  ;;  %s24_s29 = int_to_ptr.vmem [resolvable:$true] %s23_s29 }
   0x2   :  { %s4883_s30 = smov [#allocation12]   ;;  %s4884_s8 = smov 128  }
   0x3   :  { %s4885_s9 = smov 8   ;;  %s4886_s10 = smov [#allocation10]  }
   0x4   :  { %42 = dma.vmem_to_smem %s37_s26, 256, %s4883_s30, [#allocation13], %s4884_s8, %s4884_s8, %s4885_s9  }
   0x5   :  { %29 = dma.vmem_to_smem %s24_s29, 256, %s4886_s10, [#allocation11], %s4884_s8, %s4884_s8, %s4885_s9  }
   0x6   :  { %s49_s13 = sshll.u32 %s8104_s5, 4  ;;  %s4887_s14 = smov [#allocation14]   ;;  %s50_s13 = int_to_ptr.vmem [resolvable:$true] %s49_s13 }
   0x7   :  { %55 = dma.vmem_to_smem %s50_s13, 256, %s4887_s14, [#allocation13], %s4884_s8, %s4884_s8, %s4885_s9  }
   0x8   :  { %4879 = dma.done.wait [#allocation11], 256  }
   0x9   :  { %4880 = vsyncadd [#allocation11], 4294967040 }
   0xa   :  { %4881 = dma.done.wait [#allocation13], 512  }
   0xb   :  { %4882 = vsyncadd [#allocation13], 4294966784 }
   0xc   :  { %70 = sfence }
   0xd   :  { %s4635_s1 = sld [smem:[#allocation10 + $0x1]]  ;;  %v4949_v0 = vld [vmem:[%s8099_s0 + $0x10] sm:$0xff]  ;;  %v103_v1 = vld [vmem:[%s8099_s0] sm:$0xff]  ;;  %s4888_s19 = smov 127   ;;  %v4967_v7 = vld [vmem:[%s8099_s0 + $0x18] sm:$0xff]  ;;  %vm1625_vm0 = vcmask 1031168  }
   0xe   :  { %v4957_v2 = vld [vmem:[%s8099_s0 + $0x20] sm:$0xff]  ;;  %v104_v8 = vld [vmem:[%s8099_s0 + $0x8] sm:$0xff]  ;;  %v110_v13 = vld [vmem:[%s8099_s0 + $0x38] sm:$0xff]  ;;  %s4636_s30 = sld [smem:[#allocation10 + $0x2]]  ;;  %s4889_s12 = smov 126   ;;  %vm1793_vm1 = vcmask 1022976  }
   0xf   :  { %v4975_v9 = vld [vmem:[%s8099_s0 + $0x28] sm:$0xff]  ;;  %v109_v14 = vld [vmem:[%s8099_s0 + $0x30] sm:$0xff]  ;;  %v4991_v15 = vld [vmem:[%s8099_s0 + $0x40] sm:$0xff]  ;;  %s4638_s13 = sld [smem:[#allocation10 + $0x81]]  ;;  %s4892_s15 = smov 122   ;;  %vm1803_vm11 = vcmask 1020928  }
  0x10   :  { %v112_v20 = vld [vmem:[%s8099_s0 + $0x48] sm:$0x7f]  ;;  %v5023_v35 = vld [vmem:[%s8099_s0 + $0x11] sm:$0xff]  ;;  %v5031_v37 = vld [vmem:[%s8099_s0 + $0x19] sm:$0xff]  ;;  %s4641_s10 = sld [smem:[#allocation10 + $0x101]]  ;;  %vm3531_vm12 = vcmask 973824  }
  0x11   :  { %v256_v30 = vld [vmem:[%s8099_s0 + $0x1] sm:$0xff]  ;;  %v257_v36 = vld [vmem:[%s8099_s0 + $0x9] sm:$0xff]  ;;  %8117 = vst [vmem:[#allocation17_spill] sm:$0xff] %v5031_v37  ;;  %v5051_v43 = vld [vmem:[%s8099_s0 + $0x31] sm:$0xff]  ;;  %s4642_s26 = sld [smem:[#allocation10 + $0x102]]  ;;  %vm3655_vm13 = vcmask 957440  }
  0x12   :  { %v5041_v41 = vld [vmem:[%s8099_s0 + $0x29] sm:$0xff]  ;;  %v5046_v42 = vld [vmem:[%s8099_s0 + $0x21] sm:$0xff]  ;;  %8118 = vst [vmem:[#allocation18_spill] sm:$0xff] %v5051_v43  ;;  %v263_v48 = vld [vmem:[%s8099_s0 + $0x39] sm:$0xff]  ;;  %s4644_s8 = sld [smem:[#allocation10 + $0x181]] }
  0x13   :  { %v134_v3 = vstv %s4635_s1  ;;  %v5062_v47 = vld [vmem:[%s8099_s0 + $0x41] sm:$0xff]  ;;  %v265_v49 = vld [vmem:[%s8099_s0 + $0x49] sm:$0x7f]  ;;  %s4645_s24 = sld [smem:[#allocation10 + $0x182]] }
  0x14   :  { %v137_v4 = vmul.f32 %v134_v3, %v4949_v0  ;;  %v135_v5 = vmul.f32 %v134_v3, %v103_v1  ;;  %v139_v6 = vmul.f32 %v134_v3, %v4957_v2  ;;  %v138_v10 = vmul.f32 %v134_v3, %v4967_v7  ;;  %s4647_s29 = sld [smem:[#allocation10 + $0x201]] }
  0x15   :  { %v136_v11 = vmul.f32 %v134_v3, %v104_v8  ;;  %v140_v12 = vmul.f32 %v134_v3, %v4975_v9  ;;  %v142_v16 = vmul.f32 %v134_v3, %v110_v13  ;;  %v141_v17 = vmul.f32 %v134_v3, %v109_v14  ;;  %s71_s27 = sld [smem:[#allocation10]] }
  0x16   :  { %159 = vrot.lane.b32.xlu1 %v137_v4, %s4888_s19  ;;  %155 = vrot.lane.b32.xlu0 %v135_v5, %s4888_s19  ;;  %v143_v18 = vmul.f32 %v134_v3, %v4991_v15  ;;  %v195_v19 = vstv %s4636_s30  ;;  %v144_v22 = vmul.f32 %v134_v3, %v112_v20  ;;  %v287_v31 = vstv %s4638_s13  ;;  %s4639_s30 = sld [smem:[#allocation10 + $0x82]] }
  0x17   :  { %163 = vrot.lane.b32.xlu2 %v139_v6, %s4888_s19  ;;  %v196_v21 = vmul.f32 %v195_v19, %v103_v1  ;;  %v197_v23 = vmul.f32 %v195_v19, %v104_v8  ;;  %v199_v24 = vmul.f32 %v195_v19, %v4967_v7  ;;  %v198_v25 = vmul.f32 %v195_v19, %v4949_v0  ;;  %v409_v1 = vld [vmem:[%s8099_s0 + $0x2] sm:$0xff]  ;;  %v410_v4 = vld [vmem:[%s8099_s0 + $0xa] sm:$0xff]  ;;  %s4637_s28 = sld [smem:[#allocation10 + $0x80]] }
  0x18   :  { %v200_v26 = vmul.f32 %v195_v19, %v4957_v2  ;;  %v202_v27 = vmul.f32 %v195_v19, %v109_v14  ;;  %v201_v28 = vmul.f32 %v195_v19, %v4975_v9  ;;  %v203_v29 = vmul.f32 %v195_v19, %v110_v13  ;;  %v5115_v13 = vld [vmem:[%s8099_s0 + $0x22] sm:$0xff]  ;;  %s4643_s18 = sld [smem:[#allocation10 + $0x180]] }
  0x19   :  { %v205_v32 = vmul.f32 %v195_v19, %v112_v20  ;;  %v204_v33 = vmul.f32 %v195_v19, %v4991_v15  ;;  %v288_v34 = vmul.f32 %v287_v31, %v256_v30  ;;  %v290_v38 = vmul.f32 %v287_v31, %v5023_v35  ;;  %v5128_v19 = vld [vmem:[%s8099_s0 + $0x32] sm:$0xff]  ;;  %v5133_v20 = vld [vmem:[%s8099_s0 + $0x2a] sm:$0xff]  ;;  %s4646_s23 = sld [smem:[#allocation10 + $0x200]] }
  0x1a   :  { %v289_v39 = vmul.f32 %v287_v31, %v257_v36  ;;  %v291_v40 = vmul.f32 %v287_v31, %v5031_v37  ;;  %v293_v44 = vmul.f32 %v287_v31, %v5041_v41  ;;  %v292_v45 = vmul.f32 %v287_v31, %v5046_v42  ;;  %8120 = vst [vmem:[#allocation20_spill] sm:$0xff] %v5128_v19  ;;  %s4649_s1 = sld [smem:[#allocation10 + $0x280]] }
  0x1b   :  { %v294_v46 = vmul.f32 %v287_v31, %v5051_v43  ;;  %v296_v50 = vmul.f32 %v287_v31, %v5062_v47  ;;  %v295_v51 = vmul.f32 %v287_v31, %v263_v48  ;;  %v297_v52 = vmul.f32 %v287_v31, %v265_v49  ;;  %s4659_s14 = sld [smem:[#allocation10 + $0x401]] }
  0x1c   :  { %v348_v53 = vstv %s4639_s30  ;;  %v440_v3 = vstv %s4641_s10  ;;  %s4640_s10 = sld [smem:[#allocation10 + $0x100]] }
  0x1d   :  { %v350_v54 = vmul.f32 %v348_v53, %v257_v36  ;;  %v349_v55 = vmul.f32 %v348_v53, %v256_v30  ;;  %v351_v56 = vmul.f32 %v348_v53, %v5023_v35  ;;  %v353_v57 = vmul.f32 %v348_v53, %v5046_v42  ;;  %s4655_s17 = sld [smem:[#allocation10 + $0x380]] }
  0x1e   :  { %161 = vrot.lane.b32.xlu1 %v138_v10, %s4888_s19  ;;  %157 = vrot.lane.b32.xlu0 %v136_v11, %s4888_s19  ;;  %v352_v58 = vmul.f32 %v348_v53, %v5031_v37  ;;  %v354_v59 = vmul.f32 %v348_v53, %v5041_v41  ;;  %v356_v61 = vmul.f32 %v348_v53, %v263_v48  ;;  %v5105_v11 = vld [vmem:[%s8099_s0 + $0x1a] sm:$0xff]  ;;  %s4662_s9 = sld [smem:[#allocation10 + $0x481]] }
  0x1f   :  { %165 = vrot.lane.b32.xlu2 %v140_v12, %s4888_s19  ;;  %v355_v62 = vmul.f32 %v348_v53, %v5051_v43  ;;  %v357_v63 = vmul.f32 %v348_v53, %v5062_v47  ;;  %v441_v6 = vmul.f32 %v440_v3, %v409_v1  ;;  %v358_v8 = vmul.f32 %v348_v53, %v265_v49  ;;  %v5110_v12 = vld [vmem:[%s8099_s0 + $0x12] sm:$0xff]  ;;  %s4663_s25 = sld [smem:[#allocation10 + $0x482]] }
  0x20   :  { %v442_v10 = vmul.f32 %v440_v3, %v410_v4  ;;  %8119 = vst [vmem:[#allocation19_spill] sm:$0xff] %v5105_v11  ;;  %s4658_s30 = sld [smem:[#allocation10 + $0x400]] }
  0x21   :  { %s4666_s3 = sld [smem:[#allocation12 + $0x3]] }
  0x22   :  { %s4668_s16 = sld [smem:[#allocation12 + $0x81]] }
  0x23   :  { %s4672_s5 = sld [smem:[#allocation12 + $0x101]] }
  0x24   :  { %s4673_s20 = sld [smem:[#allocation12 + $0x102]] }
  0x25   :  { %s1805_s21 = sld [smem:[#allocation12]] }
  0x26   :  { %169 = vrot.lane.b32.xlu1 %v142_v16, %s4888_s19  ;;  %167 = vrot.lane.b32.xlu0 %v141_v17, %s4888_s19  ;;  %v444_v16 = vmul.f32 %v440_v3, %v5105_v11  ;;  %v443_v17 = vmul.f32 %v440_v3, %v5110_v12  ;;  %s4674_s22 = sld [smem:[#allocation12 + $0x103]] }
  0x27   :  { %171 = vrot.lane.b32.xlu2 %v143_v18, %s4888_s19  ;;  %v445_v18 = vmul.f32 %v440_v3, %v5115_v13  ;;  %s4679_s11 = sld [smem:[#allocation12 + $0x200]] }
  0x28   :  { %s4686_s13 = sld [smem:[#allocation12 + $0x283]] }
  0x2e   :  { %216 = vrot.lane.b32.xlu1 %v196_v21, %s4889_s12  ;;  %173 = vrot.lane.b32.xlu0 %v144_v22, %s4888_s19 }
  0x2f   :  { %218 = vrot.lane.b32.xlu2 %v197_v23, %s4889_s12  ;;  %v416_v23 = vld [vmem:[%s8099_s0 + $0x3a] sm:$0xff] }
  0x36   :  { %222 = vrot.lane.b32.xlu1 %v199_v24, %s4889_s12  ;;  %220 = vrot.lane.b32.xlu0 %v198_v25, %s4889_s12  ;;  %v447_v25 = vmul.f32 %v440_v3, %v5128_v19 }
  0x37   :  { %224 = vrot.lane.b32.xlu2 %v200_v26, %s4889_s12  ;;  %v446_v26 = vmul.f32 %v440_v3, %v5133_v20 }
  0x3e   :  { %228 = vrot.lane.b32.xlu1 %v202_v27, %s4889_s12  ;;  %226 = vrot.lane.b32.xlu0 %v201_v28, %s4889_s12  ;;  %v448_v27 = vmul.f32 %v440_v3, %v416_v23  ;;  %v418_v28 = vld [vmem:[%s8099_s0 + $0x4a] sm:$0x7f] }
  0x3f   :  { %230 = vrot.lane.b32.xlu2 %v203_v29, %s4889_s12  ;;  %v5151_v29 = vld [vmem:[%s8099_s0 + $0x42] sm:$0xff] }
  0x40   :  { %v449_v36 = vmul.f32 %v440_v3, %v5151_v29 }
  0x46   :  { %234 = vrot.lane.b32.xlu1 %v205_v32, %s4889_s12  ;;  %232 = vrot.lane.b32.xlu0 %v204_v33, %s4889_s12  ;;  %v501_v32 = vstv %s4642_s26  ;;  %s4651_s26 = sld [smem:[#allocation10 + $0x282]] }
  0x47   :  { %308 = vrot.lane.b32.xlu2 %v288_v34, %s4888_s19  ;;  %v450_v34 = vmul.f32 %v440_v3, %v418_v28  ;;  %v505_v48 = vmul.f32 %v501_v32, %v5105_v11  ;;  %v506_v53 = vmul.f32 %v501_v32, %v5115_v13 }
  0x4e   :  { %312 = vrot.lane.b32.xlu1 %v290_v38, %s4888_s19  ;;  %310 = vrot.lane.b32.xlu0 %v289_v39, %s4888_s19  ;;  %v502_v38 = vmul.f32 %v501_v32, %v409_v1  ;;  %v562_v1 = vld [vmem:[%s8099_s0 + $0x3] sm:$0xff] }
  0x4f   :  { %314 = vrot.lane.b32.xlu2 %v291_v40, %s4888_s19 }
  0x56   :  { %318 = vrot.lane.b32.xlu1 %v293_v44, %s4888_s19  ;;  %316 = vrot.lane.b32.xlu0 %v292_v45, %s4888_s19  ;;  %v504_v45 = vmul.f32 %v501_v32, %v5110_v12 }
  0x57   :  { %320 = vrot.lane.b32.xlu2 %v294_v46, %s4888_s19  ;;  %v503_v46 = vmul.f32 %v501_v32, %v410_v4 }
  0x5e   :  { %324 = vrot.lane.b32.xlu1 %v296_v50, %s4888_s19  ;;  %322 = vrot.lane.b32.xlu0 %v295_v51, %s4888_s19 }
  0x5f   :  { %326 = vrot.lane.b32.xlu2 %v297_v52, %s4888_s19  ;;  %v507_v52 = vmul.f32 %v501_v32, %v5133_v20 }
  0x66   :  { %371 = vrot.lane.b32.xlu1 %v350_v54, %s4889_s12  ;;  %369 = vrot.lane.b32.xlu0 %v349_v55, %s4889_s12  ;;  %v508_v54 = vmul.f32 %v501_v32, %v5128_v19 }
  0x67   :  { %373 = vrot.lane.b32.xlu2 %v351_v56, %s4889_s12 }
  0x6e   :  { %377 = vrot.lane.b32.xlu1 %v353_v57, %s4889_s12  ;;  %375 = vrot.lane.b32.xlu0 %v352_v58, %s4889_s12  ;;  %v510_v58 = vmul.f32 %v501_v32, %v5151_v29 }
  0x6f   :  { %379 = vrot.lane.b32.xlu2 %v354_v59, %s4889_s12  ;;  %v509_v59 = vmul.f32 %v501_v32, %v416_v23 }
  0x71   :  { %v5084_v60 = vpop.permute.xlu2 %163 }
  0x76   :  { %383 = vrot.lane.b32.xlu1 %v356_v61, %s4889_s12  ;;  %381 = vrot.lane.b32.xlu0 %v355_v62, %s4889_s12  ;;  %v511_v61 = vmul.f32 %v501_v32, %v418_v28  ;;  %v563_v62 = vld [vmem:[%s8099_s0 + $0xb] sm:$0xff]  ;;  %v569_v32 = vld [vmem:[%s8099_s0 + $0x3b] sm:$0xff] }
  0x77   :  { %385 = vrot.lane.b32.xlu2 %v357_v63, %s4889_s12  ;;  %v593_v63 = vstv %s4644_s8  ;;  %s4653_s8 = sld [smem:[#allocation10 + $0x301]] }
  0x79   :  { %v5097_v5 = vpop.permute.xlu2 %165 }
  0x7e   :  { %461 = vrot.lane.b32.xlu1 %v441_v6, %s4888_s19  ;;  %387 = vrot.lane.b32.xlu0 %v358_v8, %s4889_s12  ;;  %v5201_v6 = vld [vmem:[%s8099_s0 + $0x13] sm:$0xff] }
  0x7f   :  { %463 = vrot.lane.b32.xlu2 %v442_v10, %s4888_s19  ;;  %v595_v10 = vmul.f32 %v593_v63, %v563_v62 }
  0x81   :  { %v5117_v14 = vpop.permute.xlu2 %171 }
  0x86   :  { %467 = vrot.lane.b32.xlu1 %v444_v16, %s4888_s19  ;;  %465 = vrot.lane.b32.xlu0 %v443_v17, %s4888_s19  ;;  %v594_v16 = vmul.f32 %v593_v63, %v562_v1  ;;  %v596_v17 = vmul.f32 %v593_v63, %v5201_v6 }
  0x87   :  { %469 = vrot.lane.b32.xlu2 %v445_v18, %s4888_s19  ;;  %v5212_v18 = vld [vmem:[%s8099_s0 + $0x23] sm:$0xff] }
  0x88   :  { %v5135_v21 = vpop.permute.xlu1 %159  ;;  %v156_v22 = vpop.permute.xlu0 %155 }
  0x89   :  { %v219_v24 = vpop.permute.xlu2 %218  ;;  %v5217_v22 = vld [vmem:[%s8099_s0 + $0x1b] sm:$0xff] }
  0x8a   :  { %8129 = vst [vmem:[#allocation29_spill] sm:$0xff] %v5217_v22  ;;  %v597_v28 = vmul.f32 %v593_v63, %v5217_v22 }
  0x8e   :  { %473 = vrot.lane.b32.xlu1 %v447_v25, %s4888_s19  ;;  %471 = vrot.lane.b32.xlu0 %v446_v26, %s4888_s19  ;;  %v5224_v25 = vld [vmem:[%s8099_s0 + $0x2b] sm:$0xff] }
  0x8f   :  { %475 = vrot.lane.b32.xlu2 %v448_v27, %s4888_s19  ;;  %v598_v27 = vmul.f32 %v593_v63, %v5212_v18 }
  0x90   :  { %v5153_v30 = vpop.permute.xlu1 %161  ;;  %v158_v31 = vpop.permute.xlu0 %157 }
  0x91   :  { %8121 = vst [vmem:[#allocation21_spill] sm:$0xff] %v5153_v30  ;;  %v5155_v33 = vpop.permute.xlu2 %224  ;;  %v599_v31 = vmul.f32 %v593_v63, %v5224_v25 }
  0x96   :  { %479 = vrot.lane.b32.xlu1 %v450_v34, %s4888_s19  ;;  %477 = vrot.lane.b32.xlu0 %v449_v36, %s4888_s19  ;;  %v5238_v34 = vld [vmem:[%s8099_s0 + $0x33] sm:$0xff] }
  0x97   :  { %522 = vrot.lane.b32.xlu2 %v502_v38, %s4889_s12  ;;  %8130 = vst [vmem:[#allocation30_spill] sm:$0xff] %v5238_v34 }
  0x98   :  { %v5161_v39 = vpop.permute.xlu1 %169  ;;  %v5163_v40 = vpop.permute.xlu0 %167 }
  0x99   :  { %8122 = vst [vmem:[#allocation22_spill] sm:$0xff] %v5161_v39  ;;  %v5165_v44 = vpop.permute.xlu2 %230 }
  0x9a   :  { %8123 = vst [vmem:[#allocation23_spill] sm:$0xff] %v5163_v40 }
  0x9b   :  { %8124 = vst [vmem:[#allocation24_spill] sm:$0xff] %v5165_v44 }
  0x9e   :  { %526 = vrot.lane.b32.xlu1 %v504_v45, %s4889_s12  ;;  %524 = vrot.lane.b32.xlu0 %v503_v46, %s4889_s12  ;;  %v5245_v45 = vld [vmem:[%s8099_s0 + $0x43] sm:$0xff] }
  0x9f   :  { %528 = vrot.lane.b32.xlu2 %v505_v48, %s4889_s12  ;;  %v601_v48 = vmul.f32 %v593_v63, %v569_v32 }
  0xa0   :  { %v217_v49 = vpop.permute.xlu1 %216  ;;  %v174_v50 = vpop.permute.xlu0 %173 }
  0xa1   :  { %v309_v51 = vpop.permute.xlu2 %308  ;;  %v600_v49 = vmul.f32 %v593_v63, %v5238_v34  ;;  %v602_v50 = vmul.f32 %v593_v63, %v5245_v45 }
  0xa2   :  { %v654_v51 = vstv %s4645_s24  ;;  %s4648_s24 = sld [smem:[#allocation10 + $0x202]] }
  0xa6   :  { %532 = vrot.lane.b32.xlu1 %v507_v52, %s4889_s12  ;;  %530 = vrot.lane.b32.xlu0 %v506_v53, %s4889_s12  ;;  %v571_v52 = vld [vmem:[%s8099_s0 + $0x4b] sm:$0x7f] }
  0xa7   :  { %534 = vrot.lane.b32.xlu2 %v508_v54, %s4889_s12 }
  0xa8   :  { %v5178_v55 = vpop.permute.xlu1 %222  ;;  %v5180_v56 = vpop.permute.xlu0 %220 }
  0xa9   :  { %8125 = vst [vmem:[#allocation25_spill] sm:$0xff] %v5178_v55  ;;  %v5182_v57 = vpop.permute.xlu2 %314 }
  0xaa   :  { %8126 = vst [vmem:[#allocation26_spill] sm:$0xff] %v5182_v57 }
  0xae   :  { %538 = vrot.lane.b32.xlu1 %v510_v58, %s4889_s12  ;;  %536 = vrot.lane.b32.xlu0 %v509_v59, %s4889_s12  ;;  %v655_v59 = vmul.f32 %v654_v51, %v562_v1  ;;  %v659_v1 = vmul.f32 %v654_v51, %v5212_v18 }
  0xaf   :  { %540 = vrot.lane.b32.xlu2 %v511_v61, %s4889_s12  ;;  %v603_v61 = vmul.f32 %v593_v63, %v571_v52 }
  0xb0   :  { %v5194_v3 = vpop.permute.xlu1 %228  ;;  %v5196_v4 = vpop.permute.xlu0 %226 }
  0xb1   :  { %8127 = vst [vmem:[#allocation27_spill] sm:$0xff] %v5194_v3  ;;  %v5203_v8 = vpop.permute.xlu2 %320 }
  0xb2   :  { %8128 = vst [vmem:[#allocation28_spill] sm:$0xff] %v5203_v8 }
  0xb6   :  { %616 = vrot.lane.b32.xlu1 %v595_v10, %s4888_s19  ;;  %614 = vrot.lane.b32.xlu0 %v594_v16, %s4888_s19  ;;  %v656_v10 = vmul.f32 %v654_v51, %v563_v62 }
  0xb7   :  { %618 = vrot.lane.b32.xlu2 %v596_v17, %s4888_s19 }
  0xb8   :  { %v235_v23 = vpop.permute.xlu1 %234  ;;  %v5219_v24 = vpop.permute.xlu0 %232 }
  0xb9   :  { %v327_v26 = vpop.permute.xlu2 %326 }
  0xba   :  { %v658_v26 = vmul.f32 %v654_v51, %v5217_v22  ;;  %v807_v22 = vstv %s4648_s24  ;;  %s4654_s24 = sld [smem:[#allocation10 + $0x302]] }
  0xbe   :  { %622 = vrot.lane.b32.xlu1 %v598_v27, %s4888_s19  ;;  %620 = vrot.lane.b32.xlu0 %v597_v28, %s4888_s19  ;;  %v657_v27 = vmul.f32 %v654_v51, %v5201_v6 }
  0xbf   :  { %624 = vrot.lane.b32.xlu2 %v599_v31, %s4888_s19  ;;  %v661_v31 = vmul.f32 %v654_v51, %v5238_v34 }
  0xc0   :  { %v5240_v36 = vpop.permute.xlu1 %312  ;;  %v311_v38 = vpop.permute.xlu0 %310 }
  0xc1   :  { %v5247_v46 = vpop.permute.xlu2 %373  ;;  %v660_v38 = vmul.f32 %v654_v51, %v5224_v25 }
  0xc6   :  { %628 = vrot.lane.b32.xlu1 %v601_v48, %s4888_s19  ;;  %626 = vrot.lane.b32.xlu0 %v600_v49, %s4888_s19  ;;  %v662_v48 = vmul.f32 %v654_v51, %v569_v32  ;;  %v663_v32 = vmul.f32 %v654_v51, %v5245_v45 }
  0xc7   :  { %630 = vrot.lane.b32.xlu2 %v602_v50, %s4888_s19 }
  0xc8   :  { %v5257_v53 = vpop.permute.xlu1 %318  ;;  %v5259_v54 = vpop.permute.xlu0 %316 }
  0xc9   :  { %v5261_v58 = vpop.permute.xlu2 %379 }
  0xce   :  { %675 = vrot.lane.b32.xlu1 %v655_v59, %s4889_s12  ;;  %632 = vrot.lane.b32.xlu0 %v603_v61, %s4888_s19  ;;  %v715_v59 = vld [vmem:[%s8099_s0 + $0x4] sm:$0xff]  ;;  %v746_v61 = vstv %s4647_s29  ;;  %s4650_s29 = sld [smem:[#allocation10 + $0x281]] }
  0xcf   :  { %677 = vrot.lane.b32.xlu2 %v656_v10, %s4889_s12  ;;  %v808_v11 = vmul.f32 %v807_v22, %v715_v59 }
  0xd0   :  { %v5266_v16 = vpop.permute.xlu1 %324  ;;  %v5268_v17 = vpop.permute.xlu0 %322 }
  0xd1   :  { %8131 = vst [vmem:[#allocation31_spill] sm:$0xff] %v5268_v17  ;;  %v5270_v23 = vpop.permute.xlu2 %385 }
  0xd6   :  { %681 = vrot.lane.b32.xlu1 %v658_v26, %s4889_s12  ;;  %679 = vrot.lane.b32.xlu0 %v657_v27, %s4889_s12  ;;  %v664_v26 = vmul.f32 %v654_v51, %v571_v52  ;;  %v747_v27 = vmul.f32 %v746_v61, %v715_v59  ;;  %v5311_v51 = vld [vmem:[%s8099_s0 + $0x1c] sm:$0xff]  ;;  %v5377_v59 = vstv %s71_s27  ;;  %s4671_s27 = sld [smem:[#allocation12 + $0x100]] }
  0xd7   :  { %683 = vrot.lane.b32.xlu2 %v659_v1, %s4889_s12  ;;  %v5299_v1 = vld [vmem:[%s8099_s0 + $0x14] sm:$0xff]  ;;  %8135 = vst [vmem:[#allocation35_spill] sm:$0xff] %v5311_v51 }
  0xd8   :  { %v372_v62 = vpop.permute.xlu1 %371  ;;  %v370_v63 = vpop.permute.xlu0 %369 }
  0xd9   :  { %v464_v28 = vpop.permute.xlu2 %463  ;;  %v716_v62 = vld [vmem:[%s8099_s0 + $0xc] sm:$0xff] }
  0xda   :  { %v809_v8 = vmul.f32 %v807_v22, %v716_v62 }
  0xde   :  { %687 = vrot.lane.b32.xlu1 %v661_v31, %s4889_s12  ;;  %685 = vrot.lane.b32.xlu0 %v660_v38, %s4889_s12  ;;  %v749_v31 = vmul.f32 %v746_v61, %v5299_v1  ;;  %v748_v38 = vmul.f32 %v746_v61, %v716_v62 }
  0xdf   :  { %689 = vrot.lane.b32.xlu2 %v662_v48, %s4889_s12  ;;  %v750_v48 = vmul.f32 %v746_v61, %v5311_v51 }
  0xe0   :  { %v5283_v49 = vpop.permute.xlu1 %377  ;;  %v5285_v50 = vpop.permute.xlu0 %375 }
  0xe1   :  { %8132 = vst [vmem:[#allocation32_spill] sm:$0xff] %v5285_v50  ;;  %v5290_v10 = vpop.permute.xlu2 %469 }
  0xe6   :  { %693 = vrot.lane.b32.xlu1 %v664_v26, %s4889_s12  ;;  %691 = vrot.lane.b32.xlu0 %v663_v32, %s4889_s12  ;;  %v5323_v26 = vld [vmem:[%s8099_s0 + $0x2c] sm:$0xff]  ;;  %v5328_v32 = vld [vmem:[%s8099_s0 + $0x24] sm:$0xff] }
  0xe7   :  { %767 = vrot.lane.b32.xlu2 %v747_v27, %s4888_s19  ;;  %8137 = vst [vmem:[#allocation37_spill] sm:$0xff] %v5323_v26  ;;  %v813_v62 = vmul.f32 %v807_v22, %v5323_v26 }
  0xe8   :  { %v5304_v63 = vpop.permute.xlu1 %383  ;;  %v5306_v52 = vpop.permute.xlu0 %381 }
  0xe9   :  { %8133 = vst [vmem:[#allocation33_spill] sm:$0xff] %v5304_v63  ;;  %v5313_v28 = vpop.permute.xlu2 %475  ;;  %v751_v63 = vmul.f32 %v746_v61, %v5328_v32 }
  0xea   :  { %8134 = vst [vmem:[#allocation34_spill] sm:$0xff] %v5306_v52 }
  0xeb   :  { %8136 = vst [vmem:[#allocation36_spill] sm:$0xff] %v5313_v28 }
  0xee   :  { %771 = vrot.lane.b32.xlu1 %v749_v31, %s4888_s19  ;;  %769 = vrot.lane.b32.xlu0 %v748_v38, %s4888_s19  ;;  %v5333_v31 = vld [vmem:[%s8099_s0 + $0x34] sm:$0xff] }
  0xef   :  { %773 = vrot.lane.b32.xlu2 %v750_v48, %s4888_s19  ;;  %8138 = vst [vmem:[#allocation38_spill] sm:$0xff] %v5333_v31  ;;  %v752_v48 = vmul.f32 %v746_v61, %v5323_v26  ;;  %v753_v17 = vmul.f32 %v746_v61, %v5333_v31 }
  0xf0   :  { %v462_v27 = vpop.permute.xlu1 %461  ;;  %v388_v28 = vpop.permute.xlu0 %387 }
  0xf1   :  { %v523_v38 = vpop.permute.xlu2 %522  ;;  %v5344_v28 = vld [vmem:[%s8099_s0 + $0x44] sm:$0xff]  ;;  %v722_v27 = vld [vmem:[%s8099_s0 + $0x3c] sm:$0xff] }
  0xf2   :  { %8139 = vst [vmem:[#allocation39_spill] sm:$0xff] %v5344_v28  ;;  %v754_v39 = vmul.f32 %v746_v61, %v722_v27 }
  0xf6   :  { %777 = vrot.lane.b32.xlu1 %v752_v48, %s4888_s19  ;;  %775 = vrot.lane.b32.xlu0 %v751_v63, %s4888_s19  ;;  %v724_v63 = vld [vmem:[%s8099_s0 + $0x4c] sm:$0x7f] }
  0xf7   :  { %779 = vrot.lane.b32.xlu2 %v753_v17, %s4888_s19  ;;  %v755_v17 = vmul.f32 %v746_v61, %v5344_v28  ;;  %v756_v34 = vmul.f32 %v746_v61, %v724_v63  ;;  %v817_v50 = vmul.f32 %v807_v22, %v724_v63 }
  0xf8   :  { %v5349_v38 = vpop.permute.xlu1 %467  ;;  %v5351_v44 = vpop.permute.xlu0 %465 }
  0xf9   :  { %8140 = vst [vmem:[#allocation40_spill] sm:$0xff] %v5349_v38  ;;  %v5356_v48 = vpop.permute.xlu2 %528 }
  0xfa   :  { %8141 = vst [vmem:[#allocation41_spill] sm:$0xff] %v5356_v48  ;;  %v810_v48 = vmul.f32 %v807_v22, %v5299_v1 }
  0xfe   :  { %783 = vrot.lane.b32.xlu1 %v755_v17, %s4888_s19  ;;  %781 = vrot.lane.b32.xlu0 %v754_v39, %s4888_s19  ;;  %v812_v17 = vmul.f32 %v807_v22, %v5328_v32 }
  0xff   :  { %785 = vrot.lane.b32.xlu2 %v756_v34, %s4888_s19 }
 0x100   :  { %v5362_v19 = vpop.permute.xlu1 %473  ;;  %v5364_v52 = vpop.permute.xlu0 %471 }
 0x101   :  { %8142 = vst [vmem:[#allocation42_spill] sm:$0xff] %v5362_v19  ;;  %v5366_v38 = vpop.permute.xlu2 %534  ;;  %v811_v19 = vmul.f32 %v807_v22, %v5311_v51  ;;  %v5397_v51 = vstv %s4637_s28  ;;  %s4657_s28 = sld [smem:[#allocation10 + $0x382]] }
 0x102   :  { %8143 = vst [vmem:[#allocation43_spill] sm:$0xff] %v5366_v38  ;;  %v118_v38 = vmul.f32 %v5377_v59, %v4957_v2  ;;  %v815_v2 = vmul.f32 %v807_v22, %v722_v27  ;;  %v899_v27 = vstv %s4650_s29  ;;  %s4680_s29 = sld [smem:[#allocation12 + $0x201]] }
 0x106   :  { %830 = vrot.lane.b32.xlu1 %v809_v8, %s4889_s12  ;;  %828 = vrot.lane.b32.xlu0 %v808_v11, %s4889_s12  ;;  %v5387_v11 = vstv %s8101_s2  ;;  %s4682_s2 = sld [smem:[#allocation12 + $0x203]] }
 0x107   :  { %832 = vrot.lane.b32.xlu2 %v810_v48, %s4889_s12 }
 0x108   :  { %v480_v39 = vpop.permute.xlu1 %479  ;;  %v5372_v34 = vpop.permute.xlu0 %477 }
 0x109   :  { %v541_v61 = vpop.permute.xlu2 %540  ;;  %v128_v39 = vadd.f32 %v118_v38, %v5387_v11  ;;  %v5405_v38 = vld [vmem:[%s8099_s0 + $0x5] sm:$0xff] }
 0x10e   :  { %836 = vrot.lane.b32.xlu1 %v812_v17, %s4889_s12  ;;  %834 = vrot.lane.b32.xlu0 %v811_v19, %s4889_s12  ;;  %v814_v17 = vmul.f32 %v807_v22, %v5333_v31  ;;  %v816_v19 = vmul.f32 %v807_v22, %v5344_v28  ;;  %v5435_v22 = vstv %s4640_s10  ;;  %s4652_s10 = sld [smem:[#allocation10 + $0x300]] }
 0x10f   :  { %838 = vrot.lane.b32.xlu2 %v813_v62, %s4889_s12  ;;  %v189_v62 = vadd.f32 %v5084_v60, %v128_v39  ;;  %v5412_v60 = vld [vmem:[%s8099_s0 + $0xd] sm:$0xff] }
 0x110   :  { %v5389_v8 = vpop.permute.xlu1 %526  ;;  %v525_v48 = vpop.permute.xlu0 %524  ;;  %v901_v3 = vmul.f32 %v899_v27, %v5412_v60 }
 0x111   :  { %v5392_v61 = vpop.permute.xlu2 %618  ;;  %v250_v39 = vadd.f32 %v5155_v33, %v189_v62  ;;  %v5433_v33 = vld [vmem:[%s8099_s0 + $0x15] sm:$0xff] }
 0x116   :  { %842 = vrot.lane.b32.xlu1 %v815_v2, %s4889_s12  ;;  %840 = vrot.lane.b32.xlu0 %v814_v17, %s4889_s12  ;;  %v271_v2 = vmul.f32 %v5397_v51, %v5046_v42  ;;  %v5428_v42 = vld [vmem:[%s8099_s0 + $0x1d] sm:$0xff] }
 0x117   :  { %844 = vrot.lane.b32.xlu2 %v816_v19, %s4889_s12  ;;  %v900_v19 = vmul.f32 %v899_v27, %v5405_v38 }
 0x118   :  { %v5407_v48 = vpop.permute.xlu1 %532  ;;  %v531_v31 = vpop.permute.xlu0 %530  ;;  %v281_v57 = vadd.f32 %v271_v2, %v250_v39  ;;  %v903_v39 = vmul.f32 %v899_v27, %v5428_v42  ;;  %v902_v2 = vmul.f32 %v899_v27, %v5433_v33 }
 0x119   :  { %v5417_v17 = vpop.permute.xlu2 %624 }
 0x11a   :  { %v342_v43 = vadd.f32 %v5259_v54, %v281_v57  ;;  %v5444_v57 = vld [vmem:[%s8099_s0 + $0x25] sm:$0xff]  ;;  %v424_v54 = vmul.f32 %v5435_v22, %v5115_v13  ;;  %v5465_v13 = vld [vmem:[%s8099_s0 + $0x2d] sm:$0xff] }
 0x11b   :  { %v905_v37 = vmul.f32 %v899_v27, %v5465_v13 }
 0x11e   :  { %920 = vrot.lane.b32.xlu1 %v900_v19, %s4888_s19  ;;  %846 = vrot.lane.b32.xlu0 %v817_v50, %s4889_s12  ;;  %v904_v19 = vmul.f32 %v899_v27, %v5444_v57 }
 0x11f   :  { %922 = vrot.lane.b32.xlu2 %v901_v3, %s4888_s19  ;;  %v403_v3 = vadd.f32 %v5283_v49, %v342_v43  ;;  %v5460_v43 = vld [vmem:[%s8099_s0 + $0x35] sm:$0xff] }
 0x120   :  { %v5437_v63 = vpop.permute.xlu1 %538  ;;  %v5439_v62 = vpop.permute.xlu0 %536 }
 0x121   :  { %8144 = vst [vmem:[#allocation44_spill] sm:$0xff] %v5437_v63  ;;  %v5449_v50 = vpop.permute.xlu2 %630 }
 0x122   :  { %8145 = vst [vmem:[#allocation45_spill] sm:$0xff] %v5439_v62  ;;  %v434_v62 = vadd.f32 %v424_v54, %v403_v3  ;;  %v5470_v3 = vld [vmem:[%s8099_s0 + $0x3d] sm:$0xff] }
 0x123   :  { %8146 = vst [vmem:[#allocation46_spill] sm:$0xff] %v5449_v50  ;;  %v907_v28 = vmul.f32 %v899_v27, %v5470_v3  ;;  %v116_v50 = vmul.f32 %v5377_v59, %v4949_v0 }
 0x124   :  { %v495_v54 = vadd.f32 %v5290_v10, %v434_v62  ;;  %v877_v62 = vld [vmem:[%s8099_s0 + $0x4d] sm:$0x7f] }
 0x126   :  { %926 = vrot.lane.b32.xlu1 %v903_v39, %s4888_s19  ;;  %924 = vrot.lane.b32.xlu0 %v902_v2, %s4888_s19  ;;  %v5473_v2 = vstv %s4643_s18  ;;  %v556_v55 = vadd.f32 %v531_v31, %v495_v54  ;;  %v5489_v31 = vld [vmem:[%s8099_s0 + $0x45] sm:$0xff]  ;;  %s4670_s18 = sld [smem:[#allocation12 + $0x83]] }
 0x127   :  { %928 = vrot.lane.b32.xlu2 %v904_v19, %s4888_s19  ;;  %v906_v19 = vmul.f32 %v899_v27, %v5460_v43 }
 0x128   :  { %v617_v49 = vpop.permute.xlu1 %616  ;;  %v615_v40 = vpop.permute.xlu0 %614 }
 0x129   :  { %v678_v39 = vpop.permute.xlu2 %677  ;;  %v577_v40 = vmul.f32 %v5473_v2, %v5212_v18  ;;  %v960_v18 = vstv %s4651_s26  ;;  %s4660_s26 = sld [smem:[#allocation10 + $0x402]] }
 0x12a   :  { %v5493_v39 = vstv %s4646_s23  ;;  %v961_v26 = vmul.f32 %v960_v18, %v5405_v38  ;;  %v963_v0 = vmul.f32 %v960_v18, %v5433_v33  ;;  %v962_v38 = vmul.f32 %v960_v18, %v5412_v60  ;;  %s4698_s23 = sld [smem:[#allocation12 + $0x403]] }
 0x12b   :  { %v587_v10 = vadd.f32 %v577_v40, %v556_v55  ;;  %v730_v55 = vmul.f32 %v5493_v39, %v5328_v32  ;;  %v908_v40 = vmul.f32 %v899_v27, %v5489_v31 }
 0x12e   :  { %932 = vrot.lane.b32.xlu1 %v906_v19, %s4888_s19  ;;  %930 = vrot.lane.b32.xlu0 %v905_v37, %s4888_s19 }
 0x12f   :  { %934 = vrot.lane.b32.xlu2 %v907_v28, %s4888_s19  ;;  %v909_v28 = vmul.f32 %v899_v27, %v877_v62 }
 0x130   :  { %v623_v49 = vpop.permute.xlu1 %622  ;;  %v5491_v54 = vpop.permute.xlu0 %620 }
 0x131   :  { %v648_v19 = vadd.f32 %v623_v49, %v587_v10  ;;  %v684_v37 = vpop.permute.xlu2 %683  ;;  %v126_v10 = vadd.f32 %v116_v50, %v5387_v11  ;;  %v269_v50 = vmul.f32 %v5397_v51, %v5023_v35 }
 0x133   :  { %v709_v30 = vadd.f32 %v684_v37, %v648_v19  ;;  %v964_v19 = vmul.f32 %v960_v18, %v5428_v42  ;;  %v119_v37 = vmul.f32 %v5377_v59, %v4975_v9  ;;  %v965_v9 = vmul.f32 %v960_v18, %v5444_v57 }
 0x135   :  { %v5501_v63 = vadd.f32 %v730_v55, %v709_v30  ;;  %v187_v30 = vadd.f32 %v5135_v21, %v126_v10  ;;  %v129_v21 = vadd.f32 %v119_v37, %v5387_v11 }
 0x136   :  { %938 = vrot.lane.b32.xlu1 %v909_v28, %s4888_s19  ;;  %936 = vrot.lane.b32.xlu0 %v908_v40, %s4888_s19  ;;  %v966_v40 = vmul.f32 %v960_v18, %v5465_v13 }
 0x137   :  { %981 = vrot.lane.b32.xlu2 %v961_v26, %s4889_s12  ;;  %v248_v26 = vadd.f32 %v5180_v56, %v187_v30  ;;  %v122_v56 = vmul.f32 %v5377_v59, %v4991_v15 }
 0x138   :  { %v5507_v32 = vpop.permute.xlu1 %628  ;;  %v5509_v49 = vpop.permute.xlu0 %626 }
 0x139   :  { %v5511_v27 = vpop.permute.xlu2 %689  ;;  %v279_v10 = vadd.f32 %v269_v50, %v248_v26  ;;  %v132_v26 = vadd.f32 %v122_v56, %v5387_v11 }
 0x13b   :  { %v340_v35 = vadd.f32 %v5240_v36, %v279_v10  ;;  %v422_v36 = vmul.f32 %v5435_v22, %v5110_v12  ;;  %v275_v12 = vmul.f32 %v5397_v51, %v5062_v47  ;;  %v5575_v47 = vld [vmem:[%s8099_s0 + $0x16] sm:$0xff]  ;;  %v425_v10 = vmul.f32 %v5435_v22, %v5133_v20 }
 0x13d   :  { %v401_v15 = vadd.f32 %v5247_v46, %v340_v35 }
 0x13e   :  { %985 = vrot.lane.b32.xlu1 %v963_v0, %s4889_s12  ;;  %983 = vrot.lane.b32.xlu0 %v962_v38, %s4889_s12  ;;  %v967_v0 = vmul.f32 %v960_v18, %v5460_v43  ;;  %v190_v38 = vadd.f32 %v5097_v5, %v129_v21  ;;  %v193_v21 = vadd.f32 %v5117_v14, %v132_v26  ;;  %v5561_v14 = vld [vmem:[%s8099_s0 + $0xe] sm:$0xff] }
 0x13f   :  { %987 = vrot.lane.b32.xlu2 %v964_v19, %s4889_s12  ;;  %v272_v19 = vmul.f32 %v5397_v51, %v5041_v41 }
 0x140   :  { %v676_v55 = vpop.permute.xlu1 %675  ;;  %v633_v60 = vpop.permute.xlu0 %632  ;;  %v251_v30 = vadd.f32 %v5196_v4, %v190_v38  ;;  %v969_v4 = vmul.f32 %v960_v18, %v5489_v31  ;;  %v254_v46 = vadd.f32 %v5219_v24, %v193_v21  ;;  %v575_v38 = vmul.f32 %v5473_v2, %v5201_v6 }
 0x141   :  { %v768_v28 = vpop.permute.xlu2 %767  ;;  %v968_v55 = vmul.f32 %v960_v18, %v5470_v3  ;;  %v970_v60 = vmul.f32 %v960_v18, %v877_v62  ;;  %v5568_v62 = vld [vmem:[%s8099_s0 + $0x6] sm:$0xff] }
 0x142   :  { %v282_v41 = vadd.f32 %v272_v19, %v251_v30  ;;  %v285_v19 = vadd.f32 %v275_v12, %v254_v46 }
 0x144   :  { %v343_v28 = vadd.f32 %v5257_v53, %v282_v41  ;;  %v5563_v53 = vstv %s4653_s8  ;;  %v346_v26 = vadd.f32 %v5266_v16, %v285_v19  ;;  %v5604_v16 = vld [vmem:[%s8099_s0 + $0x1e] sm:$0xff]  ;;  %s4656_s8 = sld [smem:[#allocation10 + $0x381]] }
 0x145   :  { %v1054_v35 = vmul.f32 %v5563_v53, %v5561_v14  ;;  %v1053_v30 = vmul.f32 %v5563_v53, %v5568_v62  ;;  %v1056_v46 = vmul.f32 %v5563_v53, %v5604_v16 }
 0x146   :  { %991 = vrot.lane.b32.xlu1 %v966_v40, %s4889_s12  ;;  %989 = vrot.lane.b32.xlu0 %v965_v9, %s4889_s12  ;;  %v432_v40 = vadd.f32 %v422_v36, %v401_v15  ;;  %v428_v36 = vmul.f32 %v5435_v22, %v5151_v29  ;;  %v407_v41 = vadd.f32 %v5270_v23, %v346_v26 }
 0x147   :  { %993 = vrot.lane.b32.xlu2 %v967_v0, %s4889_s12  ;;  %v728_v23 = vmul.f32 %v5493_v39, %v5299_v1  ;;  %v5640_v1 = vld [vmem:[%s8099_s0 + $0x36] sm:$0xff] }
 0x148   :  { %v5539_v37 = vpop.permute.xlu1 %681  ;;  %v680_v5 = vpop.permute.xlu0 %679  ;;  %v493_v9 = vadd.f32 %v5351_v44, %v432_v40  ;;  %v404_v44 = vadd.f32 %v5261_v58, %v343_v28  ;;  %v1055_v58 = vmul.f32 %v5563_v53, %v5575_v47  ;;  %v578_v28 = vmul.f32 %v5473_v2, %v5224_v25 }
 0x149   :  { %v5545_v50 = vpop.permute.xlu2 %773  ;;  %v5628_v25 = vstv %s4649_s1  ;;  %s4891_s1 = smov 124  }
 0x14a   :  { %v554_v0 = vadd.f32 %v5389_v8, %v493_v9  ;;  %v435_v20 = vadd.f32 %v425_v10, %v404_v44  ;;  %v5599_v8 = vld [vmem:[%s8099_s0 + $0x26] sm:$0xff] }
 0x14b   :  { %v1057_v29 = vmul.f32 %v5563_v53, %v5599_v8 }
 0x14c   :  { %v585_v15 = vadd.f32 %v575_v38, %v554_v0  ;;  %v496_v6 = vadd.f32 %v5364_v52, %v435_v20  ;;  %v5611_v52 = vld [vmem:[%s8099_s0 + $0x2e] sm:$0xff]  ;;  %v117_v0 = vmul.f32 %v5377_v59, %v4967_v7 }
 0x14d   :  { %v1058_v9 = vmul.f32 %v5563_v53, %v5611_v52 }
 0x14e   :  { %997 = vrot.lane.b32.xlu1 %v969_v4, %s4889_s12  ;;  %995 = vrot.lane.b32.xlu0 %v968_v55, %s4889_s12  ;;  %v557_v21 = vadd.f32 %v5407_v48, %v496_v6  ;;  %v881_v6 = vmul.f32 %v5628_v25, %v5433_v33 }
 0x14f   :  { %999 = vrot.lane.b32.xlu2 %v970_v60, %s4889_s12  ;;  %v646_v60 = vadd.f32 %v5392_v61, %v585_v15  ;;  %v438_v61 = vadd.f32 %v428_v36, %v407_v41 }
 0x150   :  { %v5570_v24 = vpop.permute.xlu1 %687  ;;  %v686_v18 = vpop.permute.xlu0 %685  ;;  %v588_v44 = vadd.f32 %v578_v28, %v557_v21  ;;  %v127_v21 = vadd.f32 %v117_v0, %v5387_v11  ;;  %v884_v0 = vmul.f32 %v5628_v25, %v5465_v13  ;;  %v8151_v13 = vld [vmem:[#allocation39_spill] sm:$0xff] }
 0x151   :  { %v5583_v56 = vpop.permute.xlu2 %779  ;;  %v707_v12 = vadd.f32 %v680_v5, %v646_v60  ;;  %v499_v48 = vadd.f32 %v5372_v34, %v438_v61  ;;  %v5635_v5 = vld [vmem:[%s8099_s0 + $0x3e] sm:$0xff]  ;;  %v581_v34 = vmul.f32 %v5473_v2, %v5245_v45  ;;  %v1059_v45 = vmul.f32 %v5563_v53, %v5640_v1  ;;  %v8148_v60 = vld [vmem:[#allocation37_spill] sm:$0xff] }
 0x152   :  { %v649_v19 = vadd.f32 %v5417_v17, %v588_v44  ;;  %v1060_v7 = vmul.f32 %v5563_v53, %v5635_v5  ;;  %v731_v17 = vmul.f32 %v5493_v39, %v8148_v60  ;;  %v8150_v61 = vld [vmem:[#allocation46_spill] sm:$0xff] }
 0x153   :  { %v738_v10 = vadd.f32 %v728_v23, %v707_v12 }
 0x154   :  { %v710_v36 = vadd.f32 %v686_v18, %v649_v19  ;;  %v5669_v18 = vstv %s4654_s24  ;;  %s4700_s24 = sld [smem:[#allocation12 + $0x481]] }
 0x156   :  { %1075 = vrot.lane.b32.xlu1 %v1054_v35, %s4888_s19  ;;  %1073 = vrot.lane.b32.xlu0 %v1053_v30, %s4888_s19  ;;  %v5649_v30 = vld [vmem:[%s8099_s0 + $0x46] sm:$0xff]  ;;  %v741_v33 = vadd.f32 %v731_v17, %v710_v36 }
 0x157   :  { %1077 = vrot.lane.b32.xlu2 %v1055_v58, %s4888_s19  ;;  %v8147_v58 = vld [vmem:[#allocation44_spill] sm:$0xff]  ;;  %v1061_v41 = vmul.f32 %v5563_v53, %v5649_v30 }
 0x158   :  { %v694_v4 = vpop.permute.xlu1 %693  ;;  %v692_v55 = vpop.permute.xlu0 %691  ;;  %v560_v26 = vadd.f32 %v8147_v58, %v499_v48 }
 0x159   :  { %v786_v40 = vpop.permute.xlu2 %785 }
 0x15a   :  { %v591_v28 = vadd.f32 %v581_v34, %v560_v26  ;;  %v5685_v34 = vld [vmem:[%s8099_s0 + $0x30] sm:$0xff] }
 0x15c   :  { %v652_v44 = vadd.f32 %v8150_v61, %v591_v28  ;;  %v1117_v28 = vmul.f32 %v5669_v18, %v5604_v16  ;;  %v1118_v61 = vmul.f32 %v5669_v18, %v5599_v8 }
 0x15e   :  { %1081 = vrot.lane.b32.xlu1 %v1057_v29, %s4888_s19  ;;  %1079 = vrot.lane.b32.xlu0 %v1056_v46, %s4888_s19  ;;  %v5674_v29 = vld [vmem:[%s8099_s0 + $0x4e] sm:$0x7f]  ;;  %v713_v58 = vadd.f32 %v692_v55, %v652_v44  ;;  %v8155_v44 = vld [vmem:[#allocation18_spill] sm:$0xff] }
 0x15f   :  { %1083 = vrot.lane.b32.xlu2 %v1058_v9, %s4888_s19  ;;  %v8149_v46 = vld [vmem:[#allocation21_spill] sm:$0xff]  ;;  %v1062_v19 = vmul.f32 %v5563_v53, %v5674_v29 }
 0x160   :  { %v772_v38 = vpop.permute.xlu1 %771  ;;  %v770_v35 = vpop.permute.xlu0 %769  ;;  %v188_v12 = vadd.f32 %v8149_v46, %v127_v21  ;;  %v887_v21 = vmul.f32 %v5628_v25, %v5489_v31  ;;  %v8154_v46 = vld [vmem:[#allocation23_spill] sm:$0xff] }
 0x161   :  { %v799_v20 = vadd.f32 %v772_v38, %v738_v10  ;;  %v833_v15 = vpop.permute.xlu2 %832  ;;  %v120_v38 = vmul.f32 %v5685_v34, %v5377_v59  ;;  %v1114_v35 = vmul.f32 %v5669_v18, %v5568_v62 }
 0x163   :  { %v860_v4 = vadd.f32 %v833_v15, %v799_v20  ;;  %v1115_v20 = vmul.f32 %v5669_v18, %v5561_v14  ;;  %v734_v15 = vmul.f32 %v5493_v39, %v8151_v13  ;;  %v130_v53 = vadd.f32 %v120_v38, %v5387_v11  ;;  %v8157_v38 = vld [vmem:[#allocation27_spill] sm:$0xff] }
 0x165   :  { %v5664_v40 = vadd.f32 %v881_v6, %v860_v4  ;;  %v8152_v6 = vld [vmem:[#allocation25_spill] sm:$0xff]  ;;  %v744_v62 = vadd.f32 %v734_v15, %v713_v58  ;;  %v8159_v58 = vld [vmem:[#allocation19_spill] sm:$0xff] }
 0x166   :  { %1087 = vrot.lane.b32.xlu1 %v1060_v7, %s4888_s19  ;;  %1085 = vrot.lane.b32.xlu0 %v1059_v45, %s4888_s19  ;;  %v249_v7 = vadd.f32 %v8152_v6, %v188_v12  ;;  %v8153_v45 = vld [vmem:[#allocation17_spill] sm:$0xff]  ;;  %v191_v12 = vadd.f32 %v8154_v46, %v130_v53  ;;  %v1121_v53 = vmul.f32 %v5669_v18, %v5635_v5 }
 0x167   :  { %1089 = vrot.lane.b32.xlu2 %v1061_v41, %s4888_s19  ;;  %v270_v36 = vmul.f32 %v5397_v51, %v8153_v45  ;;  %v1119_v45 = vmul.f32 %v5669_v18, %v5611_v52 }
 0x168   :  { %v778_v9 = vpop.permute.xlu1 %777  ;;  %v5677_v23 = vpop.permute.xlu0 %775 }
 0x169   :  { %v802_v48 = vadd.f32 %v778_v9, %v741_v33  ;;  %v839_v10 = vpop.permute.xlu2 %838  ;;  %v280_v41 = vadd.f32 %v270_v36, %v249_v7  ;;  %v1116_v33 = vmul.f32 %v5669_v18, %v5575_v47  ;;  %v8158_v47 = vld [vmem:[#allocation32_spill] sm:$0xff]  ;;  %v1120_v7 = vmul.f32 %v5669_v18, %v5640_v1 }
 0x16b   :  { %v863_v26 = vadd.f32 %v839_v10, %v802_v48  ;;  %v273_v48 = vmul.f32 %v5397_v51, %v8155_v44  ;;  %v8156_v10 = vld [vmem:[#allocation26_spill] sm:$0xff] }
 0x16d   :  { %v5700_v4 = vadd.f32 %v884_v0, %v863_v26  ;;  %v341_v0 = vadd.f32 %v8156_v10, %v280_v41  ;;  %v423_v26 = vmul.f32 %v5435_v22, %v8159_v58  ;;  %v8161_v41 = vld [vmem:[#allocation40_spill] sm:$0xff]  ;;  %v8166_v58 = vld [vmem:[#allocation42_spill] sm:$0xff] }
 0x16e   :  { %1134 = vrot.lane.b32.xlu1 %v1114_v35, %s4889_s12  ;;  %1091 = vrot.lane.b32.xlu0 %v1062_v19, %s4888_s19  ;;  %v252_v35 = vadd.f32 %v8157_v38, %v191_v12  ;;  %v5748_v12 = vld [vmem:[%s8099_s0 + $0x7] sm:$0xff]  ;;  %v1123_v38 = vmul.f32 %v5669_v18, %v5674_v29  ;;  %v5776_v29 = vld [vmem:[%s8099_s0 + $0xf] sm:$0xff] }
 0x16f   :  { %1136 = vrot.lane.b32.xlu2 %v1115_v20, %s4889_s12  ;;  %v402_v19 = vadd.f32 %v8158_v47, %v341_v0 }
 0x170   :  { %v784_v14 = vpop.permute.xlu1 %783  ;;  %v5706_v55 = vpop.permute.xlu0 %781  ;;  %v283_v15 = vadd.f32 %v273_v48, %v252_v35  ;;  %v8165_v48 = vld [vmem:[#allocation29_spill] sm:$0xff]  ;;  %v1122_v35 = vmul.f32 %v5669_v18, %v5649_v30 }
 0x171   :  { %v805_v60 = vadd.f32 %v784_v14, %v744_v62  ;;  %v845_v17 = vpop.permute.xlu2 %844  ;;  %v433_v36 = vadd.f32 %v423_v26, %v402_v19  ;;  %v8160_v62 = vld [vmem:[#allocation28_spill] sm:$0xff]  ;;  %v576_v10 = vmul.f32 %v5473_v2, %v8165_v48  ;;  %v5771_v18 = vld [vmem:[%s8099_s0 + $0x17] sm:$0xff] }
 0x172   :  { %v344_v14 = vadd.f32 %v8160_v62, %v283_v15  ;;  %v5781_v15 = vld [vmem:[%s8099_s0 + $0x8] sm:$0xff] }
 0x173   :  { %v866_v9 = vadd.f32 %v845_v17, %v805_v60  ;;  %v494_v60 = vadd.f32 %v8161_v41, %v433_v36  ;;  %v8162_v17 = vld [vmem:[#allocation34_spill] sm:$0xff]  ;;  %v8169_v41 = vld [vmem:[#allocation35_spill] sm:$0xff] }
 0x174   :  { %v5790_v36 = vld [vmem:[%s8099_s0 + $0x1f] sm:$0xff] }
 0x175   :  { %v5721_v31 = vadd.f32 %v887_v21, %v866_v9  ;;  %v405_v21 = vadd.f32 %v8162_v17, %v344_v14  ;;  %v5750_v9 = vstv %s4656_s8  ;;  %s4661_s8 = sld [smem:[#allocation10 + $0x480]] }
 0x176   :  { %1140 = vrot.lane.b32.xlu1 %v1117_v28, %s4889_s12  ;;  %1138 = vrot.lane.b32.xlu0 %v1116_v33, %s4889_s12  ;;  %v8163_v28 = vld [vmem:[#allocation20_spill] sm:$0xff]  ;;  %v1206_v19 = vmul.f32 %v5750_v9, %v5748_v12 }
 0x177   :  { %1142 = vrot.lane.b32.xlu2 %v1118_v61, %s4889_s12  ;;  %v426_v33 = vmul.f32 %v5435_v22, %v8163_v28  ;;  %v8164_v61 = vld [vmem:[#allocation41_spill] sm:$0xff]  ;;  %v1207_v28 = vmul.f32 %v5750_v9, %v5776_v29 }
 0x178   :  { %v831_v20 = vpop.permute.xlu1 %830  ;;  %v829_v13 = vpop.permute.xlu0 %828  ;;  %v555_v44 = vadd.f32 %v8164_v61, %v494_v60  ;;  %v729_v60 = vmul.f32 %v5493_v39, %v8169_v41 }
 0x179   :  { %v923_v6 = vpop.permute.xlu2 %922  ;;  %v436_v47 = vadd.f32 %v426_v33, %v405_v21  ;;  %v1208_v21 = vmul.f32 %v5750_v9, %v5771_v18  ;;  %v1209_v33 = vmul.f32 %v5750_v9, %v5790_v36 }
 0x17a   :  { %v586_v20 = vadd.f32 %v576_v10, %v555_v44  ;;  %v8167_v6 = vld [vmem:[#allocation30_spill] sm:$0xff]  ;;  %v5813_v10 = vld [vmem:[%s8099_s0 + $0x2f] sm:$0xff] }
 0x17b   :  { %v497_v26 = vadd.f32 %v8166_v58, %v436_v47 }
 0x17c   :  { %v647_v13 = vadd.f32 %v5491_v54, %v586_v20  ;;  %v579_v54 = vmul.f32 %v5473_v2, %v8167_v6  ;;  %v1211_v6 = vmul.f32 %v5750_v9, %v5813_v10 }
 0x17e   :  { %1146 = vrot.lane.b32.xlu1 %v1120_v7, %s4889_s12  ;;  %1144 = vrot.lane.b32.xlu0 %v1119_v45, %s4889_s12  ;;  %v708_v14 = vadd.f32 %v5539_v37, %v647_v13  ;;  %v5806_v37 = vstv %s4652_s10  ;;  %s4685_s10 = sld [smem:[#allocation12 + $0x282]] }
 0x17f   :  { %1148 = vrot.lane.b32.xlu2 %v1121_v53, %s4889_s12  ;;  %v8168_v53 = vld [vmem:[#allocation43_spill] sm:$0xff] }
 0x180   :  { %v5743_v52 = vpop.permute.xlu1 %836  ;;  %v835_v46 = vpop.permute.xlu0 %834  ;;  %v558_v62 = vadd.f32 %v8168_v53, %v497_v26  ;;  %v739_v44 = vadd.f32 %v729_v60, %v708_v14  ;;  %v882_v14 = vmul.f32 %v5628_v25, %v5428_v42  ;;  %v5853_v42 = vld [vmem:[%s8099_s0 + $0x38] sm:$0xff] }
 0x181   :  { %v5755_v0 = vpop.permute.xlu2 %928  ;;  %v121_v60 = vmul.f32 %v5853_v42, %v5377_v59 }
 0x182   :  { %v589_v61 = vadd.f32 %v579_v54, %v558_v62  ;;  %v800_v26 = vadd.f32 %v5545_v50, %v739_v44 }
 0x184   :  { %v650_v48 = vadd.f32 %v5509_v49, %v589_v61  ;;  %v5825_v49 = vld [vmem:[%s8099_s0 + $0x37] sm:$0xff]  ;;  %v861_v53 = vadd.f32 %v835_v46, %v800_v26  ;;  %v5848_v46 = vld [vmem:[%s8099_s0 + $0x3f] sm:$0xff] }
 0x185   :  { %v1212_v62 = vmul.f32 %v5750_v9, %v5825_v49  ;;  %v1213_v59 = vmul.f32 %v5750_v9, %v5848_v46 }
 0x186   :  { %1152 = vrot.lane.b32.xlu1 %v1123_v38, %s4889_s12  ;;  %1150 = vrot.lane.b32.xlu0 %v1122_v35, %s4889_s12  ;;  %v5818_v38 = vld [vmem:[%s8099_s0 + $0x27] sm:$0xff]  ;;  %v8170_v35 = vld [vmem:[#allocation38_spill] sm:$0xff]  ;;  %v711_v20 = vadd.f32 %v5570_v24, %v650_v48  ;;  %v892_v50 = vadd.f32 %v882_v14, %v861_v53 }
 0x187   :  { %1226 = vrot.lane.b32.xlu2 %v1206_v19, %s4888_s19  ;;  %v732_v47 = vmul.f32 %v5493_v39, %v8170_v35  ;;  %v1210_v54 = vmul.f32 %v5750_v9, %v5818_v38  ;;  %v5843_v24 = vld [vmem:[%s8099_s0 + $0x47] sm:$0xff]  ;;  %v1035_v35 = vmul.f32 %v5806_v37, %v5604_v16 }
 0x188   :  { %v5785_v7 = vpop.permute.xlu1 %842  ;;  %v841_v45 = vpop.permute.xlu0 %840 }
 0x189   :  { %v5796_v17 = vpop.permute.xlu2 %934  ;;  %v742_v41 = vadd.f32 %v732_v47, %v711_v20  ;;  %v1214_v47 = vmul.f32 %v5750_v9, %v5843_v24  ;;  %v885_v20 = vmul.f32 %v5628_v25, %v5460_v43 }
 0x18b   :  { %v803_v61 = vadd.f32 %v5583_v56, %v742_v41  ;;  %v131_v56 = vadd.f32 %v121_v60, %v5387_v11  ;;  %v1038_v11 = vmul.f32 %v5806_v37, %v5640_v1 }
 0x18e   :  { %1230 = vrot.lane.b32.xlu1 %v1208_v21, %s4888_s19  ;;  %1228 = vrot.lane.b32.xlu0 %v1207_v28, %s4888_s19 }
 0x18f   :  { %1232 = vrot.lane.b32.xlu2 %v1209_v33, %s4888_s19  ;;  %v5862_v33 = vld [vmem:[%s8099_s0 + $0x4f] sm:$0x7f] }
 0x190   :  { %v921_v19 = vpop.permute.xlu1 %920  ;;  %v847_v58 = vpop.permute.xlu0 %846  ;;  %v1215_v26 = vmul.f32 %v5750_v9, %v5862_v33 }
 0x191   :  { %v982_v13 = vpop.permute.xlu2 %981  ;;  %v864_v19 = vadd.f32 %v841_v45, %v803_v61  ;;  %v8171_v45 = vld [vmem:[#allocation22_spill] sm:$0xff] }
 0x193   :  { %v895_v16 = vadd.f32 %v885_v20, %v864_v19  ;;  %v8174_v20 = vld [vmem:[#allocation33_spill] sm:$0xff] }
 0x196   :  { %1236 = vrot.lane.b32.xlu1 %v1211_v6, %s4888_s19  ;;  %1234 = vrot.lane.b32.xlu0 %v1210_v54, %s4888_s19  ;;  %v1266_v6 = vstv %s4657_s28  ;;  %v192_v54 = vadd.f32 %v8171_v45, %v131_v56  ;;  %s4678_s28 = sld [smem:[#allocation12 + $0x183]] }
 0x197   :  { %1238 = vrot.lane.b32.xlu2 %v1212_v62, %s4888_s19  ;;  %v1268_v43 = vmul.f32 %v1266_v6, %v5776_v29  ;;  %v1267_v41 = vmul.f32 %v1266_v6, %v5748_v12  ;;  %v1269_v60 = vmul.f32 %v1266_v6, %v5771_v18  ;;  %v1270_v19 = vmul.f32 %v1266_v6, %v5790_v36 }
 0x198   :  { %v927_v21 = vpop.permute.xlu1 %926  ;;  %v5857_v28 = vpop.permute.xlu0 %924 }
 0x199   :  { %v953_v44 = vadd.f32 %v927_v21, %v892_v50  ;;  %v988_v48 = vpop.permute.xlu2 %987  ;;  %v8172_v21 = vld [vmem:[#allocation24_spill] sm:$0xff] }
 0x19a   :  { %v253_v61 = vadd.f32 %v8172_v21, %v192_v54 }
 0x19b   :  { %v1014_v58 = vadd.f32 %v988_v48, %v953_v44  ;;  %v4795_v44 = vld [vmem:[%s8099_s0 + $0x39] sm:$0xff] }
 0x19c   :  { %v274_v48 = vmul.f32 %v4795_v44, %v5397_v51  ;;  %v1272_v51 = vmul.f32 %v1266_v6, %v5813_v10 }
 0x19d   :  { %v5876_v13 = vadd.f32 %v1035_v35, %v1014_v58  ;;  %v8173_v58 = vld [vmem:[#allocation31_spill] sm:$0xff] }
 0x19e   :  { %1242 = vrot.lane.b32.xlu1 %v1214_v47, %s4888_s19  ;;  %1240 = vrot.lane.b32.xlu0 %v1213_v59, %s4888_s19  ;;  %v284_v29 = vadd.f32 %v274_v48, %v253_v61  ;;  %v1271_v59 = vmul.f32 %v1266_v6, %v5818_v38  ;;  %v4798_v61 = vld [vmem:[%s8099_s0 + $0x3b] sm:$0xff]  ;;  %v5929_v48 = vstv %s4659_s14  ;;  %s4688_s14 = sld [smem:[#allocation12 + $0x301]] }
 0x19f   :  { %1244 = vrot.lane.b32.xlu2 %v1215_v26, %s4888_s19  ;;  %v580_v44 = vmul.f32 %v4798_v61, %v5473_v2 }
 0x1a0   :  { %v933_v53 = vpop.permute.xlu1 %932  ;;  %v5882_v62 = vpop.permute.xlu0 %930  ;;  %v345_v26 = vadd.f32 %v8173_v58, %v284_v29 }
 0x1a1   :  { %v956_v9 = vadd.f32 %v933_v53, %v895_v16  ;;  %v994_v14 = vpop.permute.xlu2 %993  ;;  %v4797_v16 = vld [vmem:[%s8099_s0 + $0x3a] sm:$0xff] }
 0x1a2   :  { %v406_v56 = vadd.f32 %v8174_v20, %v345_v26  ;;  %v427_v45 = vmul.f32 %v4797_v16, %v5435_v22  ;;  %v8175_v22 = vld [vmem:[#allocation36_spill] sm:$0xff]  ;;  %v5941_v26 = vld [vmem:[%s8099_s0 + $0x10] sm:$0xff]  ;;  %v801_v20 = vadd.f32 %v5677_v23, %v5501_v63  ;;  %v5966_v63 = vld [vmem:[%s8099_s0 + $0x20] sm:$0xff] }
 0x1a3   :  { %v1017_v50 = vadd.f32 %v994_v14, %v956_v9  ;;  %v1352_v2 = vmul.f32 %v5941_v26, %v5929_v48  ;;  %v5973_v23 = vld [vmem:[%s8099_s0 + $0x18] sm:$0xff] }
 0x1a4   :  { %v437_v9 = vadd.f32 %v427_v45, %v406_v56  ;;  %v862_v45 = vadd.f32 %v5743_v52, %v801_v20 }
 0x1a5   :  { %v5894_v35 = vadd.f32 %v1038_v11, %v1017_v50  ;;  %v1274_v11 = vmul.f32 %v1266_v6, %v5848_v46 }
 0x1a6   :  { %1289 = vrot.lane.b32.xlu1 %v1268_v43, %s4889_s12  ;;  %1287 = vrot.lane.b32.xlu0 %v1267_v41, %s4889_s12  ;;  %v1273_v43 = vmul.f32 %v1266_v6, %v5825_v49  ;;  %v1275_v41 = vmul.f32 %v1266_v6, %v5843_v24  ;;  %v498_v50 = vadd.f32 %v8175_v22, %v437_v9 }
 0x1a7   :  { %1291 = vrot.lane.b32.xlu2 %v1269_v60, %s4889_s12  ;;  %v8176_v60 = vld [vmem:[#allocation45_spill] sm:$0xff] }
 0x1a8   :  { %v939_v1 = vpop.permute.xlu1 %938  ;;  %v5899_v12 = vpop.permute.xlu0 %936  ;;  %v559_v21 = vadd.f32 %v8176_v60, %v498_v50  ;;  %v886_v50 = vmul.f32 %v5628_v25, %v5470_v3 }
 0x1a9   :  { %v1000_v47 = vpop.permute.xlu2 %999 }
 0x1aa   :  { %v590_v58 = vadd.f32 %v580_v44, %v559_v21 }
 0x1ae   :  { %1295 = vrot.lane.b32.xlu1 %v1271_v59, %s4889_s12  ;;  %1293 = vrot.lane.b32.xlu0 %v1270_v19, %s4889_s12  ;;  %v1351_v59 = vmul.f32 %v5781_v15, %v5929_v48  ;;  %v1276_v19 = vmul.f32 %v1266_v6, %v5862_v33  ;;  %v4800_v33 = vld [vmem:[%s8099_s0 + $0x3c] sm:$0xff] }
 0x1af   :  { %1297 = vrot.lane.b32.xlu2 %v1272_v51, %s4889_s12  ;;  %v651_v51 = vadd.f32 %v5507_v32, %v590_v58  ;;  %v733_v6 = vmul.f32 %v4800_v33, %v5493_v39  ;;  %v1354_v39 = vmul.f32 %v5966_v63, %v5929_v48  ;;  %v1356_v58 = vmul.f32 %v5685_v34, %v5929_v48 }
 0x1b0   :  { %v5913_v54 = vpop.permute.xlu1 %985  ;;  %v984_v53 = vpop.permute.xlu0 %983 }
 0x1b1   :  { %v5915_v14 = vpop.permute.xlu2 %1077  ;;  %v712_v32 = vadd.f32 %v5511_v27, %v651_v51  ;;  %v883_v53 = vmul.f32 %v5628_v25, %v5444_v57  ;;  %v1353_v27 = vmul.f32 %v5973_v23, %v5929_v48  ;;  %v5980_v57 = vld [vmem:[%s8099_s0 + $0x28] sm:$0xff]  ;;  %v1036_v25 = vmul.f32 %v5806_v37, %v5599_v8 }
 0x1b2   :  { %v1355_v52 = vmul.f32 %v5980_v57, %v5929_v48  ;;  %v6016_v51 = vld [vmem:[%s8099_s0 + $0x48] sm:$0xff]  ;;  %v1411_v8 = vstv %s4660_s26  ;;  %s4677_s26 = sld [smem:[#allocation12 + $0x182]] }
 0x1b6   :  { %1301 = vrot.lane.b32.xlu1 %v1274_v11, %s4889_s12  ;;  %1299 = vrot.lane.b32.xlu0 %v1273_v43, %s4889_s12  ;;  %v743_v11 = vadd.f32 %v733_v6, %v712_v32  ;;  %v893_v43 = vadd.f32 %v883_v53, %v862_v45 }
 0x1b7   :  { %1303 = vrot.lane.b32.xlu2 %v1275_v41, %s4889_s12  ;;  %v5986_v41 = vstv %s4655_s17  ;;  %s4669_s17 = sld [smem:[#allocation12 + $0x82]] }
 0x1b8   :  { %v5931_v1 = vpop.permute.xlu1 %991  ;;  %v990_v29 = vpop.permute.xlu0 %989  ;;  %v804_v22 = vadd.f32 %v5706_v55, %v743_v11  ;;  %v954_v61 = vadd.f32 %v5755_v0, %v893_v43  ;;  %v1189_v53 = vmul.f32 %v5986_v41, %v5818_v38  ;;  %v1412_v43 = vmul.f32 %v5781_v15, %v1411_v8 }
 0x1b9   :  { %v5933_v47 = vpop.permute.xlu2 %1083  ;;  %v1192_v15 = vmul.f32 %v5986_v41, %v5848_v46  ;;  %v1417_v46 = vmul.f32 %v5685_v34, %v1411_v8 }
 0x1ba   :  { %v865_v44 = vadd.f32 %v5785_v7, %v804_v22  ;;  %v1015_v55 = vadd.f32 %v990_v29, %v954_v61  ;;  %v1328_v29 = vld [vmem:[%s8099_s0 + $0x50] sm:$0x7f]  ;;  %v1039_v22 = vmul.f32 %v5806_v37, %v5635_v5  ;;  %v1413_v5 = vmul.f32 %v5941_v26, %v1411_v8 }
 0x1bb   :  { %v1418_v26 = vmul.f32 %v5853_v42, %v1411_v8 }
 0x1bc   :  { %v896_v0 = vadd.f32 %v886_v50, %v865_v44  ;;  %v1046_v7 = vadd.f32 %v1036_v25, %v1015_v55  ;;  %v1415_v44 = vmul.f32 %v5966_v63, %v1411_v8 }
 0x1be   :  { %1371 = vrot.lane.b32.xlu1 %v1351_v59, %s4888_s19  ;;  %1305 = vrot.lane.b32.xlu0 %v1276_v19, %s4889_s12  ;;  %v1357_v19 = vmul.f32 %v5853_v42, %v5929_v48  ;;  %v957_v6 = vadd.f32 %v5796_v17, %v896_v0 }
 0x1bf   :  { %1373 = vrot.lane.b32.xlu2 %v1352_v2, %s4888_s19  ;;  %v6001_v2 = vld [vmem:[%s8099_s0 + $0x40] sm:$0xff] }
 0x1c0   :  { %v5955_v56 = vpop.permute.xlu1 %997  ;;  %v996_v16 = vpop.permute.xlu0 %995  ;;  %v1358_v3 = vmul.f32 %v6001_v2, %v5929_v48  ;;  %v1419_v34 = vmul.f32 %v6001_v2, %v1411_v8 }
 0x1c1   :  { %v5961_v9 = vpop.permute.xlu2 %1089 }
 0x1c6   :  { %1377 = vrot.lane.b32.xlu1 %v1354_v39, %s4888_s19  ;;  %1375 = vrot.lane.b32.xlu0 %v1353_v27, %s4888_s19  ;;  %v1360_v39 = vmul.f32 %v5929_v48, %v1328_v29  ;;  %v1359_v27 = vmul.f32 %v5929_v48, %v6016_v51 }
 0x1c7   :  { %1379 = vrot.lane.b32.xlu2 %v1355_v52, %s4888_s19  ;;  %v1018_v52 = vadd.f32 %v996_v16, %v957_v6  ;;  %v1421_v6 = vmul.f32 %v1411_v8, %v1328_v29  ;;  %v6076_v29 = vld [vmem:[%s8099_s0 + $0x19] sm:$0xff] }
 0x1c8   :  { %v1076_v60 = vpop.permute.xlu1 %1075  ;;  %v1074_v21 = vpop.permute.xlu0 %1073 }
 0x1c9   :  { %v1137_v59 = vpop.permute.xlu2 %1136  ;;  %v1049_v17 = vadd.f32 %v1039_v22, %v1018_v52  ;;  %v1414_v21 = vmul.f32 %v5973_v23, %v1411_v8  ;;  %v6087_v22 = vld [vmem:[%s8099_s0 + $0x29] sm:$0xff] }
 0x1ce   :  { %1383 = vrot.lane.b32.xlu1 %v1357_v19, %s4888_s19  ;;  %1381 = vrot.lane.b32.xlu0 %v1356_v58, %s4888_s19 }
 0x1cf   :  { %1385 = vrot.lane.b32.xlu2 %v1358_v3, %s4888_s19  ;;  %v1416_v3 = vmul.f32 %v5980_v57, %v1411_v8 }
 0x1d0   :  { %v1082_v20 = vpop.permute.xlu1 %1081  ;;  %v6018_v33 = vpop.permute.xlu0 %1079 }
 0x1d1   :  { %v1107_v32 = vadd.f32 %v1082_v20, %v1046_v7  ;;  %v1143_v45 = vpop.permute.xlu2 %1142  ;;  %v1420_v20 = vmul.f32 %v1411_v8, %v6016_v51 }
 0x1d3   :  { %v1168_v11 = vadd.f32 %v1143_v45, %v1107_v32  ;;  %v1473_v32 = vld [vmem:[%s8099_s0 + $0x11] sm:$0xff]  ;;  %v1503_v45 = vstv %s4662_s9  ;;  %s4684_s9 = sld [smem:[#allocation12 + $0x281]] }
 0x1d4   :  { %v1505_v52 = vmul.f32 %v1503_v45, %v1473_v32 }
 0x1d5   :  { %v6029_v50 = vadd.f32 %v1189_v53, %v1168_v11  ;;  %v1472_v53 = vld [vmem:[%s8099_s0 + $0x9] sm:$0xff] }
 0x1d6   :  { %1389 = vrot.lane.b32.xlu1 %v1360_v39, %s4888_s19  ;;  %1387 = vrot.lane.b32.xlu0 %v1359_v27, %s4888_s19  ;;  %v1504_v11 = vmul.f32 %v1503_v45, %v1472_v53 }
 0x1d7   :  { %1432 = vrot.lane.b32.xlu2 %v1412_v43, %s4889_s12  ;;  %v1506_v43 = vmul.f32 %v1503_v45, %v6076_v29 }
 0x1d8   :  { %v1088_v38 = vpop.permute.xlu1 %1087  ;;  %v6034_v60 = vpop.permute.xlu0 %1085 }
 0x1d9   :  { %v1110_v48 = vadd.f32 %v1088_v38, %v1049_v17  ;;  %v1149_v16 = vpop.permute.xlu2 %1148  ;;  %v6092_v17 = vld [vmem:[%s8099_s0 + $0x21] sm:$0xff] }
 0x1db   :  { %v1171_v61 = vadd.f32 %v1149_v16, %v1110_v48  ;;  %v6097_v16 = vld [vmem:[%s8099_s0 + $0x31] sm:$0xff] }
 0x1dd   :  { %v6041_v59 = vadd.f32 %v1192_v15, %v1171_v61  ;;  %v1509_v61 = vmul.f32 %v1503_v45, %v6097_v16 }
 0x1de   :  { %1436 = vrot.lane.b32.xlu1 %v1414_v21, %s4889_s12  ;;  %1434 = vrot.lane.b32.xlu0 %v1413_v5, %s4889_s12  ;;  %v1508_v21 = vmul.f32 %v1503_v45, %v6087_v22  ;;  %v1507_v5 = vmul.f32 %v1503_v45, %v6092_v17 }
 0x1df   :  { %1438 = vrot.lane.b32.xlu2 %v1415_v44, %s4889_s12  ;;  %v958_v44 = vadd.f32 %v5899_v12, %v5721_v31  ;;  %v6122_v31 = vld [vmem:[%s8099_s0 + $0x49] sm:$0xff] }
 0x1e0   :  { %v1135_v19 = vpop.permute.xlu1 %1134  ;;  %v1092_v58 = vpop.permute.xlu0 %1091 }
 0x1e1   :  { %v1227_v55 = vpop.permute.xlu2 %1226  ;;  %v6110_v19 = vld [vmem:[%s8099_s0 + $0x41] sm:$0xff]  ;;  %v6115_v58 = vld [vmem:[%s8099_s0 + $0x39] sm:$0xff]  ;;  %v1019_v12 = vadd.f32 %v5955_v56, %v958_v44 }
 0x1e6   :  { %1442 = vrot.lane.b32.xlu1 %v1417_v46, %s4889_s12  ;;  %1440 = vrot.lane.b32.xlu0 %v1416_v3, %s4889_s12  ;;  %v1040_v3 = vmul.f32 %v5806_v37, %v5649_v30  ;;  %v1481_v30 = vld [vmem:[%s8099_s0 + $0x51] sm:$0x7f] }
 0x1e7   :  { %1444 = vrot.lane.b32.xlu2 %v1418_v26, %s4889_s12 }
 0x1e8   :  { %v6052_v25 = vpop.permute.xlu1 %1140  ;;  %v6054_v0 = vpop.permute.xlu0 %1138 }
 0x1e9   :  { %v6056_v7 = vpop.permute.xlu2 %1232 }
 0x1ee   :  { %1448 = vrot.lane.b32.xlu1 %v1420_v20, %s4889_s12  ;;  %1446 = vrot.lane.b32.xlu0 %v1419_v34, %s4889_s12  ;;  %v1511_v20 = vmul.f32 %v1503_v45, %v6110_v19  ;;  %v1510_v34 = vmul.f32 %v1503_v45, %v6115_v58 }
 0x1ef   :  { %1450 = vrot.lane.b32.xlu2 %v1421_v6, %s4889_s12  ;;  %v1512_v6 = vmul.f32 %v1503_v45, %v6122_v31 }
 0x1f0   :  { %v6069_v39 = vpop.permute.xlu1 %1146  ;;  %v6071_v27 = vpop.permute.xlu0 %1144 }
 0x1f1   :  { %v6078_v8 = vpop.permute.xlu2 %1238 }
 0x1f6   :  { %1526 = vrot.lane.b32.xlu1 %v1505_v52, %s4888_s19  ;;  %1524 = vrot.lane.b32.xlu0 %v1504_v11, %s4888_s19  ;;  %v1050_v52 = vadd.f32 %v1040_v3, %v1019_v12  ;;  %v1564_v11 = vstv %s4663_s25  ;;  %s4667_s25 = sld [smem:[#allocation12 + $0x80]] }
 0x1f7   :  { %1528 = vrot.lane.b32.xlu2 %v1506_v43, %s4888_s19  ;;  %v1566_v44 = vmul.f32 %v1564_v11, %v1473_v32 }
 0x1f8   :  { %v1153_v38 = vpop.permute.xlu1 %1152  ;;  %v1151_v48 = vpop.permute.xlu0 %1150 }
 0x1f9   :  { %v1245_v15 = vpop.permute.xlu2 %1244  ;;  %v1111_v38 = vadd.f32 %v5961_v9, %v1050_v52  ;;  %v6152_v9 = vstv %s4658_s30  ;;  %s4681_s30 = sld [smem:[#allocation12 + $0x202]] }
 0x1fa   :  { %v1338_v32 = vmul.f32 %v6152_v9, %v6016_v51  ;;  %v1571_v51 = vmul.f32 %v1564_v11, %v6115_v58 }
 0x1fe   :  { %1532 = vrot.lane.b32.xlu1 %v1508_v21, %s4888_s19  ;;  %1530 = vrot.lane.b32.xlu0 %v1507_v5, %s4888_s19  ;;  %v1565_v21 = vmul.f32 %v1564_v11, %v1472_v53  ;;  %v1513_v5 = vmul.f32 %v1503_v45, %v1481_v30  ;;  %v1568_v45 = vmul.f32 %v1564_v11, %v6092_v17 }
 0x1ff   :  { %1534 = vrot.lane.b32.xlu2 %v1509_v61, %s4888_s19  ;;  %v1172_v61 = vadd.f32 %v1151_v48, %v1111_v38 }
 0x200   :  { %v6117_v55 = vpop.permute.xlu1 %1230  ;;  %v1229_v46 = vpop.permute.xlu0 %1228 }
 0x201   :  { %v6127_v26 = vpop.permute.xlu2 %1291  ;;  %v1193_v46 = vmul.f32 %v5986_v41, %v5843_v24  ;;  %v1567_v24 = vmul.f32 %v1564_v11, %v6076_v29 }
 0x203   :  { %v1203_v12 = vadd.f32 %v1193_v46, %v1172_v61  ;;  %v1570_v61 = vmul.f32 %v1564_v11, %v6097_v16 }
 0x206   :  { %1538 = vrot.lane.b32.xlu1 %v1511_v20, %s4888_s19  ;;  %1536 = vrot.lane.b32.xlu0 %v1510_v34, %s4888_s19 }
 0x207   :  { %1540 = vrot.lane.b32.xlu2 %v1512_v6, %s4888_s19  ;;  %v1569_v6 = vmul.f32 %v1564_v11, %v6087_v22 }
 0x208   :  { %v6138_v56 = vpop.permute.xlu1 %1236  ;;  %v6140_v43 = vpop.permute.xlu0 %1234 }
 0x209   :  { %v6143_v15 = vpop.permute.xlu2 %1297 }
 0x20e   :  { %1585 = vrot.lane.b32.xlu1 %v1565_v21, %s4889_s12  ;;  %1542 = vrot.lane.b32.xlu0 %v1513_v5, %s4888_s19 }
 0x20f   :  { %1587 = vrot.lane.b32.xlu2 %v1566_v44, %s4889_s12  ;;  %v1572_v44 = vmul.f32 %v1564_v11, %v6110_v19 }
 0x210   :  { %v1243_v3 = vpop.permute.xlu1 %1242  ;;  %v6150_v20 = vpop.permute.xlu0 %1240 }
 0x211   :  { %v1264_v34 = vadd.f32 %v1243_v3, %v1203_v12  ;;  %v1304_v53 = vpop.permute.xlu2 %1303 }
 0x213   :  { %v1325_v48 = vadd.f32 %v1304_v53, %v1264_v34  ;;  %v1574_v34 = vmul.f32 %v1564_v11, %v1481_v30  ;;  %v1573_v53 = vmul.f32 %v1564_v11, %v6122_v31  ;;  %v1109_v11 = vadd.f32 %v6034_v60, %v5894_v35 }
 0x215   :  { %v6159_v52 = vadd.f32 %v1338_v32, %v1325_v48  ;;  %v1106_v32 = vadd.f32 %v6018_v33, %v5876_v13 }
 0x216   :  { %1591 = vrot.lane.b32.xlu1 %v1568_v45, %s4889_s12  ;;  %1589 = vrot.lane.b32.xlu0 %v1567_v24, %s4889_s12 }
 0x217   :  { %1593 = vrot.lane.b32.xlu2 %v1569_v6, %s4889_s12  ;;  %v1167_v48 = vadd.f32 %v6052_v25, %v1106_v32  ;;  %v1188_v6 = vmul.f32 %v5986_v41, %v5790_v36  ;;  %v1170_v25 = vadd.f32 %v6069_v39, %v1109_v11  ;;  %v1333_v36 = vmul.f32 %v5966_v63, %v6152_v9 }
 0x218   :  { %v1290_v38 = vpop.permute.xlu1 %1289  ;;  %v1288_v21 = vpop.permute.xlu0 %1287  ;;  %v1336_v39 = vmul.f32 %v5853_v42, %v6152_v9 }
 0x219   :  { %v1374_v5 = vpop.permute.xlu2 %1373  ;;  %v1198_v30 = vadd.f32 %v1188_v6, %v1167_v48  ;;  %v6182_v21 = vstv %s4661_s8  ;;  %s4675_s8 = sld [smem:[#allocation12 + $0x180]] }
 0x21a   :  { %v1191_v5 = vmul.f32 %v5986_v41, %v5825_v49  ;;  %v1486_v6 = vmul.f32 %v6182_v21, %v6092_v17 }
 0x21b   :  { %v1259_v33 = vadd.f32 %v6056_v7, %v1198_v30 }
 0x21e   :  { %1597 = vrot.lane.b32.xlu1 %v1571_v51, %s4889_s12  ;;  %1595 = vrot.lane.b32.xlu0 %v1570_v61, %s4889_s12 }
 0x21f   :  { %1599 = vrot.lane.b32.xlu2 %v1572_v44, %s4889_s12 }
 0x220   :  { %v1296_v46 = vpop.permute.xlu1 %1295  ;;  %v1294_v12 = vpop.permute.xlu0 %1293 }
 0x221   :  { %v6170_v3 = vpop.permute.xlu2 %1379  ;;  %v1320_v44 = vadd.f32 %v1294_v12, %v1259_v33 }
 0x226   :  { %1603 = vrot.lane.b32.xlu1 %v1574_v34, %s4889_s12  ;;  %1601 = vrot.lane.b32.xlu0 %v1573_v53, %s4889_s12  ;;  %v1201_v34 = vadd.f32 %v1191_v5, %v1170_v25  ;;  %v1343_v53 = vadd.f32 %v1333_v36, %v1320_v44 }
 0x228   :  { %v1302_v45 = vpop.permute.xlu1 %1301  ;;  %v1300_v24 = vpop.permute.xlu0 %1299  ;;  %v1262_v35 = vadd.f32 %v6078_v8, %v1201_v34  ;;  %v1489_v8 = vmul.f32 %v6182_v21, %v6115_v58  ;;  %v1260_v58 = vadd.f32 %v6140_v43, %v6029_v50 }
 0x229   :  { %v6180_v38 = vpop.permute.xlu2 %1385 }
 0x22a   :  { %v1323_v7 = vadd.f32 %v1300_v24, %v1262_v35 }
 0x22c   :  { %v1346_v63 = vadd.f32 %v1336_v39, %v1323_v7  ;;  %v1334_v7 = vmul.f32 %v5980_v57, %v6152_v9 }
 0x230   :  { %v1372_v51 = vpop.permute.xlu1 %1371  ;;  %v1306_v13 = vpop.permute.xlu0 %1305 }
 0x231   :  { %v1433_v61 = vpop.permute.xlu2 %1432 }
 0x238   :  { %v1378_v32 = vpop.permute.xlu1 %1377  ;;  %v6192_v48 = vpop.permute.xlu0 %1375 }
 0x239   :  { %v1404_v60 = vadd.f32 %v1378_v32, %v1343_v53  ;;  %v1439_v49 = vpop.permute.xlu2 %1438 }
 0x23b   :  { %v1465_v30 = vadd.f32 %v1439_v49, %v1404_v60  ;;  %v952_v49 = vadd.f32 %v5857_v28, %v5664_v40  ;;  %v955_v40 = vadd.f32 %v5882_v62, %v5700_v4 }
 0x23d   :  { %v6199_v12 = vadd.f32 %v1486_v6, %v1465_v30  ;;  %v1321_v6 = vadd.f32 %v1296_v46, %v1260_v58  ;;  %v1013_v39 = vadd.f32 %v5913_v54, %v952_v49  ;;  %v1337_v54 = vmul.f32 %v6001_v2, %v6152_v9 }
 0x23e   :  { %v1187_v2 = vmul.f32 %v5986_v41, %v5771_v18 }
 0x23f   :  { %v1344_v43 = vadd.f32 %v1334_v7, %v1321_v6 }
 0x240   :  { %v1384_v11 = vpop.permute.xlu1 %1383  ;;  %v6201_v5 = vpop.permute.xlu0 %1381 }
 0x241   :  { %v1407_v51 = vadd.f32 %v1384_v11, %v1346_v63  ;;  %v1445_v13 = vpop.permute.xlu2 %1444  ;;  %v4805_v63 = vld [vmem:[%s8099_s0 + $0x16] sm:$0xff]  ;;  %v1405_v46 = vadd.f32 %v6170_v3, %v1344_v43 }
 0x242   :  { %v1034_v50 = vmul.f32 %v4805_v63, %v5806_v37  ;;  %v1190_v63 = vmul.f32 %v5986_v41, %v5813_v10  ;;  %v4807_v10 = vld [vmem:[%s8099_s0 + $0x30] sm:$0xff] }
 0x243   :  { %v1468_v33 = vadd.f32 %v1445_v13, %v1407_v51  ;;  %v1263_v51 = vadd.f32 %v6150_v20, %v6041_v59  ;;  %v1487_v20 = vmul.f32 %v6182_v21, %v6087_v22 }
 0x244   :  { %v1044_v11 = vadd.f32 %v1034_v50, %v1013_v39  ;;  %v1332_v50 = vmul.f32 %v5973_v23, %v6152_v9  ;;  %v1335_v23 = vmul.f32 %v4807_v10, %v6152_v9  ;;  %v1488_v9 = vmul.f32 %v6182_v21, %v6097_v16 }
 0x245   :  { %v6205_v25 = vadd.f32 %v1489_v8, %v1468_v33  ;;  %v1324_v13 = vadd.f32 %v1302_v45, %v1263_v51  ;;  %v1016_v33 = vadd.f32 %v5931_v1, %v955_v40 }
 0x246   :  { %v1105_v4 = vadd.f32 %v5915_v14, %v1044_v11 }
 0x247   :  { %v1347_v45 = vadd.f32 %v1337_v54, %v1324_v13 }
 0x248   :  { %v1390_v17 = vpop.permute.xlu1 %1389  ;;  %v6207_v24 = vpop.permute.xlu0 %1387  ;;  %v1166_v3 = vadd.f32 %v6054_v0, %v1105_v4  ;;  %v1490_v0 = vmul.f32 %v6182_v21, %v6110_v19  ;;  %v1491_v4 = vmul.f32 %v6182_v21, %v6122_v31 }
 0x249   :  { %v1451_v61 = vpop.permute.xlu2 %1450  ;;  %v4806_v17 = vld [vmem:[%s8099_s0 + $0x2e] sm:$0xff]  ;;  %v1409_v16 = vadd.f32 %v6207_v24, %v6159_v52  ;;  %s4664_s0 = sld [smem:[#allocation12 + $0x1]] }
 0x24a   :  { %v1037_v59 = vmul.f32 %v4806_v17, %v5806_v37  ;;  %v1197_v49 = vadd.f32 %v1187_v2, %v1166_v3  ;;  %v1408_v37 = vadd.f32 %v6180_v38, %v1347_v45 }
 0x24c   :  { %v1047_v1 = vadd.f32 %v1037_v59, %v1016_v33 }
 0x24e   :  { %v1108_v14 = vadd.f32 %v5933_v47, %v1047_v1 }
 0x250   :  { %v6209_v44 = vpop.permute.xlu1 %1436  ;;  %v1435_v42 = vpop.permute.xlu0 %1434  ;;  %v1169_v18 = vadd.f32 %v6071_v27, %v1108_v14 }
 0x251   :  { %v6211_v36 = vpop.permute.xlu2 %1528 }
 0x258   :  { %v6213_v34 = vpop.permute.xlu1 %1442  ;;  %v1441_v53 = vpop.permute.xlu0 %1440 }
 0x259   :  { %v6215_v32 = vpop.permute.xlu2 %1534  ;;  %v1466_v62 = vadd.f32 %v1441_v53, %v1405_v46  ;;  %v1258_v53 = vadd.f32 %v6117_v55, %v1197_v49 }
 0x25b   :  { %v1497_v61 = vadd.f32 %v1487_v20, %v1466_v62  ;;  %v1319_v38 = vadd.f32 %v6127_v26, %v1258_v53 }
 0x25d   :  { %v1342_v40 = vadd.f32 %v1332_v50, %v1319_v38  ;;  %v1717_v38 = vlaneseq }
 0x25f   :  { %v6310_v50 = vshrl.u32 %v1717_v38, 7 }
 0x260   :  { %v6219_v35 = vpop.permute.xlu1 %1448  ;;  %v1447_v60 = vpop.permute.xlu0 %1446 }
 0x261   :  { %v6225_v30 = vpop.permute.xlu2 %1540  ;;  %v1469_v22 = vadd.f32 %v1447_v60, %v1408_v37  ;;  %v1200_v60 = vadd.f32 %v1190_v63, %v1169_v18 }
 0x263   :  { %v1500_v47 = vadd.f32 %v1490_v0, %v1469_v22  ;;  %v1261_v19 = vadd.f32 %v6138_v56, %v1200_v60  ;;  %v6316_v60 = vstv %s4664_s0  ;;  %s4689_s0 = sld [smem:[#allocation12 + $0x302]] }
 0x265   :  { %v1322_v41 = vadd.f32 %v6143_v15, %v1261_v19 }
 0x267   :  { %v1345_v13 = vadd.f32 %v1335_v23, %v1322_v41 }
 0x268   :  { %v1527_v28 = vpop.permute.xlu1 %1526  ;;  %v1525_v57 = vpop.permute.xlu0 %1524 }
 0x269   :  { %v1588_v8 = vpop.permute.xlu2 %1587  ;;  %v1403_v28 = vadd.f32 %v6192_v48, %v1342_v40  ;;  %v1485_v57 = vmul.f32 %v6182_v21, %v6076_v29  ;;  %v1406_v48 = vadd.f32 %v6201_v5, %v1345_v13 }
 0x26b   :  { %v1464_v26 = vadd.f32 %v6209_v44, %v1403_v28  ;;  %v1467_v33 = vadd.f32 %v6213_v34, %v1406_v48  ;;  %v4890_v44 = vmov 0.0   ;;  %v1470_v34 = vadd.f32 %v6219_v35, %v1409_v16 }
 0x26c   :  { %1795 = vst.msk [vmem:[#allocation3 + $0x8] sm:$0xff] %vm1793_vm1, %v4890_v44 }
 0x26d   :  { %v1495_v54 = vadd.f32 %v1485_v57, %v1464_v26  ;;  %1794 = vst.msk [vmem:[#allocation3] sm:$0xff] %vm1793_vm1, %v4890_v44 }
 0x26e   :  { %1802 = vst.msk [vmem:[#allocation3 + $0x40] sm:$0xff] %vm1793_vm1, %v4890_v44 }
 0x26f   :  { %v1556_v8 = vadd.f32 %v6211_v36, %v1495_v54  ;;  %v1498_v36 = vadd.f32 %v1488_v9, %v1467_v33  ;;  %1804 = vst.msk [vmem:[#allocation3 + $0x48] sm:$0x3f] %vm1803_vm11, %v4890_v44  ;;  %vm4625_vm11 = vcmask 760832  }
 0x270   :  { %v1533_v42 = vpop.permute.xlu1 %1532  ;;  %v1531_v58 = vpop.permute.xlu0 %1530  ;;  %3656 = vst.msk [vmem:[#allocation5] sm:$0xff] %vm3655_vm13, %v4890_v44 }
 0x271   :  { %v1558_v6 = vadd.f32 %v1533_v42, %v1497_v61  ;;  %v1594_v7 = vpop.permute.xlu2 %1593  ;;  %v1557_v15 = vadd.f32 %v1531_v58, %v6199_v12  ;;  %v1559_v12 = vadd.f32 %v6215_v32, %v1498_v36  ;;  %v1501_v42 = vadd.f32 %v1491_v4, %v1470_v34  ;;  %3662 = vst.msk [vmem:[#allocation5 + $0x30] sm:$0xff] %vm3655_vm13, %v4890_v44 }
 0x273   :  { %v1619_v39 = vadd.f32 %v1594_v7, %v1558_v6  ;;  %v1562_v31 = vadd.f32 %v6225_v30, %v1501_v42  ;;  %v6328_v28 = vld [vmem:[#allocation3 + $0x8] sm:$0xff] }
 0x274   :  { %v1874_v10 = vmul.f32 %v6316_v60, %v6328_v28 }
 0x275   :  { %1630 = vst.msk [vmem:[#allocation2 + $0x20] sm:$0xff] %vm1625_vm0, %v1619_v39 }
 0x278   :  { %v1539_v43 = vpop.permute.xlu1 %1538  ;;  %v1537_v55 = vpop.permute.xlu0 %1536 }
 0x279   :  { %v1561_v11 = vadd.f32 %v1539_v43, %v1500_v47  ;;  %v1600_v51 = vpop.permute.xlu2 %1599  ;;  %v1560_v62 = vadd.f32 %v1537_v55, %v6205_v25  ;;  %v1729_v47 = vand.u32 127, %v1717_v38  ;;  %v1720_v43 = vadd.s32 16, %v6310_v50 }
 0x27b   :  { %v1622_v27 = vadd.f32 %v1600_v51, %v1561_v11  ;;  %v6313_v55 = vand.u32 63, %v1729_v47  ;;  %vm1733_vm2 = vcmp.ge.s32.totalorder %v1720_v43, 18  ;;  %v6318_v11 = vld [vmem:[#allocation3] sm:$0xff] }
 0x27c   :  { %v1641_v49 = vld [vmem:[#allocation2 + $0x20] sm:$0xff]  ;;  %v1873_v51 = vmul.f32 %v6316_v60, %v6318_v11  ;;  %v2019_v47 = vld [vmem:[#allocation3 + $0x2] sm:$0xff] }
 0x27d   :  { %1633 = vst.msk [vmem:[#allocation2 + $0x38] sm:$0xff] %vm1625_vm0, %v1622_v27  ;;  %vm1761_vm3 = vcmp.ge.s32.totalorder %v6313_v55, 18  ;;  %vm1772_vm5 = vcmp.le.s32.totalorder %v6313_v55, 22  ;;  %vm3629_vm15 = vcmp.ge.s32.totalorder %v6313_v55, 12 }
 0x27e   :  { %vm1764_vm4 = vmand %vm1733_vm2, %vm1761_vm3 }
 0x27f   :  { %vm1775_vm6 = vmand %vm1764_vm4, %vm1772_vm5 }
 0x280   :  { %v1586_v56 = vpop.permute.xlu1 %1585  ;;  %v1543_v46 = vpop.permute.xlu0 %1542  ;;  %vm6338_vm7 = vmand %vm1761_vm3, %vm1772_vm5 }
 0x284   :  { %v1644_v30 = vld [vmem:[#allocation2 + $0x38] sm:$0xff] }
 0x288   :  { %v1592_v29 = vpop.permute.xlu1 %1591  ;;  %v1590_v17 = vpop.permute.xlu0 %1589 }
 0x289   :  { %v1618_v5 = vadd.f32 %v1592_v29, %v1557_v15  ;;  %v1617_v59 = vadd.f32 %v1590_v17, %v1556_v8  ;;  %v1725_v29 = vadd.s32 56, %v6310_v50 }
 0x28b   :  { %1629 = vst.msk [vmem:[#allocation2 + $0x18] sm:$0xff] %vm1625_vm0, %v1618_v5  ;;  %vm1748_vm8 = vcmp.le.s32.totalorder %v1725_v29, 58 }
 0x28c   :  { %1628 = vst.msk [vmem:[#allocation2 + $0x10] sm:$0xff] %vm1625_vm0, %v1617_v59  ;;  %vm1769_vm9 = vmand %vm1748_vm8, %vm1761_vm3  ;;  %vm4603_vm8 = vcmask 793600  }
 0x28d   :  { %vm1780_vm10 = vmand %vm1769_vm9, %vm1772_vm5  ;;  %vm4605_vm9 = vcmask 791552  }
 0x290   :  { %v1598_v20 = vpop.permute.xlu1 %1597  ;;  %v1596_v3 = vpop.permute.xlu0 %1595 }
 0x291   :  { %v1621_v2 = vadd.f32 %v1598_v20, %v1560_v62  ;;  %v1620_v45 = vadd.f32 %v1596_v3, %v1559_v12 }
 0x292   :  { %v1640_v1 = vld [vmem:[#allocation2 + $0x18] sm:$0xff] }
 0x293   :  { %v1650_v61 = vld [vmem:[#allocation2 + $0x19] sm:$0xff]  ;;  %1632 = vst.msk [vmem:[#allocation2 + $0x30] sm:$0xff] %vm1625_vm0, %v1621_v2  ;;  %v1639_v52 = vld [vmem:[#allocation2 + $0x10] sm:$0xff] }
 0x294   :  { %v6295_v58 = vmax.f32 %v1640_v1, %v1650_v61  ;;  %v1649_v24 = vld [vmem:[#allocation2 + $0x11] sm:$0xff]  ;;  %1631 = vst.msk [vmem:[#allocation2 + $0x28] sm:$0xff] %vm1625_vm0, %v1620_v45 }
 0x295   :  { %v1659_v32 = vmax.f32 %v1639_v52, %v1649_v24  ;;  %v1970_v24 = vstv %s4666_s3  ;;  %s4690_s3 = sld [smem:[#allocation12 + $0x303]] }
 0x296   :  { %1683 = vrot.lane.b32.xlu0 %v6295_v58, %s4888_s19 }
 0x297   :  { %1681 = vrot.lane.b32.xlu2 %v1659_v32, %s4888_s19 }
 0x298   :  { %v1604_v21 = vpop.permute.xlu1 %1603  ;;  %v1602_v25 = vpop.permute.xlu0 %1601 }
 0x299   :  { %v1623_v35 = vadd.f32 %v1602_v25, %v1562_v31 }
 0x29a   :  { %v1643_v37 = vld [vmem:[#allocation2 + $0x30] sm:$0xff] }
 0x29b   :  { %v1653_v6 = vld [vmem:[#allocation2 + $0x31] sm:$0xff]  ;;  %v1651_v7 = vld [vmem:[#allocation2 + $0x21] sm:$0xff]  ;;  %v1652_v22 = vld [vmem:[#allocation2 + $0x29] sm:$0xff]  ;;  %1634 = vst.msk [vmem:[#allocation2 + $0x40] sm:$0xff] %vm1625_vm0, %v1623_v35 }
 0x29c   :  { %v1663_v14 = vmax.f32 %v1643_v37, %v1653_v6  ;;  %v1642_v53 = vld [vmem:[#allocation2 + $0x28] sm:$0xff]  ;;  %v1661_v39 = vmax.f32 %v1641_v49, %v1651_v7 }
 0x29d   :  { %v1662_v0 = vmax.f32 %v1642_v53, %v1652_v22  ;;  %v1971_v53 = vmul.f32 %v1970_v24, %v6318_v11 }
 0x29e   :  { %1689 = vrot.lane.b32.xlu0 %v1663_v14, %s4888_s19  ;;  %1685 = vrot.lane.b32.xlu1 %v1661_v39, %s4888_s19 }
 0x29f   :  { %1687 = vrot.lane.b32.xlu2 %v1662_v0, %s4888_s19 }
 0x2a2   :  { %v1654_v18 = vld [vmem:[#allocation2 + $0x39] sm:$0xff] }
 0x2a3   :  { %v6306_v63 = vmax.f32 %v1644_v30, %v1654_v18 }
 0x2a6   :  { %1691 = vrot.lane.b32.xlu1 %v6306_v63, %s4888_s19  ;;  %1891 = vrot.lane.b32.xlu0 %v1874_v10, %s4889_s12  ;;  %s4665_s19 = sld [smem:[#allocation12 + $0x2]] }
 0x2a7   :  { %1889 = vrot.lane.b32.xlu2 %v1873_v51, %s4889_s12 }
 0x2ac   :  { %v1921_v33 = vstv %s4665_s19  ;;  %s4683_s19 = sld [smem:[#allocation12 + $0x280]] }
 0x2ad   :  { %v1922_v15 = vmul.f32 %v1921_v33, %v6318_v11  ;;  %v1923_v52 = vmul.f32 %v1921_v33, %v6328_v28 }
 0x2f1   :  { %v1682_v19 = vpop.permute.xlu2 %1681 }
 0x2f2   :  { %v1709_v40 = vmax.f32 %v1659_v32, %v1682_v19  ;;  %v1972_v32 = vmul.f32 %v1970_v24, %v6328_v28 }
 0x2f4   :  { %v1785_v27 = vsel %vm1775_vm6, %v1709_v40, 0.0 }
 0x2f5   :  { %1796 = vst.msk [vmem:[#allocation3 + $0x10] sm:$0xff] %vm1793_vm1, %v1785_v27 }
 0x2f9   :  { %v1688_v41 = vpop.permute.xlu2 %1687 }
 0x2fa   :  { %v1712_v26 = vmax.f32 %v1662_v0, %v1688_v41 }
 0x2fc   :  { %v6342_v57 = vld [vmem:[#allocation3 + $0x10] sm:$0xff]  ;;  %v1788_v56 = vsel %vm6338_vm7, %v1712_v26, 0.0 }
 0x2fd   :  { %1799 = vst.msk [vmem:[#allocation3 + $0x28] sm:$0xff] %vm1793_vm1, %v1788_v56  ;;  %v1875_v46 = vmul.f32 %v6316_v60, %v6342_v57  ;;  %v1924_v35 = vmul.f32 %v1921_v33, %v6342_v57  ;;  %v1973_v22 = vmul.f32 %v1970_v24, %v6342_v57  ;;  %v6431_v40 = vld [vmem:[#allocation3 + $0xa] sm:$0xff] }
 0x2ff   :  { %1893 = vrot.lane.b32.xlu1 %v1875_v46, %s4889_s12 }
 0x301   :  { %v1890_v29 = vpop.permute.xlu2 %1889 }
 0x304   :  { %v6350_v13 = vld [vmem:[#allocation3 + $0x28] sm:$0xff] }
 0x305   :  { %v1878_v54 = vmul.f32 %v6316_v60, %v6350_v13  ;;  %v1927_v6 = vmul.f32 %v1921_v33, %v6350_v13  ;;  %v1976_v18 = vmul.f32 %v1970_v24, %v6350_v13 }
 0x307   :  { %1899 = vrot.lane.b32.xlu1 %v1878_v54, %s4889_s12 }
 0x308   :  { %v1684_v48 = vpop.permute.xlu0 %1683 }
 0x309   :  { %v1710_v8 = vmax.f32 %v6295_v58, %v1684_v48 }
 0x30b   :  { %v1786_v9 = vsel %vm6338_vm7, %v1710_v8, 0.0  ;;  %v2142_v8 = vstv %s4670_s18  ;;  %s4694_s18 = sld [smem:[#allocation12 + $0x383]] }
 0x30c   :  { %1797 = vst.msk [vmem:[#allocation3 + $0x18] sm:$0xff] %vm1793_vm1, %v1786_v9 }
 0x30f   :  { %1938 = vrot.lane.b32.xlu1 %v1922_v15, %s4891_s1  ;;  %v2144_v15 = vmul.f32 %v2142_v8, %v6431_v40 }
 0x310   :  { %v1690_v17 = vpop.permute.xlu0 %1689  ;;  %v1686_v5 = vpop.permute.xlu1 %1685 }
 0x311   :  { %v1713_v59 = vmax.f32 %v1663_v14, %v1690_v17  ;;  %v1711_v36 = vmax.f32 %v1661_v39, %v1686_v5  ;;  %v2044_v39 = vstv %s4668_s16  ;;  %s4692_s16 = sld [smem:[#allocation12 + $0x381]] }
 0x312   :  { %v2045_v43 = vmul.f32 %v2044_v39, %v2019_v47  ;;  %v2046_v10 = vmul.f32 %v2044_v39, %v6431_v40 }
 0x313   :  { %v6362_v16 = vld [vmem:[#allocation3 + $0x18] sm:$0xff]  ;;  %v1789_v12 = vsel %vm6338_vm7, %v1713_v59, 0.0  ;;  %v1787_v34 = vsel %vm6338_vm7, %v1711_v36, 0.0  ;;  %vm3663_vm7 = vcmask 951296  }
 0x314   :  { %1800 = vst.msk [vmem:[#allocation3 + $0x30] sm:$0xff] %vm1793_vm1, %v1789_v12  ;;  %v1876_v4 = vmul.f32 %v6316_v60, %v6362_v16  ;;  %v1925_v62 = vmul.f32 %v1921_v33, %v6362_v16  ;;  %v6409_v14 = vld [vmem:[#allocation3 + $0x12] sm:$0xff] }
 0x315   :  { %1798 = vst.msk [vmem:[#allocation3 + $0x20] sm:$0xff] %vm1793_vm1, %v1787_v34  ;;  %v2047_v0 = vmul.f32 %v2044_v39, %v6409_v14 }
 0x316   :  { %1895 = vrot.lane.b32.xlu2 %v1876_v4, %s4889_s12  ;;  %3664 = vst.msk [vmem:[#allocation5 + $0x38] sm:$0x3] %vm3663_vm7, %v4890_v44  ;;  %v8018_v44 = vld [vmem:[#allocation5 + $0x30] sm:$0x3f] }
 0x317   :  { %1944 = vrot.lane.b32.xlu1 %v1925_v62, %s4891_s1 }
 0x318   :  { %v1692_v20 = vpop.permute.xlu1 %1691 }
 0x319   :  { %v1714_v3 = vmax.f32 %v6306_v63, %v1692_v20  ;;  %v1974_v63 = vmul.f32 %v1970_v24, %v6362_v16 }
 0x31b   :  { %v6380_v2 = vld [vmem:[#allocation3 + $0x30] sm:$0xff]  ;;  %v1790_v1 = vsel %vm1780_vm10, %v1714_v3, 0.0  ;;  %vm4627_vm10 = vcmask 754688  }
 0x31c   :  { %v6382_v45 = vld [vmem:[#allocation3 + $0x20] sm:$0xff]  ;;  %v1879_v61 = vmul.f32 %v6316_v60, %v6380_v2  ;;  %v1928_v42 = vmul.f32 %v1921_v33, %v6380_v2  ;;  %1801 = vst.msk [vmem:[#allocation3 + $0x38] sm:$0xff] %vm1793_vm1, %v1790_v1  ;;  %v6417_v30 = vld [vmem:[#allocation3 + $0x2a] sm:$0xff]  ;;  %v1977_v51 = vmul.f32 %v1970_v24, %v6380_v2  ;;  %v6472_v1 = vld [vmem:[#allocation3 + $0x14] sm:$0xff]  ;;  %vm3638_vm1 = vcmp.le.s32.totalorder %v6313_v55, 20 }
 0x31d   :  { %v1877_v58 = vmul.f32 %v6316_v60, %v6382_v45  ;;  %v1926_v25 = vmul.f32 %v1921_v33, %v6382_v45  ;;  %v1975_v49 = vmul.f32 %v1970_v24, %v6382_v45  ;;  %v2050_v38 = vmul.f32 %v2044_v39, %v6417_v30  ;;  %v6429_v19 = vld [vmem:[#allocation3 + $0x1a] sm:$0xff]  ;;  %v6441_v26 = vld [vmem:[#allocation3 + $0x22] sm:$0xff]  ;;  %vm7624_vm3 = vmand %vm3629_vm15, %vm3638_vm1 }
 0x31e   :  { %1901 = vrot.lane.b32.xlu2 %v1879_v61, %s4889_s12  ;;  %v2048_v27 = vmul.f32 %v2044_v39, %v6429_v19  ;;  %v2049_v46 = vmul.f32 %v2044_v39, %v6441_v26  ;;  %v2147_v59 = vmul.f32 %v2142_v8, %v6441_v26  ;;  %v2143_v61 = vmul.f32 %v2142_v8, %v2019_v47 }
 0x31f   :  { %1897 = vrot.lane.b32.xlu0 %v1877_v58, %s4889_s12  ;;  %1950 = vrot.lane.b32.xlu1 %v1928_v42, %s4891_s1  ;;  %v2145_v42 = vmul.f32 %v2142_v8, %v6409_v14  ;;  %v6475_v58 = vstv %s4672_s5  ;;  %s4687_s5 = sld [smem:[#allocation12 + $0x300]] }
 0x323   :  { %v1854_v31 = vld [vmem:[#allocation3 + $0x38] sm:$0xf] }
 0x324   :  { %v1880_v21 = vmul.f32 %v6316_v60, %v1854_v31  ;;  %v1929_v37 = vmul.f32 %v1921_v33, %v1854_v31  ;;  %v1978_v7 = vmul.f32 %v1970_v24, %v1854_v31  ;;  %v2093_v60 = vstv %s4669_s17  ;;  %v6439_v41 = vld [vmem:[#allocation3 + $0x32] sm:$0xff]  ;;  %v2026_v48 = vld [vmem:[#allocation3 + $0x3a] sm:$0xf]  ;;  %s4693_s17 = sld [smem:[#allocation12 + $0x382]] }
 0x325   :  { %v2094_v11 = vmul.f32 %v2093_v60, %v2019_v47  ;;  %v2097_v23 = vmul.f32 %v2093_v60, %v6429_v19  ;;  %v2051_v56 = vmul.f32 %v2044_v39, %v6439_v41  ;;  %v2100_v54 = vmul.f32 %v2093_v60, %v6439_v41  ;;  %v6484_v31 = vld [vmem:[#allocation3 + $0x2c] sm:$0xff]  ;;  %v6511_v47 = vld [vmem:[#allocation3 + $0x1c] sm:$0xff] }
 0x326   :  { %1940 = vrot.lane.b32.xlu2 %v1923_v52, %s4891_s1  ;;  %v2095_v33 = vmul.f32 %v2093_v60, %v6431_v40  ;;  %v2052_v9 = vmul.f32 %v2044_v39, %v2026_v48  ;;  %v2098_v17 = vmul.f32 %v2093_v60, %v6441_v26  ;;  %v2096_v5 = vmul.f32 %v2093_v60, %v6409_v14 }
 0x327   :  { %1903 = vrot.lane.b32.xlu0 %v1880_v21, %s4889_s12  ;;  %1989 = vrot.lane.b32.xlu1 %v1972_v32, %s4892_s15  ;;  %v2101_v34 = vmul.f32 %v2093_v60, %v2026_v48  ;;  %v2099_v4 = vmul.f32 %v2093_v60, %v6417_v30  ;;  %v2150_v62 = vmul.f32 %v2142_v8, %v2026_v48  ;;  %v6535_v48 = vld [vmem:[#allocation3 + $0x34] sm:$0xff] }
 0x328   :  { %v2219_v52 = vmul.f32 %v6475_v58, %v6472_v1  ;;  %v2148_v21 = vmul.f32 %v2142_v8, %v6417_v30  ;;  %v2220_v60 = vmul.f32 %v6475_v58, %v6511_v47  ;;  %v2223_v29 = vmul.f32 %v6475_v58, %v6535_v48 }
 0x32e   :  { %1946 = vrot.lane.b32.xlu2 %v1926_v25, %s4891_s1  ;;  %v2146_v25 = vmul.f32 %v2142_v8, %v6429_v19 }
 0x32f   :  { %1942 = vrot.lane.b32.xlu0 %v1924_v35, %s4891_s1  ;;  %1995 = vrot.lane.b32.xlu1 %v1975_v49, %s4892_s15  ;;  %v2222_v35 = vmul.f32 %v6475_v58, %v6484_v31  ;;  %v6493_v49 = vpop.permute.xlu0 %1891 }
 0x336   :  { %1952 = vrot.lane.b32.xlu2 %v1929_v37, %s4891_s1  ;;  %v6495_v37 = vld [vmem:[#allocation3 + $0x4] sm:$0xff] }
 0x337   :  { %1948 = vrot.lane.b32.xlu0 %v1927_v6, %s4891_s1  ;;  %2001 = vrot.lane.b32.xlu1 %v1978_v7, %s4892_s15 }
 0x33e   :  { %1991 = vrot.lane.b32.xlu2 %v1973_v22, %s4892_s15  ;;  %v6501_v22 = vstv %s4673_s20  ;;  %s4696_s20 = sld [smem:[#allocation12 + $0x401]] }
 0x33f   :  { %1987 = vrot.lane.b32.xlu0 %v1971_v53, %s4892_s15  ;;  %2065 = vrot.lane.b32.xlu1 %v2047_v0, %s4889_s12  ;;  %v2217_v53 = vmul.f32 %v6475_v58, %v6495_v37  ;;  %v2266_v39 = vmul.f32 %v6501_v22, %v6495_v37  ;;  %v2149_v0 = vmul.f32 %v2142_v8, %v6439_v41 }
 0x346   :  { %1997 = vrot.lane.b32.xlu2 %v1976_v18, %s4892_s15 }
 0x347   :  { %1993 = vrot.lane.b32.xlu0 %v1974_v63, %s4892_s15  ;;  %2071 = vrot.lane.b32.xlu1 %v2050_v38, %s4889_s12 }
 0x34e   :  { %2061 = vrot.lane.b32.xlu2 %v2045_v43, %s4889_s12  ;;  %v6513_v43 = vld [vmem:[#allocation3 + $0xc] sm:$0xff] }
 0x34f   :  { %1999 = vrot.lane.b32.xlu0 %v1977_v51, %s4892_s15  ;;  %2110 = vrot.lane.b32.xlu1 %v2094_v11, %s4891_s1  ;;  %v6517_v11 = vstv %s1805_s21  ;;  %v2218_v51 = vmul.f32 %v6475_v58, %v6513_v43  ;;  %s4697_s21 = sld [smem:[#allocation12 + $0x402]] }
 0x350   :  { %v1858_v8 = vmul.f32 %v6517_v11, %v6342_v57 }
 0x356   :  { %2067 = vrot.lane.b32.xlu2 %v2048_v27, %s4889_s12  ;;  %v2269_v27 = vmul.f32 %v6501_v22, %v6511_v47 }
 0x357   :  { %2063 = vrot.lane.b32.xlu0 %v2046_v10, %s4889_s12  ;;  %2116 = vrot.lane.b32.xlu1 %v2097_v23, %s4891_s1  ;;  %v1860_v10 = vmul.f32 %v6517_v11, %v6382_v45 }
 0x35e   :  { %2073 = vrot.lane.b32.xlu2 %v2051_v56, %s4889_s12  ;;  %v6531_v56 = vstv %s8103_s4  ;;  %s4676_s4 = sld [smem:[#allocation12 + $0x181]] }
 0x35f   :  { %2069 = vrot.lane.b32.xlu0 %v2049_v46, %s4889_s12  ;;  %2122 = vrot.lane.b32.xlu1 %v2100_v54, %s4891_s1 }
 0x366   :  { %2112 = vrot.lane.b32.xlu2 %v2095_v33, %s4891_s1  ;;  %v1868_v33 = vadd.f32 %v1860_v10, %v6531_v56 }
 0x367   :  { %2075 = vrot.lane.b32.xlu0 %v2052_v9, %s4889_s12  ;;  %2161 = vrot.lane.b32.xlu1 %v2144_v15, %s4892_s15  ;;  %v6540_v9 = vld [vmem:[#allocation3 + $0x24] sm:$0xff] }
 0x36e   :  { %2118 = vrot.lane.b32.xlu2 %v2098_v17, %s4891_s1  ;;  %v2221_v17 = vmul.f32 %v6475_v58, %v6540_v9 }
 0x36f   :  { %2114 = vrot.lane.b32.xlu0 %v2096_v5, %s4891_s1  ;;  %2167 = vrot.lane.b32.xlu1 %v2147_v59, %s4892_s15  ;;  %v2272_v5 = vmul.f32 %v6501_v22, %v6535_v48  ;;  %v1866_v59 = vadd.f32 %v1858_v8, %v6531_v56  ;;  %v1859_v8 = vmul.f32 %v6517_v11, %v6362_v16 }
 0x370   :  { %v6460_v36 = vpop.permute.xlu2 %1895 }
 0x371   :  { %v6462_v12 = vpop.permute.xlu1 %1893 }
 0x376   :  { %2124 = vrot.lane.b32.xlu2 %v2101_v34, %s4891_s1  ;;  %v1915_v34 = vadd.f32 %v6462_v12, %v1866_v59  ;;  %v2271_v59 = vmul.f32 %v6501_v22, %v6484_v31 }
 0x377   :  { %2120 = vrot.lane.b32.xlu0 %v2099_v4, %s4891_s1  ;;  %2173 = vrot.lane.b32.xlu1 %v2150_v62, %s4892_s15 }
 0x378   :  { %v6468_v20 = vpop.permute.xlu2 %1901 }
 0x379   :  { %v6470_v3 = vpop.permute.xlu1 %1899 }
 0x37e   :  { %2163 = vrot.lane.b32.xlu2 %v2145_v42, %s4892_s15 }
 0x37f   :  { %2159 = vrot.lane.b32.xlu0 %v2143_v61, %s4892_s15  ;;  %2237 = vrot.lane.b32.xlu1 %v2219_v52, %s4889_s12  ;;  %v6555_v52 = vstv %s4674_s22  ;;  %s4691_s22 = sld [smem:[#allocation12 + $0x380]] }
 0x380   :  { %v6482_v24 = vpop.permute.xlu2 %1940 }
 0x381   :  { %v1939_v32 = vpop.permute.xlu1 %1938 }
 0x382   :  { %v6557_v32 = vstv %s4667_s25  ;;  %s4701_s25 = sld [smem:[#allocation12 + $0x482]] }
 0x383   :  { %v2030_v12 = vmul.f32 %v6557_v32, %v6409_v14 }
 0x386   :  { %2169 = vrot.lane.b32.xlu2 %v2148_v21, %s4892_s15 }
 0x387   :  { %2165 = vrot.lane.b32.xlu0 %v2146_v25, %s4892_s15  ;;  %2243 = vrot.lane.b32.xlu1 %v2222_v35, %s4889_s12  ;;  %v2198_v35 = vld [vmem:[#allocation3 + $0x3c] sm:$0xf] }
 0x388   :  { %v1947_v6 = vpop.permute.xlu2 %1946 }
 0x389   :  { %v6497_v7 = vpop.permute.xlu1 %1944 }
 0x38e   :  { %2233 = vrot.lane.b32.xlu2 %v2217_v53, %s4889_s12  ;;  %v2032_v53 = vmul.f32 %v6557_v32, %v6441_v26 }
 0x38f   :  { %2171 = vrot.lane.b32.xlu0 %v2149_v0, %s4892_s15  ;;  %2282 = vrot.lane.b32.xlu1 %v2266_v39, %s4891_s1  ;;  %v2267_v39 = vmul.f32 %v6501_v22, %v6513_v43 }
 0x390   :  { %v1953_v18 = vpop.permute.xlu2 %1952 }
 0x391   :  { %v1898_v63 = vpop.permute.xlu0 %1897  ;;  %v6509_v38 = vpop.permute.xlu1 %1950  ;;  %v2224_v18 = vmul.f32 %v6475_v58, %v2198_v35  ;;  %v2268_v58 = vmul.f32 %v6501_v22, %v6472_v1 }
 0x392   :  { %v1917_v15 = vadd.f32 %v1898_v63, %v1868_v33  ;;  %v2316_v63 = vmul.f32 %v6555_v52, %v6513_v43 }
 0x394   :  { %v1966_v4 = vadd.f32 %v1947_v6, %v1917_v15 }
 0x396   :  { %2239 = vrot.lane.b32.xlu2 %v2220_v60, %s4889_s12 }
 0x397   :  { %2235 = vrot.lane.b32.xlu0 %v2218_v51, %s4889_s12  ;;  %2288 = vrot.lane.b32.xlu1 %v2269_v27, %s4891_s1 }
 0x398   :  { %v1992_v23 = vpop.permute.xlu2 %1991 }
 0x399   :  { %v1904_v46 = vpop.permute.xlu0 %1903  ;;  %v6533_v54 = vpop.permute.xlu1 %1989 }
 0x39a   :  { %v2319_v46 = vmul.f32 %v6555_v52, %v6540_v9 }
 0x39e   :  { %2245 = vrot.lane.b32.xlu2 %v2223_v29, %s4889_s12 }
 0x39f   :  { %2241 = vrot.lane.b32.xlu0 %v2221_v17, %s4889_s12  ;;  %2294 = vrot.lane.b32.xlu1 %v2272_v5, %s4891_s1  ;;  %v1867_v17 = vadd.f32 %v1859_v8, %v6531_v56  ;;  %v2273_v5 = vmul.f32 %v6501_v22, %v2198_v35  ;;  %v2034_v8 = vmul.f32 %v6557_v32, %v6439_v41 }
 0x3a0   :  { %v6553_v62 = vpop.permute.xlu2 %1997 }
 0x3a1   :  { %v1943_v61 = vpop.permute.xlu0 %1942  ;;  %v1996_v42 = vpop.permute.xlu1 %1995 }
 0x3a2   :  { %v1964_v21 = vadd.f32 %v1943_v61, %v1915_v34  ;;  %v2015_v25 = vadd.f32 %v1996_v42, %v1966_v4  ;;  %v2322_v34 = vmul.f32 %v6555_v52, %v2198_v35  ;;  %v1916_v4 = vadd.f32 %v6460_v36, %v1867_v17  ;;  %v6610_v35 = vld [vmem:[#allocation3 + $0x16] sm:$0xff]  ;;  %v6632_v17 = vld [vmem:[#allocation3 + $0x2e] sm:$0xff] }
 0x3a3   :  { %v1862_v61 = vmul.f32 %v6517_v11, %v6380_v2 }
 0x3a4   :  { %v2013_v0 = vadd.f32 %v1992_v23, %v1964_v21  ;;  %v6565_v6 = vadd.f32 %v2032_v53, %v2015_v25  ;;  %v2270_v23 = vmul.f32 %v6501_v22, %v6540_v9  ;;  %v1965_v42 = vadd.f32 %v6497_v7, %v1916_v4  ;;  %v6646_v4 = vld [vmem:[#allocation3 + $0x6] sm:$0xff] }
 0x3a5   :  { %v2031_v22 = vmul.f32 %v6557_v32, %v6429_v19  ;;  %v2317_v7 = vmul.f32 %v6555_v52, %v6472_v1 }
 0x3a6   :  { %2284 = vrot.lane.b32.xlu2 %v2267_v39, %s4891_s1  ;;  %v6571_v60 = vadd.f32 %v2030_v12, %v2013_v0  ;;  %v2315_v39 = vmul.f32 %v6555_v52, %v6495_v37  ;;  %v1870_v0 = vadd.f32 %v1862_v61, %v6531_v56  ;;  %v1857_v37 = vmul.f32 %v6517_v11, %v6328_v28 }
 0x3a7   :  { %2247 = vrot.lane.b32.xlu0 %v2224_v18, %s4889_s12  ;;  %2333 = vrot.lane.b32.xlu1 %v2316_v63, %s4892_s15  ;;  %v6619_v18 = vstv %s4676_s4  ;;  %s4695_s4 = sld [smem:[#allocation12 + $0x400]] }
 0x3a8   :  { %v2062_v51 = vpop.permute.xlu2 %2061  ;;  %v2391_v63 = vmul.f32 %v6619_v18, %v6610_v35 }
 0x3a9   :  { %v6575_v27 = vpop.permute.xlu0 %1948  ;;  %v2002_v10 = vpop.permute.xlu1 %2001  ;;  %v1919_v51 = vadd.f32 %v6468_v20, %v1870_v0  ;;  %v1865_v20 = vadd.f32 %v1857_v37, %v6531_v56 }
 0x3ab   :  { %v1968_v10 = vadd.f32 %v6509_v38, %v1919_v51  ;;  %v2318_v38 = vmul.f32 %v6555_v52, %v6511_v47  ;;  %v1914_v61 = vadd.f32 %v6493_v49, %v1865_v20  ;;  %v2029_v49 = vmul.f32 %v6557_v32, %v6431_v40 }
 0x3ae   :  { %2290 = vrot.lane.b32.xlu2 %v2270_v23, %s4891_s1 }
 0x3af   :  { %2286 = vrot.lane.b32.xlu0 %v2268_v58, %s4891_s1  ;;  %2339 = vrot.lane.b32.xlu1 %v2319_v46, %s4892_s15 }
 0x3b0   :  { %v6588_v33 = vpop.permute.xlu2 %2067 }
 0x3b1   :  { %v1988_v15 = vpop.permute.xlu0 %1987  ;;  %v6590_v29 = vpop.permute.xlu1 %2065 }
 0x3b6   :  { %2296 = vrot.lane.b32.xlu2 %v2273_v5, %s4891_s1 }
 0x3b7   :  { %2292 = vrot.lane.b32.xlu0 %v2271_v59, %s4891_s1  ;;  %2345 = vrot.lane.b32.xlu1 %v2322_v34, %s4892_s15  ;;  %v2320_v59 = vmul.f32 %v6555_v52, %v6484_v31  ;;  %v2394_v34 = vmul.f32 %v6619_v18, %v6632_v17 }
 0x3b8   :  { %v6604_v21 = vpop.permute.xlu2 %2073 }
 0x3b9   :  { %v1994_v25 = vpop.permute.xlu0 %1993  ;;  %v6606_v53 = vpop.permute.xlu1 %2071 }
 0x3ba   :  { %v2014_v36 = vadd.f32 %v1994_v25, %v1965_v42 }
 0x3bc   :  { %v6615_v12 = vadd.f32 %v2031_v22, %v2014_v36  ;;  %v2389_v36 = vmul.f32 %v6619_v18, %v6646_v4 }
 0x3be   :  { %2335 = vrot.lane.b32.xlu2 %v2317_v7, %s4892_s15  ;;  %v1963_v7 = vadd.f32 %v6482_v24, %v1914_v61  ;;  %v6668_v24 = vld [vmem:[#allocation3 + $0x1e] sm:$0xff] }
 0x3bf   :  { %2331 = vrot.lane.b32.xlu0 %v2315_v39, %s4892_s15  ;;  %2409 = vrot.lane.b32.xlu1 %v2391_v63, %s4889_s12  ;;  %v6653_v39 = vstv %s4677_s26  ;;  %v2321_v63 = vmul.f32 %v6555_v52, %v6535_v48  ;;  %v6670_v52 = vld [vmem:[#allocation3 + $0xe] sm:$0xff]  ;;  %s4702_s26 = sld [smem:[#allocation12 + $0x483]] }
 0x3c0   :  { %v2113_v23 = vpop.permute.xlu2 %2112  ;;  %v2438_v0 = vmul.f32 %v6653_v39, %v6646_v4  ;;  %v2012_v51 = vadd.f32 %v6533_v54, %v1963_v7  ;;  %v2441_v20 = vmul.f32 %v6653_v39, %v6668_v24 }
 0x3c1   :  { %v2000_v58 = vpop.permute.xlu0 %1999  ;;  %v2111_v46 = vpop.permute.xlu1 %2110 }
 0x3c2   :  { %v2017_v15 = vadd.f32 %v2000_v58, %v1968_v10  ;;  %v2037_v46 = vadd.f32 %v2029_v49, %v2012_v51  ;;  %v6688_v51 = vld [vmem:[#allocation3 + $0x26] sm:$0xff] }
 0x3c4   :  { %v6635_v5 = vadd.f32 %v2034_v8, %v2017_v15  ;;  %v2392_v8 = vmul.f32 %v6619_v18, %v6668_v24  ;;  %v2390_v15 = vmul.f32 %v6619_v18, %v6670_v52 }
 0x3c6   :  { %2341 = vrot.lane.b32.xlu2 %v2320_v59, %s4892_s15  ;;  %v1861_v59 = vmul.f32 %v6517_v11, %v6350_v13 }
 0x3c7   :  { %2337 = vrot.lane.b32.xlu0 %v2318_v38, %s4892_s15  ;;  %2415 = vrot.lane.b32.xlu1 %v2394_v34, %s4889_s12  ;;  %v6683_v38 = vstv %s4671_s27  ;;  %s4699_s27 = sld [smem:[#allocation12 + $0x480]] }
 0x3c8   :  { %v2119_v42 = vpop.permute.xlu2 %2118  ;;  %v1869_v7 = vadd.f32 %v1861_v59, %v6531_v56  ;;  %v2201_v11 = vmul.f32 %v6683_v38, %v6513_v43  ;;  %v6708_v59 = vstv %s4678_s28  ;;  %s4704_s28 = sld [smem:[#allocation14 + $0x2]] }
 0x3c9   :  { %v2064_v25 = vpop.permute.xlu0 %2063  ;;  %v6649_v22 = vpop.permute.xlu1 %2116 }
 0x3ca   :  { %v2086_v54 = vadd.f32 %v2064_v25, %v2037_v46  ;;  %v1918_v49 = vadd.f32 %v6470_v3, %v1869_v7  ;;  %v2087_v3 = vadd.f32 %v6590_v29, %v6571_v60  ;;  %v2204_v7 = vmul.f32 %v6683_v38, %v6540_v9 }
 0x3cb   :  { %v2202_v60 = vmul.f32 %v6683_v38, %v6472_v1  ;;  %v2033_v29 = vmul.f32 %v6557_v32, %v6417_v30 }
 0x3cc   :  { %v2135_v34 = vadd.f32 %v2113_v23, %v2086_v54  ;;  %v2393_v54 = vmul.f32 %v6619_v18, %v6688_v51 }
 0x3ce   :  { %2405 = vrot.lane.b32.xlu2 %v2389_v36, %s4889_s12 }
 0x3cf   :  { %2343 = vrot.lane.b32.xlu0 %v2321_v63, %s4892_s15  ;;  %2454 = vrot.lane.b32.xlu1 %v2438_v0, %s4891_s1  ;;  %v6685_v0 = vld [vmem:[#allocation3 + $0x36] sm:$0xff] }
 0x3d0   :  { %v2125_v37 = vpop.permute.xlu2 %2124  ;;  %v2395_v23 = vmul.f32 %v6619_v18, %v6685_v0  ;;  %v2444_v56 = vmul.f32 %v6653_v39, %v6685_v0 }
 0x3d1   :  { %v2070_v10 = vpop.permute.xlu0 %2069  ;;  %v6666_v58 = vpop.permute.xlu1 %2122 }
 0x3d2   :  { %v2089_v37 = vadd.f32 %v2070_v10, %v6565_v6 }
 0x3d4   :  { %v2138_v6 = vadd.f32 %v2119_v42, %v2089_v37 }
 0x3d6   :  { %2411 = vrot.lane.b32.xlu2 %v2392_v8, %s4889_s12  ;;  %v1967_v8 = vadd.f32 %v6575_v27, %v1918_v49  ;;  %v2370_v27 = vld [vmem:[#allocation3 + $0x3e] sm:$0xf]  ;;  %v2488_v49 = vmul.f32 %v6708_v59, %v6670_v52 }
 0x3d7   :  { %2407 = vrot.lane.b32.xlu0 %v2390_v15, %s4889_s12  ;;  %2460 = vrot.lane.b32.xlu1 %v2441_v20, %s4891_s1 }
 0x3d8   :  { %v2164_v61 = vpop.permute.xlu2 %2163 }
 0x3d9   :  { %v2076_v25 = vpop.permute.xlu0 %2075  ;;  %v2162_v36 = vpop.permute.xlu1 %2161 }
 0x3da   :  { %v2184_v63 = vadd.f32 %v2162_v36, %v2135_v34  ;;  %v2016_v34 = vadd.f32 %v6553_v62, %v1967_v8  ;;  %v2396_v62 = vmul.f32 %v6619_v18, %v2370_v27  ;;  %v2442_v18 = vmul.f32 %v6653_v39, %v6688_v51 }
 0x3dc   :  { %v6696_v46 = vadd.f32 %v2201_v11, %v2184_v63  ;;  %v2439_v63 = vmul.f32 %v6653_v39, %v6670_v52  ;;  %v2041_v37 = vadd.f32 %v2033_v29, %v2016_v34 }
 0x3de   :  { %2417 = vrot.lane.b32.xlu2 %v2395_v23, %s4889_s12  ;;  %v2090_v1 = vadd.f32 %v6606_v53, %v2041_v37  ;;  %v2091_v37 = vadd.f32 %v6604_v21, %v6635_v5  ;;  %v2492_v21 = vmul.f32 %v6708_v59, %v6632_v17  ;;  %v2490_v5 = vmul.f32 %v6708_v59, %v6668_v24 }
 0x3df   :  { %2413 = vrot.lane.b32.xlu0 %v2393_v54, %s4889_s12  ;;  %2466 = vrot.lane.b32.xlu1 %v2444_v56, %s4891_s1 }
 0x3e0   :  { %v2170_v10 = vpop.permute.xlu2 %2169 }
 0x3e1   :  { %v2115_v15 = vpop.permute.xlu0 %2114  ;;  %v2168_v20 = vpop.permute.xlu1 %2167 }
 0x3e2   :  { %v2136_v25 = vadd.f32 %v2115_v15, %v2087_v3  ;;  %v2187_v36 = vadd.f32 %v2168_v20, %v2138_v6  ;;  %v2205_v3 = vmul.f32 %v6683_v38, %v6484_v31  ;;  %v2440_v6 = vmul.f32 %v6653_v39, %v6610_v35 }
 0x3e3   :  { %v2491_v15 = vmul.f32 %v6708_v59, %v6688_v51  ;;  %v2445_v31 = vmul.f32 %v6653_v39, %v2370_v27 }
 0x3e4   :  { %v2185_v42 = vadd.f32 %v2164_v61, %v2136_v25  ;;  %v6719_v11 = vadd.f32 %v2204_v7, %v2187_v36  ;;  %v2443_v25 = vmul.f32 %v6653_v39, %v6632_v17  ;;  %v2494_v36 = vmul.f32 %v6708_v59, %v2370_v27 }
 0x3e5   :  { %v2088_v7 = vadd.f32 %v6588_v33, %v6615_v12  ;;  %v2203_v39 = vmul.f32 %v6683_v38, %v6511_v47  ;;  %v2487_v33 = vmul.f32 %v6708_v59, %v6646_v4  ;;  %v2140_v4 = vadd.f32 %v6666_v58, %v2091_v37 }
 0x3e6   :  { %2456 = vrot.lane.b32.xlu2 %v2439_v63, %s4891_s1  ;;  %v6725_v23 = vadd.f32 %v2202_v60, %v2185_v42 }
 0x3e7   :  { %2419 = vrot.lane.b32.xlu0 %v2396_v62, %s4889_s12  ;;  %2505 = vrot.lane.b32.xlu1 %v2488_v49, %s4892_s15  ;;  %v2137_v63 = vadd.f32 %v6649_v22, %v2088_v7  ;;  %v2489_v62 = vmul.f32 %v6708_v59, %v6610_v35  ;;  %v6769_v49 = vstv %s4680_s29  ;;  %s4893_s29 = smov 120  }
 0x3e8   :  { %v2234_v32 = vpop.permute.xlu2 %2233  ;;  %v2557_v22 = vmul.f32 %v6769_v49, %v6362_v16 }
 0x3e9   :  { %v2121_v61 = vpop.permute.xlu0 %2120  ;;  %v2174_v54 = vpop.permute.xlu1 %2173 }
 0x3ea   :  { %v2139_v56 = vadd.f32 %v2121_v61, %v2090_v1  ;;  %v2206_v54 = vmul.f32 %v6683_v38, %v6535_v48 }
 0x3ec   :  { %v2188_v8 = vadd.f32 %v2170_v10, %v2139_v56 }
 0x3ee   :  { %2462 = vrot.lane.b32.xlu2 %v2442_v18, %s4891_s1  ;;  %v6739_v53 = vadd.f32 %v2205_v3, %v2188_v8  ;;  %v2560_v18 = vmul.f32 %v6769_v49, %v6380_v2 }
 0x3ef   :  { %2458 = vrot.lane.b32.xlu0 %v2440_v6, %s4891_s1  ;;  %2511 = vrot.lane.b32.xlu1 %v2491_v15, %s4892_s15  ;;  %v2555_v6 = vmul.f32 %v6769_v49, %v6328_v28  ;;  %v6796_v15 = vstv %s4681_s30  ;;  %s4706_s30 = sld [smem:[#allocation14 + $0x4]] }
 0x3f0   :  { %v6743_v10 = vpop.permute.xlu2 %2239 }
 0x3f1   :  { %v2160_v20 = vpop.permute.xlu0 %2159  ;;  %v6745_v34 = vpop.permute.xlu1 %2237 }
 0x3f2   :  { %v2604_v20 = vmul.f32 %v6796_v15, %v6328_v28  ;;  %v2556_v28 = vmul.f32 %v6769_v49, %v6342_v57 }
 0x3f6   :  { %2468 = vrot.lane.b32.xlu2 %v2445_v31, %s4891_s1  ;;  %v2493_v31 = vmul.f32 %v6708_v59, %v6685_v0  ;;  %v2607_v59 = vmul.f32 %v6796_v15, %v6382_v45 }
 0x3f7   :  { %2464 = vrot.lane.b32.xlu0 %v2443_v25, %s4891_s1  ;;  %2517 = vrot.lane.b32.xlu1 %v2494_v36, %s4892_s15 }
 0x3f8   :  { %v6757_v60 = vpop.permute.xlu2 %2245 }
 0x3f9   :  { %v2166_v29 = vpop.permute.xlu0 %2165  ;;  %v6759_v42 = vpop.permute.xlu1 %2243 }
 0x3fa   :  { %v2186_v27 = vadd.f32 %v2166_v29, %v2137_v63  ;;  %v2558_v29 = vmul.f32 %v6769_v49, %v6382_v45 }
 0x3fc   :  { %v6765_v12 = vadd.f32 %v2203_v39, %v2186_v27  ;;  %v6817_v39 = vstv %s4675_s8  ;;  %s4707_s8 = sld [smem:[#allocation14 + $0x5]] }
 0x3fe   :  { %2507 = vrot.lane.b32.xlu2 %v2489_v62, %s4892_s15 }
 0x3ff   :  { %2503 = vrot.lane.b32.xlu0 %v2487_v33, %s4892_s15  ;;  %2575 = vrot.lane.b32.xlu1 %v2557_v22, %s4889_s12  ;;  %v6819_v22 = vld [vmem:[#allocation3 + $0x38] sm:$0xff] }
 0x400   :  { %v2285_v1 = vpop.permute.xlu2 %2284 }
 0x401   :  { %v2172_v32 = vpop.permute.xlu0 %2171  ;;  %v2283_v61 = vpop.permute.xlu1 %2282 }
 0x402   :  { %v2189_v56 = vadd.f32 %v2172_v32, %v2140_v4  ;;  %v2373_v4 = vmul.f32 %v6817_v39, %v6670_v52  ;;  %v2561_v61 = vmul.f32 %v6769_v49, %v6819_v22 }
 0x404   :  { %v6781_v8 = vadd.f32 %v2206_v54, %v2189_v56  ;;  %v2610_v56 = vmul.f32 %v6796_v15, %v6819_v22 }
 0x406   :  { %2513 = vrot.lane.b32.xlu2 %v2492_v21, %s4892_s15 }
 0x407   :  { %2509 = vrot.lane.b32.xlu0 %v2490_v5, %s4892_s15  ;;  %2581 = vrot.lane.b32.xlu1 %v2560_v18, %s4889_s12  ;;  %v2536_v18 = vld [vmem:[#allocation3 + $0x40] sm:$0xf] }
 0x408   :  { %v2291_v58 = vpop.permute.xlu2 %2290 }
 0x409   :  { %v2236_v38 = vpop.permute.xlu0 %2235  ;;  %v6792_v3 = vpop.permute.xlu1 %2288 }
 0x40a   :  { %v2258_v63 = vadd.f32 %v2236_v38, %v6696_v46 }
 0x40c   :  { %v2307_v27 = vadd.f32 %v2285_v1, %v2258_v63  ;;  %v2559_v1 = vmul.f32 %v6769_v49, %v6350_v13  ;;  %v2605_v63 = vmul.f32 %v6796_v15, %v6342_v57 }
 0x40e   :  { %2571 = vrot.lane.b32.xlu2 %v2555_v6, %s4889_s12 }
 0x40f   :  { %2515 = vrot.lane.b32.xlu0 %v2493_v31, %s4892_s15  ;;  %2620 = vrot.lane.b32.xlu1 %v2604_v20, %s4891_s1 }
 0x410   :  { %v2297_v25 = vpop.permute.xlu2 %2296 }
 0x411   :  { %v2242_v36 = vpop.permute.xlu0 %2241  ;;  %v6805_v7 = vpop.permute.xlu1 %2294  ;;  %v6837_v25 = vstv %s4682_s2  ;;  %s4894_s2 = smov 116  }
 0x412   :  { %v2261_v32 = vadd.f32 %v2242_v36, %v6719_v11  ;;  %v2259_v11 = vadd.f32 %v6745_v34, %v6725_v23  ;;  %v2376_v36 = vmul.f32 %v6817_v39, %v6688_v51  ;;  %v2374_v23 = vmul.f32 %v6817_v39, %v6610_v35 }
 0x414   :  { %v2310_v21 = vadd.f32 %v2291_v58, %v2261_v32  ;;  %v2654_v58 = vmul.f32 %v6837_v25, %v6342_v57  ;;  %v2377_v57 = vmul.f32 %v6817_v39, %v6632_v17  ;;  %v2657_v32 = vmul.f32 %v6837_v25, %v6350_v13 }
 0x415   :  { %v2611_v17 = vmul.f32 %v6796_v15, %v2536_v18 }
 0x416   :  { %2577 = vrot.lane.b32.xlu2 %v2558_v29, %s4889_s12  ;;  %v2562_v29 = vmul.f32 %v6769_v49, %v2536_v18  ;;  %v2262_v49 = vadd.f32 %v6759_v42, %v6739_v53 }
 0x417   :  { %2573 = vrot.lane.b32.xlu0 %v2556_v28, %s4889_s12  ;;  %2626 = vrot.lane.b32.xlu1 %v2607_v59, %s4891_s1 }
 0x418   :  { %v2336_v33 = vpop.permute.xlu2 %2335 }
 0x419   :  { %v2248_v46 = vpop.permute.xlu0 %2247  ;;  %v2334_v62 = vpop.permute.xlu1 %2333 }
 0x41a   :  { %v2356_v37 = vadd.f32 %v2334_v62, %v2307_v27 }
 0x41c   :  { %v6826_v54 = vadd.f32 %v2373_v4, %v2356_v37  ;;  %v2608_v37 = vmul.f32 %v6796_v15, %v6350_v13  ;;  %v2606_v4 = vmul.f32 %v6796_v15, %v6362_v16  ;;  %v2609_v13 = vmul.f32 %v6796_v15, %v6380_v2 }
 0x41e   :  { %2583 = vrot.lane.b32.xlu2 %v2561_v61, %s4889_s12 }
 0x41f   :  { %2579 = vrot.lane.b32.xlu0 %v2559_v1, %s4889_s12  ;;  %2632 = vrot.lane.b32.xlu1 %v2610_v56, %s4891_s1  ;;  %v2660_v56 = vmul.f32 %v6837_v25, %v2536_v18  ;;  %v2375_v18 = vmul.f32 %v6817_v39, %v6668_v24 }
 0x420   :  { %v2342_v5 = vpop.permute.xlu2 %2341 }
 0x421   :  { %v2287_v38 = vpop.permute.xlu0 %2286  ;;  %v2340_v6 = vpop.permute.xlu1 %2339 }
 0x422   :  { %v2308_v20 = vadd.f32 %v2287_v38, %v2259_v11  ;;  %v2359_v31 = vadd.f32 %v2340_v6, %v2310_v21  ;;  %v2260_v11 = vadd.f32 %v6743_v10, %v6765_v12 }
 0x424   :  { %v2357_v28 = vadd.f32 %v2336_v33, %v2308_v20  ;;  %v6846_v34 = vadd.f32 %v2376_v36, %v2359_v31  ;;  %v2309_v21 = vadd.f32 %v6792_v3, %v2260_v11  ;;  %v4808_v20 = vld [vmem:[#allocation3 + $0x8] sm:$0xff]  ;;  %v2655_v31 = vmul.f32 %v6837_v25, %v6362_v16 }
 0x425   :  { %v2653_v10 = vmul.f32 %v4808_v20, %v6837_v25  ;;  %v6895_v36 = vstv %s4684_s9  ;;  %v2378_v16 = vmul.f32 %v6817_v39, %v6685_v0  ;;  %s4895_s9 = smov 112  }
 0x426   :  { %2622 = vrot.lane.b32.xlu2 %v2605_v63, %s4891_s1  ;;  %v6851_v59 = vadd.f32 %v2374_v23, %v2357_v28  ;;  %v2723_v3 = vmul.f32 %v6895_v36, %v6429_v19  ;;  %v2263_v63 = vadd.f32 %v6757_v60, %v6781_v8  ;;  %v2658_v60 = vmul.f32 %v6837_v25, %v6380_v2 }
 0x427   :  { %2585 = vrot.lane.b32.xlu0 %v2562_v29, %s4889_s12  ;;  %2671 = vrot.lane.b32.xlu1 %v2654_v58, %s4892_s15  ;;  %v2656_v8 = vmul.f32 %v6837_v25, %v6382_v45  ;;  %v2721_v2 = vmul.f32 %v6895_v36, %v6431_v40  ;;  %v2659_v45 = vmul.f32 %v6837_v25, %v6819_v22 }
 0x428   :  { %v2406_v27 = vpop.permute.xlu2 %2405  ;;  %v2312_v29 = vadd.f32 %v6805_v7, %v2263_v63  ;;  %v2724_v25 = vmul.f32 %v6895_v36, %v6441_v26 }
 0x429   :  { %v2293_v33 = vpop.permute.xlu0 %2292  ;;  %v2346_v46 = vpop.permute.xlu1 %2345 }
 0x42a   :  { %v2311_v35 = vadd.f32 %v2293_v33, %v2262_v49  ;;  %v2726_v33 = vmul.f32 %v6895_v36, %v6439_v41 }
 0x42c   :  { %v2360_v62 = vadd.f32 %v2342_v5, %v2311_v35  ;;  %v6922_v35 = vstv %s4685_s10  ;;  %s4896_s10 = smov 108  }
 0x42e   :  { %2628 = vrot.lane.b32.xlu2 %v2608_v37, %s4891_s1  ;;  %v6866_v53 = vadd.f32 %v2377_v57, %v2360_v62  ;;  %v2770_v62 = vmul.f32 %v6922_v35, %v6431_v40  ;;  %v2722_v40 = vmul.f32 %v6895_v36, %v6409_v14 }
 0x42f   :  { %2624 = vrot.lane.b32.xlu0 %v2606_v4, %s4891_s1  ;;  %2677 = vrot.lane.b32.xlu1 %v2657_v32, %s4892_s15 }
 0x430   :  { %v6870_v42 = vpop.permute.xlu2 %2411 }
 0x431   :  { %v2332_v61 = vpop.permute.xlu0 %2331  ;;  %v6872_v1 = vpop.permute.xlu1 %2409 }
 0x432   :  { %v2773_v61 = vmul.f32 %v6922_v35, %v6441_v26 }
 0x436   :  { %2634 = vrot.lane.b32.xlu2 %v2611_v17, %s4891_s1  ;;  %v6947_v17 = vstv %s4679_s11  ;;  %s7645_s11 = sld [smem:[#allocation14 + $0x82]] }
 0x437   :  { %2630 = vrot.lane.b32.xlu0 %v2609_v13, %s4891_s1  ;;  %2683 = vrot.lane.b32.xlu1 %v2660_v56, %s4892_s15 }
 0x438   :  { %v6884_v5 = vpop.permute.xlu2 %2417 }
 0x439   :  { %v2338_v38 = vpop.permute.xlu0 %2337  ;;  %v6886_v6 = vpop.permute.xlu1 %2415 }
 0x43a   :  { %v2358_v15 = vadd.f32 %v2338_v38, %v2309_v21  ;;  %v6949_v21 = vld [vmem:[#allocation3 + $0x3a] sm:$0xff] }
 0x43c   :  { %v6891_v12 = vadd.f32 %v2375_v18, %v2358_v15  ;;  %v6951_v18 = vld [vmem:[#allocation3 + $0x10] sm:$0xff]  ;;  %v2727_v15 = vmul.f32 %v6895_v36, %v6949_v21 }
 0x43d   :  { %v2539_v26 = vmul.f32 %v6951_v18, %v6947_v17 }
 0x43e   :  { %2673 = vrot.lane.b32.xlu2 %v2655_v31, %s4892_s15  ;;  %v2776_v31 = vmul.f32 %v6922_v35, %v6949_v21 }
 0x43f   :  { %2669 = vrot.lane.b32.xlu0 %v2653_v10, %s4892_s15  ;;  %2741 = vrot.lane.b32.xlu1 %v2723_v3, %s4889_s12  ;;  %v2725_v10 = vmul.f32 %v6895_v36, %v6417_v30  ;;  %v2431_v3 = vadd.f32 %v6872_v1, %v6851_v59 }
 0x440   :  { %v2457_v28 = vpop.permute.xlu2 %2456 }
 0x441   :  { %v2344_v23 = vpop.permute.xlu0 %2343  ;;  %v2455_v58 = vpop.permute.xlu1 %2454 }
 0x442   :  { %v2361_v49 = vadd.f32 %v2344_v23, %v2312_v29  ;;  %v2702_v29 = vld [vmem:[#allocation3 + $0x42] sm:$0xf] }
 0x443   :  { %v2728_v30 = vmul.f32 %v6895_v36, %v2702_v29  ;;  %v2434_v36 = vadd.f32 %v6886_v6, %v6866_v53 }
 0x444   :  { %v6907_v27 = vadd.f32 %v2378_v16, %v2361_v49  ;;  %v2771_v49 = vmul.f32 %v6922_v35, %v6409_v14 }
 0x446   :  { %2679 = vrot.lane.b32.xlu2 %v2658_v60, %s4892_s15  ;;  %v6973_v60 = vstv %s4686_s13  ;;  %s7647_s13 = sld [smem:[#allocation14 + $0x81]] }
 0x447   :  { %2675 = vrot.lane.b32.xlu0 %v2656_v8, %s4892_s15  ;;  %2747 = vrot.lane.b32.xlu1 %v2726_v33, %s4889_s12  ;;  %v6975_v8 = vld [vmem:[#allocation3 + $0x18] sm:$0xff]  ;;  %v2820_v59 = vmul.f32 %v6973_v60, %v6409_v14 }
 0x448   :  { %v6918_v7 = vpop.permute.xlu2 %2462  ;;  %v2540_v33 = vmul.f32 %v6975_v8, %v6947_v17 }
 0x449   :  { %v2408_v39 = vpop.permute.xlu0 %2407  ;;  %v6920_v46 = vpop.permute.xlu1 %2460 }
 0x44a   :  { %v2430_v32 = vadd.f32 %v2408_v39, %v6826_v54 }
 0x44c   :  { %v2479_v56 = vadd.f32 %v2457_v28, %v2430_v32  ;;  %v6988_v32 = vld [vmem:[#allocation3 + $0x2a] sm:$0xff] }
 0x44d   :  { %v2774_v14 = vmul.f32 %v6988_v32, %v6922_v35  ;;  %v2823_v53 = vmul.f32 %v6988_v32, %v6973_v60 }
 0x44e   :  { %2737 = vrot.lane.b32.xlu2 %v2721_v2, %s4889_s12 }
 0x44f   :  { %2681 = vrot.lane.b32.xlu0 %v2659_v45, %s4892_s15  ;;  %2786 = vrot.lane.b32.xlu1 %v2770_v62, %s4891_s1 }
 0x450   :  { %v2469_v37 = vpop.permute.xlu2 %2468 }
 0x451   :  { %v6933_v57 = vpop.permute.xlu0 %2413  ;;  %v6935_v4 = vpop.permute.xlu1 %2466 }
 0x456   :  { %2743 = vrot.lane.b32.xlu2 %v2724_v25, %s4889_s12  ;;  %v6992_v25 = vld [vmem:[#allocation3 + $0x30] sm:$0xff] }
 0x457   :  { %2739 = vrot.lane.b32.xlu0 %v2722_v40, %s4889_s12  ;;  %2792 = vrot.lane.b32.xlu1 %v2773_v61, %s4891_s1  ;;  %v2543_v40 = vmul.f32 %v6992_v25, %v6947_v17  ;;  %v2772_v61 = vmul.f32 %v6922_v35, %v6429_v19  ;;  %v2826_v19 = vmul.f32 %v6973_v60, %v2702_v29 }
 0x458   :  { %v2508_v13 = vpop.permute.xlu2 %2507 }
 0x459   :  { %v2420_v54 = vpop.permute.xlu0 %2419  ;;  %v2506_v11 = vpop.permute.xlu1 %2505 }
 0x45a   :  { %v2528_v38 = vadd.f32 %v2506_v11, %v2479_v56  ;;  %v2777_v11 = vmul.f32 %v6922_v35, %v2702_v29 }
 0x45c   :  { %v6957_v20 = vadd.f32 %v2539_v26, %v2528_v38  ;;  %v2775_v38 = vmul.f32 %v6922_v35, %v6439_v41  ;;  %v2432_v26 = vadd.f32 %v6870_v42, %v6891_v12  ;;  %v7029_v12 = vld [vmem:[#allocation3 + $0x1a] sm:$0xff] }
 0x45d   :  { %v2821_v29 = vmul.f32 %v7029_v12, %v6973_v60 }
 0x45e   :  { %2749 = vrot.lane.b32.xlu2 %v2727_v15, %s4889_s12  ;;  %v2481_v15 = vadd.f32 %v6920_v46, %v2432_v26  ;;  %v4815_v46 = vld [vmem:[#allocation3 + $0xa] sm:$0xff] }
 0x45f   :  { %2745 = vrot.lane.b32.xlu0 %v2725_v10, %s4889_s12  ;;  %2798 = vrot.lane.b32.xlu1 %v2776_v31, %s4891_s1 }
 0x460   :  { %v2514_v63 = vpop.permute.xlu2 %2513 }
 0x461   :  { %v2459_v28 = vpop.permute.xlu0 %2458  ;;  %v6968_v23 = vpop.permute.xlu1 %2511 }
 0x462   :  { %v2480_v58 = vadd.f32 %v2459_v28, %v2431_v3  ;;  %v7033_v28 = vstv %s4688_s14  ;;  %s4711_s14 = sld [smem:[#allocation14 + $0x83]] }
 0x464   :  { %v2529_v16 = vadd.f32 %v2508_v13, %v2480_v58  ;;  %v2819_v58 = vmul.f32 %v4815_v46, %v6973_v60 }
 0x466   :  { %2788 = vrot.lane.b32.xlu2 %v2771_v49, %s4891_s1  ;;  %v6982_v1 = vadd.f32 %v2540_v33, %v2529_v16  ;;  %v2435_v16 = vadd.f32 %v6884_v5, %v6907_v27  ;;  %v7052_v27 = vld [vmem:[#allocation3 + $0x22] sm:$0xff] }
 0x467   :  { %2751 = vrot.lane.b32.xlu0 %v2728_v30, %s4889_s12  ;;  %2837 = vrot.lane.b32.xlu1 %v2820_v59, %s4892_s15  ;;  %v2889_v30 = vmul.f32 %v7033_v28, %v6511_v47 }
 0x468   :  { %v2572_v39 = vpop.permute.xlu2 %2571  ;;  %v2484_v49 = vadd.f32 %v6935_v4, %v2435_v16  ;;  %v2822_v4 = vmul.f32 %v7052_v27, %v6973_v60 }
 0x469   :  { %v2465_v2 = vpop.permute.xlu0 %2464  ;;  %v2518_v45 = vpop.permute.xlu1 %2517  ;;  %v2544_v39 = vmul.f32 %v6947_v17, %v6819_v22 }
 0x46a   :  { %v2483_v62 = vadd.f32 %v2465_v2, %v2434_v36  ;;  %v7048_v45 = vld [vmem:[#allocation3 + $0x32] sm:$0xff] }
 0x46b   :  { %v2824_v5 = vmul.f32 %v7048_v45, %v6973_v60 }
 0x46c   :  { %v2532_v37 = vadd.f32 %v2514_v63, %v2483_v62  ;;  %v7023_v63 = vld [vmem:[#allocation3 + $0x20] sm:$0xff]  ;;  %v2892_v62 = vmul.f32 %v7033_v28, %v6535_v48 }
 0x46d   :  { %v2541_v41 = vmul.f32 %v7023_v63, %v6947_v17 }
 0x46e   :  { %2794 = vrot.lane.b32.xlu2 %v2774_v14, %s4891_s1  ;;  %v7001_v6 = vadd.f32 %v2543_v40, %v2532_v37 }
 0x46f   :  { %2790 = vrot.lane.b32.xlu0 %v2772_v61, %s4891_s1  ;;  %2843 = vrot.lane.b32.xlu1 %v2823_v53, %s4892_s15  ;;  %v7063_v61 = vstv %s4689_s0  ;;  %v2887_v53 = vmul.f32 %v7033_v28, %v6513_v43  ;;  %s4713_s0 = sld [smem:[#allocation14 + $0x85]] }
 0x470   :  { %v7005_v56 = vpop.permute.xlu2 %2577  ;;  %v2936_v48 = vmul.f32 %v7063_v61, %v6513_v43  ;;  %v2890_v43 = vmul.f32 %v7033_v28, %v6540_v9 }
 0x471   :  { %v2504_v13 = vpop.permute.xlu0 %2503  ;;  %v7007_v54 = vpop.permute.xlu1 %2575 }
 0x472   :  { %v2825_v13 = vmul.f32 %v6973_v60, %v6949_v21 }
 0x475   :  { %v3870_v55 = vstv %s4713_s0  ;;  %s7812_s0 = sld [smem:[#allocation14 + $0x285]] }
 0x476   :  { %2800 = vrot.lane.b32.xlu2 %v2777_v11, %s4891_s1  ;;  %v2433_v11 = vadd.f32 %v6933_v57, %v6846_v34  ;;  %v2939_v34 = vmul.f32 %v7063_v61, %v6540_v9  ;;  %v7098_v9 = vstv %s4683_s19  ;;  %s4712_s19 = sld [smem:[#allocation14 + $0x84]] }
 0x477   :  { %2796 = vrot.lane.b32.xlu0 %v2775_v38, %s4891_s1  ;;  %2849 = vrot.lane.b32.xlu1 %v2826_v19, %s4892_s15 }
 0x478   :  { %v7019_v10 = vpop.permute.xlu2 %2583 }
 0x479   :  { %v2510_v31 = vpop.permute.xlu0 %2509  ;;  %v7021_v3 = vpop.permute.xlu1 %2581 }
 0x47a   :  { %v2530_v35 = vadd.f32 %v2510_v31, %v2481_v15  ;;  %v2482_v15 = vadd.f32 %v6918_v7, %v2433_v11  ;;  %v7082_v31 = vld [vmem:[#allocation3 + $0x14] sm:$0xff]  ;;  %v7092_v7 = vld [vmem:[#allocation3 + $0x28] sm:$0xff] }
 0x47c   :  { %v7027_v42 = vadd.f32 %v2541_v41, %v2530_v35  ;;  %v2888_v41 = vmul.f32 %v7082_v31, %v7033_v28  ;;  %v2531_v57 = vadd.f32 %v6968_v23, %v2482_v15 }
 0x47e   :  { %2839 = vrot.lane.b32.xlu2 %v2821_v29, %s4892_s15 }
 0x47f   :  { %2835 = vrot.lane.b32.xlu0 %v2819_v58, %s4892_s15  ;;  %2907 = vrot.lane.b32.xlu1 %v2889_v30, %s4889_s12  ;;  %v7096_v30 = vld [vmem:[#allocation3 + $0x3c] sm:$0xff] }
 0x480   :  { %v2623_v33 = vpop.permute.xlu2 %2622 }
 0x481   :  { %v2516_v59 = vpop.permute.xlu0 %2515  ;;  %v2621_v36 = vpop.permute.xlu1 %2620 }
 0x482   :  { %v2533_v2 = vadd.f32 %v2516_v59, %v2484_v49  ;;  %v7100_v49 = vld [vmem:[#allocation3 + $0x12] sm:$0xff] }
 0x483   :  { %v2705_v59 = vmul.f32 %v7100_v49, %v7098_v9 }
 0x484   :  { %v7046_v47 = vadd.f32 %v2544_v39, %v2533_v2  ;;  %v7108_v39 = vld [vmem:[#allocation3 + $0x2c] sm:$0xff] }
 0x485   :  { %v2891_v2 = vmul.f32 %v7108_v39, %v7033_v28 }
 0x486   :  { %2845 = vrot.lane.b32.xlu2 %v2824_v5, %s4892_s15  ;;  %v2942_v5 = vmul.f32 %v7063_v61, %v7096_v30 }
 0x487   :  { %2841 = vrot.lane.b32.xlu0 %v2822_v4, %s4892_s15  ;;  %2913 = vrot.lane.b32.xlu1 %v2892_v62, %s4889_s12  ;;  %v2597_v4 = vadd.f32 %v7007_v54, %v6982_v1  ;;  %v2706_v1 = vmul.f32 %v7029_v12, %v7098_v9 }
 0x488   :  { %v2629_v37 = vpop.permute.xlu2 %2628 }
 0x489   :  { %v2574_v14 = vpop.permute.xlu0 %2573  ;;  %v7061_v40 = vpop.permute.xlu1 %2626 }
 0x48a   :  { %v2596_v60 = vadd.f32 %v2574_v14, %v6957_v20  ;;  %v2542_v20 = vmul.f32 %v7092_v7, %v6947_v17  ;;  %v2893_v17 = vmul.f32 %v7033_v28, %v7096_v30 }
 0x48c   :  { %v2645_v35 = vadd.f32 %v2623_v33, %v2596_v60  ;;  %v2550_v23 = vadd.f32 %v2542_v20, %v2531_v57  ;;  %v7122_v60 = vstv %s4690_s3  ;;  %s4715_s3 = sld [smem:[#allocation14 + $0x101]] }
 0x48e   :  { %2903 = vrot.lane.b32.xlu2 %v2887_v53, %s4889_s12  ;;  %v2868_v53 = vld [vmem:[#allocation3 + $0x44] sm:$0xf] }
 0x48f   :  { %2847 = vrot.lane.b32.xlu0 %v2825_v13, %s4892_s15  ;;  %2952 = vrot.lane.b32.xlu1 %v2936_v48, %s4891_s1  ;;  %v2894_v15 = vmul.f32 %v7033_v28, %v2868_v53  ;;  %v2600_v28 = vadd.f32 %v7021_v3, %v7001_v6 }
 0x490   :  { %v2635_v19 = vpop.permute.xlu2 %2634 }
 0x491   :  { %v2580_v38 = vpop.permute.xlu0 %2579  ;;  %v7076_v26 = vpop.permute.xlu1 %2632 }
 0x492   :  { %v2599_v36 = vadd.f32 %v2580_v38, %v2550_v23  ;;  %v2708_v38 = vmul.f32 %v6988_v32, %v7098_v9  ;;  %v2709_v23 = vmul.f32 %v7048_v45, %v7098_v9 }
 0x494   :  { %v2648_v62 = vadd.f32 %v2629_v37, %v2599_v36  ;;  %v2986_v37 = vmul.f32 %v7082_v31, %v7122_v60  ;;  %v2989_v36 = vmul.f32 %v7108_v39, %v7122_v60 }
 0x496   :  { %2909 = vrot.lane.b32.xlu2 %v2890_v43, %s4889_s12 }
 0x497   :  { %2905 = vrot.lane.b32.xlu0 %v2888_v41, %s4889_s12  ;;  %2958 = vrot.lane.b32.xlu1 %v2939_v34, %s4891_s1  ;;  %v2937_v41 = vmul.f32 %v7082_v31, %v7063_v61 }
 0x498   :  { %v2674_v29 = vpop.permute.xlu2 %2673 }
 0x499   :  { %v2586_v46 = vpop.permute.xlu0 %2585  ;;  %v2672_v58 = vpop.permute.xlu1 %2671 }
 0x49a   :  { %v2694_v16 = vadd.f32 %v2672_v58, %v2645_v35  ;;  %v2940_v58 = vmul.f32 %v7108_v39, %v7063_v61 }
 0x49c   :  { %v7106_v33 = vadd.f32 %v2705_v59, %v2694_v16  ;;  %v7143_v16 = vld [vmem:[#allocation3 + $0x1c] sm:$0xff] }
 0x49d   :  { %v2938_v59 = vmul.f32 %v7143_v16, %v7063_v61 }
 0x49e   :  { %2915 = vrot.lane.b32.xlu2 %v2893_v17, %s4889_s12 }
 0x49f   :  { %2911 = vrot.lane.b32.xlu0 %v2891_v2, %s4889_s12  ;;  %2964 = vrot.lane.b32.xlu1 %v2942_v5, %s4891_s1  ;;  %v2943_v5 = vmul.f32 %v7063_v61, %v2868_v53 }
 0x4a0   :  { %v2680_v14 = vpop.permute.xlu2 %2679 }
 0x4a1   :  { %v2625_v13 = vpop.permute.xlu0 %2624  ;;  %v2678_v48 = vpop.permute.xlu1 %2677 }
 0x4a2   :  { %v2646_v11 = vadd.f32 %v2625_v13, %v2597_v4  ;;  %v2697_v19 = vadd.f32 %v2678_v48, %v2648_v62  ;;  %v2992_v4 = vmul.f32 %v7122_v60, %v2868_v53  ;;  %v7160_v62 = vld [vmem:[#allocation3 + $0x34] sm:$0xff]  ;;  %v2598_v13 = vadd.f32 %v7005_v56, %v7027_v42 }
 0x4a3   :  { %v7178_v56 = vstv %s4692_s16  ;;  %v2987_v42 = vmul.f32 %v7143_v16, %v7122_v60  ;;  %s7692_s16 = sld [smem:[#allocation14 + $0x103]] }
 0x4a4   :  { %v2695_v43 = vadd.f32 %v2674_v29, %v2646_v11  ;;  %v7128_v54 = vadd.f32 %v2708_v38, %v2697_v19  ;;  %v2647_v48 = vadd.f32 %v7061_v40, %v2598_v13  ;;  %v2707_v38 = vmul.f32 %v7052_v27, %v7098_v9 }
 0x4a5   :  { %v3055_v40 = vmul.f32 %v7178_v56, %v6668_v24  ;;  %v3056_v13 = vmul.f32 %v7178_v56, %v6688_v51 }
 0x4a6   :  { %2954 = vrot.lane.b32.xlu2 %v2937_v41, %s4891_s1  ;;  %v7133_v34 = vadd.f32 %v2706_v1, %v2695_v43  ;;  %v4826_v43 = vld [vmem:[#allocation3 + $0xc] sm:$0xff]  ;;  %v2601_v1 = vadd.f32 %v7019_v10, %v7046_v47  ;;  %v2990_v10 = vmul.f32 %v7160_v62, %v7122_v60  ;;  %v7197_v47 = vld [vmem:[#allocation3 + $0x24] sm:$0xff] }
 0x4a7   :  { %2917 = vrot.lane.b32.xlu0 %v2894_v15, %s4889_s12  ;;  %3003 = vrot.lane.b32.xlu1 %v2986_v37, %s4892_s15  ;;  %v2985_v41 = vmul.f32 %v4826_v43, %v7122_v60 }
 0x4a8   :  { %v2738_v57 = vpop.permute.xlu2 %2737  ;;  %v2650_v37 = vadd.f32 %v7076_v26, %v2601_v1  ;;  %v3058_v26 = vmul.f32 %v7178_v56, %v6685_v0  ;;  %v2991_v0 = vmul.f32 %v7122_v60, %v7096_v30 }
 0x4a9   :  { %v2631_v20 = vpop.permute.xlu0 %2630  ;;  %v2684_v35 = vpop.permute.xlu1 %2683 }
 0x4aa   :  { %v2649_v29 = vadd.f32 %v2631_v20, %v2600_v28  ;;  %v2710_v35 = vmul.f32 %v7098_v9, %v6949_v21 }
 0x4ac   :  { %v2698_v46 = vadd.f32 %v2680_v14, %v2649_v29  ;;  %v2941_v14 = vmul.f32 %v7160_v62, %v7063_v61 }
 0x4ae   :  { %2960 = vrot.lane.b32.xlu2 %v2940_v58, %s4891_s1  ;;  %v7150_v6 = vadd.f32 %v2709_v23, %v2698_v46  ;;  %v2988_v46 = vmul.f32 %v7197_v47, %v7122_v60 }
 0x4af   :  { %2956 = vrot.lane.b32.xlu0 %v2938_v59, %s4891_s1  ;;  %3009 = vrot.lane.b32.xlu1 %v2989_v36, %s4892_s15  ;;  %v7209_v59 = vstv %s4693_s17  ;;  %v3053_v36 = vmul.f32 %v7178_v56, %v6670_v52  ;;  %s4716_s17 = sld [smem:[#allocation14 + $0x102]] }
 0x4b0   :  { %v7154_v3 = vpop.permute.xlu2 %2743 }
 0x4b1   :  { %v2670_v17 = vpop.permute.xlu0 %2669  ;;  %v7156_v2 = vpop.permute.xlu1 %2741 }
 0x4b2   :  { %v3102_v17 = vmul.f32 %v7209_v59, %v6670_v52  ;;  %v3105_v52 = vmul.f32 %v7209_v59, %v6688_v51 }
 0x4b6   :  { %2966 = vrot.lane.b32.xlu2 %v2943_v5, %s4891_s1 }
 0x4b7   :  { %2962 = vrot.lane.b32.xlu0 %v2941_v14, %s4891_s1  ;;  %3015 = vrot.lane.b32.xlu1 %v2992_v4, %s4892_s15 }
 0x4b8   :  { %v7170_v11 = vpop.permute.xlu2 %2749 }
 0x4b9   :  { %v2676_v53 = vpop.permute.xlu0 %2675  ;;  %v7172_v19 = vpop.permute.xlu1 %2747 }
 0x4ba   :  { %v2696_v61 = vadd.f32 %v2676_v53, %v2647_v48  ;;  %v7224_v48 = vld [vmem:[#allocation3 + $0x16] sm:$0xff] }
 0x4bb   :  { %v3054_v60 = vmul.f32 %v7224_v48, %v7178_v56 }
 0x4bc   :  { %v7176_v15 = vadd.f32 %v2707_v38, %v2696_v61 }
 0x4be   :  { %3005 = vrot.lane.b32.xlu2 %v2987_v42, %s4892_s15  ;;  %v7233_v42 = vld [vmem:[#allocation3 + $0x3e] sm:$0xff] }
 0x4bf   :  { %3001 = vrot.lane.b32.xlu0 %v2985_v41, %s4892_s15  ;;  %3073 = vrot.lane.b32.xlu1 %v3055_v40, %s4889_s12  ;;  %v3059_v43 = vmul.f32 %v7178_v56, %v7233_v42  ;;  %v7237_v41 = vld [vmem:[#allocation3 + $0x2e] sm:$0xff]  ;;  %v3108_v40 = vmul.f32 %v7209_v59, %v7233_v42 }
 0x4c0   :  { %v2789_v28 = vpop.permute.xlu2 %2788  ;;  %v3057_v51 = vmul.f32 %v7237_v41, %v7178_v56 }
 0x4c1   :  { %v2682_v57 = vpop.permute.xlu0 %2681  ;;  %v2787_v20 = vpop.permute.xlu1 %2786 }
 0x4c2   :  { %v2699_v29 = vadd.f32 %v2682_v57, %v2650_v37  ;;  %v2763_v37 = vadd.f32 %v7156_v2, %v7133_v34  ;;  %v3034_v20 = vld [vmem:[#allocation3 + $0x46] sm:$0xf] }
 0x4c4   :  { %v7193_v24 = vadd.f32 %v2710_v35, %v2699_v29 }
 0x4c6   :  { %3011 = vrot.lane.b32.xlu2 %v2990_v10, %s4892_s15 }
 0x4c7   :  { %3007 = vrot.lane.b32.xlu0 %v2988_v46, %s4892_s15  ;;  %3079 = vrot.lane.b32.xlu1 %v3058_v26, %s4889_s12  ;;  %v3060_v26 = vmul.f32 %v7178_v56, %v3034_v20 }
 0x4c8   :  { %v2795_v9 = vpop.permute.xlu2 %2794 }
 0x4c9   :  { %v2740_v58 = vpop.permute.xlu0 %2739  ;;  %v7207_v23 = vpop.permute.xlu1 %2792 }
 0x4ca   :  { %v2762_v1 = vadd.f32 %v2740_v58, %v7106_v33  ;;  %v3103_v58 = vmul.f32 %v7224_v48, %v7209_v59 }
 0x4cc   :  { %v2811_v46 = vadd.f32 %v2789_v28, %v2762_v1 }
 0x4ce   :  { %3069 = vrot.lane.b32.xlu2 %v3053_v36, %s4889_s12  ;;  %v7250_v36 = vstv %s4694_s18  ;;  %s7699_s18 = sld [smem:[#allocation14]] }
 0x4cf   :  { %3013 = vrot.lane.b32.xlu0 %v2991_v0, %s4892_s15  ;;  %3118 = vrot.lane.b32.xlu1 %v3102_v17, %s4891_s1  ;;  %v7252_v0 = vstv %s4687_s5  ;;  %v3152_v2 = vmul.f32 %v7224_v48, %v7250_v36  ;;  %s4718_s5 = sld [smem:[#allocation14 + $0x104]] }
 0x4d0   :  { %v2801_v5 = vpop.permute.xlu2 %2800  ;;  %v2872_v17 = vmul.f32 %v7143_v16, %v7252_v0  ;;  %v2766_v16 = vadd.f32 %v7172_v19, %v7150_v6  ;;  %v3155_v6 = vmul.f32 %v7237_v41, %v7250_v36 }
 0x4d1   :  { %v2746_v4 = vpop.permute.xlu0 %2745  ;;  %v7220_v14 = vpop.permute.xlu1 %2798  ;;  %v2871_v5 = vmul.f32 %v7082_v31, %v7252_v0 }
 0x4d2   :  { %v2765_v56 = vadd.f32 %v2746_v4, %v7128_v54  ;;  %v3106_v54 = vmul.f32 %v7237_v41, %v7209_v59  ;;  %v2875_v4 = vmul.f32 %v7160_v62, %v7252_v0  ;;  %v2874_v62 = vmul.f32 %v7108_v39, %v7252_v0 }
 0x4d3   :  { %v2764_v39 = vadd.f32 %v7154_v3, %v7176_v15  ;;  %v7315_v3 = vstv %s4696_s20  ;;  %s7863_s20 = sld [smem:[#allocation14 + $0x382]] }
 0x4d6   :  { %3075 = vrot.lane.b32.xlu2 %v3056_v13, %s4889_s12 }
 0x4d7   :  { %3071 = vrot.lane.b32.xlu0 %v3054_v60, %s4889_s12  ;;  %3124 = vrot.lane.b32.xlu1 %v3105_v52, %s4891_s1 }
 0x4d8   :  { %v2840_v53 = vpop.permute.xlu2 %2839 }
 0x4d9   :  { %v2752_v38 = vpop.permute.xlu0 %2751  ;;  %v2838_v61 = vpop.permute.xlu1 %2837 }
 0x4da   :  { %v2860_v34 = vadd.f32 %v2838_v61, %v2811_v46  ;;  %v2814_v61 = vadd.f32 %v2795_v9, %v2765_v56 }
 0x4de   :  { %3081 = vrot.lane.b32.xlu2 %v3059_v43, %s4889_s12 }
 0x4df   :  { %3077 = vrot.lane.b32.xlu0 %v3057_v51, %s4889_s12  ;;  %3130 = vrot.lane.b32.xlu1 %v3108_v40, %s4891_s1  ;;  %v7276_v40 = vld [vmem:[#allocation3 + $0x1e] sm:$0xff] }
 0x4e0   :  { %v2846_v57 = vpop.permute.xlu2 %2845  ;;  %v3104_v31 = vmul.f32 %v7276_v40, %v7209_v59  ;;  %v3153_v15 = vmul.f32 %v7276_v40, %v7250_v36 }
 0x4e1   :  { %v2791_v35 = vpop.permute.xlu0 %2790  ;;  %v2844_v29 = vpop.permute.xlu1 %2843 }
 0x4e2   :  { %v2812_v10 = vadd.f32 %v2791_v35, %v2763_v37  ;;  %v2863_v51 = vadd.f32 %v2844_v29, %v2814_v61  ;;  %v3109_v35 = vmul.f32 %v7209_v59, %v3034_v20  ;;  %v3158_v29 = vmul.f32 %v7250_v36, %v3034_v20 }
 0x4e4   :  { %v2861_v33 = vadd.f32 %v2840_v53, %v2812_v10  ;;  %v7270_v53 = vadd.f32 %v2871_v5, %v2860_v34  ;;  %v7297_v10 = vld [vmem:[#allocation3 + $0x36] sm:$0xff]  ;;  %v2767_v5 = vadd.f32 %v7170_v11, %v7193_v24  ;;  %v7334_v24 = vld [vmem:[#allocation3 + $0x26] sm:$0xff] }
 0x4e5   :  { %v3107_v46 = vmul.f32 %v7297_v10, %v7209_v59  ;;  %v3156_v11 = vmul.f32 %v7297_v10, %v7250_v36 }
 0x4e6   :  { %3120 = vrot.lane.b32.xlu2 %v3103_v58, %s4891_s1  ;;  %v7261_v28 = vadd.f32 %v2872_v17, %v2861_v33  ;;  %v2873_v17 = vmul.f32 %v7197_v47, %v7252_v0  ;;  %v2816_v47 = vadd.f32 %v7220_v14, %v2767_v5  ;;  %v3224_v14 = vmul.f32 %v7315_v3, %v6819_v22  ;;  %v3200_v5 = vld [vmem:[#allocation3 + $0x48] sm:$0xf] }
 0x4e7   :  { %3083 = vrot.lane.b32.xlu0 %v3060_v26, %s4889_s12  ;;  %3169 = vrot.lane.b32.xlu1 %v3152_v2, %s4892_s15  ;;  %v2813_v26 = vadd.f32 %v7207_v23, %v2764_v39  ;;  %v4833_v2 = vld [vmem:[#allocation3 + $0xe] sm:$0xff]  ;;  %v3221_v23 = vmul.f32 %v7023_v63, %v7315_v3 }
 0x4e8   :  { %v2904_v13 = vpop.permute.xlu2 %2903  ;;  %v3151_v56 = vmul.f32 %v4833_v2, %v7250_v36 }
 0x4e9   :  { %v2797_v60 = vpop.permute.xlu0 %2796  ;;  %v2850_v52 = vpop.permute.xlu1 %2849 }
 0x4ea   :  { %v2815_v38 = vadd.f32 %v2797_v60, %v2766_v16  ;;  %v2876_v52 = vmul.f32 %v7252_v0, %v7096_v30 }
 0x4ec   :  { %v2864_v43 = vadd.f32 %v2846_v57, %v2815_v38  ;;  %v7293_v57 = vadd.f32 %v2874_v62, %v2863_v51  ;;  %v3219_v51 = vmul.f32 %v6951_v18, %v7315_v3 }
 0x4ee   :  { %3126 = vrot.lane.b32.xlu2 %v3106_v54, %s4891_s1  ;;  %v7283_v19 = vadd.f32 %v2875_v4, %v2864_v43  ;;  %v3154_v43 = vmul.f32 %v7334_v24, %v7250_v36  ;;  %v7345_v4 = vstv %s4697_s21  ;;  %s7865_s21 = sld [smem:[#allocation14 + $0x381]] }
 0x4ef   :  { %3122 = vrot.lane.b32.xlu0 %v3104_v31, %s4891_s1  ;;  %3175 = vrot.lane.b32.xlu1 %v3155_v6, %s4892_s15  ;;  %v3157_v31 = vmul.f32 %v7250_v36, %v7233_v42  ;;  %v3268_v22 = vmul.f32 %v6951_v18, %v7345_v4  ;;  %v3271_v36 = vmul.f32 %v7092_v7, %v7345_v4 }
 0x4f0   :  { %v7289_v9 = vpop.permute.xlu2 %2909 }
 0x4f1   :  { %v2836_v1 = vpop.permute.xlu0 %2835  ;;  %v7291_v37 = vpop.permute.xlu1 %2907 }
 0x4f6   :  { %3132 = vrot.lane.b32.xlu2 %v3109_v35, %s4891_s1  ;;  %v3222_v35 = vmul.f32 %v7092_v7, %v7315_v3 }
 0x4f7   :  { %3128 = vrot.lane.b32.xlu0 %v3107_v46, %s4891_s1  ;;  %3181 = vrot.lane.b32.xlu1 %v3158_v29, %s4892_s15  ;;  %v3220_v29 = vmul.f32 %v6975_v8, %v7315_v3  ;;  %v7367_v46 = vld [vmem:[#allocation3 + $0x40] sm:$0xff] }
 0x4f8   :  { %v7307_v33 = vpop.permute.xlu2 %2915 }
 0x4f9   :  { %v2842_v20 = vpop.permute.xlu0 %2841  ;;  %v7309_v58 = vpop.permute.xlu1 %2913 }
 0x4fa   :  { %v2862_v59 = vadd.f32 %v2842_v20, %v2813_v26 }
 0x4fc   :  { %v7313_v34 = vadd.f32 %v2873_v17, %v2862_v59  ;;  %v3225_v17 = vmul.f32 %v7315_v3, %v7367_v46  ;;  %v3274_v59 = vmul.f32 %v7345_v4, %v7367_v46 }
 0x4fe   :  { %3171 = vrot.lane.b32.xlu2 %v3153_v15, %s4892_s15  ;;  %v3223_v15 = vmul.f32 %v6992_v25, %v7315_v3 }
 0x4ff   :  { %3167 = vrot.lane.b32.xlu0 %v3151_v56, %s4892_s15  ;;  %3239 = vrot.lane.b32.xlu1 %v3221_v23, %s4889_s12  ;;  %v2929_v56 = vadd.f32 %v7291_v37, %v7261_v28 }
 0x500   :  { %v2955_v16 = vpop.permute.xlu2 %2954 }
 0x501   :  { %v2848_v13 = vpop.permute.xlu0 %2847  ;;  %v2953_v60 = vpop.permute.xlu1 %2952 }
 0x502   :  { %v2865_v38 = vadd.f32 %v2848_v13, %v2816_v47 }
 0x504   :  { %v7330_v61 = vadd.f32 %v2876_v52, %v2865_v38  ;;  %v3226_v38 = vmul.f32 %v7315_v3, %v3200_v5 }
 0x506   :  { %3177 = vrot.lane.b32.xlu2 %v3156_v11, %s4892_s15  ;;  %v7382_v11 = vstv %s4691_s22  ;;  %s7716_s22 = sld [smem:[#allocation14 + $0x181]] }
 0x507   :  { %3173 = vrot.lane.b32.xlu0 %v3154_v43, %s4892_s15  ;;  %3245 = vrot.lane.b32.xlu1 %v3224_v14, %s4889_s12  ;;  %v7384_v14 = vstv %s4698_s23  ;;  %s4719_s23 = sld [smem:[#allocation14 + $0x105]] }
 0x508   :  { %v2961_v30 = vpop.permute.xlu2 %2960  ;;  %v3318_v37 = vmul.f32 %v6975_v8, %v7384_v14 }
 0x509   :  { %v2906_v0 = vpop.permute.xlu0 %2905  ;;  %v7343_v54 = vpop.permute.xlu1 %2958 }
 0x50a   :  { %v2928_v2 = vadd.f32 %v2906_v0, %v7270_v53  ;;  %v3269_v53 = vmul.f32 %v6975_v8, %v7345_v4  ;;  %v3038_v0 = vmul.f32 %v7276_v40, %v7382_v11  ;;  %v2932_v40 = vadd.f32 %v7309_v58, %v7283_v19 }
 0x50b   :  { %v3321_v19 = vmul.f32 %v6992_v25, %v7384_v14 }
 0x50c   :  { %v2977_v52 = vadd.f32 %v2955_v16, %v2928_v2  ;;  %v3324_v2 = vmul.f32 %v7384_v14, %v3200_v5 }
 0x50e   :  { %3235 = vrot.lane.b32.xlu2 %v3219_v51, %s4889_s12  ;;  %v3037_v51 = vmul.f32 %v7224_v48, %v7382_v11  ;;  %v3270_v48 = vmul.f32 %v7023_v63, %v7345_v4 }
 0x50f   :  { %3179 = vrot.lane.b32.xlu0 %v3157_v31, %s4892_s15  ;;  %3284 = vrot.lane.b32.xlu1 %v3268_v22, %s4891_s1 }
 0x510   :  { %v2967_v6 = vpop.permute.xlu2 %2966 }
 0x511   :  { %v2912_v62 = vpop.permute.xlu0 %2911  ;;  %v7356_v1 = vpop.permute.xlu1 %2964 }
 0x512   :  { %v2931_v3 = vadd.f32 %v2912_v62, %v7293_v57  ;;  %v3272_v57 = vmul.f32 %v6992_v25, %v7345_v4  ;;  %v3041_v62 = vmul.f32 %v7297_v10, %v7382_v11 }
 0x516   :  { %3241 = vrot.lane.b32.xlu2 %v3222_v35, %s4889_s12 }
 0x517   :  { %3237 = vrot.lane.b32.xlu0 %v3220_v29, %s4889_s12  ;;  %3290 = vrot.lane.b32.xlu1 %v3271_v36, %s4891_s1  ;;  %v2980_v36 = vadd.f32 %v2961_v30, %v2931_v3  ;;  %v3040_v30 = vmul.f32 %v7237_v41, %v7382_v11  ;;  %v2930_v41 = vadd.f32 %v7289_v9, %v7313_v34  ;;  %v3384_v9 = vstv %s4700_s24  ;;  %s4724_s24 = sld [smem:[#allocation14 + $0x184]] }
 0x518   :  { %v3006_v39 = vpop.permute.xlu2 %3005  ;;  %v3319_v34 = vmul.f32 %v7023_v63, %v7384_v14  ;;  %v3042_v3 = vmul.f32 %v7382_v11, %v7233_v42 }
 0x519   :  { %v2918_v26 = vpop.permute.xlu0 %2917  ;;  %v3004_v20 = vpop.permute.xlu1 %3003 }
 0x51a   :  { %v3026_v28 = vadd.f32 %v3004_v20, %v2977_v52  ;;  %v3039_v52 = vmul.f32 %v7334_v24, %v7382_v11 }
 0x51c   :  { %v7402_v35 = vadd.f32 %v3037_v51, %v3026_v28 }
 0x51e   :  { %3247 = vrot.lane.b32.xlu2 %v3225_v17, %s4889_s12 }
 0x51f   :  { %3243 = vrot.lane.b32.xlu0 %v3223_v15, %s4889_s12  ;;  %3296 = vrot.lane.b32.xlu1 %v3274_v59, %s4891_s1  ;;  %v3275_v15 = vmul.f32 %v7345_v4, %v3200_v5 }
 0x520   :  { %v3012_v23 = vpop.permute.xlu2 %3011 }
 0x521   :  { %v2957_v47 = vpop.permute.xlu0 %2956  ;;  %v3010_v13 = vpop.permute.xlu1 %3009 }
 0x522   :  { %v2978_v60 = vadd.f32 %v2957_v47, %v2929_v56  ;;  %v3029_v26 = vadd.f32 %v3010_v13, %v2980_v36  ;;  %v7427_v56 = vld [vmem:[#allocation3 + $0x38] sm:$0xff]  ;;  %v2979_v47 = vadd.f32 %v7343_v54, %v2930_v41  ;;  %v3387_v54 = vmul.f32 %v7052_v27, %v3384_v9 }
 0x524   :  { %v3027_v43 = vadd.f32 %v3006_v39, %v2978_v60  ;;  %v7423_v59 = vadd.f32 %v3040_v30, %v3029_v26  ;;  %v7489_v26 = vld [vmem:[#allocation3 + $0x42] sm:$0xff] }
 0x526   :  { %3286 = vrot.lane.b32.xlu2 %v3269_v53, %s4891_s1  ;;  %v7393_v16 = vadd.f32 %v3038_v0, %v3027_v43  ;;  %v3317_v43 = vmul.f32 %v6951_v18, %v7384_v14  ;;  %v2933_v53 = vadd.f32 %v7307_v33, %v7330_v61  ;;  %v3322_v33 = vmul.f32 %v7427_v56, %v7384_v14 }
 0x527   :  { %3249 = vrot.lane.b32.xlu0 %v3226_v38, %s4889_s12  ;;  %3335 = vrot.lane.b32.xlu1 %v3318_v37, %s4892_s15  ;;  %v3320_v61 = vmul.f32 %v7092_v7, %v7384_v14 }
 0x528   :  { %v3070_v31 = vpop.permute.xlu2 %3069  ;;  %v2982_v24 = vadd.f32 %v7356_v1, %v2933_v53 }
 0x529   :  { %v2963_v22 = vpop.permute.xlu0 %2962  ;;  %v3016_v6 = vpop.permute.xlu1 %3015  ;;  %v7470_v31 = vstv %s4701_s25  ;;  %s4723_s25 = sld [smem:[#allocation14 + $0x183]] }
 0x52a   :  { %v2981_v29 = vadd.f32 %v2963_v22, %v2932_v40  ;;  %v3390_v40 = vmul.f32 %v3384_v9, %v6949_v21  ;;  %v3323_v22 = vmul.f32 %v7384_v14, %v7367_v46  ;;  %v3385_v6 = vmul.f32 %v7100_v49, %v3384_v9 }
 0x52b   :  { %v3434_v21 = vmul.f32 %v7100_v49, %v7470_v31  ;;  %v3437_v14 = vmul.f32 %v6988_v32, %v7470_v31 }
 0x52c   :  { %v3030_v39 = vadd.f32 %v3012_v23, %v2981_v29  ;;  %v3273_v23 = vmul.f32 %v7427_v56, %v7345_v4 }
 0x52e   :  { %3292 = vrot.lane.b32.xlu2 %v3272_v57, %s4891_s1  ;;  %v7413_v58 = vadd.f32 %v3041_v62, %v3030_v39  ;;  %v3388_v57 = vmul.f32 %v6988_v32, %v3384_v9  ;;  %v3386_v62 = vmul.f32 %v7029_v12, %v3384_v9  ;;  %v3389_v32 = vmul.f32 %v7048_v45, %v3384_v9 }
 0x52f   :  { %3288 = vrot.lane.b32.xlu0 %v3270_v48, %s4891_s1  ;;  %3341 = vrot.lane.b32.xlu1 %v3321_v19, %s4892_s15 }
 0x530   :  { %v7419_v20 = vpop.permute.xlu2 %3075 }
 0x531   :  { %v3002_v10 = vpop.permute.xlu0 %3001  ;;  %v7421_v17 = vpop.permute.xlu1 %3073 }
 0x532   :  { %v3391_v10 = vmul.f32 %v3384_v9, %v7489_v26 }
 0x536   :  { %3298 = vrot.lane.b32.xlu2 %v3275_v15, %s4891_s1  ;;  %v3440_v15 = vmul.f32 %v7470_v31, %v7489_v26 }
 0x537   :  { %3294 = vrot.lane.b32.xlu0 %v3273_v23, %s4891_s1  ;;  %3347 = vrot.lane.b32.xlu1 %v3324_v2, %s4892_s15  ;;  %v3095_v23 = vadd.f32 %v7421_v17, %v7393_v16 }
 0x538   :  { %v7437_v13 = vpop.permute.xlu2 %3081 }
 0x539   :  { %v3008_v5 = vpop.permute.xlu0 %3007  ;;  %v7439_v60 = vpop.permute.xlu1 %3079 }
 0x53a   :  { %v3028_v4 = vadd.f32 %v3008_v5, %v2979_v47  ;;  %v3366_v47 = vld [vmem:[#allocation3 + $0x4a] sm:$0xf] }
 0x53c   :  { %v7443_v38 = vadd.f32 %v3039_v52, %v3028_v4 }
 0x53e   :  { %3337 = vrot.lane.b32.xlu2 %v3319_v34, %s4892_s15 }
 0x53f   :  { %3333 = vrot.lane.b32.xlu0 %v3317_v43, %s4892_s15  ;;  %3405 = vrot.lane.b32.xlu1 %v3387_v54, %s4889_s12  ;;  %v3392_v43 = vmul.f32 %v3384_v9, %v3366_v47  ;;  %v7501_v54 = vstv %s4695_s4  ;;  %s4725_s4 = sld [smem:[#allocation14 + $0x185]] }
 0x540   :  { %v3121_v0 = vpop.permute.xlu2 %3120  ;;  %v3203_v9 = vmul.f32 %v6975_v8, %v7501_v54  ;;  %v3436_v8 = vmul.f32 %v7052_v27, %v7470_v31 }
 0x541   :  { %v3014_v28 = vpop.permute.xlu0 %3013  ;;  %v3119_v37 = vpop.permute.xlu1 %3118 }
 0x542   :  { %v3031_v18 = vadd.f32 %v3014_v28, %v2982_v24  ;;  %v3482_v24 = vstv %s4702_s26  ;;  %v3204_v28 = vmul.f32 %v7023_v63, %v7501_v54  ;;  %s7748_s26 = sld [smem:[#allocation14 + $0x202]] }
 0x543   :  { %v3484_v16 = vmul.f32 %v7029_v12, %v3482_v24 }
 0x544   :  { %v7458_v51 = vadd.f32 %v3042_v3, %v3031_v18 }
 0x546   :  { %3343 = vrot.lane.b32.xlu2 %v3322_v33, %s4892_s15 }
 0x547   :  { %3339 = vrot.lane.b32.xlu0 %v3320_v61, %s4892_s15  ;;  %3411 = vrot.lane.b32.xlu1 %v3390_v40, %s4889_s12 }
 0x548   :  { %v3127_v1 = vpop.permute.xlu2 %3126 }
 0x549   :  { %v3072_v42 = vpop.permute.xlu0 %3071  ;;  %v7468_v11 = vpop.permute.xlu1 %3124 }
 0x54a   :  { %v3094_v2 = vadd.f32 %v3072_v42, %v7402_v35  ;;  %v3435_v35 = vmul.f32 %v7029_v12, %v7470_v31 }
 0x54c   :  { %v3143_v34 = vadd.f32 %v3121_v0, %v3094_v2  ;;  %v3098_v0 = vadd.f32 %v7439_v60, %v7413_v58  ;;  %v3206_v60 = vmul.f32 %v6992_v25, %v7501_v54 }
 0x54e   :  { %3401 = vrot.lane.b32.xlu2 %v3385_v6, %s4889_s12 }
 0x54f   :  { %3345 = vrot.lane.b32.xlu0 %v3323_v22, %s4892_s15  ;;  %3450 = vrot.lane.b32.xlu1 %v3434_v21, %s4891_s1  ;;  %v3207_v22 = vmul.f32 %v7427_v56, %v7501_v54  ;;  %v3487_v21 = vmul.f32 %v7048_v45, %v3482_v24 }
 0x550   :  { %v3133_v29 = vpop.permute.xlu2 %3132 }
 0x551   :  { %v3078_v36 = vpop.permute.xlu0 %3077  ;;  %v7480_v39 = vpop.permute.xlu1 %3130 }
 0x552   :  { %v3097_v3 = vadd.f32 %v3078_v36, %v7423_v59  ;;  %v3438_v59 = vmul.f32 %v7048_v45, %v7470_v31 }
 0x554   :  { %v3146_v40 = vadd.f32 %v3127_v1, %v3097_v3 }
 0x556   :  { %3407 = vrot.lane.b32.xlu2 %v3388_v57, %s4889_s12  ;;  %v3441_v57 = vmul.f32 %v7470_v31, %v3366_v47 }
 0x557   :  { %3403 = vrot.lane.b32.xlu0 %v3386_v62, %s4889_s12  ;;  %3456 = vrot.lane.b32.xlu1 %v3437_v14, %s4891_s1  ;;  %v3490_v62 = vmul.f32 %v3482_v24, %v3366_v47  ;;  %v4837_v14 = vld [vmem:[#allocation3 + $0x3a] sm:$0xff] }
 0x558   :  { %v3172_v48 = vpop.permute.xlu2 %3171  ;;  %v3439_v45 = vmul.f32 %v4837_v14, %v7470_v31  ;;  %v3488_v2 = vmul.f32 %v4837_v14, %v3482_v24 }
 0x559   :  { %v3084_v19 = vpop.permute.xlu0 %3083  ;;  %v3170_v30 = vpop.permute.xlu1 %3169 }
 0x55a   :  { %v3192_v37 = vadd.f32 %v3170_v30, %v3143_v34  ;;  %v3485_v30 = vmul.f32 %v7052_v27, %v3482_v24 }
 0x55c   :  { %v3211_v61 = vadd.f32 %v3203_v9, %v3192_v37 }
 0x55e   :  { %3413 = vrot.lane.b32.xlu2 %v3391_v10, %s4889_s12  ;;  %v3483_v10 = vmul.f32 %v7100_v49, %v3482_v24  ;;  %v3489_v49 = vmul.f32 %v3482_v24, %v7489_v26 }
 0x55f   :  { %3409 = vrot.lane.b32.xlu0 %v3389_v32, %s4889_s12  ;;  %3462 = vrot.lane.b32.xlu1 %v3440_v15, %s4891_s1 }
 0x560   :  { %v3178_v41 = vpop.permute.xlu2 %3177 }
 0x561   :  { %v3123_v5 = vpop.permute.xlu0 %3122  ;;  %v3176_v52 = vpop.permute.xlu1 %3175 }
 0x562   :  { %v3144_v4 = vadd.f32 %v3123_v5, %v3095_v23  ;;  %v3195_v6 = vadd.f32 %v3176_v52, %v3146_v40  ;;  %v4838_v23 = vld [vmem:[#allocation3 + $0x2a] sm:$0xff] }
 0x564   :  { %v3193_v53 = vadd.f32 %v3172_v48, %v3144_v4  ;;  %v3214_v36 = vadd.f32 %v3206_v60, %v3195_v6 }
 0x566   :  { %3452 = vrot.lane.b32.xlu2 %v3435_v35, %s4891_s1  ;;  %v3212_v17 = vadd.f32 %v3204_v28, %v3193_v53 }
 0x567   :  { %3415 = vrot.lane.b32.xlu0 %v3392_v43, %s4889_s12  ;;  %3501 = vrot.lane.b32.xlu1 %v3484_v16, %s4892_s15 }
 0x568   :  { %v3236_v18 = vpop.permute.xlu2 %3235 }
 0x569   :  { %v3129_v63 = vpop.permute.xlu0 %3128  ;;  %v3182_v33 = vpop.permute.xlu1 %3181 }
 0x56a   :  { %v3147_v12 = vadd.f32 %v3129_v63, %v3098_v0  ;;  %v7549_v33 = vstv %s4699_s27  ;;  %s7750_s27 = sld [smem:[#allocation14 + $0x201]] }
 0x56c   :  { %v3196_v42 = vadd.f32 %v3178_v41, %v3147_v12  ;;  %v3486_v41 = vmul.f32 %v4838_v23, %v3482_v24  ;;  %v3370_v12 = vmul.f32 %v7052_v27, %v7549_v33  ;;  %v3373_v27 = vmul.f32 %v4837_v14, %v7549_v33 }
 0x56e   :  { %3458 = vrot.lane.b32.xlu2 %v3438_v59, %s4891_s1  ;;  %v3215_v58 = vadd.f32 %v3207_v22, %v3196_v42  ;;  %v4840_v22 = vld [vmem:[#allocation3 + $0x1a] sm:$0xff] }
 0x56f   :  { %3454 = vrot.lane.b32.xlu0 %v3436_v8, %s4891_s1  ;;  %3507 = vrot.lane.b32.xlu1 %v3487_v21, %s4892_s15  ;;  %v3369_v6 = vmul.f32 %v4840_v22, %v7549_v33 }
 0x570   :  { %v7528_v1 = vpop.permute.xlu2 %3241 }
 0x571   :  { %v3168_v29 = vpop.permute.xlu0 %3167  ;;  %v3240_v56 = vpop.permute.xlu1 %3239 }
 0x572   :  { %v3261_v16 = vadd.f32 %v3240_v56, %v3212_v17  ;;  %v3096_v29 = vadd.f32 %v7419_v20, %v7443_v38 }
 0x576   :  { %3464 = vrot.lane.b32.xlu2 %v3441_v57, %s4891_s1 }
 0x577   :  { %3460 = vrot.lane.b32.xlu0 %v3439_v45, %s4891_s1  ;;  %3513 = vrot.lane.b32.xlu1 %v3490_v62, %s4892_s15  ;;  %v3145_v62 = vadd.f32 %v7468_v11, %v3096_v29 }
 0x578   :  { %v7535_v48 = vpop.permute.xlu2 %3247 }
 0x579   :  { %v3174_v25 = vpop.permute.xlu0 %3173  ;;  %v3246_v19 = vpop.permute.xlu1 %3245 }
 0x57a   :  { %v3264_v8 = vadd.f32 %v3246_v19, %v3215_v58  ;;  %v3205_v19 = vmul.f32 %v7092_v7, %v7501_v54 }
 0x57e   :  { %3503 = vrot.lane.b32.xlu2 %v3485_v30, %s4892_s15 }
 0x57f   :  { %3499 = vrot.lane.b32.xlu0 %v3483_v10, %s4892_s15 }
 0x580   :  { %v3287_v15 = vpop.permute.xlu2 %3286 }
 0x581   :  { %v7541_v31 = vpop.permute.xlu0 %3179  ;;  %v3285_v32 = vpop.permute.xlu1 %3284 }
 0x586   :  { %3509 = vrot.lane.b32.xlu2 %v3488_v2, %s4892_s15 }
 0x587   :  { %3505 = vrot.lane.b32.xlu0 %v3486_v41, %s4892_s15 }
 0x588   :  { %v3293_v47 = vpop.permute.xlu2 %3292 }
 0x589   :  { %v3238_v5 = vpop.permute.xlu0 %3237  ;;  %v3291_v52 = vpop.permute.xlu1 %3290 }
 0x58a   :  { %v3260_v37 = vadd.f32 %v3238_v5, %v3211_v61 }
 0x58c   :  { %v3309_v63 = vadd.f32 %v3287_v15, %v3260_v37  ;;  %v4842_v15 = vld [vmem:[#allocation3 + $0x32] sm:$0xff] }
 0x58d   :  { %v3372_v58 = vmul.f32 %v4842_v15, %v7549_v33 }
 0x58f   :  { %3511 = vrot.lane.b32.xlu0 %v3489_v49, %s4892_s15  ;;  %v3371_v49 = vmul.f32 %v4838_v23, %v7549_v33  ;;  %s7603_s15 = sld [smem:[#allocation14 + $0x1]] }
 0x590   :  { %v3299_v4 = vpop.permute.xlu2 %3298 }
 0x591   :  { %v3244_v34 = vpop.permute.xlu0 %3243  ;;  %v7547_v43 = vpop.permute.xlu1 %3296 }
 0x592   :  { %v3263_v59 = vadd.f32 %v3244_v34, %v3214_v36  ;;  %v3194_v36 = vadd.f32 %v3174_v25, %v3145_v62 }
 0x594   :  { %v3312_v57 = vadd.f32 %v3293_v47, %v3263_v59  ;;  %v3213_v41 = vadd.f32 %v3205_v19, %v3194_v36 }
 0x596   :  { %v3262_v11 = vadd.f32 %v7528_v1, %v3213_v41 }
 0x598   :  { %v3338_v53 = vpop.permute.xlu2 %3337  ;;  %v3311_v47 = vadd.f32 %v3291_v52, %v3262_v11 }
 0x599   :  { %v3250_v35 = vpop.permute.xlu0 %3249  ;;  %v3336_v28 = vpop.permute.xlu1 %3335 }
 0x59a   :  { %v3358_v40 = vadd.f32 %v3336_v28, %v3309_v63 }
 0x59c   :  { %v3377_v60 = vadd.f32 %v3369_v6, %v3358_v40 }
 0x5a0   :  { %v3344_v3 = vpop.permute.xlu2 %3343 }
 0x5a1   :  { %v3289_v9 = vpop.permute.xlu0 %3288  ;;  %v3342_v0 = vpop.permute.xlu1 %3341 }
 0x5a2   :  { %v3310_v18 = vadd.f32 %v3289_v9, %v3261_v16  ;;  %v3361_v30 = vadd.f32 %v3342_v0, %v3312_v57 }
 0x5a4   :  { %v3359_v24 = vadd.f32 %v3338_v53, %v3310_v18  ;;  %v3380_v38 = vadd.f32 %v3372_v58, %v3361_v30 }
 0x5a6   :  { %v3378_v42 = vadd.f32 %v3370_v12, %v3359_v24 }
 0x5a8   :  { %v3402_v61 = vpop.permute.xlu2 %3401 }
 0x5a9   :  { %v3295_v17 = vpop.permute.xlu0 %3294  ;;  %v3348_v21 = vpop.permute.xlu1 %3347 }
 0x5aa   :  { %v3313_v56 = vadd.f32 %v3295_v17, %v3264_v8  ;;  %v3099_v21 = vadd.f32 %v7437_v13, %v7458_v51 }
 0x5ac   :  { %v3362_v45 = vadd.f32 %v3344_v3, %v3313_v56 }
 0x5ae   :  { %v3381_v10 = vadd.f32 %v3373_v27, %v3362_v45 }
 0x5b0   :  { %v7561_v32 = vpop.permute.xlu2 %3407 }
 0x5b1   :  { %v3334_v2 = vpop.permute.xlu0 %3333  ;;  %v3406_v20 = vpop.permute.xlu1 %3405 }
 0x5b2   :  { %v3427_v23 = vadd.f32 %v3406_v20, %v3378_v42  ;;  %v3208_v42 = vmul.f32 %v7501_v54, %v7367_v46 }
 0x5b8   :  { %v7564_v5 = vpop.permute.xlu2 %3413 }
 0x5b9   :  { %v3340_v14 = vpop.permute.xlu0 %3339  ;;  %v3412_v25 = vpop.permute.xlu1 %3411 }
 0x5ba   :  { %v3360_v4 = vadd.f32 %v3340_v14, %v3311_v47  ;;  %v3430_v29 = vadd.f32 %v3412_v25, %v3381_v10  ;;  %v3374_v10 = vmul.f32 %v7549_v33, %v7489_v26 }
 0x5bc   :  { %v3379_v34 = vadd.f32 %v3371_v49, %v3360_v4 }
 0x5be   :  { %v3428_v2 = vadd.f32 %v7561_v32, %v3379_v34 }
 0x5c0   :  { %v3453_v7 = vpop.permute.xlu2 %3452 }
 0x5c1   :  { %v3346_v53 = vpop.permute.xlu0 %3345  ;;  %v3451_v35 = vpop.permute.xlu1 %3450 }
 0x5c8   :  { %v3459_v16 = vpop.permute.xlu2 %3458 }
 0x5c9   :  { %v3404_v28 = vpop.permute.xlu0 %3403  ;;  %v3457_v37 = vpop.permute.xlu1 %3456 }
 0x5ca   :  { %v3426_v0 = vadd.f32 %v3404_v28, %v3377_v60  ;;  %v3148_v60 = vadd.f32 %v7480_v39, %v3099_v21  ;;  %v3746_v28 = vstv %s7603_s15  ;;  %s7758_s15 = sld [smem:[#allocation14 + $0x80]] }
 0x5cc   :  { %v3475_v1 = vadd.f32 %v3453_v7, %v3426_v0  ;;  %v3197_v62 = vadd.f32 %v7541_v31, %v3148_v60  ;;  %v7605_v7 = vld [vmem:[#allocation5] sm:$0xff] }
 0x5ce   :  { %v3216_v58 = vadd.f32 %v3208_v42, %v3197_v62  ;;  %v3831_v42 = vstv %s7645_s11  ;;  %v3818_v62 = vstv %s7647_s13  ;;  %s4735_s11 = sld [smem:[#allocation14 + $0x283]] }
 0x5cf   :  { %s4734_s13 = sld [smem:[#allocation14 + $0x282]] }
 0x5d0   :  { %v3465_v18 = vpop.permute.xlu2 %3464  ;;  %v3265_v46 = vadd.f32 %v7535_v48, %v3216_v58 }
 0x5d1   :  { %v3410_v3 = vpop.permute.xlu0 %3409  ;;  %v3463_v9 = vpop.permute.xlu1 %3462 }
 0x5d2   :  { %v3429_v12 = vadd.f32 %v3410_v3, %v3380_v38  ;;  %v3314_v39 = vadd.f32 %v7547_v43, %v3265_v46  ;;  %v3477_v38 = vadd.f32 %v3457_v37, %v3428_v2  ;;  %v3759_v37 = vstv %s4704_s28  ;;  %s7763_s28 = sld [smem:[#allocation14 + $0x203]] }
 0x5d3   :  { %v3760_v3 = vmul.f32 %v3759_v37, %v7605_v7 }
 0x5d4   :  { %v3478_v59 = vadd.f32 %v3459_v16, %v3429_v12  ;;  %v3363_v19 = vadd.f32 %v3346_v53, %v3314_v39  ;;  %v3747_v16 = vmul.f32 %v3746_v28, %v7605_v7 }
 0x5d6   :  { %v3382_v11 = vadd.f32 %v3374_v10, %v3363_v19  ;;  %v3844_v10 = vstv %s4711_s14  ;;  %s4736_s14 = sld [smem:[#allocation14 + $0x284]] }
 0x5d8   :  { %v3504_v40 = vpop.permute.xlu2 %3503  ;;  %v3431_v48 = vadd.f32 %v7564_v5, %v3382_v11 }
 0x5d9   :  { %v3416_v52 = vpop.permute.xlu0 %3415  ;;  %v3502_v63 = vpop.permute.xlu1 %3501 }
 0x5da   :  { %v3524_v24 = vadd.f32 %v3502_v63, %v3475_v1  ;;  %v3480_v43 = vadd.f32 %v3463_v9, %v3431_v48  ;;  %v1719_v9 = vadd.s32 8, %v6310_v50 }
 0x5dc   :  { %3533 = vst.msk [vmem:[#allocation4 + $0x8] sm:$0xff] %vm3531_vm12, %v3524_v24  ;;  %vm3606_vm14 = vcmp.ge.s32.totalorder %v1719_v9, 12 }
 0x5dd   :  { %vm3631_vm0 = vmand %vm3606_vm14, %vm3629_vm15 }
 0x5de   :  { %vm3640_vm2 = vmand %vm3631_vm0, %vm3638_vm1 }
 0x5e0   :  { %v3510_v27 = vpop.permute.xlu2 %3509 }
 0x5e1   :  { %v3455_v22 = vpop.permute.xlu0 %3454  ;;  %v3508_v6 = vpop.permute.xlu1 %3507 }
 0x5e2   :  { %v3476_v8 = vadd.f32 %v3455_v22, %v3427_v23  ;;  %v3527_v61 = vadd.f32 %v3508_v6, %v3478_v59 }
 0x5e3   :  { %v3542_v36 = vld [vmem:[#allocation4 + $0x8] sm:$0xff] }
 0x5e4   :  { %v3525_v17 = vadd.f32 %v3504_v40, %v3476_v8  ;;  %3536 = vst.msk [vmem:[#allocation4 + $0x20] sm:$0xff] %vm3531_vm12, %v3527_v61  ;;  %v3785_v8 = vstv %s4706_s30  ;;  %v3798_v61 = vstv %s4707_s8  ;;  %s7778_s30 = sld [smem:[#allocation14 + $0x204]] }
 0x5e5   :  { %v3799_v21 = vmul.f32 %v3798_v61, %v7605_v7  ;;  %s4733_s8 = sld [smem:[#allocation14 + $0x281]] }
 0x5e6   :  { %3534 = vst.msk [vmem:[#allocation4 + $0x10] sm:$0xff] %vm3531_vm12, %v3525_v17  ;;  %v3786_v17 = vmul.f32 %v3785_v8, %v7605_v7 }
 0x5e9   :  { %v3461_v56 = vpop.permute.xlu0 %3460  ;;  %v3514_v57 = vpop.permute.xlu1 %3513 }
 0x5ea   :  { %v3479_v45 = vadd.f32 %v3461_v56, %v3430_v29 }
 0x5eb   :  { %v3545_v54 = vld [vmem:[#allocation4 + $0x20] sm:$0xff] }
 0x5ec   :  { %v3528_v30 = vadd.f32 %v3510_v27, %v3479_v45 }
 0x5ed   :  { %v3550_v15 = vld [vmem:[#allocation4 + $0xa] sm:$0xff] }
 0x5ee   :  { %3537 = vst.msk [vmem:[#allocation4 + $0x28] sm:$0xff] %vm3531_vm12, %v3528_v30  ;;  %v3558_v13 = vmax.f32 %v3542_v36, %v3550_v15  ;;  %v3543_v49 = vld [vmem:[#allocation4 + $0x10] sm:$0xff]  ;;  %v1723_v30 = vadd.s32 40, %v6310_v50 }
 0x5f0   :  { %3575 = vrot.lane.b32.xlu2 %v3558_v13, %s4889_s12  ;;  %vm3618_vm4 = vcmp.le.s32.totalorder %v1723_v30, 44 }
 0x5f1   :  { %v3500_v51 = vpop.permute.xlu0 %3499  ;;  %vm3635_vm5 = vmand %vm3618_vm4, %vm3629_vm15 }
 0x5f2   :  { %vm3644_vm6 = vmand %vm3635_vm5, %vm3638_vm1 }
 0x5f5   :  { %v3553_v31 = vld [vmem:[#allocation4 + $0x22] sm:$0xff] }
 0x5f6   :  { %v3561_v20 = vmax.f32 %v3545_v54, %v3553_v31  ;;  %v3546_v5 = vld [vmem:[#allocation4 + $0x28] sm:$0xff] }
 0x5f8   :  { %3581 = vrot.lane.b32.xlu2 %v3561_v20, %s4889_s12 }
 0x5f9   :  { %v3506_v41 = vpop.permute.xlu0 %3505 }
 0x5fa   :  { %v3526_v47 = vadd.f32 %v3506_v41, %v3477_v38  ;;  %v3857_v38 = vstv %s4712_s19  ;;  %s7814_s19 = sld [smem:[#allocation14 + $0x301]] }
 0x5fc   :  { %3535 = vst.msk [vmem:[#allocation4 + $0x18] sm:$0xff] %vm3531_vm12, %v3526_v47 }
 0x601   :  { %v3512_v14 = vpop.permute.xlu0 %3511 }
 0x602   :  { %v3529_v25 = vadd.f32 %v3512_v14, %v3480_v43  ;;  %v3890_v43 = vstv %s4715_s3  ;;  %s7824_s3 = sld [smem:[#allocation14 + $0x302]] }
 0x603   :  { %v3544_v4 = vld [vmem:[#allocation4 + $0x18] sm:$0xff] }
 0x604   :  { %v3552_v26 = vld [vmem:[#allocation4 + $0x1a] sm:$0xff]  ;;  %v3551_v33 = vld [vmem:[#allocation4 + $0x12] sm:$0xff]  ;;  %3538 = vst.msk [vmem:[#allocation4 + $0x30] sm:$0xff] %vm3531_vm12, %v3529_v25 }
 0x605   :  { %v7591_v32 = vmax.f32 %v3544_v4, %v3552_v26  ;;  %v7593_v34 = vmax.f32 %v3543_v49, %v3551_v33  ;;  %v3916_v26 = vstv %s7692_s16  ;;  %v3903_v33 = vstv %s4716_s17  ;;  %s7827_s16 = sld [smem:[#allocation14 + $0x100]] }
 0x606   :  { %s7840_s17 = sld [smem:[#allocation14 + $0x304]] }
 0x607   :  { %3579 = vrot.lane.b32.xlu1 %v7591_v32, %s4889_s12  ;;  %3577 = vrot.lane.b32.xlu0 %v7593_v34, %s4889_s12 }
 0x60b   :  { %v3554_v53 = vld [vmem:[#allocation4 + $0x2a] sm:$0xff] }
 0x60c   :  { %v7599_v35 = vmax.f32 %v3546_v5, %v3554_v53  ;;  %v3741_v53 = vstv %s7699_s18  ;;  %s7844_s18 = sld [smem:[#allocation14 + $0x303]] }
 0x60f   :  { %3583 = vrot.lane.b32.xlu0 %v7599_v35, %s4889_s12  ;;  %3751 = vrot.lane.b32.xlu1 %v3747_v16, %s4891_s1  ;;  %s4705_s12 = sld [smem:[#allocation14 + $0x3]] }
 0x615   :  { %v3772_v12 = vstv %s4705_s12  ;;  %s7776_s12 = sld [smem:[#allocation14 + $0x205]] }
 0x616   :  { %v3773_v60 = vmul.f32 %v3772_v12, %v7605_v7 }
 0x617   :  { %3764 = vrot.lane.b32.xlu0 %v3760_v3, %s4893_s29  ;;  %v3929_v3 = vstv %s4718_s5  ;;  %s7851_s5 = sld [smem:[#allocation14 + $0x305]] }
 0x64a   :  { %v3576_v0 = vpop.permute.xlu2 %3575 }
 0x64b   :  { %v3598_v18 = vmax.f32 %v3558_v13, %v3576_v0 }
 0x64d   :  { %v3648_v1 = vsel %vm3640_vm2, %v3598_v18, 0.0 }
 0x64e   :  { %3657 = vst.msk [vmem:[#allocation5 + $0x8] sm:$0xff] %vm3655_vm13, %v3648_v1 }
 0x652   :  { %v3582_v63 = vpop.permute.xlu2 %3581 }
 0x653   :  { %v3601_v24 = vmax.f32 %v3561_v20, %v3582_v63 }
 0x655   :  { %v3651_v23 = vsel %vm7624_vm3, %v3601_v24, 0.0  ;;  %v7630_v40 = vld [vmem:[#allocation5 + $0x8] sm:$0x3f]  ;;  %v3962_v24 = vstv %s7716_s22  ;;  %s7873_s22 = sld [smem:[#allocation14 + $0x180]] }
 0x656   :  { %3660 = vst.msk [vmem:[#allocation5 + $0x20] sm:$0xff] %vm3655_vm13, %v3651_v23  ;;  %v3774_v59 = vmul.f32 %v3772_v12, %v7630_v40  ;;  %v3761_v22 = vmul.f32 %v3759_v37, %v7630_v40  ;;  %v3748_v6 = vmul.f32 %v3746_v28, %v7630_v40  ;;  %v3800_v29 = vmul.f32 %v3798_v61, %v7630_v40  ;;  %v7653_v57 = vld [vmem:[#allocation5 + $0x4] sm:$0xff] }
 0x657   :  { %v3787_v56 = vmul.f32 %v3785_v8, %v7630_v40  ;;  %v3832_v45 = vmul.f32 %v3831_v42, %v7653_v57  ;;  %v3819_v27 = vmul.f32 %v3818_v62, %v7653_v57  ;;  %v3845_v41 = vmul.f32 %v3844_v10, %v7653_v57  ;;  %v7702_v4 = vld [vmem:[#allocation5 + $0x8] sm:$0xff] }
 0x658   :  { %3779 = vrot.lane.b32.xlu0 %v3774_v59, %s4894_s2  ;;  %3766 = vrot.lane.b32.xlu1 %v3761_v22, %s4893_s29  ;;  %v3871_v11 = vmul.f32 %v3870_v55, %v7653_v57  ;;  %v3858_v47 = vmul.f32 %v3857_v38, %v7653_v57  ;;  %v3904_v5 = vmul.f32 %v3903_v33, %v7702_v4  ;;  %v3738_v28 = vstv %s8105_s6  ;;  %s4722_s6 = sld [smem:[#allocation14 + $0x182]] }
 0x659   :  { %3753 = vrot.lane.b32.xlu2 %v3748_v6, %s4891_s1  ;;  %v3942_v12 = vstv %s4719_s23  ;;  %v3930_v23 = vmul.f32 %v3929_v3, %v7702_v4  ;;  %v3743_v6 = vmul.f32 %v3741_v53, %v7630_v40  ;;  %s7879_s23 = sld [smem:[#allocation14 + $0x383]] }
 0x65a   :  { %v3943_v22 = vmul.f32 %v3942_v12, %v7702_v4 }
 0x65b   :  { %v3745_v8 = vadd.f32 %v3743_v6, %v3738_v28 }
 0x660   :  { %3790 = vrot.lane.b32.xlu1 %v3786_v17, %s4895_s9  ;;  %3803 = vrot.lane.b32.xlu0 %v3799_v21, %s4896_s10  ;;  %v3975_v17 = vstv %s4722_s6  ;;  %s7890_s6 = sld [smem:[#allocation14 + $0x385]] }
 0x661   :  { %3777 = vrot.lane.b32.xlu2 %v3773_v60, %s4894_s2 }
 0x668   :  { %3805 = vrot.lane.b32.xlu1 %v3800_v29, %s4896_s10 }
 0x669   :  { %3792 = vrot.lane.b32.xlu2 %v3787_v56, %s4895_s9 }
 0x670   :  { %3836 = vrot.lane.b32.xlu1 %v3832_v45, %s4893_s29  ;;  %v3988_v45 = vstv %s4723_s25  ;;  %s7905_s25 = sld [smem:[#allocation14 + $0x401]] }
 0x671   :  { %3823 = vrot.lane.b32.xlu2 %v3819_v27, %s4891_s1 }
 0x679   :  { %v3580_v36 = vpop.permute.xlu1 %3579  ;;  %v3578_v15 = vpop.permute.xlu0 %3577 }
 0x67a   :  { %v3600_v58 = vmax.f32 %v7591_v32, %v3580_v36  ;;  %v3599_v13 = vmax.f32 %v7593_v34, %v3578_v15  ;;  %v3891_v32 = vmul.f32 %v3890_v43, %v7702_v4  ;;  %v3917_v34 = vmul.f32 %v3916_v26, %v7702_v4 }
 0x67c   :  { %v3650_v51 = vsel %vm7624_vm3, %v3600_v58, 0.0  ;;  %v3649_v46 = vsel %vm7624_vm3, %v3599_v13, 0.0  ;;  %v4014_v58 = vstv %s4725_s4  ;;  %s7913_s4 = sld [smem:[#allocation14 + $0x402]] }
 0x67d   :  { %3659 = vst.msk [vmem:[#allocation5 + $0x18] sm:$0xff] %vm3655_vm13, %v3650_v51 }
 0x67e   :  { %3658 = vst.msk [vmem:[#allocation5 + $0x10] sm:$0xff] %vm3655_vm13, %v3649_v46 }
 0x681   :  { %v3584_v50 = vpop.permute.xlu0 %3583  ;;  %v3752_v16 = vpop.permute.xlu1 %3751 }
 0x682   :  { %v3602_v39 = vmax.f32 %v7599_v35, %v3584_v50  ;;  %v3742_v35 = vmul.f32 %v3741_v53, %v7605_v7 }
 0x684   :  { %v3652_v54 = vsel %vm3644_vm6, %v3602_v39, 0.0  ;;  %v3744_v37 = vadd.f32 %v3742_v35, %v3738_v28 }
 0x685   :  { %3661 = vst.msk [vmem:[#allocation5 + $0x28] sm:$0xff] %vm3655_vm13, %v3652_v54  ;;  %v7676_v31 = vld [vmem:[#allocation5 + $0xc] sm:$0x3f]  ;;  %v7734_v61 = vld [vmem:[#allocation5 + $0x14] sm:$0x3f] }
 0x686   :  { %v3820_v19 = vmul.f32 %v3818_v62, %v7676_v31  ;;  %v3846_v2 = vmul.f32 %v3844_v10, %v7676_v31  ;;  %v3833_v20 = vmul.f32 %v3831_v42, %v7676_v31  ;;  %v7690_v48 = vld [vmem:[#allocation5 + $0x10] sm:$0x3f]  ;;  %v3859_v14 = vmul.f32 %v3857_v38, %v7676_v31 }
 0x687   :  { %v3892_v25 = vmul.f32 %v3890_v43, %v7690_v48  ;;  %v3872_v49 = vmul.f32 %v3870_v55, %v7676_v31  ;;  %v3757_v9 = vadd.f32 %v3752_v16, %v3744_v37  ;;  %v3905_v0 = vmul.f32 %v3903_v33, %v7690_v48  ;;  %v7724_v63 = vld [vmem:[#allocation5 + $0xc] sm:$0xff] }
 0x688   :  { %3825 = vrot.lane.b32.xlu0 %v3820_v19, %s4891_s1  ;;  %3851 = vrot.lane.b32.xlu1 %v3846_v2, %s4894_s2  ;;  %v3931_v18 = vmul.f32 %v3929_v3, %v7690_v48  ;;  %v3918_v52 = vmul.f32 %v3916_v26, %v7690_v48  ;;  %v3963_v59 = vmul.f32 %v3962_v24, %v7724_v63  ;;  %v4001_v42 = vstv %s4724_s24  ;;  %v7760_v54 = vld [vmem:[#allocation5 + $0x10] sm:$0xff]  ;;  %s7892_s24 = sld [smem:[#allocation14 + $0x384]] }
 0x689   :  { %3838 = vrot.lane.b32.xlu2 %v3833_v20, %s4893_s29  ;;  %v3765_v1 = vpop.permute.xlu0 %3764  ;;  %v3944_v29 = vmul.f32 %v3942_v12, %v7690_v48  ;;  %v3977_v56 = vmul.f32 %v3975_v17, %v7734_v61  ;;  %v3964_v40 = vmul.f32 %v3962_v24, %v7734_v61  ;;  %v3976_v30 = vmul.f32 %v3975_v17, %v7724_v63 }
 0x68a   :  { %v3770_v7 = vadd.f32 %v3765_v1, %v3757_v9  ;;  %v4002_v36 = vmul.f32 %v4001_v42, %v7724_v63  ;;  %v3989_v15 = vmul.f32 %v3988_v45, %v7724_v63  ;;  %v3990_v13 = vmul.f32 %v3988_v45, %v7734_v61 }
 0x68b   :  { %v4016_v51 = vmul.f32 %v4014_v58, %v7734_v61  ;;  %v4003_v46 = vmul.f32 %v4001_v42, %v7734_v61  ;;  %v4047_v10 = vstv %s7748_s26  ;;  %v4034_v2 = vstv %s7750_s27  ;;  %s7917_s26 = sld [smem:[#allocation14 + $0x403]] }
 0x68c   :  { %v4015_v55 = vmul.f32 %v4014_v58, %v7724_v63  ;;  %v4048_v38 = vmul.f32 %v4047_v10, %v7760_v54  ;;  %v4060_v26 = vstv %s7763_s28  ;;  %v4086_v9 = vstv %s7776_s12  ;;  %s7919_s27 = sld [smem:[#allocation14 + $0x200]] }
 0x68d   :  { %s7943_s28 = sld [smem:[#allocation14 + $0x481]] }
 0x68e   :  { %s7945_s12 = sld [smem:[#allocation14 + $0x405]] }
 0x690   :  { %3849 = vrot.lane.b32.xlu0 %v3845_v41, %s4894_s2  ;;  %3875 = vrot.lane.b32.xlu1 %v3871_v11, %s4896_s10  ;;  %v4035_v11 = vmul.f32 %v4034_v2, %v7760_v54 }
 0x691   :  { %3862 = vrot.lane.b32.xlu2 %v3858_v47, %s4895_s9 }
 0x698   :  { %3864 = vrot.lane.b32.xlu0 %v3859_v14, %s4895_s9  ;;  %3897 = vrot.lane.b32.xlu1 %v3892_v25, %s4891_s1  ;;  %v3813_v14 = vstv %s7758_s15  ;;  %s7933_s15 = sld [smem:[#allocation14 + $0x404]] }
 0x699   :  { %3877 = vrot.lane.b32.xlu2 %v3872_v49, %s4896_s10  ;;  %v7773_v49 = vld [vmem:[#allocation5 + $0x18] sm:$0x3f] }
 0x69a   :  { %v4062_v53 = vmul.f32 %v4060_v26, %v7773_v49  ;;  %v4049_v35 = vmul.f32 %v4047_v10, %v7773_v49  ;;  %v4088_v17 = vmul.f32 %v4086_v9, %v7773_v49 }
 0x6a0   :  { %3895 = vrot.lane.b32.xlu0 %v3891_v32, %s4891_s1  ;;  %3921 = vrot.lane.b32.xlu1 %v3917_v34, %s4894_s2  ;;  %v3814_v32 = vmul.f32 %v3813_v14, %v7653_v57  ;;  %v3815_v57 = vmul.f32 %v3813_v14, %v7676_v31  ;;  %v4106_v31 = vstv %s4733_s8  ;;  %v7836_v14 = vld [vmem:[#allocation5 + $0x20] sm:$0x3f]  ;;  %s7960_s8 = sld [smem:[#allocation14 + $0x280]] }
 0x6a1   :  { %3908 = vrot.lane.b32.xlu2 %v3904_v5, %s4893_s29  ;;  %v4036_v5 = vmul.f32 %v4034_v2, %v7773_v49 }
 0x6a8   :  { %3910 = vrot.lane.b32.xlu0 %v3905_v0, %s4893_s29  ;;  %3936 = vrot.lane.b32.xlu1 %v3931_v18, %s4895_s9  ;;  %v4073_v18 = vstv %s7778_s30  ;;  %s7957_s30 = sld [smem:[#allocation14 + $0x482]] }
 0x6a9   :  { %3923 = vrot.lane.b32.xlu2 %v3918_v52, %s4894_s2  ;;  %v4061_v52 = vmul.f32 %v4060_v26, %v7760_v54  ;;  %v4074_v24 = vmul.f32 %v4073_v18, %v7760_v54  ;;  %v4075_v6 = vmul.f32 %v4073_v18, %v7773_v49  ;;  %v3885_v26 = vstv %s7827_s16  ;;  %s4738_s16 = sld [smem:[#allocation14 + $0x300]] }
 0x6aa   :  { %v4204_v18 = vstv %s7844_s18  ;;  %s8025_s18 = sld [smem:[#allocation14 + $0x504]] }
 0x6b0   :  { %3934 = vrot.lane.b32.xlu0 %v3930_v23, %s4895_s9  ;;  %3967 = vrot.lane.b32.xlu1 %v3963_v59, %s4891_s1  ;;  %v7796_v59 = vld [vmem:[#allocation5 + $0x1c] sm:$0x3f] }
 0x6b1   :  { %3947 = vrot.lane.b32.xlu2 %v3943_v22, %s4896_s10 }
 0x6b3   :  { %v3754_v21 = vpop.permute.xlu2 %3753 }
 0x6b4   :  { %v3758_v60 = vadd.f32 %v3754_v21, %v3745_v8  ;;  %v4108_v8 = vmul.f32 %v4106_v31, %v7796_v59 }
 0x6b8   :  { %3949 = vrot.lane.b32.xlu0 %v3944_v29, %s4896_s10  ;;  %3982 = vrot.lane.b32.xlu1 %v3977_v56, %s4893_s29  ;;  %v4132_v29 = vstv %s4735_s11  ;;  %v4119_v56 = vstv %s4734_s13  ;;  %s7971_s11 = sld [smem:[#allocation14 + $0x484]] }
 0x6b9   :  { %3969 = vrot.lane.b32.xlu2 %v3964_v40, %s4891_s1  ;;  %s7974_s13 = sld [smem:[#allocation14 + $0x483]] }
 0x6bb   :  { %v3778_v62 = vpop.permute.xlu2 %3777 }
 0x6bc   :  { %v3783_v27 = vadd.f32 %v3778_v62, %v3770_v7  ;;  %v4087_v7 = vmul.f32 %v4086_v9, %v7760_v54 }
 0x6c0   :  { %3980 = vrot.lane.b32.xlu0 %v3976_v30, %s4893_s29  ;;  %4006 = vrot.lane.b32.xlu1 %v4002_v36, %s4895_s9  ;;  %v4121_v30 = vmul.f32 %v4119_v56, %v7796_v59 }
 0x6c1   :  { %3993 = vrot.lane.b32.xlu2 %v3989_v15, %s4894_s2  ;;  %v4134_v15 = vmul.f32 %v4132_v29, %v7796_v59 }
 0x6c3   :  { %v3793_v41 = vpop.permute.xlu2 %3792 }
 0x6c8   :  { %3995 = vrot.lane.b32.xlu0 %v3990_v13, %s4894_s2  ;;  %4021 = vrot.lane.b32.xlu1 %v4016_v51, %s4896_s10 }
 0x6c9   :  { %4008 = vrot.lane.b32.xlu2 %v4003_v46, %s4895_s9 }
 0x6ca   :  { %v3780_v50 = vpop.permute.xlu0 %3779  ;;  %v3767_v39 = vpop.permute.xlu1 %3766 }
 0x6cb   :  { %v3771_v19 = vadd.f32 %v3767_v39, %v3758_v60  ;;  %v3824_v37 = vpop.permute.xlu2 %3823  ;;  %v7804_v60 = vld [vmem:[#allocation5 + $0x14] sm:$0xff]  ;;  %v4158_v39 = vstv %s7812_s0  ;;  %s7995_s0 = sld [smem:[#allocation14 + $0x502]] }
 0x6cc   :  { %v4107_v40 = vmul.f32 %v4106_v31, %v7804_v60  ;;  %v4133_v42 = vmul.f32 %v4132_v29, %v7804_v60  ;;  %v4120_v62 = vmul.f32 %v4119_v56, %v7804_v60 }
 0x6cd   :  { %v3784_v20 = vadd.f32 %v3780_v50, %v3771_v19  ;;  %v7822_v50 = vld [vmem:[#allocation5 + $0x18] sm:$0xff]  ;;  %v4178_v19 = vstv %s7814_s19  ;;  %s7997_s19 = sld [smem:[#allocation14 + $0x501]] }
 0x6cf   :  { %v3797_v47 = vadd.f32 %v3793_v41, %v3784_v20  ;;  %v4179_v20 = vmul.f32 %v4178_v19, %v7822_v50 }
 0x6d0   :  { %4019 = vrot.lane.b32.xlu0 %v4015_v55, %s4896_s10  ;;  %4052 = vrot.lane.b32.xlu1 %v4048_v38, %s4893_s29  ;;  %v4159_v38 = vmul.f32 %v4158_v39, %v7804_v60 }
 0x6d1   :  { %4039 = vrot.lane.b32.xlu2 %v4035_v11, %s4891_s1 }
 0x6d2   :  { %v3791_v43 = vpop.permute.xlu1 %3790  ;;  %v3804_v25 = vpop.permute.xlu0 %3803 }
 0x6d3   :  { %v3796_v33 = vadd.f32 %v3791_v43, %v3783_v27  ;;  %v4145_v27 = vstv %s4736_s14  ;;  %s7984_s14 = sld [smem:[#allocation14 + $0x485]] }
 0x6d4   :  { %v4147_v36 = vmul.f32 %v4145_v27, %v7796_v59  ;;  %v4146_v2 = vmul.f32 %v4145_v27, %v7804_v60  ;;  %v7875_v27 = vld [vmem:[#allocation5 + $0x1c] sm:$0xff] }
 0x6d5   :  { %v3809_v34 = vadd.f32 %v3804_v25, %v3796_v33  ;;  %v4191_v25 = vstv %s7824_s3  ;;  %s8009_s3 = sld [smem:[#allocation14 + $0x503]] }
 0x6d7   :  { %v3816_v28 = vadd.f32 %v3814_v32, %v3809_v34  ;;  %v4160_v32 = vmul.f32 %v4158_v39, %v7796_v59  ;;  %v4193_v34 = vmul.f32 %v4191_v25, %v7836_v14 }
 0x6d8   :  { %4041 = vrot.lane.b32.xlu0 %v4036_v5, %s4891_s1  ;;  %4067 = vrot.lane.b32.xlu1 %v4062_v53, %s4894_s2  ;;  %v3886_v5 = vmul.f32 %v3885_v26, %v7702_v4 }
 0x6d9   :  { %4054 = vrot.lane.b32.xlu2 %v4049_v35, %s4893_s29  ;;  %v3829_v16 = vadd.f32 %v3824_v37, %v3816_v28  ;;  %v4180_v35 = vmul.f32 %v4178_v19, %v7836_v14 }
 0x6da   :  { %v3806_v3 = vpop.permute.xlu1 %3805 }
 0x6db   :  { %v3810_v0 = vadd.f32 %v3806_v3, %v3797_v47 }
 0x6dd   :  { %v3817_v1 = vadd.f32 %v3815_v57, %v3810_v0  ;;  %v3887_v57 = vmul.f32 %v3885_v26, %v7690_v48  ;;  %v4217_v0 = vstv %s7840_s17  ;;  %s8021_s17 = sld [smem:[#allocation14 + $0x505]] }
 0x6de   :  { %v4219_v56 = vmul.f32 %v4217_v0, %v7836_v14 }
 0x6e0   :  { %4065 = vrot.lane.b32.xlu0 %v4061_v52, %s4894_s2  ;;  %4091 = vrot.lane.b32.xlu1 %v4087_v7, %s4896_s10  ;;  %v4218_v52 = vmul.f32 %v4217_v0, %v7822_v50 }
 0x6e1   :  { %4078 = vrot.lane.b32.xlu2 %v4074_v24, %s4895_s9  ;;  %v4205_v24 = vmul.f32 %v4204_v18, %v7822_v50 }
 0x6e2   :  { %v3837_v23 = vpop.permute.xlu1 %3836 }
 0x6e3   :  { %v3839_v12 = vpop.permute.xlu2 %3838  ;;  %v3842_v22 = vadd.f32 %v3837_v23, %v3829_v16 }
 0x6e8   :  { %4080 = vrot.lane.b32.xlu0 %v4075_v6, %s4895_s9  ;;  %4113 = vrot.lane.b32.xlu1 %v4108_v8, %s4891_s1  ;;  %v4230_v6 = vstv %s7851_s5  ;;  %s8034_s5 = sld [smem:[#allocation14 + $0x581]] }
 0x6e9   :  { %4093 = vrot.lane.b32.xlu2 %v4088_v17, %s4896_s10  ;;  %v4206_v17 = vmul.f32 %v4204_v18, %v7836_v14 }
 0x6eb   :  { %v3863_v21 = vpop.permute.xlu2 %3862 }
 0x6f0   :  { %4111 = vrot.lane.b32.xlu0 %v4107_v40, %s4891_s1  ;;  %4137 = vrot.lane.b32.xlu1 %v4133_v42, %s4894_s2 }
 0x6f1   :  { %4124 = vrot.lane.b32.xlu2 %v4120_v62, %s4893_s29 }
 0x6f3   :  { %v3878_v45 = vpop.permute.xlu2 %3877 }
 0x6f8   :  { %4126 = vrot.lane.b32.xlu0 %v4121_v30, %s4893_s29  ;;  %4152 = vrot.lane.b32.xlu1 %v4147_v36, %s4895_s9  ;;  %v4263_v30 = vstv %s7863_s20  ;;  %v4250_v36 = vstv %s7865_s21  ;;  %s8046_s20 = sld [smem:[#allocation14 + $0x583]] }
 0x6f9   :  { %4139 = vrot.lane.b32.xlu2 %v4134_v15, %s4894_s2  ;;  %s8050_s21 = sld [smem:[#allocation14 + $0x582]] }
 0x6fa   :  { %v3826_v58 = vpop.permute.xlu0 %3825  ;;  %v3852_v13 = vpop.permute.xlu1 %3851 }
 0x6fb   :  { %v3830_v51 = vadd.f32 %v3826_v58, %v3817_v1  ;;  %v3909_v46 = vpop.permute.xlu2 %3908  ;;  %v4192_v1 = vmul.f32 %v4191_v25, %v7822_v50  ;;  %v4231_v58 = vmul.f32 %v4230_v6, %v7822_v50 }
 0x6fd   :  { %v3843_v10 = vadd.f32 %v3839_v12, %v3830_v51 }
 0x6ff   :  { %v3856_v55 = vadd.f32 %v3852_v13, %v3843_v10  ;;  %v4264_v13 = vmul.f32 %v4263_v30, %v7875_v27  ;;  %v3957_v10 = vstv %s7873_s22  ;;  %s4744_s22 = sld [smem:[#allocation14 + $0x380]] }
 0x700   :  { %4150 = vrot.lane.b32.xlu0 %v4146_v2, %s4895_s9  ;;  %4183 = vrot.lane.b32.xlu1 %v4179_v20, %s4891_s1 }
 0x701   :  { %4163 = vrot.lane.b32.xlu2 %v4159_v38, %s4896_s10 }
 0x702   :  { %v3850_v41 = vpop.permute.xlu0 %3849  ;;  %v3876_v11 = vpop.permute.xlu1 %3875 }
 0x703   :  { %v3855_v47 = vadd.f32 %v3850_v41, %v3842_v22  ;;  %v3924_v43 = vpop.permute.xlu2 %3923  ;;  %v3958_v41 = vmul.f32 %v3957_v10, %v7724_v63  ;;  %v3959_v63 = vmul.f32 %v3957_v10, %v7734_v61 }
 0x705   :  { %v3868_v33 = vadd.f32 %v3863_v21, %v3855_v47  ;;  %v4232_v21 = vmul.f32 %v4230_v6, %v7836_v14 }
 0x707   :  { %v3881_v53 = vadd.f32 %v3876_v11, %v3868_v33  ;;  %v4276_v11 = vstv %s7879_s23  ;;  %s8059_s23 = sld [smem:[#allocation14 + $0x584]] }
 0x708   :  { %4165 = vrot.lane.b32.xlu0 %v4160_v32, %s4896_s10  ;;  %4198 = vrot.lane.b32.xlu1 %v4193_v34, %s4893_s29 }
 0x709   :  { %v3888_v28 = vadd.f32 %v3886_v5, %v3881_v53  ;;  %4185 = vrot.lane.b32.xlu2 %v4180_v35, %s4891_s1  ;;  %v4302_v35 = vstv %s7890_s6  ;;  %s4773_s6 = sld [smem:[#allocation14 + $0x585]] }
 0x70a   :  { %v3865_v37 = vpop.permute.xlu0 %3864  ;;  %v3898_v16 = vpop.permute.xlu1 %3897 }
 0x70b   :  { %v3869_v3 = vadd.f32 %v3865_v37, %v3856_v55  ;;  %v3948_v9 = vpop.permute.xlu2 %3947  ;;  %v7888_v55 = vld [vmem:[#allocation5 + $0x24] sm:$0x3f] }
 0x70c   :  { %v4252_v47 = vmul.f32 %v4250_v36, %v7888_v55  ;;  %v4265_v26 = vmul.f32 %v4263_v30, %v7888_v55 }
 0x70d   :  { %v3882_v4 = vadd.f32 %v3878_v45, %v3869_v3  ;;  %v4303_v3 = vmul.f32 %v4302_v35, %v7875_v27 }
 0x70f   :  { %v3889_v7 = vadd.f32 %v3887_v57, %v3882_v4 }
 0x710   :  { %4196 = vrot.lane.b32.xlu0 %v4192_v1, %s4893_s29  ;;  %4222 = vrot.lane.b32.xlu1 %v4218_v52, %s4895_s9  ;;  %v7915_v52 = vld [vmem:[#allocation5 + $0x28] sm:$0x3f] }
 0x711   :  { %v3902_v12 = vadd.f32 %v3898_v16, %v3889_v7  ;;  %4209 = vrot.lane.b32.xlu2 %v4205_v24, %s4894_s2  ;;  %v4277_v16 = vmul.f32 %v4276_v11, %v7875_v27  ;;  %v4322_v24 = vstv %s7905_s25 }
 0x712   :  { %v3896_v23 = vpop.permute.xlu0 %3895  ;;  %v3922_v48 = vpop.permute.xlu1 %3921 }
 0x713   :  { %v3901_v31 = vadd.f32 %v3896_v23, %v3888_v28  ;;  %v3970_v22 = vpop.permute.xlu2 %3969  ;;  %v4289_v28 = vstv %s7892_s24  ;;  %v4324_v23 = vmul.f32 %v4322_v24, %v7915_v52  ;;  %s4750_s24 = sld [smem:[#allocation14 + $0x400]] }
 0x714   :  { %v4290_v57 = vmul.f32 %v4289_v28, %v7875_v27 }
 0x715   :  { %v3914_v8 = vadd.f32 %v3909_v46, %v3901_v31  ;;  %v4251_v46 = vmul.f32 %v4250_v36, %v7875_v27  ;;  %v4304_v31 = vmul.f32 %v4302_v35, %v7888_v55 }
 0x717   :  { %v3927_v29 = vadd.f32 %v3922_v48, %v3914_v8 }
 0x718   :  { %4211 = vrot.lane.b32.xlu0 %v4206_v17, %s4894_s2  ;;  %4237 = vrot.lane.b32.xlu1 %v4232_v21, %s4896_s10  ;;  %v7928_v21 = vld [vmem:[#allocation5 + $0x20] sm:$0xff] }
 0x719   :  { %4224 = vrot.lane.b32.xlu2 %v4219_v56, %s4895_s9  ;;  %v4335_v56 = vstv %s7913_s4 }
 0x71a   :  { %v3911_v40 = vpop.permute.xlu0 %3910  ;;  %v3937_v42 = vpop.permute.xlu1 %3936  ;;  %v4336_v36 = vmul.f32 %v4335_v56, %v7928_v21 }
 0x71b   :  { %v3915_v62 = vadd.f32 %v3911_v40, %v3902_v12  ;;  %v3994_v45 = vpop.permute.xlu2 %3993  ;;  %v4291_v12 = vmul.f32 %v4289_v28, %v7888_v55  ;;  %v4029_v40 = vstv %s7919_s27 }
 0x71d   :  { %v3928_v15 = vadd.f32 %v3924_v43, %v3915_v62  ;;  %v4278_v43 = vmul.f32 %v4276_v11, %v7888_v55  ;;  %v4323_v62 = vmul.f32 %v4322_v24, %v7928_v21 }
 0x71f   :  { %v3941_v51 = vadd.f32 %v3937_v42, %v3928_v15  ;;  %v4031_v15 = vmul.f32 %v4029_v40, %v7773_v49  ;;  %v4361_v49 = vstv %s7933_s15 }
 0x720   :  { %4235 = vrot.lane.b32.xlu0 %v4231_v58, %s4896_s10  ;;  %4268 = vrot.lane.b32.xlu1 %v4264_v13, %s4893_s29 }
 0x721   :  { %4255 = vrot.lane.b32.xlu2 %v4251_v46, %s4891_s1  ;;  %v4030_v46 = vmul.f32 %v4029_v40, %v7760_v54 }
 0x722   :  { %v3935_v39 = vpop.permute.xlu0 %3934  ;;  %v3968_v19 = vpop.permute.xlu1 %3967 }
 0x723   :  { %v3940_v2 = vadd.f32 %v3935_v39, %v3927_v29  ;;  %v4009_v20 = vpop.permute.xlu2 %4008  ;;  %v4348_v29 = vstv %s7917_s26 }
 0x725   :  { %v3953_v38 = vadd.f32 %v3948_v9, %v3940_v2  ;;  %v4337_v2 = vmul.f32 %v4335_v56, %v7915_v52 }
 0x727   :  { %v3960_v25 = vadd.f32 %v3958_v41, %v3953_v38  ;;  %v4350_v41 = vmul.f32 %v4348_v29, %v7915_v52 }
 0x728   :  { %4257 = vrot.lane.b32.xlu0 %v4252_v47, %s4891_s1  ;;  %4283 = vrot.lane.b32.xlu1 %v4278_v43, %s4894_s2 }
 0x729   :  { %v3973_v33 = vadd.f32 %v3968_v19, %v3960_v25  ;;  %4270 = vrot.lane.b32.xlu2 %v4265_v26, %s4893_s29  ;;  %v7954_v26 = vld [vmem:[#allocation5 + $0x24] sm:$0xff] }
 0x72a   :  { %v3950_v32 = vpop.permute.xlu0 %3949  ;;  %v3983_v34 = vpop.permute.xlu1 %3982 }
 0x72b   :  { %v3954_v5 = vadd.f32 %v3950_v32, %v3941_v51  ;;  %v4040_v53 = vpop.permute.xlu2 %4039  ;;  %v4374_v32 = vstv %s7945_s12 }
 0x72c   :  { %v4375_v35 = vmul.f32 %v4374_v32, %v7928_v21 }
 0x72d   :  { %v3961_v37 = vadd.f32 %v3959_v63, %v3954_v5  ;;  %v4362_v63 = vmul.f32 %v4361_v49, %v7928_v21 }
 0x72f   :  { %v3974_v9 = vadd.f32 %v3970_v22, %v3961_v37 }
 0x730   :  { %4281 = vrot.lane.b32.xlu0 %v4277_v16, %s4894_s2  ;;  %4307 = vrot.lane.b32.xlu1 %v4303_v3, %s4896_s10 }
 0x731   :  { %v3987_v61 = vadd.f32 %v3983_v34, %v3974_v9  ;;  %4294 = vrot.lane.b32.xlu2 %v4290_v57, %s4895_s9  ;;  %v7968_v9 = vld [vmem:[#allocation5 + $0x2c] sm:$0x3f]  ;;  %v4407_v57 = vstv %s7957_s30 }
 0x732   :  { %v3981_v4 = vpop.permute.xlu0 %3980  ;;  %v4007_v0 = vpop.permute.xlu1 %4006 }
 0x733   :  { %v3986_v18 = vadd.f32 %v3981_v4, %v3973_v33  ;;  %v4055_v1 = vpop.permute.xlu2 %4054  ;;  %v4394_v33 = vstv %s7943_s28 }
 0x734   :  { %v4395_v5 = vmul.f32 %v4394_v33, %v7954_v26 }
 0x735   :  { %v3999_v7 = vadd.f32 %v3994_v45, %v3986_v18  ;;  %v4349_v45 = vmul.f32 %v4348_v29, %v7928_v21  ;;  %v4409_v18 = vmul.f32 %v4407_v57, %v7968_v9 }
 0x737   :  { %v4012_v48 = vadd.f32 %v4007_v0, %v3999_v7  ;;  %v4376_v0 = vmul.f32 %v4374_v32, %v7915_v52  ;;  %v4396_v7 = vmul.f32 %v4394_v33, %v7968_v9 }
 0x738   :  { %4296 = vrot.lane.b32.xlu0 %v4291_v12, %s4895_s9  ;;  %4329 = vrot.lane.b32.xlu1 %v4324_v23, %s4891_s1 }
 0x739   :  { %4309 = vrot.lane.b32.xlu2 %v4304_v31, %s4896_s10 }
 0x73a   :  { %v3996_v22 = vpop.permute.xlu0 %3995  ;;  %v4022_v6 = vpop.permute.xlu1 %4021 }
 0x73b   :  { %v4000_v8 = vadd.f32 %v3996_v22, %v3987_v61  ;;  %v4079_v17 = vpop.permute.xlu2 %4078  ;;  %v4101_v61 = vstv %s7960_s8 }
 0x73c   :  { %v4102_v24 = vmul.f32 %v4101_v61, %v7804_v60  ;;  %v4103_v29 = vmul.f32 %v4101_v61, %v7796_v59  ;;  %v4408_v60 = vmul.f32 %v4407_v57, %v7954_v26 }
 0x73d   :  { %v4013_v42 = vadd.f32 %v4009_v20, %v4000_v8  ;;  %v4363_v20 = vmul.f32 %v4361_v49, %v7915_v52  ;;  %v4420_v8 = vstv %s7974_s13 }
 0x73f   :  { %v4026_v30 = vadd.f32 %v4022_v6, %v4013_v42  ;;  %v4433_v6 = vstv %s7971_s11  ;;  %v4421_v42 = vmul.f32 %v4420_v8, %v7954_v26 }
 0x740   :  { %4327 = vrot.lane.b32.xlu0 %v4323_v62, %s4891_s1  ;;  %4353 = vrot.lane.b32.xlu1 %v4349_v45, %s4894_s2  ;;  %v4434_v56 = vmul.f32 %v4433_v6, %v7954_v26 }
 0x741   :  { %4340 = vrot.lane.b32.xlu2 %v4336_v36, %s4893_s29  ;;  %v4033_v58 = vadd.f32 %v4031_v15, %v4026_v30 }
 0x742   :  { %v4020_v13 = vpop.permute.xlu0 %4019  ;;  %v4053_v51 = vpop.permute.xlu1 %4052 }
 0x743   :  { %v4025_v39 = vadd.f32 %v4020_v13, %v4012_v48  ;;  %v4094_v10 = vpop.permute.xlu2 %4093  ;;  %v4422_v13 = vmul.f32 %v4420_v8, %v7968_v9 }
 0x745   :  { %v4032_v19 = vadd.f32 %v4030_v46, %v4025_v39  ;;  %v4435_v39 = vmul.f32 %v4433_v6, %v7968_v9  ;;  %v8043_v6 = vld [vmem:[#allocation5 + $0x34] sm:$0x3f] }
 0x747   :  { %v4045_v38 = vadd.f32 %v4040_v53, %v4032_v19 }
 0x748   :  { %4342 = vrot.lane.b32.xlu0 %v4337_v2, %s4893_s29  ;;  %4368 = vrot.lane.b32.xlu1 %v4363_v20, %s4895_s9  ;;  %v8006_v20 = vld [vmem:[#allocation5 + $0x28] sm:$0xff] }
 0x749   :  { %v4058_v54 = vadd.f32 %v4053_v51, %v4045_v38  ;;  %4355 = vrot.lane.b32.xlu2 %v4350_v41, %s4894_s2  ;;  %v4479_v38 = vstv %s7995_s0  ;;  %v4466_v41 = vstv %s7997_s19 }
 0x74a   :  { %v4042_v11 = vpop.permute.xlu0 %4041  ;;  %v4068_v47 = vpop.permute.xlu1 %4067 }
 0x74b   :  { %v4046_v43 = vadd.f32 %v4042_v11, %v4033_v58  ;;  %v4125_v25 = vpop.permute.xlu2 %4124  ;;  %v4446_v58 = vstv %s7984_s14 }
 0x74c   :  { %v4448_v51 = vmul.f32 %v4446_v58, %v7968_v9  ;;  %v4447_v11 = vmul.f32 %v4446_v58, %v7954_v26 }
 0x74d   :  { %v4059_v34 = vadd.f32 %v4055_v1, %v4046_v43 }
 0x74f   :  { %v4072_v53 = vadd.f32 %v4068_v47, %v4059_v34  ;;  %v4480_v47 = vmul.f32 %v4479_v38, %v8006_v20 }
 0x750   :  { %4366 = vrot.lane.b32.xlu0 %v4362_v63, %s4895_s9  ;;  %4399 = vrot.lane.b32.xlu1 %v4395_v5, %s4891_s1  ;;  %v4492_v5 = vstv %s8009_s3 }
 0x751   :  { %4379 = vrot.lane.b32.xlu2 %v4375_v35, %s4896_s10  ;;  %v4468_v35 = vmul.f32 %v4466_v41, %v8018_v44 }
 0x752   :  { %v4066_v28 = vpop.permute.xlu0 %4065  ;;  %v4092_v37 = vpop.permute.xlu1 %4091 }
 0x753   :  { %v4071_v16 = vadd.f32 %v4066_v28, %v4058_v54  ;;  %v4140_v3 = vpop.permute.xlu2 %4139  ;;  %v4494_v28 = vmul.f32 %v4492_v5, %v8018_v44 }
 0x755   :  { %v4084_v4 = vadd.f32 %v4079_v17, %v4071_v16 }
 0x757   :  { %v4097_v1 = vadd.f32 %v4092_v37, %v4084_v4 }
 0x758   :  { %4381 = vrot.lane.b32.xlu0 %v4376_v0, %s4896_s10  ;;  %4414 = vrot.lane.b32.xlu1 %v4409_v18, %s4893_s29 }
 0x759   :  { %4401 = vrot.lane.b32.xlu2 %v4396_v7, %s4891_s1  ;;  %v4104_v12 = vadd.f32 %v4102_v24, %v4097_v1  ;;  %v4518_v24 = vstv %s8021_s17 }
 0x75a   :  { %v4081_v23 = vpop.permute.xlu0 %4080  ;;  %v4114_v48 = vpop.permute.xlu1 %4113 }
 0x75b   :  { %v4085_v31 = vadd.f32 %v4081_v23, %v4072_v53  ;;  %v4164_v22 = vpop.permute.xlu2 %4163  ;;  %v4173_v53 = vstv %s4738_s16  ;;  %v4493_v23 = vmul.f32 %v4492_v5, %v8006_v20 }
 0x75c   :  { %v4174_v16 = vmul.f32 %v4173_v53, %v7822_v50  ;;  %v4175_v18 = vmul.f32 %v4173_v53, %v7836_v14  ;;  %v4505_v50 = vstv %s8025_s18 }
 0x75d   :  { %v4098_v17 = vadd.f32 %v4094_v10, %v4085_v31 }
 0x75f   :  { %v4105_v40 = vadd.f32 %v4103_v29, %v4098_v17 }
 0x760   :  { %4412 = vrot.lane.b32.xlu0 %v4408_v60, %s4893_s29  ;;  %4438 = vrot.lane.b32.xlu1 %v4434_v56, %s4895_s9  ;;  %v4538_v56 = vstv %s8034_s5 }
 0x761   :  { %v4118_v62 = vadd.f32 %v4114_v48, %v4105_v40  ;;  %4425 = vrot.lane.b32.xlu2 %v4421_v42, %s4894_s2  ;;  %v4519_v48 = vmul.f32 %v4518_v24, %v8006_v20  ;;  %v4507_v40 = vmul.f32 %v4505_v50, %v8018_v44  ;;  %v4540_v42 = vmul.f32 %v4538_v56, %v8043_v6 }
 0x762   :  { %v4112_v45 = vpop.permute.xlu0 %4111  ;;  %v4138_v30 = vpop.permute.xlu1 %4137 }
 0x763   :  { %v4117_v36 = vadd.f32 %v4112_v45, %v4104_v12  ;;  %v4186_v15 = vpop.permute.xlu2 %4185  ;;  %v4520_v45 = vmul.f32 %v4518_v24, %v8018_v44  ;;  %v4317_v24 = vstv %s4750_s24 }
 0x765   :  { %v4130_v59 = vadd.f32 %v4125_v25, %v4117_v36  ;;  %v4467_v25 = vmul.f32 %v4466_v41, %v8006_v20 }
 0x767   :  { %v4143_v46 = vadd.f32 %v4138_v30, %v4130_v59 }
 0x768   :  { %4427 = vrot.lane.b32.xlu0 %v4422_v13, %s4894_s2  ;;  %4453 = vrot.lane.b32.xlu1 %v4448_v51, %s4896_s10  ;;  %v8056_v13 = vld [vmem:[#allocation5 + $0x2c] sm:$0xff]  ;;  %v4564_v51 = vstv %s8046_s20 }
 0x769   :  { %4440 = vrot.lane.b32.xlu2 %v4435_v39, %s4895_s9  ;;  %v4566_v5 = vmul.f32 %v4564_v51, %v8043_v6 }
 0x76a   :  { %v4127_v10 = vpop.permute.xlu0 %4126  ;;  %v4153_v19 = vpop.permute.xlu1 %4152 }
 0x76b   :  { %v4131_v49 = vadd.f32 %v4127_v10, %v4118_v62  ;;  %v4210_v2 = vpop.permute.xlu2 %4209  ;;  %v4539_v10 = vmul.f32 %v4538_v56, %v8056_v13 }
 0x76d   :  { %v4144_v54 = vadd.f32 %v4140_v3, %v4131_v49  ;;  %v4481_v3 = vmul.f32 %v4479_v38, %v8018_v44  ;;  %v4245_v49 = vstv %s4744_s22 }
 0x76e   :  { %v4247_v41 = vmul.f32 %v4245_v49, %v7888_v55 }
 0x76f   :  { %v4157_v43 = vadd.f32 %v4153_v19, %v4144_v54  ;;  %v4565_v19 = vmul.f32 %v4564_v51, %v8056_v13 }
 0x770   :  { %4451 = vrot.lane.b32.xlu0 %v4447_v11, %s4896_s10  ;;  %4484 = vrot.lane.b32.xlu1 %v4480_v47, %s4893_s29 }
 0x771   :  { %4471 = vrot.lane.b32.xlu2 %v4467_v25, %s4891_s1 }
 0x772   :  { %v4151_v33 = vpop.permute.xlu0 %4150  ;;  %v4184_v32 = vpop.permute.xlu1 %4183 }
 0x773   :  { %v4156_v34 = vadd.f32 %v4151_v33, %v4143_v46  ;;  %v4225_v63 = vpop.permute.xlu2 %4224  ;;  %v4551_v46 = vstv %s8050_s21 }
 0x774   :  { %v4552_v38 = vmul.f32 %v4551_v46, %v8056_v13 }
 0x775   :  { %v4169_v37 = vadd.f32 %v4164_v22, %v4156_v34  ;;  %v4506_v22 = vmul.f32 %v4505_v50, %v8006_v20  ;;  %v4553_v34 = vmul.f32 %v4551_v46, %v8043_v6 }
 0x777   :  { %v4176_v57 = vadd.f32 %v4174_v16, %v4169_v37  ;;  %v4590_v16 = vstv %s4773_s6 }
 0x778   :  { %4473 = vrot.lane.b32.xlu0 %v4468_v35, %s4891_s1  ;;  %4499 = vrot.lane.b32.xlu1 %v4494_v28, %s4894_s2 }
 0x779   :  { %v4189_v61 = vadd.f32 %v4184_v32, %v4176_v57  ;;  %4486 = vrot.lane.b32.xlu2 %v4481_v3, %s4893_s29  ;;  %v4577_v32 = vstv %s8059_s23 }
 0x77a   :  { %v4166_v4 = vpop.permute.xlu0 %4165  ;;  %v4199_v0 = vpop.permute.xlu1 %4198  ;;  %v4578_v57 = vmul.f32 %v4577_v32, %v8056_v13 }
 0x77b   :  { %v4170_v1 = vadd.f32 %v4166_v4, %v4157_v43  ;;  %v4256_v7 = vpop.permute.xlu2 %4255  ;;  %v4246_v43 = vmul.f32 %v4245_v49, %v7875_v27 }
 0x77d   :  { %v4177_v12 = vadd.f32 %v4175_v18, %v4170_v1 }
 0x77f   :  { %v4190_v31 = vadd.f32 %v4186_v15, %v4177_v12 }
 0x780   :  { %4497 = vrot.lane.b32.xlu0 %v4493_v23, %s4894_s2  ;;  %4523 = vrot.lane.b32.xlu1 %v4519_v48, %s4896_s10  ;;  %v4318_v48 = vmul.f32 %v4317_v24, %v7928_v21 }
 0x781   :  { %v4203_v14 = vadd.f32 %v4199_v0, %v4190_v31  ;;  %4510 = vrot.lane.b32.xlu2 %v4506_v22, %s4895_s9 }
 0x782   :  { %v4197_v8 = vpop.permute.xlu0 %4196  ;;  %v4223_v17 = vpop.permute.xlu1 %4222 }
 0x783   :  { %v4202_v29 = vadd.f32 %v4197_v8, %v4189_v61  ;;  %v4271_v60 = vpop.permute.xlu2 %4270  ;;  %v4591_v61 = vmul.f32 %v4590_v16, %v8056_v13 }
 0x785   :  { %v4215_v62 = vadd.f32 %v4210_v2, %v4202_v29 }
 0x787   :  { %v4228_v30 = vadd.f32 %v4223_v17, %v4215_v62 }
 0x788   :  { %4512 = vrot.lane.b32.xlu0 %v4507_v40, %s4895_s9  ;;  %4545 = vrot.lane.b32.xlu1 %v4540_v42, %s4891_s1 }
 0x789   :  { %4525 = vrot.lane.b32.xlu2 %v4520_v45, %s4896_s10 }
 0x78a   :  { %v4212_v36 = vpop.permute.xlu0 %4211  ;;  %v4238_v15 = vpop.permute.xlu1 %4237 }
 0x78b   :  { %v4216_v58 = vadd.f32 %v4212_v36, %v4203_v14  ;;  %v4295_v59 = vpop.permute.xlu2 %4294 }
 0x78d   :  { %v4229_v39 = vadd.f32 %v4225_v63, %v4216_v58  ;;  %v4579_v63 = vmul.f32 %v4577_v32, %v8043_v6 }
 0x78f   :  { %v4242_v2 = vadd.f32 %v4238_v15, %v4229_v39 }
 0x790   :  { %4543 = vrot.lane.b32.xlu0 %v4539_v10, %s4891_s1  ;;  %4569 = vrot.lane.b32.xlu1 %v4565_v19, %s4894_s2 }
 0x791   :  { %4556 = vrot.lane.b32.xlu2 %v4552_v38, %s4893_s29  ;;  %v4249_v54 = vadd.f32 %v4247_v41, %v4242_v2 }
 0x792   :  { %v4236_v11 = vpop.permute.xlu0 %4235  ;;  %v4269_v47 = vpop.permute.xlu1 %4268 }
 0x793   :  { %v4241_v25 = vadd.f32 %v4236_v11, %v4228_v30  ;;  %v4310_v33 = vpop.permute.xlu2 %4309 }
 0x795   :  { %v4248_v55 = vadd.f32 %v4246_v43, %v4241_v25 }
 0x797   :  { %v4261_v53 = vadd.f32 %v4256_v7, %v4248_v55  ;;  %v4592_v7 = vmul.f32 %v4590_v16, %v8043_v6 }
 0x798   :  { %4558 = vrot.lane.b32.xlu0 %v4553_v34, %s4893_s29  ;;  %4584 = vrot.lane.b32.xlu1 %v4579_v63, %s4895_s9  ;;  %s4756_s29 = sld [smem:[#allocation14 + $0x480]] }
 0x799   :  { %4571 = vrot.lane.b32.xlu2 %v4566_v5, %s4894_s2  ;;  %v4274_v4 = vadd.f32 %v4269_v47, %v4261_v53  ;;  %s4762_s2 = sld [smem:[#allocation14 + $0x500]] }
 0x79a   :  { %v4258_v35 = vpop.permute.xlu0 %4257  ;;  %v4284_v27 = vpop.permute.xlu1 %4283 }
 0x79b   :  { %v4262_v28 = vadd.f32 %v4258_v35, %v4249_v54  ;;  %v4341_v37 = vpop.permute.xlu2 %4340 }
 0x79d   :  { %v4275_v3 = vadd.f32 %v4271_v60, %v4262_v28  ;;  %v4319_v60 = vmul.f32 %v4317_v24, %v7915_v52 }
 0x79e   :  { %v4389_v39 = vstv %s4756_s29 }
 0x79f   :  { %v4288_v31 = vadd.f32 %v4284_v27, %v4275_v3  ;;  %v4390_v38 = vmul.f32 %v4389_v39, %v7954_v26  ;;  %v4391_v43 = vmul.f32 %v4389_v39, %v7968_v9 }
 0x7a0   :  { %4582 = vrot.lane.b32.xlu0 %v4578_v57, %s4895_s9  ;;  %s4768_s9 = sld [smem:[#allocation14 + $0x580]] }
 0x7a1   :  { %4595 = vrot.lane.b32.xlu2 %v4591_v61, %s4896_s10 }
 0x7a2   :  { %v4282_v0 = vpop.permute.xlu0 %4281  ;;  %v4308_v18 = vpop.permute.xlu1 %4307 }
 0x7a3   :  { %v4287_v1 = vadd.f32 %v4282_v0, %v4274_v4  ;;  %v4356_v12 = vpop.permute.xlu2 %4355 }
 0x7a5   :  { %v4300_v50 = vadd.f32 %v4295_v59, %v4287_v1 }
 0x7a7   :  { %v4313_v23 = vadd.f32 %v4308_v18, %v4300_v50 }
 0x7a8   :  { %4597 = vrot.lane.b32.xlu0 %v4592_v7, %s4896_s10 }
 0x7a9   :  { %v4320_v22 = vadd.f32 %v4318_v48, %v4313_v23 }
 0x7aa   :  { %v4297_v14 = vpop.permute.xlu0 %4296  ;;  %v4330_v8 = vpop.permute.xlu1 %4329 }
 0x7ab   :  { %v4301_v17 = vadd.f32 %v4297_v14, %v4288_v31  ;;  %v4380_v40 = vpop.permute.xlu2 %4379 }
 0x7ad   :  { %v4314_v29 = vadd.f32 %v4310_v33, %v4301_v17  ;;  %v4533_v17 = vstv %s4768_s9 }
 0x7af   :  { %v4321_v56 = vadd.f32 %v4319_v60, %v4314_v29 }
 0x7b1   :  { %v4334_v58 = vadd.f32 %v4330_v8, %v4321_v56 }
 0x7b2   :  { %v4328_v42 = vpop.permute.xlu0 %4327  ;;  %v4354_v62 = vpop.permute.xlu1 %4353 }
 0x7b3   :  { %v4333_v45 = vadd.f32 %v4328_v42, %v4320_v22  ;;  %v4402_v30 = vpop.permute.xlu2 %4401  ;;  %v4534_v42 = vmul.f32 %v4533_v17, %v8056_v13 }
 0x7b5   :  { %v4346_v21 = vadd.f32 %v4341_v37, %v4333_v45  ;;  %v4461_v37 = vstv %s4762_s2 }
 0x7b6   :  { %v4462_v61 = vmul.f32 %v4461_v37, %v8006_v20  ;;  %v4463_v14 = vmul.f32 %v4461_v37, %v8018_v44  ;;  %v4535_v44 = vmul.f32 %v4533_v17, %v8043_v6 }
 0x7b7   :  { %v4359_v59 = vadd.f32 %v4354_v62, %v4346_v21 }
 0x7ba   :  { %v4343_v36 = vpop.permute.xlu0 %4342  ;;  %v4369_v15 = vpop.permute.xlu1 %4368 }
 0x7bb   :  { %v4347_v51 = vadd.f32 %v4343_v36, %v4334_v58  ;;  %v4426_v19 = vpop.permute.xlu2 %4425 }
 0x7bd   :  { %v4360_v2 = vadd.f32 %v4356_v12, %v4347_v51 }
 0x7bf   :  { %v4373_v54 = vadd.f32 %v4369_v15, %v4360_v2 }
 0x7c2   :  { %v4367_v46 = vpop.permute.xlu0 %4366  ;;  %v4400_v10 = vpop.permute.xlu1 %4399 }
 0x7c3   :  { %v4372_v49 = vadd.f32 %v4367_v46, %v4359_v59  ;;  %v4441_v33 = vpop.permute.xlu2 %4440 }
 0x7c5   :  { %v4385_v52 = vadd.f32 %v4380_v40, %v4372_v49 }
 0x7c7   :  { %v4392_v41 = vadd.f32 %v4390_v38, %v4385_v52 }
 0x7c9   :  { %v4405_v55 = vadd.f32 %v4400_v10, %v4392_v41 }
 0x7ca   :  { %v4382_v11 = vpop.permute.xlu0 %4381  ;;  %v4415_v47 = vpop.permute.xlu1 %4414 }
 0x7cb   :  { %v4386_v25 = vadd.f32 %v4382_v11, %v4373_v54  ;;  %v4472_v5 = vpop.permute.xlu2 %4471 }
 0x7cd   :  { %v4393_v32 = vadd.f32 %v4391_v43, %v4386_v25 }
 0x7cf   :  { %v4406_v4 = vadd.f32 %v4402_v30, %v4393_v32 }
 0x7d1   :  { %v4419_v18 = vadd.f32 %v4415_v47, %v4406_v4 }
 0x7d2   :  { %v4413_v34 = vpop.permute.xlu0 %4412  ;;  %v4439_v63 = vpop.permute.xlu1 %4438 }
 0x7d3   :  { %v4418_v53 = vadd.f32 %v4413_v34, %v4405_v55  ;;  %v4487_v16 = vpop.permute.xlu2 %4486 }
 0x7d5   :  { %v4431_v28 = vadd.f32 %v4426_v19, %v4418_v53 }
 0x7d7   :  { %v4444_v26 = vadd.f32 %v4439_v63, %v4431_v28 }
 0x7da   :  { %v4428_v35 = vpop.permute.xlu0 %4427  ;;  %v4454_v27 = vpop.permute.xlu1 %4453 }
 0x7db   :  { %v4432_v7 = vadd.f32 %v4428_v35, %v4419_v18  ;;  %v4511_v24 = vpop.permute.xlu2 %4510 }
 0x7dd   :  { %v4445_v23 = vadd.f32 %v4441_v33, %v4432_v7 }
 0x7df   :  { %v4458_v22 = vadd.f32 %v4454_v27, %v4445_v23 }
 0x7e1   :  { %v4465_v56 = vadd.f32 %v4463_v14, %v4458_v22 }
 0x7e2   :  { %v4452_v3 = vpop.permute.xlu0 %4451  ;;  %v4485_v57 = vpop.permute.xlu1 %4484 }
 0x7e3   :  { %v4457_v9 = vadd.f32 %v4452_v3, %v4444_v26  ;;  %v4526_v20 = vpop.permute.xlu2 %4525 }
 0x7e5   :  { %v4464_v0 = vadd.f32 %v4462_v61, %v4457_v9 }
 0x7e7   :  { %v4477_v12 = vadd.f32 %v4472_v5, %v4464_v0 }
 0x7e9   :  { %v4490_v48 = vadd.f32 %v4485_v57, %v4477_v12 }
 0x7ea   :  { %v4474_v1 = vpop.permute.xlu0 %4473  ;;  %v4500_v50 = vpop.permute.xlu1 %4499 }
 0x7eb   :  { %v4478_v62 = vadd.f32 %v4474_v1, %v4465_v56  ;;  %v4557_v15 = vpop.permute.xlu2 %4556 }
 0x7ed   :  { %v4491_v36 = vadd.f32 %v4487_v16, %v4478_v62 }
 0x7ef   :  { %v4504_v21 = vadd.f32 %v4500_v50, %v4491_v36 }
 0x7f2   :  { %v4498_v31 = vpop.permute.xlu0 %4497  ;;  %v4524_v60 = vpop.permute.xlu1 %4523 }
 0x7f3   :  { %v4503_v8 = vadd.f32 %v4498_v31, %v4490_v48  ;;  %v4572_v10 = vpop.permute.xlu2 %4571 }
 0x7f5   :  { %v4516_v29 = vadd.f32 %v4511_v24, %v4503_v8 }
 0x7f7   :  { %v4529_v40 = vadd.f32 %v4524_v60, %v4516_v29 }
 0x7f9   :  { %v4536_v45 = vadd.f32 %v4534_v42, %v4529_v40 }
 0x7fa   :  { %v4513_v30 = vpop.permute.xlu0 %4512  ;;  %v4546_v51 = vpop.permute.xlu1 %4545 }
 0x7fb   :  { %v4517_v59 = vadd.f32 %v4513_v30, %v4504_v21  ;;  %v4596_v47 = vpop.permute.xlu2 %4595 }
 0x7fd   :  { %v4530_v46 = vadd.f32 %v4526_v20, %v4517_v59 }
 0x7ff   :  { %v4537_v49 = vadd.f32 %v4535_v44, %v4530_v46 }
 0x801   :  { %v4550_v38 = vadd.f32 %v4546_v51, %v4537_v49 }
 0x802   :  { %v4544_v58 = vpop.permute.xlu0 %4543  ;;  %v4570_v52 = vpop.permute.xlu1 %4569 }
 0x803   :  { %v4549_v39 = vadd.f32 %v4544_v58, %v4536_v45 }
 0x805   :  { %v4562_v2 = vadd.f32 %v4557_v15, %v4549_v39 }
 0x807   :  { %v4575_v13 = vadd.f32 %v4570_v52, %v4562_v2 }
 0x80a   :  { %v4559_v19 = vpop.permute.xlu0 %4558  ;;  %v4585_v33 = vpop.permute.xlu1 %4584 }
 0x80b   :  { %v4563_v41 = vadd.f32 %v4559_v19, %v4550_v38 }
 0x80d   :  { %v4576_v43 = vadd.f32 %v4572_v10, %v4563_v41 }
 0x80f   :  { %v4589_v32 = vadd.f32 %v4585_v33, %v4576_v43 }
 0x812   :  { %v4583_v54 = vpop.permute.xlu0 %4582 }
 0x813   :  { %v4588_v11 = vadd.f32 %v4583_v54, %v4575_v13 }
 0x815   :  { %v4601_v25 = vadd.f32 %v4596_v47, %v4588_v11 }
 0x817   :  { %4604 = vst.msk [vmem:[#allocation6] sm:$0xff] %vm4603_vm8, %v4601_v25 }
 0x81a   :  { %v4598_v6 = vpop.permute.xlu0 %4597 }
 0x81b   :  { %v4602_v34 = vadd.f32 %v4598_v6, %v4589_v32 }
 0x81d   :  { %4606 = vst.msk [vmem:[#allocation6 + $0x8] sm:$0x3f] %vm4605_vm9, %v4602_v34 }
 0x81e   :  { %v4607_v63 = vld [vmem:[#allocation6] sm:$0xff] }
 0x824   :  { %v4608_v55 = vld [vmem:[#allocation6 + $0x8] sm:$0x3]  ;;  %v4610_v5 = vld [vmem:[#allocation6 + $0xc] sm:$0x3] }
 0x825   :  { %v4609_v53 = vld [vmem:[#allocation6 + $0x4] sm:$0xff]  ;;  %v4612_v35 = vadd.f32 %v4610_v5, %v4608_v55 }
 0x826   :  { %v4611_v27 = vadd.f32 %v4609_v53, %v4607_v63 }
 0x827   :  { %4617 = vrot.lane.b32.xlu2 %v4612_v35, %s4891_s1 }
 0x828   :  { %4615 = vrot.lane.b32.xlu1 %v4611_v27, %s4891_s1 }
 0x881   :  { %v4618_v28 = vpop.permute.xlu2 %4617 }
 0x882   :  { %v4622_v37 = vadd.f32 %v4618_v28, %v4612_v35 }
 0x884   :  { %v4624_v26 = vmul.f32 0.25, %v4622_v37 }
 0x886   :  { %4628 = vst.msk [vmem:[%s8106_s7 + $0x8] sm:$0x3] %vm4627_vm10, %v4624_v26 }
 0x89a   :  { %v4616_v16 = vpop.permute.xlu1 %4615 }
 0x89b   :  { %v4621_v3 = vadd.f32 %v4616_v16, %v4611_v27 }
 0x89d   :  { %v4623_v57 = vmul.f32 0.25, %v4621_v3 }
 0x89f   :  { %4626 = vst.msk [vmem:[%s8106_s7] sm:$0xff] %vm4625_vm11, %v4623_v57 }
 0x8a0   :  { %4633 = vsyncpa [#allocation11], 1 }
 0x8a1   :  { %4634 = vsyncpa [#allocation13], 1 }

</bundles_post_ra>
